<compile_context>
chip_gen: v7x
topology: tpu7x:2x2x1
jax: 0.10.0
libtpu: 0.0.40
codegen_flags: <defaults>
</compile_context>

<pallas_src>
import jax
import jax.numpy as jnp
from jax import lax
from jax.experimental import pallas as pl
from jax.experimental.pallas import tpu as pltpu

_VMEM_LIMIT = 32 * 1024 * 1024

# conv2/pool geometry (MNIST 28x28 -> conv1 26x26 -> conv2 24x24 -> pool 12x12)
_Y1_ROWS = 26 * 26        # 676 valid conv1 rows per image (row index = h*26+w)
_Z_ROWS = 640             # conv2 rows computed; >= 622 = last pooled read + 1
_Z_CHUNK = 128            # M sub-chunk of the conv2 accumulation (16 f32 vregs)
_Y1P_ROWS = 704           # zero-padded y1 rows; >= (_Z_ROWS-1) + 54 + 1 = 694


def _round_up(n, m):
    return ((n + m - 1) // m) * m


# --------------------------------------------------------------------------
# Pallas kernels
# --------------------------------------------------------------------------
def _conv2_pool_kernel(y1_ref, w2_ref, b2_ref, o_ref, z_ref):
    """Fused conv2 (3x3, 32->64) + bias + ReLU + 2x2 max-pool + NHWC flatten.

    y1_ref: (_Y1P_ROWS, 32) bf16 -- one image's conv1 output flattened as
            row r = h*26 + w (h, w in [0,26)), zero-padded beyond 676 rows.
    w2_ref: (9, 32, 64) bf16 -- conv2 weight per tap t = i*3 + j.
    b2_ref: (1, 64) f32.
    o_ref : (144, 64) bf16 -- pooled rows p = ph*12 + pw (NHWC flatten order).
    z_ref : (_Z_ROWS, 64) f32 scratch -- conv2 pre-activation, row r = h*26+w.

    conv2 output row r only needs y1 rows r + i*26 + j, so the conv is 9
    row-shifted matmuls (im2col never materialized).  Rows with w >= 24 or
    h >= 24 are garbage-but-finite and never read back.
    """
    # conv2 as 9 shifted matmuls, M-chunked to bound accumulator vreg usage.
    for c0 in range(0, _Z_ROWS, _Z_CHUNK):
        acc = jnp.dot(y1_ref[pl.ds(c0, _Z_CHUNK), :], w2_ref[0],
                      preferred_element_type=jnp.float32)
        for t in range(1, 9):
            shift = (t // 3) * 26 + (t % 3)
            acc = acc + jnp.dot(y1_ref[pl.ds(c0 + shift, _Z_CHUNK), :],
                                w2_ref[t], preferred_element_type=jnp.float32)
        z_ref[pl.ds(c0, _Z_CHUNK), :] = acc

    # Fused bias + ReLU + 2x2 max-pool + compaction of the 12 valid columns.
    # pooled(ph, pw) = max over z rows 52*ph + 2*pw + {0, 1, 26, 27}; the
    # stride-2 reads pick pw = 0..11 in one sublane-strided load.
    b2 = b2_ref[...]
    for ph in range(12):
        m = z_ref[pl.ds(52 * ph, 12, 2), :]
        for s in (1, 26, 27):
            m = jnp.maximum(m, z_ref[pl.ds(52 * ph + s, 12, 2), :])
        # bias/ReLU commute with max (monotone, per-channel constant).
        o_ref[ph * 12:(ph + 1) * 12, :] = (
            jnp.maximum(m + b2, 0.0).astype(o_ref.dtype))


def _fc_head_kernel(x_ref, w1_ref, b1_ref, w2_ref, b2_ref, o_ref):
    """o = log_softmax(relu(x @ w1 + b1) @ w2 + b2); fc2 padded to 128 lanes.

    Pad columns have zero weights and bias -1e30, so exp underflows to 0 and
    they do not perturb the log-softmax of the 10 real classes.  Both matmuls
    run with bf16 MXU operands and f32 accumulation.
    """
    h = jnp.dot(x_ref[...], w1_ref[...], preferred_element_type=jnp.float32)
    h = jnp.maximum(h + b1_ref[...], 0.0)                    # f32 epilogue
    z = jnp.dot(h.astype(jnp.bfloat16), w2_ref[...],
                preferred_element_type=jnp.float32) + b2_ref[...]
    m = jnp.max(z, axis=-1, keepdims=True)
    e = jnp.exp(z - m)
    lse = jnp.log(jnp.sum(e, axis=-1, keepdims=True))
    o_ref[...] = (z - m - lse).astype(o_ref.dtype)


# --------------------------------------------------------------------------
# pallas_call wrappers
# --------------------------------------------------------------------------
def conv2_pool(y1p, w2t, b2):
    """y1p: (B, _Y1P_ROWS, 32) bf16 -> pooled (B, 144, 64) bf16."""
    B = y1p.shape[0]
    cost = pl.CostEstimate(
        flops=2 * B * _Z_ROWS * 32 * 64 * 9,
        transcendentals=0,
        bytes_accessed=y1p.size * 2 + w2t.size * 2 + b2.size * 4
        + B * 144 * 64 * 2)
    return pl.pallas_call(
        _conv2_pool_kernel,
        out_shape=jax.ShapeDtypeStruct((B, 144, 64), jnp.bfloat16),
        grid=(B,),
        in_specs=[pl.BlockSpec((None, _Y1P_ROWS, 32), lambda b: (b, 0, 0)),
                  pl.BlockSpec((9, 32, 64), lambda b: (0, 0, 0)),
                  pl.BlockSpec((1, 64), lambda b: (0, 0))],
        out_specs=pl.BlockSpec((None, 144, 64), lambda b: (b, 0, 0)),
        scratch_shapes=[pltpu.VMEM((_Z_ROWS, 64), jnp.float32)],
        compiler_params=pltpu.CompilerParams(
            dimension_semantics=("parallel",),
            vmem_limit_bytes=_VMEM_LIMIT),
        cost_estimate=cost,
    )(y1p, w2t, b2)


def fc_head(x, w1, b1, w2, b2, *, batch_cap=256):
    """x: (B, 9216) bf16 -> (B, 128) f32 lane-padded log-probs."""
    B, K = x.shape
    H = w1.shape[1]
    N = w2.shape[1]
    # Robust tiling: round the tile to a multiple of 8 and zero-pad the batch
    # to a multiple of the tile (padded rows are finite and sliced off).
    tb = min(batch_cap, _round_up(B, 8))
    Bp = _round_up(B, tb)
    if Bp != B:
        x = jnp.pad(x, ((0, Bp - B), (0, 0)))
    cost = pl.CostEstimate(
        flops=2 * Bp * K * H + 2 * Bp * H * N,
        transcendentals=Bp * N,
        bytes_accessed=x.size * 2 + w1.size * 2 + w2.size * 2 + Bp * N * 4)
    out = pl.pallas_call(
        _fc_head_kernel,
        out_shape=jax.ShapeDtypeStruct((Bp, N), jnp.float32),
        grid=(Bp // tb,),
        in_specs=[pl.BlockSpec((tb, K), lambda i: (i, 0)),
                  pl.BlockSpec((K, H), lambda i: (0, 0)),
                  pl.BlockSpec((1, H), lambda i: (0, 0)),
                  pl.BlockSpec((H, N), lambda i: (0, 0)),
                  pl.BlockSpec((1, N), lambda i: (0, 0))],
        out_specs=pl.BlockSpec((tb, N), lambda i: (i, 0)),
        compiler_params=pltpu.CompilerParams(
            dimension_semantics=("parallel",),
            vmem_limit_bytes=_VMEM_LIMIT),
        cost_estimate=cost,
    )(x, w1, b1, w2, b2)
    return out[:B]


# --------------------------------------------------------------------------
# XLA glue: conv1 (9 broadcast FMAs, Cin=1) + flatten/pad for the fused kernel
# --------------------------------------------------------------------------
def _conv1_relu_pad(x, w1, b1):
    """x: (B,1,28,28) f32 NCHW -> (B, _Y1P_ROWS, 32) bf16 flat-padded NHWC."""
    B = x.shape[0]
    xh = jnp.transpose(x, (0, 2, 3, 1))                       # (B,28,28,1)
    acc = jnp.zeros((B, 26, 26, 32), jnp.float32)
    for i in range(3):
        for j in range(3):
            acc = acc + xh[:, i:i + 26, j:j + 26, :] * w1[i, j, :]
    y1 = jnp.maximum(acc + b1, 0.0).astype(jnp.bfloat16)      # (B,26,26,32)
    y1 = y1.reshape(B, _Y1_ROWS, 32)                          # row = h*26 + w
    return jnp.pad(y1, ((0, 0), (0, _Y1P_ROWS - _Y1_ROWS), (0, 0)))


# --------------------------------------------------------------------------
# Model: parameter init (PyTorch layout) + one-time prep + forward
# --------------------------------------------------------------------------
def init_params(key):
    ks = jax.random.split(key, 8)
    def u(k, shape, fan_in):
        bound = 1.0 / jnp.sqrt(fan_in)
        return jax.random.uniform(k, shape, jnp.float32, -bound, bound)
    return {
        "conv1_w": u(ks[0], (32, 1, 3, 3), 1 * 9),
        "conv1_b": u(ks[1], (32,), 1 * 9),
        "conv2_w": u(ks[2], (64, 32, 3, 3), 32 * 9),
        "conv2_b": u(ks[3], (64,), 32 * 9),
        "fc1_w":   u(ks[4], (128, 9216), 9216),
        "fc1_b":   u(ks[5], (128,), 9216),
        "fc2_w":   u(ks[6], (10, 128), 128),
        "fc2_b":   u(ks[7], (10,), 128),
    }


def prepare_params(p):
    """One-time weight prep (outside the hot path)."""
    # conv1: (32,1,3,3) -> (3,3,32) f32 for the XLA broadcast-FMA conv1.
    w1 = p["conv1_w"].transpose(2, 3, 1, 0).reshape(3, 3, 32)
    # conv2: (64,32,3,3) -> (9,32,64) bf16, tap-major (i*3+j, cin, cout).
    w2t = (p["conv2_w"].transpose(2, 3, 1, 0)
           .reshape(9, 32, 64).astype(jnp.bfloat16))
    # fc1: rows permuted from NCHW flatten (c,h,w) to NHWC (h,w,c) so the
    # pooled NHWC activations are used directly (no activation transpose).
    wf1 = (p["fc1_w"].reshape(128, 64, 12, 12)
           .transpose(2, 3, 1, 0).reshape(9216, 128).astype(jnp.bfloat16))
    # fc2: padded 10 -> 128 output lanes (zero weights, -1e30 bias) so the
    # head kernel writes a lane-dense (B,128) block; bf16 MXU operand.
    wf2 = (jnp.zeros((128, 128), jnp.float32).at[:, :10].set(p["fc2_w"].T)
           .astype(jnp.bfloat16))
    bf2 = jnp.full((1, 128), -1e30, jnp.float32).at[0, :10].set(p["fc2_b"])
    return {
        "w1": w1, "b1": p["conv1_b"].astype(jnp.float32),
        "w2t": w2t, "b2": p["conv2_b"].reshape(1, 64).astype(jnp.float32),
        "wf1": wf1, "bf1": p["fc1_b"].reshape(1, 128).astype(jnp.float32),
        "wf2": wf2, "bf2": bf2,
    }


def net_forward(x, pp):
    """x: (B, 1, 28, 28) f32 NCHW (like PyTorch). Returns (B, 10) log-probs."""
    B = x.shape[0]
    # conv1 + ReLU in XLA (tiny VPU work), flattened/padded for the kernel.
    y1p = _conv1_relu_pad(x, pp["w1"], pp["b1"])              # (B,704,32) bf16
    # conv2 + bias + ReLU + maxpool(2) + NHWC flatten, fused per image.
    pooled = conv2_pool(y1p, pp["w2t"], pp["b2"])             # (B,144,64) bf16
    # dropout1 / dropout2 are identity in eval mode (inference).
    flat = pooled.reshape(B, 9216)                            # free collapse
    # fc1 + ReLU + fc2 + log_softmax; drop the 118 pad lanes.
    out = fc_head(flat, pp["wf1"], pp["bf1"], pp["wf2"], pp["bf2"])
    return out[:, :10]


# --------------------------------------------------------------------------
# Pure-JAX f32 reference (PyTorch layouts) for validation only.
# --------------------------------------------------------------------------
def _reference_forward(x, p):
    y = lax.conv_general_dilated(x, p["conv1_w"], (1, 1), "VALID",
                                 dimension_numbers=("NCHW", "OIHW", "NCHW"))
    y = jax.nn.relu(y + p["conv1_b"][None, :, None, None])
    y = lax.conv_general_dilated(y, p["conv2_w"], (1, 1), "VALID",
                                 dimension_numbers=("NCHW", "OIHW", "NCHW"))
    y = jax.nn.relu(y + p["conv2_b"][None, :, None, None])
    B, C, H, W = y.shape
    y = y.reshape(B, C, H // 2, 2, W // 2, 2).max(axis=(3, 5))
    y = y.reshape(B, -1)
    y = jax.nn.relu(y @ p["fc1_w"].T + p["fc1_b"])
    y = y @ p["fc2_w"].T + p["fc2_b"]
    return jax.nn.log_softmax(y, axis=-1)


# --------------------------------------------------------------------------
if __name__ == "__main__":
    key = jax.random.PRNGKey(0)
    k_params, k_x = jax.random.split(key)
    raw = init_params(k_params)
    params = prepare_params(raw)

    # MNIST-shaped input (28x28x1 is required by fc1's 9216); small batch.
    B = 8
    x = jax.random.normal(k_x, (B, 1, 28, 28), dtype=jnp.float32)

    out = jax.jit(net_forward)(x, params)
    out = jax.block_until_ready(out)

    assert out.shape == (B, 10)
    # log_softmax sanity: exp(row) sums to 1.
    row_sums = jnp.sum(jnp.exp(out), axis=1)
    assert bool(jnp.all(jnp.abs(row_sums - 1.0) < 1e-3))
    assert bool(jnp.all(jnp.isfinite(out)))
    # Numerical check vs a pure-f32 XLA reference (bf16 MXU operands drift).
    ref = _reference_forward(x, raw)
    max_err = float(jnp.max(jnp.abs(out - ref)))
    assert max_err < 7.5e-2, f"max |out - ref| = {max_err}"
    print("KERNEL_OK")
</pallas_src>

<mosaic_0001>
module attributes {stable_mosaic.version = 11 : i64} {
  func.func @_conv2_pool_kernel(%arg0: i32, %arg1: memref<1x704x32xbf16, #tpu.memory_space<vmem>>, %arg2: memref<9x32x64xbf16, #tpu.memory_space<vmem>>, %arg3: memref<1x64xf32, #tpu.memory_space<vmem>>, %arg4: memref<1x144x64xbf16, #tpu.memory_space<vmem>>, %arg5: memref<640x64xf32, #tpu.memory_space<vmem>>) attributes {dimension_semantics = [#tpu.dimension_semantics<parallel>], iteration_bounds = array<i64: 8>, scalar_prefetch = 0 : i64, scratch_operands = 1 : i64, tpu.core_type = #tpu.core_type<tc>, window_params = [{transform_indices = @transform_0, window_bounds = array<i64: 1, 704, 32>}, {pipeline_mode = #tpu.pipeline_mode<synchronous>, transform_indices = @transform_1, window_bounds = array<i64: 9, 32, 64>}, {pipeline_mode = #tpu.pipeline_mode<synchronous>, transform_indices = @transform_2, window_bounds = array<i64: 1, 64>}, {transform_indices = @transform_3, window_bounds = array<i64: 1, 144, 64>}]} {
    %c0 = arith.constant 0 : index
    %c0_0 = arith.constant 0 : index
    %c0_1 = arith.constant 0 : index
    %0 = vector.load %arg1[%c0, %c0_0, %c0_1] : memref<1x704x32xbf16, #tpu.memory_space<vmem>>, vector<1x128x32xbf16>
    %1 = vector.shape_cast %0 : vector<1x128x32xbf16> to vector<128x32xbf16>
    %c0_2 = arith.constant 0 : index
    %c0_3 = arith.constant 0 : index
    %c0_4 = arith.constant 0 : index
    %2 = vector.load %arg2[%c0_2, %c0_3, %c0_4] : memref<9x32x64xbf16, #tpu.memory_space<vmem>>, vector<1x32x64xbf16>
    %3 = vector.shape_cast %2 : vector<1x32x64xbf16> to vector<32x64xbf16>
    %cst = arith.constant dense<0.000000e+00> : vector<128x64xf32>
    %4 = tpu.matmul %1, %3, %cst {dimension_numbers = #tpu.dot_dimension_numbers<[1], [0], [0], [1], [0, 0, 1, 1], [], []>} : vector<128x32xbf16>, vector<32x64xbf16>, vector<128x64xf32> -> vector<128x64xf32>
    %c0_5 = arith.constant 0 : index
    %c1 = arith.constant 1 : index
    %c0_6 = arith.constant 0 : index
    %5 = vector.load %arg1[%c0_5, %c1, %c0_6] : memref<1x704x32xbf16, #tpu.memory_space<vmem>>, vector<1x128x32xbf16>
    %6 = vector.shape_cast %5 : vector<1x128x32xbf16> to vector<128x32xbf16>
    %c1_7 = arith.constant 1 : index
    %c0_8 = arith.constant 0 : index
    %c0_9 = arith.constant 0 : index
    %7 = vector.load %arg2[%c1_7, %c0_8, %c0_9] : memref<9x32x64xbf16, #tpu.memory_space<vmem>>, vector<1x32x64xbf16>
    %8 = vector.shape_cast %7 : vector<1x32x64xbf16> to vector<32x64xbf16>
    %cst_10 = arith.constant dense<0.000000e+00> : vector<128x64xf32>
    %9 = tpu.matmul %6, %8, %cst_10 {dimension_numbers = #tpu.dot_dimension_numbers<[1], [0], [0], [1], [0, 0, 1, 1], [], []>} : vector<128x32xbf16>, vector<32x64xbf16>, vector<128x64xf32> -> vector<128x64xf32>
    %10 = arith.addf %4, %9 : vector<128x64xf32>
    %c0_11 = arith.constant 0 : index
    %c2 = arith.constant 2 : index
    %c0_12 = arith.constant 0 : index
    %11 = vector.load %arg1[%c0_11, %c2, %c0_12] : memref<1x704x32xbf16, #tpu.memory_space<vmem>>, vector<1x128x32xbf16>
    %12 = vector.shape_cast %11 : vector<1x128x32xbf16> to vector<128x32xbf16>
    %c2_13 = arith.constant 2 : index
    %c0_14 = arith.constant 0 : index
    %c0_15 = arith.constant 0 : index
    %13 = vector.load %arg2[%c2_13, %c0_14, %c0_15] : memref<9x32x64xbf16, #tpu.memory_space<vmem>>, vector<1x32x64xbf16>
    %14 = vector.shape_cast %13 : vector<1x32x64xbf16> to vector<32x64xbf16>
    %cst_16 = arith.constant dense<0.000000e+00> : vector<128x64xf32>
    %15 = tpu.matmul %12, %14, %cst_16 {dimension_numbers = #tpu.dot_dimension_numbers<[1], [0], [0], [1], [0, 0, 1, 1], [], []>} : vector<128x32xbf16>, vector<32x64xbf16>, vector<128x64xf32> -> vector<128x64xf32>
    %16 = arith.addf %10, %15 : vector<128x64xf32>
    %c0_17 = arith.constant 0 : index
    %c26 = arith.constant 26 : index
    %c0_18 = arith.constant 0 : index
    %17 = vector.load %arg1[%c0_17, %c26, %c0_18] : memref<1x704x32xbf16, #tpu.memory_space<vmem>>, vector<1x128x32xbf16>
    %18 = vector.shape_cast %17 : vector<1x128x32xbf16> to vector<128x32xbf16>
    %c3 = arith.constant 3 : index
    %c0_19 = arith.constant 0 : index
    %c0_20 = arith.constant 0 : index
    %19 = vector.load %arg2[%c3, %c0_19, %c0_20] : memref<9x32x64xbf16, #tpu.memory_space<vmem>>, vector<1x32x64xbf16>
    %20 = vector.shape_cast %19 : vector<1x32x64xbf16> to vector<32x64xbf16>
    %cst_21 = arith.constant dense<0.000000e+00> : vector<128x64xf32>
    %21 = tpu.matmul %18, %20, %cst_21 {dimension_numbers = #tpu.dot_dimension_numbers<[1], [0], [0], [1], [0, 0, 1, 1], [], []>} : vector<128x32xbf16>, vector<32x64xbf16>, vector<128x64xf32> -> vector<128x64xf32>
    %22 = arith.addf %16, %21 : vector<128x64xf32>
    %c0_22 = arith.constant 0 : index
    %c27 = arith.constant 27 : index
    %c0_23 = arith.constant 0 : index
    %23 = vector.load %arg1[%c0_22, %c27, %c0_23] : memref<1x704x32xbf16, #tpu.memory_space<vmem>>, vector<1x128x32xbf16>
    %24 = vector.shape_cast %23 : vector<1x128x32xbf16> to vector<128x32xbf16>
    %c4 = arith.constant 4 : index
    %c0_24 = arith.constant 0 : index
    %c0_25 = arith.constant 0 : index
    %25 = vector.load %arg2[%c4, %c0_24, %c0_25] : memref<9x32x64xbf16, #tpu.memory_space<vmem>>, vector<1x32x64xbf16>
    %26 = vector.shape_cast %25 : vector<1x32x64xbf16> to vector<32x64xbf16>
    %cst_26 = arith.constant dense<0.000000e+00> : vector<128x64xf32>
    %27 = tpu.matmul %24, %26, %cst_26 {dimension_numbers = #tpu.dot_dimension_numbers<[1], [0], [0], [1], [0, 0, 1, 1], [], []>} : vector<128x32xbf16>, vector<32x64xbf16>, vector<128x64xf32> -> vector<128x64xf32>
    %28 = arith.addf %22, %27 : vector<128x64xf32>
    %c0_27 = arith.constant 0 : index
    %c28 = arith.constant 28 : index
    %c0_28 = arith.constant 0 : index
    %29 = vector.load %arg1[%c0_27, %c28, %c0_28] : memref<1x704x32xbf16, #tpu.memory_space<vmem>>, vector<1x128x32xbf16>
    %30 = vector.shape_cast %29 : vector<1x128x32xbf16> to vector<128x32xbf16>
    %c5 = arith.constant 5 : index
    %c0_29 = arith.constant 0 : index
    %c0_30 = arith.constant 0 : index
    %31 = vector.load %arg2[%c5, %c0_29, %c0_30] : memref<9x32x64xbf16, #tpu.memory_space<vmem>>, vector<1x32x64xbf16>
    %32 = vector.shape_cast %31 : vector<1x32x64xbf16> to vector<32x64xbf16>
    %cst_31 = arith.constant dense<0.000000e+00> : vector<128x64xf32>
    %33 = tpu.matmul %30, %32, %cst_31 {dimension_numbers = #tpu.dot_dimension_numbers<[1], [0], [0], [1], [0, 0, 1, 1], [], []>} : vector<128x32xbf16>, vector<32x64xbf16>, vector<128x64xf32> -> vector<128x64xf32>
    %34 = arith.addf %28, %33 : vector<128x64xf32>
    %c0_32 = arith.constant 0 : index
    %c52 = arith.constant 52 : index
    %c0_33 = arith.constant 0 : index
    %35 = vector.load %arg1[%c0_32, %c52, %c0_33] : memref<1x704x32xbf16, #tpu.memory_space<vmem>>, vector<1x128x32xbf16>
    %36 = vector.shape_cast %35 : vector<1x128x32xbf16> to vector<128x32xbf16>
    %c6 = arith.constant 6 : index
    %c0_34 = arith.constant 0 : index
    %c0_35 = arith.constant 0 : index
    %37 = vector.load %arg2[%c6, %c0_34, %c0_35] : memref<9x32x64xbf16, #tpu.memory_space<vmem>>, vector<1x32x64xbf16>
    %38 = vector.shape_cast %37 : vector<1x32x64xbf16> to vector<32x64xbf16>
    %cst_36 = arith.constant dense<0.000000e+00> : vector<128x64xf32>
    %39 = tpu.matmul %36, %38, %cst_36 {dimension_numbers = #tpu.dot_dimension_numbers<[1], [0], [0], [1], [0, 0, 1, 1], [], []>} : vector<128x32xbf16>, vector<32x64xbf16>, vector<128x64xf32> -> vector<128x64xf32>
    %40 = arith.addf %34, %39 : vector<128x64xf32>
    %c0_37 = arith.constant 0 : index
    %c53 = arith.constant 53 : index
    %c0_38 = arith.constant 0 : index
    %41 = vector.load %arg1[%c0_37, %c53, %c0_38] : memref<1x704x32xbf16, #tpu.memory_space<vmem>>, vector<1x128x32xbf16>
    %42 = vector.shape_cast %41 : vector<1x128x32xbf16> to vector<128x32xbf16>
    %c7 = arith.constant 7 : index
    %c0_39 = arith.constant 0 : index
    %c0_40 = arith.constant 0 : index
    %43 = vector.load %arg2[%c7, %c0_39, %c0_40] : memref<9x32x64xbf16, #tpu.memory_space<vmem>>, vector<1x32x64xbf16>
    %44 = vector.shape_cast %43 : vector<1x32x64xbf16> to vector<32x64xbf16>
    %cst_41 = arith.constant dense<0.000000e+00> : vector<128x64xf32>
    %45 = tpu.matmul %42, %44, %cst_41 {dimension_numbers = #tpu.dot_dimension_numbers<[1], [0], [0], [1], [0, 0, 1, 1], [], []>} : vector<128x32xbf16>, vector<32x64xbf16>, vector<128x64xf32> -> vector<128x64xf32>
    %46 = arith.addf %40, %45 : vector<128x64xf32>
    %c0_42 = arith.constant 0 : index
    %c54 = arith.constant 54 : index
    %c0_43 = arith.constant 0 : index
    %47 = vector.load %arg1[%c0_42, %c54, %c0_43] : memref<1x704x32xbf16, #tpu.memory_space<vmem>>, vector<1x128x32xbf16>
    %48 = vector.shape_cast %47 : vector<1x128x32xbf16> to vector<128x32xbf16>
    %c8 = arith.constant 8 : index
    %c0_44 = arith.constant 0 : index
    %c0_45 = arith.constant 0 : index
    %49 = vector.load %arg2[%c8, %c0_44, %c0_45] : memref<9x32x64xbf16, #tpu.memory_space<vmem>>, vector<1x32x64xbf16>
    %50 = vector.shape_cast %49 : vector<1x32x64xbf16> to vector<32x64xbf16>
    %cst_46 = arith.constant dense<0.000000e+00> : vector<128x64xf32>
    %51 = tpu.matmul %48, %50, %cst_46 {dimension_numbers = #tpu.dot_dimension_numbers<[1], [0], [0], [1], [0, 0, 1, 1], [], []>} : vector<128x32xbf16>, vector<32x64xbf16>, vector<128x64xf32> -> vector<128x64xf32>
    %52 = arith.addf %46, %51 : vector<128x64xf32>
    %c0_47 = arith.constant 0 : index
    %c0_48 = arith.constant 0 : index
    %53 = vector.load %arg5[%c0_47, %c0_48] : memref<640x64xf32, #tpu.memory_space<vmem>>, vector<128x64xf32>
    tpu.vector_store %arg5[%c0_47, %c0_48], %52 {strides = array<i32>} : memref<640x64xf32, #tpu.memory_space<vmem>>, vector<128x64xf32>,
    %c0_49 = arith.constant 0 : index
    %c128 = arith.constant 128 : index
    %c0_50 = arith.constant 0 : index
    %54 = vector.load %arg1[%c0_49, %c128, %c0_50] : memref<1x704x32xbf16, #tpu.memory_space<vmem>>, vector<1x128x32xbf16>
    %55 = vector.shape_cast %54 : vector<1x128x32xbf16> to vector<128x32xbf16>
    %c0_51 = arith.constant 0 : index
    %c0_52 = arith.constant 0 : index
    %c0_53 = arith.constant 0 : index
    %56 = vector.load %arg2[%c0_51, %c0_52, %c0_53] : memref<9x32x64xbf16, #tpu.memory_space<vmem>>, vector<1x32x64xbf16>
    %57 = vector.shape_cast %56 : vector<1x32x64xbf16> to vector<32x64xbf16>
    %cst_54 = arith.constant dense<0.000000e+00> : vector<128x64xf32>
    %58 = tpu.matmul %55, %57, %cst_54 {dimension_numbers = #tpu.dot_dimension_numbers<[1], [0], [0], [1], [0, 0, 1, 1], [], []>} : vector<128x32xbf16>, vector<32x64xbf16>, vector<128x64xf32> -> vector<128x64xf32>
    %c0_55 = arith.constant 0 : index
    %c129 = arith.constant 129 : index
    %c0_56 = arith.constant 0 : index
    %59 = vector.load %arg1[%c0_55, %c129, %c0_56] : memref<1x704x32xbf16, #tpu.memory_space<vmem>>, vector<1x128x32xbf16>
    %60 = vector.shape_cast %59 : vector<1x128x32xbf16> to vector<128x32xbf16>
    %c1_57 = arith.constant 1 : index
    %c0_58 = arith.constant 0 : index
    %c0_59 = arith.constant 0 : index
    %61 = vector.load %arg2[%c1_57, %c0_58, %c0_59] : memref<9x32x64xbf16, #tpu.memory_space<vmem>>, vector<1x32x64xbf16>
    %62 = vector.shape_cast %61 : vector<1x32x64xbf16> to vector<32x64xbf16>
    %cst_60 = arith.constant dense<0.000000e+00> : vector<128x64xf32>
    %63 = tpu.matmul %60, %62, %cst_60 {dimension_numbers = #tpu.dot_dimension_numbers<[1], [0], [0], [1], [0, 0, 1, 1], [], []>} : vector<128x32xbf16>, vector<32x64xbf16>, vector<128x64xf32> -> vector<128x64xf32>
    %64 = arith.addf %58, %63 : vector<128x64xf32>
    %c0_61 = arith.constant 0 : index
    %c130 = arith.constant 130 : index
    %c0_62 = arith.constant 0 : index
    %65 = vector.load %arg1[%c0_61, %c130, %c0_62] : memref<1x704x32xbf16, #tpu.memory_space<vmem>>, vector<1x128x32xbf16>
    %66 = vector.shape_cast %65 : vector<1x128x32xbf16> to vector<128x32xbf16>
    %c2_63 = arith.constant 2 : index
    %c0_64 = arith.constant 0 : index
    %c0_65 = arith.constant 0 : index
    %67 = vector.load %arg2[%c2_63, %c0_64, %c0_65] : memref<9x32x64xbf16, #tpu.memory_space<vmem>>, vector<1x32x64xbf16>
    %68 = vector.shape_cast %67 : vector<1x32x64xbf16> to vector<32x64xbf16>
    %cst_66 = arith.constant dense<0.000000e+00> : vector<128x64xf32>
    %69 = tpu.matmul %66, %68, %cst_66 {dimension_numbers = #tpu.dot_dimension_numbers<[1], [0], [0], [1], [0, 0, 1, 1], [], []>} : vector<128x32xbf16>, vector<32x64xbf16>, vector<128x64xf32> -> vector<128x64xf32>
    %70 = arith.addf %64, %69 : vector<128x64xf32>
    %c0_67 = arith.constant 0 : index
    %c154 = arith.constant 154 : index
    %c0_68 = arith.constant 0 : index
    %71 = vector.load %arg1[%c0_67, %c154, %c0_68] : memref<1x704x32xbf16, #tpu.memory_space<vmem>>, vector<1x128x32xbf16>
    %72 = vector.shape_cast %71 : vector<1x128x32xbf16> to vector<128x32xbf16>
    %c3_69 = arith.constant 3 : index
    %c0_70 = arith.constant 0 : index
    %c0_71 = arith.constant 0 : index
    %73 = vector.load %arg2[%c3_69, %c0_70, %c0_71] : memref<9x32x64xbf16, #tpu.memory_space<vmem>>, vector<1x32x64xbf16>
    %74 = vector.shape_cast %73 : vector<1x32x64xbf16> to vector<32x64xbf16>
    %cst_72 = arith.constant dense<0.000000e+00> : vector<128x64xf32>
    %75 = tpu.matmul %72, %74, %cst_72 {dimension_numbers = #tpu.dot_dimension_numbers<[1], [0], [0], [1], [0, 0, 1, 1], [], []>} : vector<128x32xbf16>, vector<32x64xbf16>, vector<128x64xf32> -> vector<128x64xf32>
    %76 = arith.addf %70, %75 : vector<128x64xf32>
    %c0_73 = arith.constant 0 : index
    %c155 = arith.constant 155 : index
    %c0_74 = arith.constant 0 : index
    %77 = vector.load %arg1[%c0_73, %c155, %c0_74] : memref<1x704x32xbf16, #tpu.memory_space<vmem>>, vector<1x128x32xbf16>
    %78 = vector.shape_cast %77 : vector<1x128x32xbf16> to vector<128x32xbf16>
    %c4_75 = arith.constant 4 : index
    %c0_76 = arith.constant 0 : index
    %c0_77 = arith.constant 0 : index
    %79 = vector.load %arg2[%c4_75, %c0_76, %c0_77] : memref<9x32x64xbf16, #tpu.memory_space<vmem>>, vector<1x32x64xbf16>
    %80 = vector.shape_cast %79 : vector<1x32x64xbf16> to vector<32x64xbf16>
    %cst_78 = arith.constant dense<0.000000e+00> : vector<128x64xf32>
    %81 = tpu.matmul %78, %80, %cst_78 {dimension_numbers = #tpu.dot_dimension_numbers<[1], [0], [0], [1], [0, 0, 1, 1], [], []>} : vector<128x32xbf16>, vector<32x64xbf16>, vector<128x64xf32> -> vector<128x64xf32>
    %82 = arith.addf %76, %81 : vector<128x64xf32>
    %c0_79 = arith.constant 0 : index
    %c156 = arith.constant 156 : index
    %c0_80 = arith.constant 0 : index
    %83 = vector.load %arg1[%c0_79, %c156, %c0_80] : memref<1x704x32xbf16, #tpu.memory_space<vmem>>, vector<1x128x32xbf16>
    %84 = vector.shape_cast %83 : vector<1x128x32xbf16> to vector<128x32xbf16>
    %c5_81 = arith.constant 5 : index
    %c0_82 = arith.constant 0 : index
    %c0_83 = arith.constant 0 : index
    %85 = vector.load %arg2[%c5_81, %c0_82, %c0_83] : memref<9x32x64xbf16, #tpu.memory_space<vmem>>, vector<1x32x64xbf16>
    %86 = vector.shape_cast %85 : vector<1x32x64xbf16> to vector<32x64xbf16>
    %cst_84 = arith.constant dense<0.000000e+00> : vector<128x64xf32>
    %87 = tpu.matmul %84, %86, %cst_84 {dimension_numbers = #tpu.dot_dimension_numbers<[1], [0], [0], [1], [0, 0, 1, 1], [], []>} : vector<128x32xbf16>, vector<32x64xbf16>, vector<128x64xf32> -> vector<128x64xf32>
    %88 = arith.addf %82, %87 : vector<128x64xf32>
    %c0_85 = arith.constant 0 : index
    %c180 = arith.constant 180 : index
    %c0_86 = arith.constant 0 : index
    %89 = vector.load %arg1[%c0_85, %c180, %c0_86] : memref<1x704x32xbf16, #tpu.memory_space<vmem>>, vector<1x128x32xbf16>
    %90 = vector.shape_cast %89 : vector<1x128x32xbf16> to vector<128x32xbf16>
    %c6_87 = arith.constant 6 : index
    %c0_88 = arith.constant 0 : index
    %c0_89 = arith.constant 0 : index
    %91 = vector.load %arg2[%c6_87, %c0_88, %c0_89] : memref<9x32x64xbf16, #tpu.memory_space<vmem>>, vector<1x32x64xbf16>
    %92 = vector.shape_cast %91 : vector<1x32x64xbf16> to vector<32x64xbf16>
    %cst_90 = arith.constant dense<0.000000e+00> : vector<128x64xf32>
    %93 = tpu.matmul %90, %92, %cst_90 {dimension_numbers = #tpu.dot_dimension_numbers<[1], [0], [0], [1], [0, 0, 1, 1], [], []>} : vector<128x32xbf16>, vector<32x64xbf16>, vector<128x64xf32> -> vector<128x64xf32>
    %94 = arith.addf %88, %93 : vector<128x64xf32>
    %c0_91 = arith.constant 0 : index
    %c181 = arith.constant 181 : index
    %c0_92 = arith.constant 0 : index
    %95 = vector.load %arg1[%c0_91, %c181, %c0_92] : memref<1x704x32xbf16, #tpu.memory_space<vmem>>, vector<1x128x32xbf16>
    %96 = vector.shape_cast %95 : vector<1x128x32xbf16> to vector<128x32xbf16>
    %c7_93 = arith.constant 7 : index
    %c0_94 = arith.constant 0 : index
    %c0_95 = arith.constant 0 : index
    %97 = vector.load %arg2[%c7_93, %c0_94, %c0_95] : memref<9x32x64xbf16, #tpu.memory_space<vmem>>, vector<1x32x64xbf16>
    %98 = vector.shape_cast %97 : vector<1x32x64xbf16> to vector<32x64xbf16>
    %cst_96 = arith.constant dense<0.000000e+00> : vector<128x64xf32>
    %99 = tpu.matmul %96, %98, %cst_96 {dimension_numbers = #tpu.dot_dimension_numbers<[1], [0], [0], [1], [0, 0, 1, 1], [], []>} : vector<128x32xbf16>, vector<32x64xbf16>, vector<128x64xf32> -> vector<128x64xf32>
    %100 = arith.addf %94, %99 : vector<128x64xf32>
    %c0_97 = arith.constant 0 : index
    %c182 = arith.constant 182 : index
    %c0_98 = arith.constant 0 : index
    %101 = vector.load %arg1[%c0_97, %c182, %c0_98] : memref<1x704x32xbf16, #tpu.memory_space<vmem>>, vector<1x128x32xbf16>
    %102 = vector.shape_cast %101 : vector<1x128x32xbf16> to vector<128x32xbf16>
    %c8_99 = arith.constant 8 : index
    %c0_100 = arith.constant 0 : index
    %c0_101 = arith.constant 0 : index
    %103 = vector.load %arg2[%c8_99, %c0_100, %c0_101] : memref<9x32x64xbf16, #tpu.memory_space<vmem>>, vector<1x32x64xbf16>
    %104 = vector.shape_cast %103 : vector<1x32x64xbf16> to vector<32x64xbf16>
    %cst_102 = arith.constant dense<0.000000e+00> : vector<128x64xf32>
    %105 = tpu.matmul %102, %104, %cst_102 {dimension_numbers = #tpu.dot_dimension_numbers<[1], [0], [0], [1], [0, 0, 1, 1], [], []>} : vector<128x32xbf16>, vector<32x64xbf16>, vector<128x64xf32> -> vector<128x64xf32>
    %106 = arith.addf %100, %105 : vector<128x64xf32>
    %c128_103 = arith.constant 128 : index
    %c0_104 = arith.constant 0 : index
    %107 = vector.load %arg5[%c128_103, %c0_104] : memref<640x64xf32, #tpu.memory_space<vmem>>, vector<128x64xf32>
    tpu.vector_store %arg5[%c128_103, %c0_104], %106 {strides = array<i32>} : memref<640x64xf32, #tpu.memory_space<vmem>>, vector<128x64xf32>,
    %c0_105 = arith.constant 0 : index
    %c256 = arith.constant 256 : index
    %c0_106 = arith.constant 0 : index
    %108 = vector.load %arg1[%c0_105, %c256, %c0_106] : memref<1x704x32xbf16, #tpu.memory_space<vmem>>, vector<1x128x32xbf16>
    %109 = vector.shape_cast %108 : vector<1x128x32xbf16> to vector<128x32xbf16>
    %c0_107 = arith.constant 0 : index
    %c0_108 = arith.constant 0 : index
    %c0_109 = arith.constant 0 : index
    %110 = vector.load %arg2[%c0_107, %c0_108, %c0_109] : memref<9x32x64xbf16, #tpu.memory_space<vmem>>, vector<1x32x64xbf16>
    %111 = vector.shape_cast %110 : vector<1x32x64xbf16> to vector<32x64xbf16>
    %cst_110 = arith.constant dense<0.000000e+00> : vector<128x64xf32>
    %112 = tpu.matmul %109, %111, %cst_110 {dimension_numbers = #tpu.dot_dimension_numbers<[1], [0], [0], [1], [0, 0, 1, 1], [], []>} : vector<128x32xbf16>, vector<32x64xbf16>, vector<128x64xf32> -> vector<128x64xf32>
    %c0_111 = arith.constant 0 : index
    %c257 = arith.constant 257 : index
    %c0_112 = arith.constant 0 : index
    %113 = vector.load %arg1[%c0_111, %c257, %c0_112] : memref<1x704x32xbf16, #tpu.memory_space<vmem>>, vector<1x128x32xbf16>
    %114 = vector.shape_cast %113 : vector<1x128x32xbf16> to vector<128x32xbf16>
    %c1_113 = arith.constant 1 : index
    %c0_114 = arith.constant 0 : index
    %c0_115 = arith.constant 0 : index
    %115 = vector.load %arg2[%c1_113, %c0_114, %c0_115] : memref<9x32x64xbf16, #tpu.memory_space<vmem>>, vector<1x32x64xbf16>
    %116 = vector.shape_cast %115 : vector<1x32x64xbf16> to vector<32x64xbf16>
    %cst_116 = arith.constant dense<0.000000e+00> : vector<128x64xf32>
    %117 = tpu.matmul %114, %116, %cst_116 {dimension_numbers = #tpu.dot_dimension_numbers<[1], [0], [0], [1], [0, 0, 1, 1], [], []>} : vector<128x32xbf16>, vector<32x64xbf16>, vector<128x64xf32> -> vector<128x64xf32>
    %118 = arith.addf %112, %117 : vector<128x64xf32>
    %c0_117 = arith.constant 0 : index
    %c258 = arith.constant 258 : index
    %c0_118 = arith.constant 0 : index
    %119 = vector.load %arg1[%c0_117, %c258, %c0_118] : memref<1x704x32xbf16, #tpu.memory_space<vmem>>, vector<1x128x32xbf16>
    %120 = vector.shape_cast %119 : vector<1x128x32xbf16> to vector<128x32xbf16>
    %c2_119 = arith.constant 2 : index
    %c0_120 = arith.constant 0 : index
    %c0_121 = arith.constant 0 : index
    %121 = vector.load %arg2[%c2_119, %c0_120, %c0_121] : memref<9x32x64xbf16, #tpu.memory_space<vmem>>, vector<1x32x64xbf16>
    %122 = vector.shape_cast %121 : vector<1x32x64xbf16> to vector<32x64xbf16>
    %cst_122 = arith.constant dense<0.000000e+00> : vector<128x64xf32>
    %123 = tpu.matmul %120, %122, %cst_122 {dimension_numbers = #tpu.dot_dimension_numbers<[1], [0], [0], [1], [0, 0, 1, 1], [], []>} : vector<128x32xbf16>, vector<32x64xbf16>, vector<128x64xf32> -> vector<128x64xf32>
    %124 = arith.addf %118, %123 : vector<128x64xf32>
    %c0_123 = arith.constant 0 : index
    %c282 = arith.constant 282 : index
    %c0_124 = arith.constant 0 : index
    %125 = vector.load %arg1[%c0_123, %c282, %c0_124] : memref<1x704x32xbf16, #tpu.memory_space<vmem>>, vector<1x128x32xbf16>
    %126 = vector.shape_cast %125 : vector<1x128x32xbf16> to vector<128x32xbf16>
    %c3_125 = arith.constant 3 : index
    %c0_126 = arith.constant 0 : index
    %c0_127 = arith.constant 0 : index
    %127 = vector.load %arg2[%c3_125, %c0_126, %c0_127] : memref<9x32x64xbf16, #tpu.memory_space<vmem>>, vector<1x32x64xbf16>
    %128 = vector.shape_cast %127 : vector<1x32x64xbf16> to vector<32x64xbf16>
    %cst_128 = arith.constant dense<0.000000e+00> : vector<128x64xf32>
    %129 = tpu.matmul %126, %128, %cst_128 {dimension_numbers = #tpu.dot_dimension_numbers<[1], [0], [0], [1], [0, 0, 1, 1], [], []>} : vector<128x32xbf16>, vector<32x64xbf16>, vector<128x64xf32> -> vector<128x64xf32>
    %130 = arith.addf %124, %129 : vector<128x64xf32>
    %c0_129 = arith.constant 0 : index
    %c283 = arith.constant 283 : index
    %c0_130 = arith.constant 0 : index
    %131 = vector.load %arg1[%c0_129, %c283, %c0_130] : memref<1x704x32xbf16, #tpu.memory_space<vmem>>, vector<1x128x32xbf16>
    %132 = vector.shape_cast %131 : vector<1x128x32xbf16> to vector<128x32xbf16>
    %c4_131 = arith.constant 4 : index
    %c0_132 = arith.constant 0 : index
    %c0_133 = arith.constant 0 : index
    %133 = vector.load %arg2[%c4_131, %c0_132, %c0_133] : memref<9x32x64xbf16, #tpu.memory_space<vmem>>, vector<1x32x64xbf16>
    %134 = vector.shape_cast %133 : vector<1x32x64xbf16> to vector<32x64xbf16>
    %cst_134 = arith.constant dense<0.000000e+00> : vector<128x64xf32>
    %135 = tpu.matmul %132, %134, %cst_134 {dimension_numbers = #tpu.dot_dimension_numbers<[1], [0], [0], [1], [0, 0, 1, 1], [], []>} : vector<128x32xbf16>, vector<32x64xbf16>, vector<128x64xf32> -> vector<128x64xf32>
    %136 = arith.addf %130, %135 : vector<128x64xf32>
    %c0_135 = arith.constant 0 : index
    %c284 = arith.constant 284 : index
    %c0_136 = arith.constant 0 : index
    %137 = vector.load %arg1[%c0_135, %c284, %c0_136] : memref<1x704x32xbf16, #tpu.memory_space<vmem>>, vector<1x128x32xbf16>
    %138 = vector.shape_cast %137 : vector<1x128x32xbf16> to vector<128x32xbf16>
    %c5_137 = arith.constant 5 : index
    %c0_138 = arith.constant 0 : index
    %c0_139 = arith.constant 0 : index
    %139 = vector.load %arg2[%c5_137, %c0_138, %c0_139] : memref<9x32x64xbf16, #tpu.memory_space<vmem>>, vector<1x32x64xbf16>
    %140 = vector.shape_cast %139 : vector<1x32x64xbf16> to vector<32x64xbf16>
    %cst_140 = arith.constant dense<0.000000e+00> : vector<128x64xf32>
    %141 = tpu.matmul %138, %140, %cst_140 {dimension_numbers = #tpu.dot_dimension_numbers<[1], [0], [0], [1], [0, 0, 1, 1], [], []>} : vector<128x32xbf16>, vector<32x64xbf16>, vector<128x64xf32> -> vector<128x64xf32>
    %142 = arith.addf %136, %141 : vector<128x64xf32>
    %c0_141 = arith.constant 0 : index
    %c308 = arith.constant 308 : index
    %c0_142 = arith.constant 0 : index
    %143 = vector.load %arg1[%c0_141, %c308, %c0_142] : memref<1x704x32xbf16, #tpu.memory_space<vmem>>, vector<1x128x32xbf16>
    %144 = vector.shape_cast %143 : vector<1x128x32xbf16> to vector<128x32xbf16>
    %c6_143 = arith.constant 6 : index
    %c0_144 = arith.constant 0 : index
    %c0_145 = arith.constant 0 : index
    %145 = vector.load %arg2[%c6_143, %c0_144, %c0_145] : memref<9x32x64xbf16, #tpu.memory_space<vmem>>, vector<1x32x64xbf16>
    %146 = vector.shape_cast %145 : vector<1x32x64xbf16> to vector<32x64xbf16>
    %cst_146 = arith.constant dense<0.000000e+00> : vector<128x64xf32>
    %147 = tpu.matmul %144, %146, %cst_146 {dimension_numbers = #tpu.dot_dimension_numbers<[1], [0], [0], [1], [0, 0, 1, 1], [], []>} : vector<128x32xbf16>, vector<32x64xbf16>, vector<128x64xf32> -> vector<128x64xf32>
    %148 = arith.addf %142, %147 : vector<128x64xf32>
    %c0_147 = arith.constant 0 : index
    %c309 = arith.constant 309 : index
    %c0_148 = arith.constant 0 : index
    %149 = vector.load %arg1[%c0_147, %c309, %c0_148] : memref<1x704x32xbf16, #tpu.memory_space<vmem>>, vector<1x128x32xbf16>
    %150 = vector.shape_cast %149 : vector<1x128x32xbf16> to vector<128x32xbf16>
    %c7_149 = arith.constant 7 : index
    %c0_150 = arith.constant 0 : index
    %c0_151 = arith.constant 0 : index
    %151 = vector.load %arg2[%c7_149, %c0_150, %c0_151] : memref<9x32x64xbf16, #tpu.memory_space<vmem>>, vector<1x32x64xbf16>
    %152 = vector.shape_cast %151 : vector<1x32x64xbf16> to vector<32x64xbf16>
    %cst_152 = arith.constant dense<0.000000e+00> : vector<128x64xf32>
    %153 = tpu.matmul %150, %152, %cst_152 {dimension_numbers = #tpu.dot_dimension_numbers<[1], [0], [0], [1], [0, 0, 1, 1], [], []>} : vector<128x32xbf16>, vector<32x64xbf16>, vector<128x64xf32> -> vector<128x64xf32>
    %154 = arith.addf %148, %153 : vector<128x64xf32>
    %c0_153 = arith.constant 0 : index
    %c310 = arith.constant 310 : index
    %c0_154 = arith.constant 0 : index
    %155 = vector.load %arg1[%c0_153, %c310, %c0_154] : memref<1x704x32xbf16, #tpu.memory_space<vmem>>, vector<1x128x32xbf16>
    %156 = vector.shape_cast %155 : vector<1x128x32xbf16> to vector<128x32xbf16>
    %c8_155 = arith.constant 8 : index
    %c0_156 = arith.constant 0 : index
    %c0_157 = arith.constant 0 : index
    %157 = vector.load %arg2[%c8_155, %c0_156, %c0_157] : memref<9x32x64xbf16, #tpu.memory_space<vmem>>, vector<1x32x64xbf16>
    %158 = vector.shape_cast %157 : vector<1x32x64xbf16> to vector<32x64xbf16>
    %cst_158 = arith.constant dense<0.000000e+00> : vector<128x64xf32>
    %159 = tpu.matmul %156, %158, %cst_158 {dimension_numbers = #tpu.dot_dimension_numbers<[1], [0], [0], [1], [0, 0, 1, 1], [], []>} : vector<128x32xbf16>, vector<32x64xbf16>, vector<128x64xf32> -> vector<128x64xf32>
    %160 = arith.addf %154, %159 : vector<128x64xf32>
    %c256_159 = arith.constant 256 : index
    %c0_160 = arith.constant 0 : index
    %161 = vector.load %arg5[%c256_159, %c0_160] : memref<640x64xf32, #tpu.memory_space<vmem>>, vector<128x64xf32>
    tpu.vector_store %arg5[%c256_159, %c0_160], %160 {strides = array<i32>} : memref<640x64xf32, #tpu.memory_space<vmem>>, vector<128x64xf32>,
    %c0_161 = arith.constant 0 : index
    %c384 = arith.constant 384 : index
    %c0_162 = arith.constant 0 : index
    %162 = vector.load %arg1[%c0_161, %c384, %c0_162] : memref<1x704x32xbf16, #tpu.memory_space<vmem>>, vector<1x128x32xbf16>
    %163 = vector.shape_cast %162 : vector<1x128x32xbf16> to vector<128x32xbf16>
    %c0_163 = arith.constant 0 : index
    %c0_164 = arith.constant 0 : index
    %c0_165 = arith.constant 0 : index
    %164 = vector.load %arg2[%c0_163, %c0_164, %c0_165] : memref<9x32x64xbf16, #tpu.memory_space<vmem>>, vector<1x32x64xbf16>
    %165 = vector.shape_cast %164 : vector<1x32x64xbf16> to vector<32x64xbf16>
    %cst_166 = arith.constant dense<0.000000e+00> : vector<128x64xf32>
    %166 = tpu.matmul %163, %165, %cst_166 {dimension_numbers = #tpu.dot_dimension_numbers<[1], [0], [0], [1], [0, 0, 1, 1], [], []>} : vector<128x32xbf16>, vector<32x64xbf16>, vector<128x64xf32> -> vector<128x64xf32>
    %c0_167 = arith.constant 0 : index
    %c385 = arith.constant 385 : index
    %c0_168 = arith.constant 0 : index
    %167 = vector.load %arg1[%c0_167, %c385, %c0_168] : memref<1x704x32xbf16, #tpu.memory_space<vmem>>, vector<1x128x32xbf16>
    %168 = vector.shape_cast %167 : vector<1x128x32xbf16> to vector<128x32xbf16>
    %c1_169 = arith.constant 1 : index
    %c0_170 = arith.constant 0 : index
    %c0_171 = arith.constant 0 : index
    %169 = vector.load %arg2[%c1_169, %c0_170, %c0_171] : memref<9x32x64xbf16, #tpu.memory_space<vmem>>, vector<1x32x64xbf16>
    %170 = vector.shape_cast %169 : vector<1x32x64xbf16> to vector<32x64xbf16>
    %cst_172 = arith.constant dense<0.000000e+00> : vector<128x64xf32>
    %171 = tpu.matmul %168, %170, %cst_172 {dimension_numbers = #tpu.dot_dimension_numbers<[1], [0], [0], [1], [0, 0, 1, 1], [], []>} : vector<128x32xbf16>, vector<32x64xbf16>, vector<128x64xf32> -> vector<128x64xf32>
    %172 = arith.addf %166, %171 : vector<128x64xf32>
    %c0_173 = arith.constant 0 : index
    %c386 = arith.constant 386 : index
    %c0_174 = arith.constant 0 : index
    %173 = vector.load %arg1[%c0_173, %c386, %c0_174] : memref<1x704x32xbf16, #tpu.memory_space<vmem>>, vector<1x128x32xbf16>
    %174 = vector.shape_cast %173 : vector<1x128x32xbf16> to vector<128x32xbf16>
    %c2_175 = arith.constant 2 : index
    %c0_176 = arith.constant 0 : index
    %c0_177 = arith.constant 0 : index
    %175 = vector.load %arg2[%c2_175, %c0_176, %c0_177] : memref<9x32x64xbf16, #tpu.memory_space<vmem>>, vector<1x32x64xbf16>
    %176 = vector.shape_cast %175 : vector<1x32x64xbf16> to vector<32x64xbf16>
    %cst_178 = arith.constant dense<0.000000e+00> : vector<128x64xf32>
    %177 = tpu.matmul %174, %176, %cst_178 {dimension_numbers = #tpu.dot_dimension_numbers<[1], [0], [0], [1], [0, 0, 1, 1], [], []>} : vector<128x32xbf16>, vector<32x64xbf16>, vector<128x64xf32> -> vector<128x64xf32>
    %178 = arith.addf %172, %177 : vector<128x64xf32>
    %c0_179 = arith.constant 0 : index
    %c410 = arith.constant 410 : index
    %c0_180 = arith.constant 0 : index
    %179 = vector.load %arg1[%c0_179, %c410, %c0_180] : memref<1x704x32xbf16, #tpu.memory_space<vmem>>, vector<1x128x32xbf16>
    %180 = vector.shape_cast %179 : vector<1x128x32xbf16> to vector<128x32xbf16>
    %c3_181 = arith.constant 3 : index
    %c0_182 = arith.constant 0 : index
    %c0_183 = arith.constant 0 : index
    %181 = vector.load %arg2[%c3_181, %c0_182, %c0_183] : memref<9x32x64xbf16, #tpu.memory_space<vmem>>, vector<1x32x64xbf16>
    %182 = vector.shape_cast %181 : vector<1x32x64xbf16> to vector<32x64xbf16>
    %cst_184 = arith.constant dense<0.000000e+00> : vector<128x64xf32>
    %183 = tpu.matmul %180, %182, %cst_184 {dimension_numbers = #tpu.dot_dimension_numbers<[1], [0], [0], [1], [0, 0, 1, 1], [], []>} : vector<128x32xbf16>, vector<32x64xbf16>, vector<128x64xf32> -> vector<128x64xf32>
    %184 = arith.addf %178, %183 : vector<128x64xf32>
    %c0_185 = arith.constant 0 : index
    %c411 = arith.constant 411 : index
    %c0_186 = arith.constant 0 : index
    %185 = vector.load %arg1[%c0_185, %c411, %c0_186] : memref<1x704x32xbf16, #tpu.memory_space<vmem>>, vector<1x128x32xbf16>
    %186 = vector.shape_cast %185 : vector<1x128x32xbf16> to vector<128x32xbf16>
    %c4_187 = arith.constant 4 : index
    %c0_188 = arith.constant 0 : index
    %c0_189 = arith.constant 0 : index
    %187 = vector.load %arg2[%c4_187, %c0_188, %c0_189] : memref<9x32x64xbf16, #tpu.memory_space<vmem>>, vector<1x32x64xbf16>
    %188 = vector.shape_cast %187 : vector<1x32x64xbf16> to vector<32x64xbf16>
    %cst_190 = arith.constant dense<0.000000e+00> : vector<128x64xf32>
    %189 = tpu.matmul %186, %188, %cst_190 {dimension_numbers = #tpu.dot_dimension_numbers<[1], [0], [0], [1], [0, 0, 1, 1], [], []>} : vector<128x32xbf16>, vector<32x64xbf16>, vector<128x64xf32> -> vector<128x64xf32>
    %190 = arith.addf %184, %189 : vector<128x64xf32>
    %c0_191 = arith.constant 0 : index
    %c412 = arith.constant 412 : index
    %c0_192 = arith.constant 0 : index
    %191 = vector.load %arg1[%c0_191, %c412, %c0_192] : memref<1x704x32xbf16, #tpu.memory_space<vmem>>, vector<1x128x32xbf16>
    %192 = vector.shape_cast %191 : vector<1x128x32xbf16> to vector<128x32xbf16>
    %c5_193 = arith.constant 5 : index
    %c0_194 = arith.constant 0 : index
    %c0_195 = arith.constant 0 : index
    %193 = vector.load %arg2[%c5_193, %c0_194, %c0_195] : memref<9x32x64xbf16, #tpu.memory_space<vmem>>, vector<1x32x64xbf16>
    %194 = vector.shape_cast %193 : vector<1x32x64xbf16> to vector<32x64xbf16>
    %cst_196 = arith.constant dense<0.000000e+00> : vector<128x64xf32>
    %195 = tpu.matmul %192, %194, %cst_196 {dimension_numbers = #tpu.dot_dimension_numbers<[1], [0], [0], [1], [0, 0, 1, 1], [], []>} : vector<128x32xbf16>, vector<32x64xbf16>, vector<128x64xf32> -> vector<128x64xf32>
    %196 = arith.addf %190, %195 : vector<128x64xf32>
    %c0_197 = arith.constant 0 : index
    %c436 = arith.constant 436 : index
    %c0_198 = arith.constant 0 : index
    %197 = vector.load %arg1[%c0_197, %c436, %c0_198] : memref<1x704x32xbf16, #tpu.memory_space<vmem>>, vector<1x128x32xbf16>
    %198 = vector.shape_cast %197 : vector<1x128x32xbf16> to vector<128x32xbf16>
    %c6_199 = arith.constant 6 : index
    %c0_200 = arith.constant 0 : index
    %c0_201 = arith.constant 0 : index
    %199 = vector.load %arg2[%c6_199, %c0_200, %c0_201] : memref<9x32x64xbf16, #tpu.memory_space<vmem>>, vector<1x32x64xbf16>
    %200 = vector.shape_cast %199 : vector<1x32x64xbf16> to vector<32x64xbf16>
    %cst_202 = arith.constant dense<0.000000e+00> : vector<128x64xf32>
    %201 = tpu.matmul %198, %200, %cst_202 {dimension_numbers = #tpu.dot_dimension_numbers<[1], [0], [0], [1], [0, 0, 1, 1], [], []>} : vector<128x32xbf16>, vector<32x64xbf16>, vector<128x64xf32> -> vector<128x64xf32>
    %202 = arith.addf %196, %201 : vector<128x64xf32>
    %c0_203 = arith.constant 0 : index
    %c437 = arith.constant 437 : index
    %c0_204 = arith.constant 0 : index
    %203 = vector.load %arg1[%c0_203, %c437, %c0_204] : memref<1x704x32xbf16, #tpu.memory_space<vmem>>, vector<1x128x32xbf16>
    %204 = vector.shape_cast %203 : vector<1x128x32xbf16> to vector<128x32xbf16>
    %c7_205 = arith.constant 7 : index
    %c0_206 = arith.constant 0 : index
    %c0_207 = arith.constant 0 : index
    %205 = vector.load %arg2[%c7_205, %c0_206, %c0_207] : memref<9x32x64xbf16, #tpu.memory_space<vmem>>, vector<1x32x64xbf16>
    %206 = vector.shape_cast %205 : vector<1x32x64xbf16> to vector<32x64xbf16>
    %cst_208 = arith.constant dense<0.000000e+00> : vector<128x64xf32>
    %207 = tpu.matmul %204, %206, %cst_208 {dimension_numbers = #tpu.dot_dimension_numbers<[1], [0], [0], [1], [0, 0, 1, 1], [], []>} : vector<128x32xbf16>, vector<32x64xbf16>, vector<128x64xf32> -> vector<128x64xf32>
    %208 = arith.addf %202, %207 : vector<128x64xf32>
    %c0_209 = arith.constant 0 : index
    %c438 = arith.constant 438 : index
    %c0_210 = arith.constant 0 : index
    %209 = vector.load %arg1[%c0_209, %c438, %c0_210] : memref<1x704x32xbf16, #tpu.memory_space<vmem>>, vector<1x128x32xbf16>
    %210 = vector.shape_cast %209 : vector<1x128x32xbf16> to vector<128x32xbf16>
    %c8_211 = arith.constant 8 : index
    %c0_212 = arith.constant 0 : index
    %c0_213 = arith.constant 0 : index
    %211 = vector.load %arg2[%c8_211, %c0_212, %c0_213] : memref<9x32x64xbf16, #tpu.memory_space<vmem>>, vector<1x32x64xbf16>
    %212 = vector.shape_cast %211 : vector<1x32x64xbf16> to vector<32x64xbf16>
    %cst_214 = arith.constant dense<0.000000e+00> : vector<128x64xf32>
    %213 = tpu.matmul %210, %212, %cst_214 {dimension_numbers = #tpu.dot_dimension_numbers<[1], [0], [0], [1], [0, 0, 1, 1], [], []>} : vector<128x32xbf16>, vector<32x64xbf16>, vector<128x64xf32> -> vector<128x64xf32>
    %214 = arith.addf %208, %213 : vector<128x64xf32>
    %c384_215 = arith.constant 384 : index
    %c0_216 = arith.constant 0 : index
    %215 = vector.load %arg5[%c384_215, %c0_216] : memref<640x64xf32, #tpu.memory_space<vmem>>, vector<128x64xf32>
    tpu.vector_store %arg5[%c384_215, %c0_216], %214 {strides = array<i32>} : memref<640x64xf32, #tpu.memory_space<vmem>>, vector<128x64xf32>,
    %c0_217 = arith.constant 0 : index
    %c512 = arith.constant 512 : index
    %c0_218 = arith.constant 0 : index
    %216 = vector.load %arg1[%c0_217, %c512, %c0_218] : memref<1x704x32xbf16, #tpu.memory_space<vmem>>, vector<1x128x32xbf16>
    %217 = vector.shape_cast %216 : vector<1x128x32xbf16> to vector<128x32xbf16>
    %c0_219 = arith.constant 0 : index
    %c0_220 = arith.constant 0 : index
    %c0_221 = arith.constant 0 : index
    %218 = vector.load %arg2[%c0_219, %c0_220, %c0_221] : memref<9x32x64xbf16, #tpu.memory_space<vmem>>, vector<1x32x64xbf16>
    %219 = vector.shape_cast %218 : vector<1x32x64xbf16> to vector<32x64xbf16>
    %cst_222 = arith.constant dense<0.000000e+00> : vector<128x64xf32>
    %220 = tpu.matmul %217, %219, %cst_222 {dimension_numbers = #tpu.dot_dimension_numbers<[1], [0], [0], [1], [0, 0, 1, 1], [], []>} : vector<128x32xbf16>, vector<32x64xbf16>, vector<128x64xf32> -> vector<128x64xf32>
    %c0_223 = arith.constant 0 : index
    %c513 = arith.constant 513 : index
    %c0_224 = arith.constant 0 : index
    %221 = vector.load %arg1[%c0_223, %c513, %c0_224] : memref<1x704x32xbf16, #tpu.memory_space<vmem>>, vector<1x128x32xbf16>
    %222 = vector.shape_cast %221 : vector<1x128x32xbf16> to vector<128x32xbf16>
    %c1_225 = arith.constant 1 : index
    %c0_226 = arith.constant 0 : index
    %c0_227 = arith.constant 0 : index
    %223 = vector.load %arg2[%c1_225, %c0_226, %c0_227] : memref<9x32x64xbf16, #tpu.memory_space<vmem>>, vector<1x32x64xbf16>
    %224 = vector.shape_cast %223 : vector<1x32x64xbf16> to vector<32x64xbf16>
    %cst_228 = arith.constant dense<0.000000e+00> : vector<128x64xf32>
    %225 = tpu.matmul %222, %224, %cst_228 {dimension_numbers = #tpu.dot_dimension_numbers<[1], [0], [0], [1], [0, 0, 1, 1], [], []>} : vector<128x32xbf16>, vector<32x64xbf16>, vector<128x64xf32> -> vector<128x64xf32>
    %226 = arith.addf %220, %225 : vector<128x64xf32>
    %c0_229 = arith.constant 0 : index
    %c514 = arith.constant 514 : index
    %c0_230 = arith.constant 0 : index
    %227 = vector.load %arg1[%c0_229, %c514, %c0_230] : memref<1x704x32xbf16, #tpu.memory_space<vmem>>, vector<1x128x32xbf16>
    %228 = vector.shape_cast %227 : vector<1x128x32xbf16> to vector<128x32xbf16>
    %c2_231 = arith.constant 2 : index
    %c0_232 = arith.constant 0 : index
    %c0_233 = arith.constant 0 : index
    %229 = vector.load %arg2[%c2_231, %c0_232, %c0_233] : memref<9x32x64xbf16, #tpu.memory_space<vmem>>, vector<1x32x64xbf16>
    %230 = vector.shape_cast %229 : vector<1x32x64xbf16> to vector<32x64xbf16>
    %cst_234 = arith.constant dense<0.000000e+00> : vector<128x64xf32>
    %231 = tpu.matmul %228, %230, %cst_234 {dimension_numbers = #tpu.dot_dimension_numbers<[1], [0], [0], [1], [0, 0, 1, 1], [], []>} : vector<128x32xbf16>, vector<32x64xbf16>, vector<128x64xf32> -> vector<128x64xf32>
    %232 = arith.addf %226, %231 : vector<128x64xf32>
    %c0_235 = arith.constant 0 : index
    %c538 = arith.constant 538 : index
    %c0_236 = arith.constant 0 : index
    %233 = vector.load %arg1[%c0_235, %c538, %c0_236] : memref<1x704x32xbf16, #tpu.memory_space<vmem>>, vector<1x128x32xbf16>
    %234 = vector.shape_cast %233 : vector<1x128x32xbf16> to vector<128x32xbf16>
    %c3_237 = arith.constant 3 : index
    %c0_238 = arith.constant 0 : index
    %c0_239 = arith.constant 0 : index
    %235 = vector.load %arg2[%c3_237, %c0_238, %c0_239] : memref<9x32x64xbf16, #tpu.memory_space<vmem>>, vector<1x32x64xbf16>
    %236 = vector.shape_cast %235 : vector<1x32x64xbf16> to vector<32x64xbf16>
    %cst_240 = arith.constant dense<0.000000e+00> : vector<128x64xf32>
    %237 = tpu.matmul %234, %236, %cst_240 {dimension_numbers = #tpu.dot_dimension_numbers<[1], [0], [0], [1], [0, 0, 1, 1], [], []>} : vector<128x32xbf16>, vector<32x64xbf16>, vector<128x64xf32> -> vector<128x64xf32>
    %238 = arith.addf %232, %237 : vector<128x64xf32>
    %c0_241 = arith.constant 0 : index
    %c539 = arith.constant 539 : index
    %c0_242 = arith.constant 0 : index
    %239 = vector.load %arg1[%c0_241, %c539, %c0_242] : memref<1x704x32xbf16, #tpu.memory_space<vmem>>, vector<1x128x32xbf16>
    %240 = vector.shape_cast %239 : vector<1x128x32xbf16> to vector<128x32xbf16>
    %c4_243 = arith.constant 4 : index
    %c0_244 = arith.constant 0 : index
    %c0_245 = arith.constant 0 : index
    %241 = vector.load %arg2[%c4_243, %c0_244, %c0_245] : memref<9x32x64xbf16, #tpu.memory_space<vmem>>, vector<1x32x64xbf16>
    %242 = vector.shape_cast %241 : vector<1x32x64xbf16> to vector<32x64xbf16>
    %cst_246 = arith.constant dense<0.000000e+00> : vector<128x64xf32>
    %243 = tpu.matmul %240, %242, %cst_246 {dimension_numbers = #tpu.dot_dimension_numbers<[1], [0], [0], [1], [0, 0, 1, 1], [], []>} : vector<128x32xbf16>, vector<32x64xbf16>, vector<128x64xf32> -> vector<128x64xf32>
    %244 = arith.addf %238, %243 : vector<128x64xf32>
    %c0_247 = arith.constant 0 : index
    %c540 = arith.constant 540 : index
    %c0_248 = arith.constant 0 : index
    %245 = vector.load %arg1[%c0_247, %c540, %c0_248] : memref<1x704x32xbf16, #tpu.memory_space<vmem>>, vector<1x128x32xbf16>
    %246 = vector.shape_cast %245 : vector<1x128x32xbf16> to vector<128x32xbf16>
    %c5_249 = arith.constant 5 : index
    %c0_250 = arith.constant 0 : index
    %c0_251 = arith.constant 0 : index
    %247 = vector.load %arg2[%c5_249, %c0_250, %c0_251] : memref<9x32x64xbf16, #tpu.memory_space<vmem>>, vector<1x32x64xbf16>
    %248 = vector.shape_cast %247 : vector<1x32x64xbf16> to vector<32x64xbf16>
    %cst_252 = arith.constant dense<0.000000e+00> : vector<128x64xf32>
    %249 = tpu.matmul %246, %248, %cst_252 {dimension_numbers = #tpu.dot_dimension_numbers<[1], [0], [0], [1], [0, 0, 1, 1], [], []>} : vector<128x32xbf16>, vector<32x64xbf16>, vector<128x64xf32> -> vector<128x64xf32>
    %250 = arith.addf %244, %249 : vector<128x64xf32>
    %c0_253 = arith.constant 0 : index
    %c564 = arith.constant 564 : index
    %c0_254 = arith.constant 0 : index
    %251 = vector.load %arg1[%c0_253, %c564, %c0_254] : memref<1x704x32xbf16, #tpu.memory_space<vmem>>, vector<1x128x32xbf16>
    %252 = vector.shape_cast %251 : vector<1x128x32xbf16> to vector<128x32xbf16>
    %c6_255 = arith.constant 6 : index
    %c0_256 = arith.constant 0 : index
    %c0_257 = arith.constant 0 : index
    %253 = vector.load %arg2[%c6_255, %c0_256, %c0_257] : memref<9x32x64xbf16, #tpu.memory_space<vmem>>, vector<1x32x64xbf16>
    %254 = vector.shape_cast %253 : vector<1x32x64xbf16> to vector<32x64xbf16>
    %cst_258 = arith.constant dense<0.000000e+00> : vector<128x64xf32>
    %255 = tpu.matmul %252, %254, %cst_258 {dimension_numbers = #tpu.dot_dimension_numbers<[1], [0], [0], [1], [0, 0, 1, 1], [], []>} : vector<128x32xbf16>, vector<32x64xbf16>, vector<128x64xf32> -> vector<128x64xf32>
    %256 = arith.addf %250, %255 : vector<128x64xf32>
    %c0_259 = arith.constant 0 : index
    %c565 = arith.constant 565 : index
    %c0_260 = arith.constant 0 : index
    %257 = vector.load %arg1[%c0_259, %c565, %c0_260] : memref<1x704x32xbf16, #tpu.memory_space<vmem>>, vector<1x128x32xbf16>
    %258 = vector.shape_cast %257 : vector<1x128x32xbf16> to vector<128x32xbf16>
    %c7_261 = arith.constant 7 : index
    %c0_262 = arith.constant 0 : index
    %c0_263 = arith.constant 0 : index
    %259 = vector.load %arg2[%c7_261, %c0_262, %c0_263] : memref<9x32x64xbf16, #tpu.memory_space<vmem>>, vector<1x32x64xbf16>
    %260 = vector.shape_cast %259 : vector<1x32x64xbf16> to vector<32x64xbf16>
    %cst_264 = arith.constant dense<0.000000e+00> : vector<128x64xf32>
    %261 = tpu.matmul %258, %260, %cst_264 {dimension_numbers = #tpu.dot_dimension_numbers<[1], [0], [0], [1], [0, 0, 1, 1], [], []>} : vector<128x32xbf16>, vector<32x64xbf16>, vector<128x64xf32> -> vector<128x64xf32>
    %262 = arith.addf %256, %261 : vector<128x64xf32>
    %c0_265 = arith.constant 0 : index
    %c566 = arith.constant 566 : index
    %c0_266 = arith.constant 0 : index
    %263 = vector.load %arg1[%c0_265, %c566, %c0_266] : memref<1x704x32xbf16, #tpu.memory_space<vmem>>, vector<1x128x32xbf16>
    %264 = vector.shape_cast %263 : vector<1x128x32xbf16> to vector<128x32xbf16>
    %c8_267 = arith.constant 8 : index
    %c0_268 = arith.constant 0 : index
    %c0_269 = arith.constant 0 : index
    %265 = vector.load %arg2[%c8_267, %c0_268, %c0_269] : memref<9x32x64xbf16, #tpu.memory_space<vmem>>, vector<1x32x64xbf16>
    %266 = vector.shape_cast %265 : vector<1x32x64xbf16> to vector<32x64xbf16>
    %cst_270 = arith.constant dense<0.000000e+00> : vector<128x64xf32>
    %267 = tpu.matmul %264, %266, %cst_270 {dimension_numbers = #tpu.dot_dimension_numbers<[1], [0], [0], [1], [0, 0, 1, 1], [], []>} : vector<128x32xbf16>, vector<32x64xbf16>, vector<128x64xf32> -> vector<128x64xf32>
    %268 = arith.addf %262, %267 : vector<128x64xf32>
    %c512_271 = arith.constant 512 : index
    %c0_272 = arith.constant 0 : index
    %269 = vector.load %arg5[%c512_271, %c0_272] : memref<640x64xf32, #tpu.memory_space<vmem>>, vector<128x64xf32>
    tpu.vector_store %arg5[%c512_271, %c0_272], %268 {strides = array<i32>} : memref<640x64xf32, #tpu.memory_space<vmem>>, vector<128x64xf32>,
    %c0_273 = arith.constant 0 : index
    %c0_274 = arith.constant 0 : index
    %270 = vector.load %arg3[%c0_273, %c0_274] : memref<1x64xf32, #tpu.memory_space<vmem>>, vector<1x64xf32>
    %c0_275 = arith.constant 0 : index
    %c0_276 = arith.constant 0 : index
    %271 = tpu.strided_load %arg5[%c0_275, %c0_276] {strides = array<i32: 2, 1>} : memref<640x64xf32, #tpu.memory_space<vmem>>, vector<12x64xf32>
    %c1_277 = arith.constant 1 : index
    %c0_278 = arith.constant 0 : index
    %272 = tpu.strided_load %arg5[%c1_277, %c0_278] {strides = array<i32: 2, 1>} : memref<640x64xf32, #tpu.memory_space<vmem>>, vector<12x64xf32>
    %273 = arith.maximumf %271, %272 : vector<12x64xf32>
    %c26_279 = arith.constant 26 : index
    %c0_280 = arith.constant 0 : index
    %274 = tpu.strided_load %arg5[%c26_279, %c0_280] {strides = array<i32: 2, 1>} : memref<640x64xf32, #tpu.memory_space<vmem>>, vector<12x64xf32>
    %275 = arith.maximumf %273, %274 : vector<12x64xf32>
    %c27_281 = arith.constant 27 : index
    %c0_282 = arith.constant 0 : index
    %276 = tpu.strided_load %arg5[%c27_281, %c0_282] {strides = array<i32: 2, 1>} : memref<640x64xf32, #tpu.memory_space<vmem>>, vector<12x64xf32>
    %277 = arith.maximumf %275, %276 : vector<12x64xf32>
    %278 = vector.broadcast %270 : vector<1x64xf32> to vector<12x64xf32>
    %279 = arith.addf %277, %278 : vector<12x64xf32>
    %cst_283 = arith.constant 0.000000e+00 : f32
    %280 = vector.broadcast %cst_283 : f32 to vector<12x64xf32>
    %281 = arith.maximumf %279, %280 : vector<12x64xf32>
    %282 = arith.truncf %281 : vector<12x64xf32> to vector<12x64xbf16>
    %c0_284 = arith.constant 0 : index
    %c0_285 = arith.constant 0 : index
    %c0_286 = arith.constant 0 : index
    %283 = vector.load %arg4[%c0_284, %c0_285, %c0_286] : memref<1x144x64xbf16, #tpu.memory_space<vmem>>, vector<1x12x64xbf16>
    %284 = vector.shape_cast %283 : vector<1x12x64xbf16> to vector<12x64xbf16>
    %285 = vector.shape_cast %282 : vector<12x64xbf16> to vector<1x12x64xbf16>
    tpu.vector_store %arg4[%c0_284, %c0_285, %c0_286], %285 {strides = array<i32>} : memref<1x144x64xbf16, #tpu.memory_space<vmem>>, vector<1x12x64xbf16>,
    %c52_287 = arith.constant 52 : index
    %c0_288 = arith.constant 0 : index
    %286 = tpu.strided_load %arg5[%c52_287, %c0_288] {strides = array<i32: 2, 1>} : memref<640x64xf32, #tpu.memory_space<vmem>>, vector<12x64xf32>
    %c53_289 = arith.constant 53 : index
    %c0_290 = arith.constant 0 : index
    %287 = tpu.strided_load %arg5[%c53_289, %c0_290] {strides = array<i32: 2, 1>} : memref<640x64xf32, #tpu.memory_space<vmem>>, vector<12x64xf32>
    %288 = arith.maximumf %286, %287 : vector<12x64xf32>
    %c78 = arith.constant 78 : index
    %c0_291 = arith.constant 0 : index
    %289 = tpu.strided_load %arg5[%c78, %c0_291] {strides = array<i32: 2, 1>} : memref<640x64xf32, #tpu.memory_space<vmem>>, vector<12x64xf32>
    %290 = arith.maximumf %288, %289 : vector<12x64xf32>
    %c79 = arith.constant 79 : index
    %c0_292 = arith.constant 0 : index
    %291 = tpu.strided_load %arg5[%c79, %c0_292] {strides = array<i32: 2, 1>} : memref<640x64xf32, #tpu.memory_space<vmem>>, vector<12x64xf32>
    %292 = arith.maximumf %290, %291 : vector<12x64xf32>
    %293 = vector.broadcast %270 : vector<1x64xf32> to vector<12x64xf32>
    %294 = arith.addf %292, %293 : vector<12x64xf32>
    %cst_293 = arith.constant 0.000000e+00 : f32
    %295 = vector.broadcast %cst_293 : f32 to vector<12x64xf32>
    %296 = arith.maximumf %294, %295 : vector<12x64xf32>
    %297 = arith.truncf %296 : vector<12x64xf32> to vector<12x64xbf16>
    %c0_294 = arith.constant 0 : index
    %c12 = arith.constant 12 : index
    %c0_295 = arith.constant 0 : index
    %298 = vector.load %arg4[%c0_294, %c12, %c0_295] : memref<1x144x64xbf16, #tpu.memory_space<vmem>>, vector<1x12x64xbf16>
    %299 = vector.shape_cast %298 : vector<1x12x64xbf16> to vector<12x64xbf16>
    %300 = vector.shape_cast %297 : vector<12x64xbf16> to vector<1x12x64xbf16>
    tpu.vector_store %arg4[%c0_294, %c12, %c0_295], %300 {strides = array<i32>} : memref<1x144x64xbf16, #tpu.memory_space<vmem>>, vector<1x12x64xbf16>,
    %c104 = arith.constant 104 : index
    %c0_296 = arith.constant 0 : index
    %301 = tpu.strided_load %arg5[%c104, %c0_296] {strides = array<i32: 2, 1>} : memref<640x64xf32, #tpu.memory_space<vmem>>, vector<12x64xf32>
    %c105 = arith.constant 105 : index
    %c0_297 = arith.constant 0 : index
    %302 = tpu.strided_load %arg5[%c105, %c0_297] {strides = array<i32: 2, 1>} : memref<640x64xf32, #tpu.memory_space<vmem>>, vector<12x64xf32>
    %303 = arith.maximumf %301, %302 : vector<12x64xf32>
    %c130_298 = arith.constant 130 : index
    %c0_299 = arith.constant 0 : index
    %304 = tpu.strided_load %arg5[%c130_298, %c0_299] {strides = array<i32: 2, 1>} : memref<640x64xf32, #tpu.memory_space<vmem>>, vector<12x64xf32>
    %305 = arith.maximumf %303, %304 : vector<12x64xf32>
    %c131 = arith.constant 131 : index
    %c0_300 = arith.constant 0 : index
    %306 = tpu.strided_load %arg5[%c131, %c0_300] {strides = array<i32: 2, 1>} : memref<640x64xf32, #tpu.memory_space<vmem>>, vector<12x64xf32>
    %307 = arith.maximumf %305, %306 : vector<12x64xf32>
    %308 = vector.broadcast %270 : vector<1x64xf32> to vector<12x64xf32>
    %309 = arith.addf %307, %308 : vector<12x64xf32>
    %cst_301 = arith.constant 0.000000e+00 : f32
    %310 = vector.broadcast %cst_301 : f32 to vector<12x64xf32>
    %311 = arith.maximumf %309, %310 : vector<12x64xf32>
    %312 = arith.truncf %311 : vector<12x64xf32> to vector<12x64xbf16>
    %c0_302 = arith.constant 0 : index
    %c24 = arith.constant 24 : index
    %c0_303 = arith.constant 0 : index
    %313 = vector.load %arg4[%c0_302, %c24, %c0_303] : memref<1x144x64xbf16, #tpu.memory_space<vmem>>, vector<1x12x64xbf16>
    %314 = vector.shape_cast %313 : vector<1x12x64xbf16> to vector<12x64xbf16>
    %315 = vector.shape_cast %312 : vector<12x64xbf16> to vector<1x12x64xbf16>
    tpu.vector_store %arg4[%c0_302, %c24, %c0_303], %315 {strides = array<i32>} : memref<1x144x64xbf16, #tpu.memory_space<vmem>>, vector<1x12x64xbf16>,
    %c156_304 = arith.constant 156 : index
    %c0_305 = arith.constant 0 : index
    %316 = tpu.strided_load %arg5[%c156_304, %c0_305] {strides = array<i32: 2, 1>} : memref<640x64xf32, #tpu.memory_space<vmem>>, vector<12x64xf32>
    %c157 = arith.constant 157 : index
    %c0_306 = arith.constant 0 : index
    %317 = tpu.strided_load %arg5[%c157, %c0_306] {strides = array<i32: 2, 1>} : memref<640x64xf32, #tpu.memory_space<vmem>>, vector<12x64xf32>
    %318 = arith.maximumf %316, %317 : vector<12x64xf32>
    %c182_307 = arith.constant 182 : index
    %c0_308 = arith.constant 0 : index
    %319 = tpu.strided_load %arg5[%c182_307, %c0_308] {strides = array<i32: 2, 1>} : memref<640x64xf32, #tpu.memory_space<vmem>>, vector<12x64xf32>
    %320 = arith.maximumf %318, %319 : vector<12x64xf32>
    %c183 = arith.constant 183 : index
    %c0_309 = arith.constant 0 : index
    %321 = tpu.strided_load %arg5[%c183, %c0_309] {strides = array<i32: 2, 1>} : memref<640x64xf32, #tpu.memory_space<vmem>>, vector<12x64xf32>
    %322 = arith.maximumf %320, %321 : vector<12x64xf32>
    %323 = vector.broadcast %270 : vector<1x64xf32> to vector<12x64xf32>
    %324 = arith.addf %322, %323 : vector<12x64xf32>
    %cst_310 = arith.constant 0.000000e+00 : f32
    %325 = vector.broadcast %cst_310 : f32 to vector<12x64xf32>
    %326 = arith.maximumf %324, %325 : vector<12x64xf32>
    %327 = arith.truncf %326 : vector<12x64xf32> to vector<12x64xbf16>
    %c0_311 = arith.constant 0 : index
    %c36 = arith.constant 36 : index
    %c0_312 = arith.constant 0 : index
    %328 = vector.load %arg4[%c0_311, %c36, %c0_312] : memref<1x144x64xbf16, #tpu.memory_space<vmem>>, vector<1x12x64xbf16>
    %329 = vector.shape_cast %328 : vector<1x12x64xbf16> to vector<12x64xbf16>
    %330 = vector.shape_cast %327 : vector<12x64xbf16> to vector<1x12x64xbf16>
    tpu.vector_store %arg4[%c0_311, %c36, %c0_312], %330 {strides = array<i32>} : memref<1x144x64xbf16, #tpu.memory_space<vmem>>, vector<1x12x64xbf16>,
    %c208 = arith.constant 208 : index
    %c0_313 = arith.constant 0 : index
    %331 = tpu.strided_load %arg5[%c208, %c0_313] {strides = array<i32: 2, 1>} : memref<640x64xf32, #tpu.memory_space<vmem>>, vector<12x64xf32>
    %c209 = arith.constant 209 : index
    %c0_314 = arith.constant 0 : index
    %332 = tpu.strided_load %arg5[%c209, %c0_314] {strides = array<i32: 2, 1>} : memref<640x64xf32, #tpu.memory_space<vmem>>, vector<12x64xf32>
    %333 = arith.maximumf %331, %332 : vector<12x64xf32>
    %c234 = arith.constant 234 : index
    %c0_315 = arith.constant 0 : index
    %334 = tpu.strided_load %arg5[%c234, %c0_315] {strides = array<i32: 2, 1>} : memref<640x64xf32, #tpu.memory_space<vmem>>, vector<12x64xf32>
    %335 = arith.maximumf %333, %334 : vector<12x64xf32>
    %c235 = arith.constant 235 : index
    %c0_316 = arith.constant 0 : index
    %336 = tpu.strided_load %arg5[%c235, %c0_316] {strides = array<i32: 2, 1>} : memref<640x64xf32, #tpu.memory_space<vmem>>, vector<12x64xf32>
    %337 = arith.maximumf %335, %336 : vector<12x64xf32>
    %338 = vector.broadcast %270 : vector<1x64xf32> to vector<12x64xf32>
    %339 = arith.addf %337, %338 : vector<12x64xf32>
    %cst_317 = arith.constant 0.000000e+00 : f32
    %340 = vector.broadcast %cst_317 : f32 to vector<12x64xf32>
    %341 = arith.maximumf %339, %340 : vector<12x64xf32>
    %342 = arith.truncf %341 : vector<12x64xf32> to vector<12x64xbf16>
    %c0_318 = arith.constant 0 : index
    %c48 = arith.constant 48 : index
    %c0_319 = arith.constant 0 : index
    %343 = vector.load %arg4[%c0_318, %c48, %c0_319] : memref<1x144x64xbf16, #tpu.memory_space<vmem>>, vector<1x12x64xbf16>
    %344 = vector.shape_cast %343 : vector<1x12x64xbf16> to vector<12x64xbf16>
    %345 = vector.shape_cast %342 : vector<12x64xbf16> to vector<1x12x64xbf16>
    tpu.vector_store %arg4[%c0_318, %c48, %c0_319], %345 {strides = array<i32>} : memref<1x144x64xbf16, #tpu.memory_space<vmem>>, vector<1x12x64xbf16>,
    %c260 = arith.constant 260 : index
    %c0_320 = arith.constant 0 : index
    %346 = tpu.strided_load %arg5[%c260, %c0_320] {strides = array<i32: 2, 1>} : memref<640x64xf32, #tpu.memory_space<vmem>>, vector<12x64xf32>
    %c261 = arith.constant 261 : index
    %c0_321 = arith.constant 0 : index
    %347 = tpu.strided_load %arg5[%c261, %c0_321] {strides = array<i32: 2, 1>} : memref<640x64xf32, #tpu.memory_space<vmem>>, vector<12x64xf32>
    %348 = arith.maximumf %346, %347 : vector<12x64xf32>
    %c286 = arith.constant 286 : index
    %c0_322 = arith.constant 0 : index
    %349 = tpu.strided_load %arg5[%c286, %c0_322] {strides = array<i32: 2, 1>} : memref<640x64xf32, #tpu.memory_space<vmem>>, vector<12x64xf32>
    %350 = arith.maximumf %348, %349 : vector<12x64xf32>
    %c287 = arith.constant 287 : index
    %c0_323 = arith.constant 0 : index
    %351 = tpu.strided_load %arg5[%c287, %c0_323] {strides = array<i32: 2, 1>} : memref<640x64xf32, #tpu.memory_space<vmem>>, vector<12x64xf32>
    %352 = arith.maximumf %350, %351 : vector<12x64xf32>
    %353 = vector.broadcast %270 : vector<1x64xf32> to vector<12x64xf32>
    %354 = arith.addf %352, %353 : vector<12x64xf32>
    %cst_324 = arith.constant 0.000000e+00 : f32
    %355 = vector.broadcast %cst_324 : f32 to vector<12x64xf32>
    %356 = arith.maximumf %354, %355 : vector<12x64xf32>
    %357 = arith.truncf %356 : vector<12x64xf32> to vector<12x64xbf16>
    %c0_325 = arith.constant 0 : index
    %c60 = arith.constant 60 : index
    %c0_326 = arith.constant 0 : index
    %358 = vector.load %arg4[%c0_325, %c60, %c0_326] : memref<1x144x64xbf16, #tpu.memory_space<vmem>>, vector<1x12x64xbf16>
    %359 = vector.shape_cast %358 : vector<1x12x64xbf16> to vector<12x64xbf16>
    %360 = vector.shape_cast %357 : vector<12x64xbf16> to vector<1x12x64xbf16>
    tpu.vector_store %arg4[%c0_325, %c60, %c0_326], %360 {strides = array<i32>} : memref<1x144x64xbf16, #tpu.memory_space<vmem>>, vector<1x12x64xbf16>,
    %c312 = arith.constant 312 : index
    %c0_327 = arith.constant 0 : index
    %361 = tpu.strided_load %arg5[%c312, %c0_327] {strides = array<i32: 2, 1>} : memref<640x64xf32, #tpu.memory_space<vmem>>, vector<12x64xf32>
    %c313 = arith.constant 313 : index
    %c0_328 = arith.constant 0 : index
    %362 = tpu.strided_load %arg5[%c313, %c0_328] {strides = array<i32: 2, 1>} : memref<640x64xf32, #tpu.memory_space<vmem>>, vector<12x64xf32>
    %363 = arith.maximumf %361, %362 : vector<12x64xf32>
    %c338 = arith.constant 338 : index
    %c0_329 = arith.constant 0 : index
    %364 = tpu.strided_load %arg5[%c338, %c0_329] {strides = array<i32: 2, 1>} : memref<640x64xf32, #tpu.memory_space<vmem>>, vector<12x64xf32>
    %365 = arith.maximumf %363, %364 : vector<12x64xf32>
    %c339 = arith.constant 339 : index
    %c0_330 = arith.constant 0 : index
    %366 = tpu.strided_load %arg5[%c339, %c0_330] {strides = array<i32: 2, 1>} : memref<640x64xf32, #tpu.memory_space<vmem>>, vector<12x64xf32>
    %367 = arith.maximumf %365, %366 : vector<12x64xf32>
    %368 = vector.broadcast %270 : vector<1x64xf32> to vector<12x64xf32>
    %369 = arith.addf %367, %368 : vector<12x64xf32>
    %cst_331 = arith.constant 0.000000e+00 : f32
    %370 = vector.broadcast %cst_331 : f32 to vector<12x64xf32>
    %371 = arith.maximumf %369, %370 : vector<12x64xf32>
    %372 = arith.truncf %371 : vector<12x64xf32> to vector<12x64xbf16>
    %c0_332 = arith.constant 0 : index
    %c72 = arith.constant 72 : index
    %c0_333 = arith.constant 0 : index
    %373 = vector.load %arg4[%c0_332, %c72, %c0_333] : memref<1x144x64xbf16, #tpu.memory_space<vmem>>, vector<1x12x64xbf16>
    %374 = vector.shape_cast %373 : vector<1x12x64xbf16> to vector<12x64xbf16>
    %375 = vector.shape_cast %372 : vector<12x64xbf16> to vector<1x12x64xbf16>
    tpu.vector_store %arg4[%c0_332, %c72, %c0_333], %375 {strides = array<i32>} : memref<1x144x64xbf16, #tpu.memory_space<vmem>>, vector<1x12x64xbf16>,
    %c364 = arith.constant 364 : index
    %c0_334 = arith.constant 0 : index
    %376 = tpu.strided_load %arg5[%c364, %c0_334] {strides = array<i32: 2, 1>} : memref<640x64xf32, #tpu.memory_space<vmem>>, vector<12x64xf32>
    %c365 = arith.constant 365 : index
    %c0_335 = arith.constant 0 : index
    %377 = tpu.strided_load %arg5[%c365, %c0_335] {strides = array<i32: 2, 1>} : memref<640x64xf32, #tpu.memory_space<vmem>>, vector<12x64xf32>
    %378 = arith.maximumf %376, %377 : vector<12x64xf32>
    %c390 = arith.constant 390 : index
    %c0_336 = arith.constant 0 : index
    %379 = tpu.strided_load %arg5[%c390, %c0_336] {strides = array<i32: 2, 1>} : memref<640x64xf32, #tpu.memory_space<vmem>>, vector<12x64xf32>
    %380 = arith.maximumf %378, %379 : vector<12x64xf32>
    %c391 = arith.constant 391 : index
    %c0_337 = arith.constant 0 : index
    %381 = tpu.strided_load %arg5[%c391, %c0_337] {strides = array<i32: 2, 1>} : memref<640x64xf32, #tpu.memory_space<vmem>>, vector<12x64xf32>
    %382 = arith.maximumf %380, %381 : vector<12x64xf32>
    %383 = vector.broadcast %270 : vector<1x64xf32> to vector<12x64xf32>
    %384 = arith.addf %382, %383 : vector<12x64xf32>
    %cst_338 = arith.constant 0.000000e+00 : f32
    %385 = vector.broadcast %cst_338 : f32 to vector<12x64xf32>
    %386 = arith.maximumf %384, %385 : vector<12x64xf32>
    %387 = arith.truncf %386 : vector<12x64xf32> to vector<12x64xbf16>
    %c0_339 = arith.constant 0 : index
    %c84 = arith.constant 84 : index
    %c0_340 = arith.constant 0 : index
    %388 = vector.load %arg4[%c0_339, %c84, %c0_340] : memref<1x144x64xbf16, #tpu.memory_space<vmem>>, vector<1x12x64xbf16>
    %389 = vector.shape_cast %388 : vector<1x12x64xbf16> to vector<12x64xbf16>
    %390 = vector.shape_cast %387 : vector<12x64xbf16> to vector<1x12x64xbf16>
    tpu.vector_store %arg4[%c0_339, %c84, %c0_340], %390 {strides = array<i32>} : memref<1x144x64xbf16, #tpu.memory_space<vmem>>, vector<1x12x64xbf16>,
    %c416 = arith.constant 416 : index
    %c0_341 = arith.constant 0 : index
    %391 = tpu.strided_load %arg5[%c416, %c0_341] {strides = array<i32: 2, 1>} : memref<640x64xf32, #tpu.memory_space<vmem>>, vector<12x64xf32>
    %c417 = arith.constant 417 : index
    %c0_342 = arith.constant 0 : index
    %392 = tpu.strided_load %arg5[%c417, %c0_342] {strides = array<i32: 2, 1>} : memref<640x64xf32, #tpu.memory_space<vmem>>, vector<12x64xf32>
    %393 = arith.maximumf %391, %392 : vector<12x64xf32>
    %c442 = arith.constant 442 : index
    %c0_343 = arith.constant 0 : index
    %394 = tpu.strided_load %arg5[%c442, %c0_343] {strides = array<i32: 2, 1>} : memref<640x64xf32, #tpu.memory_space<vmem>>, vector<12x64xf32>
    %395 = arith.maximumf %393, %394 : vector<12x64xf32>
    %c443 = arith.constant 443 : index
    %c0_344 = arith.constant 0 : index
    %396 = tpu.strided_load %arg5[%c443, %c0_344] {strides = array<i32: 2, 1>} : memref<640x64xf32, #tpu.memory_space<vmem>>, vector<12x64xf32>
    %397 = arith.maximumf %395, %396 : vector<12x64xf32>
    %398 = vector.broadcast %270 : vector<1x64xf32> to vector<12x64xf32>
    %399 = arith.addf %397, %398 : vector<12x64xf32>
    %cst_345 = arith.constant 0.000000e+00 : f32
    %400 = vector.broadcast %cst_345 : f32 to vector<12x64xf32>
    %401 = arith.maximumf %399, %400 : vector<12x64xf32>
    %402 = arith.truncf %401 : vector<12x64xf32> to vector<12x64xbf16>
    %c0_346 = arith.constant 0 : index
    %c96 = arith.constant 96 : index
    %c0_347 = arith.constant 0 : index
    %403 = vector.load %arg4[%c0_346, %c96, %c0_347] : memref<1x144x64xbf16, #tpu.memory_space<vmem>>, vector<1x12x64xbf16>
    %404 = vector.shape_cast %403 : vector<1x12x64xbf16> to vector<12x64xbf16>
    %405 = vector.shape_cast %402 : vector<12x64xbf16> to vector<1x12x64xbf16>
    tpu.vector_store %arg4[%c0_346, %c96, %c0_347], %405 {strides = array<i32>} : memref<1x144x64xbf16, #tpu.memory_space<vmem>>, vector<1x12x64xbf16>,
    %c468 = arith.constant 468 : index
    %c0_348 = arith.constant 0 : index
    %406 = tpu.strided_load %arg5[%c468, %c0_348] {strides = array<i32: 2, 1>} : memref<640x64xf32, #tpu.memory_space<vmem>>, vector<12x64xf32>
    %c469 = arith.constant 469 : index
    %c0_349 = arith.constant 0 : index
    %407 = tpu.strided_load %arg5[%c469, %c0_349] {strides = array<i32: 2, 1>} : memref<640x64xf32, #tpu.memory_space<vmem>>, vector<12x64xf32>
    %408 = arith.maximumf %406, %407 : vector<12x64xf32>
    %c494 = arith.constant 494 : index
    %c0_350 = arith.constant 0 : index
    %409 = tpu.strided_load %arg5[%c494, %c0_350] {strides = array<i32: 2, 1>} : memref<640x64xf32, #tpu.memory_space<vmem>>, vector<12x64xf32>
    %410 = arith.maximumf %408, %409 : vector<12x64xf32>
    %c495 = arith.constant 495 : index
    %c0_351 = arith.constant 0 : index
    %411 = tpu.strided_load %arg5[%c495, %c0_351] {strides = array<i32: 2, 1>} : memref<640x64xf32, #tpu.memory_space<vmem>>, vector<12x64xf32>
    %412 = arith.maximumf %410, %411 : vector<12x64xf32>
    %413 = vector.broadcast %270 : vector<1x64xf32> to vector<12x64xf32>
    %414 = arith.addf %412, %413 : vector<12x64xf32>
    %cst_352 = arith.constant 0.000000e+00 : f32
    %415 = vector.broadcast %cst_352 : f32 to vector<12x64xf32>
    %416 = arith.maximumf %414, %415 : vector<12x64xf32>
    %417 = arith.truncf %416 : vector<12x64xf32> to vector<12x64xbf16>
    %c0_353 = arith.constant 0 : index
    %c108 = arith.constant 108 : index
    %c0_354 = arith.constant 0 : index
    %418 = vector.load %arg4[%c0_353, %c108, %c0_354] : memref<1x144x64xbf16, #tpu.memory_space<vmem>>, vector<1x12x64xbf16>
    %419 = vector.shape_cast %418 : vector<1x12x64xbf16> to vector<12x64xbf16>
    %420 = vector.shape_cast %417 : vector<12x64xbf16> to vector<1x12x64xbf16>
    tpu.vector_store %arg4[%c0_353, %c108, %c0_354], %420 {strides = array<i32>} : memref<1x144x64xbf16, #tpu.memory_space<vmem>>, vector<1x12x64xbf16>,
    %c520 = arith.constant 520 : index
    %c0_355 = arith.constant 0 : index
    %421 = tpu.strided_load %arg5[%c520, %c0_355] {strides = array<i32: 2, 1>} : memref<640x64xf32, #tpu.memory_space<vmem>>, vector<12x64xf32>
    %c521 = arith.constant 521 : index
    %c0_356 = arith.constant 0 : index
    %422 = tpu.strided_load %arg5[%c521, %c0_356] {strides = array<i32: 2, 1>} : memref<640x64xf32, #tpu.memory_space<vmem>>, vector<12x64xf32>
    %423 = arith.maximumf %421, %422 : vector<12x64xf32>
    %c546 = arith.constant 546 : index
    %c0_357 = arith.constant 0 : index
    %424 = tpu.strided_load %arg5[%c546, %c0_357] {strides = array<i32: 2, 1>} : memref<640x64xf32, #tpu.memory_space<vmem>>, vector<12x64xf32>
    %425 = arith.maximumf %423, %424 : vector<12x64xf32>
    %c547 = arith.constant 547 : index
    %c0_358 = arith.constant 0 : index
    %426 = tpu.strided_load %arg5[%c547, %c0_358] {strides = array<i32: 2, 1>} : memref<640x64xf32, #tpu.memory_space<vmem>>, vector<12x64xf32>
    %427 = arith.maximumf %425, %426 : vector<12x64xf32>
    %428 = vector.broadcast %270 : vector<1x64xf32> to vector<12x64xf32>
    %429 = arith.addf %427, %428 : vector<12x64xf32>
    %cst_359 = arith.constant 0.000000e+00 : f32
    %430 = vector.broadcast %cst_359 : f32 to vector<12x64xf32>
    %431 = arith.maximumf %429, %430 : vector<12x64xf32>
    %432 = arith.truncf %431 : vector<12x64xf32> to vector<12x64xbf16>
    %c0_360 = arith.constant 0 : index
    %c120 = arith.constant 120 : index
    %c0_361 = arith.constant 0 : index
    %433 = vector.load %arg4[%c0_360, %c120, %c0_361] : memref<1x144x64xbf16, #tpu.memory_space<vmem>>, vector<1x12x64xbf16>
    %434 = vector.shape_cast %433 : vector<1x12x64xbf16> to vector<12x64xbf16>
    %435 = vector.shape_cast %432 : vector<12x64xbf16> to vector<1x12x64xbf16>
    tpu.vector_store %arg4[%c0_360, %c120, %c0_361], %435 {strides = array<i32>} : memref<1x144x64xbf16, #tpu.memory_space<vmem>>, vector<1x12x64xbf16>,
    %c572 = arith.constant 572 : index
    %c0_362 = arith.constant 0 : index
    %436 = tpu.strided_load %arg5[%c572, %c0_362] {strides = array<i32: 2, 1>} : memref<640x64xf32, #tpu.memory_space<vmem>>, vector<12x64xf32>
    %c573 = arith.constant 573 : index
    %c0_363 = arith.constant 0 : index
    %437 = tpu.strided_load %arg5[%c573, %c0_363] {strides = array<i32: 2, 1>} : memref<640x64xf32, #tpu.memory_space<vmem>>, vector<12x64xf32>
    %438 = arith.maximumf %436, %437 : vector<12x64xf32>
    %c598 = arith.constant 598 : index
    %c0_364 = arith.constant 0 : index
    %439 = tpu.strided_load %arg5[%c598, %c0_364] {strides = array<i32: 2, 1>} : memref<640x64xf32, #tpu.memory_space<vmem>>, vector<12x64xf32>
    %440 = arith.maximumf %438, %439 : vector<12x64xf32>
    %c599 = arith.constant 599 : index
    %c0_365 = arith.constant 0 : index
    %441 = tpu.strided_load %arg5[%c599, %c0_365] {strides = array<i32: 2, 1>} : memref<640x64xf32, #tpu.memory_space<vmem>>, vector<12x64xf32>
    %442 = arith.maximumf %440, %441 : vector<12x64xf32>
    %443 = vector.broadcast %270 : vector<1x64xf32> to vector<12x64xf32>
    %444 = arith.addf %442, %443 : vector<12x64xf32>
    %cst_366 = arith.constant 0.000000e+00 : f32
    %445 = vector.broadcast %cst_366 : f32 to vector<12x64xf32>
    %446 = arith.maximumf %444, %445 : vector<12x64xf32>
    %447 = arith.truncf %446 : vector<12x64xf32> to vector<12x64xbf16>
    %c0_367 = arith.constant 0 : index
    %c132 = arith.constant 132 : index
    %c0_368 = arith.constant 0 : index
    %448 = vector.load %arg4[%c0_367, %c132, %c0_368] : memref<1x144x64xbf16, #tpu.memory_space<vmem>>, vector<1x12x64xbf16>
    %449 = vector.shape_cast %448 : vector<1x12x64xbf16> to vector<12x64xbf16>
    %450 = vector.shape_cast %447 : vector<12x64xbf16> to vector<1x12x64xbf16>
    tpu.vector_store %arg4[%c0_367, %c132, %c0_368], %450 {strides = array<i32>} : memref<1x144x64xbf16, #tpu.memory_space<vmem>>, vector<1x12x64xbf16>,
    return
  }
  func.func @transform_0(%arg0: i32) -> (i32, i32, i32) {
    %c0_i32 = arith.constant 0 : i32
    %c0_i32_0 = arith.constant 0 : i32
    %c0_i32_1 = arith.constant 0 : i32
    return %arg0, %c0_i32, %c0_i32_0 : i32, i32, i32
  }
  func.func @transform_1(%arg0: i32) -> (i32, i32, i32) {
    %c0_i32 = arith.constant 0 : i32
    %c0_i32_0 = arith.constant 0 : i32
    %c0_i32_1 = arith.constant 0 : i32
    %c0_i32_2 = arith.constant 0 : i32
    return %c0_i32, %c0_i32_0, %c0_i32_1 : i32, i32, i32
  }
  func.func @transform_2(%arg0: i32) -> (i32, i32) {
    %c0_i32 = arith.constant 0 : i32
    %c0_i32_0 = arith.constant 0 : i32
    %c0_i32_1 = arith.constant 0 : i32
    return %c0_i32, %c0_i32_0 : i32, i32
  }
  func.func @transform_3(%arg0: i32) -> (i32, i32, i32) {
    %c0_i32 = arith.constant 0 : i32
    %c0_i32_0 = arith.constant 0 : i32
    %c0_i32_1 = arith.constant 0 : i32
    return %arg0, %c0_i32, %c0_i32_0 : i32, i32, i32
  }
}

module attributes {stable_mosaic.version = 11 : i64} {
  func.func @_fc_head_kernel(%arg0: i32, %arg1: memref<8x9216xbf16, #tpu.memory_space<vmem>>, %arg2: memref<9216x128xbf16, #tpu.memory_space<vmem>>, %arg3: memref<1x128xf32, #tpu.memory_space<vmem>>, %arg4: memref<128x128xbf16, #tpu.memory_space<vmem>>, %arg5: memref<1x128xf32, #tpu.memory_space<vmem>>, %arg6: memref<8x128xf32, #tpu.memory_space<vmem>>) attributes {dimension_semantics = [#tpu.dimension_semantics<parallel>], iteration_bounds = array<i64: 1>, scalar_prefetch = 0 : i64, scratch_operands = 0 : i64, tpu.core_type = #tpu.core_type<tc>, window_params = [{transform_indices = @transform_0, window_bounds = array<i64: 8, 9216>}, {pipeline_mode = #tpu.pipeline_mode<synchronous>, transform_indices = @transform_1, window_bounds = array<i64: 9216, 128>}, {pipeline_mode = #tpu.pipeline_mode<synchronous>, transform_indices = @transform_2, window_bounds = array<i64: 1, 128>}, {pipeline_mode = #tpu.pipeline_mode<synchronous>, transform_indices = @transform_3, window_bounds = array<i64: 128, 128>}, {pipeline_mode = #tpu.pipeline_mode<synchronous>, transform_indices = @transform_4, window_bounds = array<i64: 1, 128>}, {transform_indices = @transform_5, window_bounds = array<i64: 8, 128>}]} {
    %c0 = arith.constant 0 : index
    %c0_0 = arith.constant 0 : index
    %0 = vector.load %arg1[%c0, %c0_0] : memref<8x9216xbf16, #tpu.memory_space<vmem>>, vector<8x9216xbf16>
    %c0_1 = arith.constant 0 : index
    %c0_2 = arith.constant 0 : index
    %1 = vector.load %arg2[%c0_1, %c0_2] : memref<9216x128xbf16, #tpu.memory_space<vmem>>, vector<9216x128xbf16>
    %cst = arith.constant dense<0.000000e+00> : vector<8x128xf32>
    %2 = tpu.matmul %0, %1, %cst {dimension_numbers = #tpu.dot_dimension_numbers<[1], [0], [0], [1], [0, 0, 1, 1], [], []>} : vector<8x9216xbf16>, vector<9216x128xbf16>, vector<8x128xf32> -> vector<8x128xf32>
    %c0_3 = arith.constant 0 : index
    %c0_4 = arith.constant 0 : index
    %3 = vector.load %arg3[%c0_3, %c0_4] : memref<1x128xf32, #tpu.memory_space<vmem>>, vector<1x128xf32>
    %4 = vector.broadcast %3 : vector<1x128xf32> to vector<8x128xf32>
    %5 = arith.addf %2, %4 : vector<8x128xf32>
    %cst_5 = arith.constant 0.000000e+00 : f32
    %6 = vector.broadcast %cst_5 : f32 to vector<8x128xf32>
    %7 = arith.maximumf %5, %6 : vector<8x128xf32>
    %8 = arith.truncf %7 : vector<8x128xf32> to vector<8x128xbf16>
    %c0_6 = arith.constant 0 : index
    %c0_7 = arith.constant 0 : index
    %9 = vector.load %arg4[%c0_6, %c0_7] : memref<128x128xbf16, #tpu.memory_space<vmem>>, vector<128x128xbf16>
    %cst_8 = arith.constant dense<0.000000e+00> : vector<8x128xf32>
    %10 = tpu.matmul %8, %9, %cst_8 {dimension_numbers = #tpu.dot_dimension_numbers<[1], [0], [0], [1], [0, 0, 1, 1], [], []>} : vector<8x128xbf16>, vector<128x128xbf16>, vector<8x128xf32> -> vector<8x128xf32>
    %c0_9 = arith.constant 0 : index
    %c0_10 = arith.constant 0 : index
    %11 = vector.load %arg5[%c0_9, %c0_10] : memref<1x128xf32, #tpu.memory_space<vmem>>, vector<1x128xf32>
    %12 = vector.broadcast %11 : vector<1x128xf32> to vector<8x128xf32>
    %13 = arith.addf %10, %12 : vector<8x128xf32>
    %cst_11 = arith.constant dense<0xFF800000> : vector<8xf32>
    %14 = vector.multi_reduction <maximumf>, %13, %cst_11 [1] : vector<8x128xf32> to vector<8xf32>
    %15 = vector.shape_cast %14 : vector<8xf32> to vector<8x1xf32>
    %16 = vector.broadcast %15 : vector<8x1xf32> to vector<8x128xf32>
    %17 = arith.subf %13, %16 : vector<8x128xf32>
    %18 = math.exp %17 : vector<8x128xf32>
    %cst_12 = arith.constant dense<0.000000e+00> : vector<8xf32>
    %19 = vector.multi_reduction <add>, %18, %cst_12 [1] : vector<8x128xf32> to vector<8xf32>
    %20 = vector.shape_cast %19 : vector<8xf32> to vector<8x1xf32>
    %21 = math.log %20 : vector<8x1xf32>
    %22 = vector.broadcast %15 : vector<8x1xf32> to vector<8x128xf32>
    %23 = arith.subf %13, %22 : vector<8x128xf32>
    %24 = vector.broadcast %21 : vector<8x1xf32> to vector<8x128xf32>
    %25 = arith.subf %23, %24 : vector<8x128xf32>
    %c0_13 = arith.constant 0 : index
    %c0_14 = arith.constant 0 : index
    %26 = vector.load %arg6[%c0_13, %c0_14] : memref<8x128xf32, #tpu.memory_space<vmem>>, vector<8x128xf32>
    tpu.vector_store %arg6[%c0_13, %c0_14], %25 {strides = array<i32>} : memref<8x128xf32, #tpu.memory_space<vmem>>, vector<8x128xf32>,
    return
  }
  func.func @transform_0(%arg0: i32) -> (i32, i32) {
    %c0_i32 = arith.constant 0 : i32
    %c0_i32_0 = arith.constant 0 : i32
    return %arg0, %c0_i32 : i32, i32
  }
  func.func @transform_1(%arg0: i32) -> (i32, i32) {
    %c0_i32 = arith.constant 0 : i32
    %c0_i32_0 = arith.constant 0 : i32
    %c0_i32_1 = arith.constant 0 : i32
    return %c0_i32, %c0_i32_0 : i32, i32
  }
  func.func @transform_2(%arg0: i32) -> (i32, i32) {
    %c0_i32 = arith.constant 0 : i32
    %c0_i32_0 = arith.constant 0 : i32
    %c0_i32_1 = arith.constant 0 : i32
    return %c0_i32, %c0_i32_0 : i32, i32
  }
  func.func @transform_3(%arg0: i32) -> (i32, i32) {
    %c0_i32 = arith.constant 0 : i32
    %c0_i32_0 = arith.constant 0 : i32
    %c0_i32_1 = arith.constant 0 : i32
    return %c0_i32, %c0_i32_0 : i32, i32
  }
  func.func @transform_4(%arg0: i32) -> (i32, i32) {
    %c0_i32 = arith.constant 0 : i32
    %c0_i32_0 = arith.constant 0 : i32
    %c0_i32_1 = arith.constant 0 : i32
    return %c0_i32, %c0_i32_0 : i32, i32
  }
  func.func @transform_5(%arg0: i32) -> (i32, i32) {
    %c0_i32 = arith.constant 0 : i32
    %c0_i32_0 = arith.constant 0 : i32
    return %arg0, %c0_i32 : i32, i32
  }
}

</mosaic_0001>

<bundles_post_ra>
// kernel: net_forward.2
= control target key start
LH: loop header
LB: loop body
LE: loop exit
PB: predicated region body
PF: predicated region fallthrough
CT: control target
= control target key end

     0   :  { %s13150_s12 = smov 0   ;;  %s15942_s0 = inlined_call_operand.vmem [shape: bf16[8,704,32], index: 0, kind: input, shape index: {}]   ;;  %s15943_s1 = inlined_call_operand.vmem [shape: bf16[9,32,64], index: 1, kind: input, shape index: {}]   ;;  %s15944_s2 = inlined_call_operand.vmem [shape: f32[1,64], index: 2, kind: input, shape index: {}]   ;;  %s15945_s3 = inlined_call_operand.vmem [shape: bf16[8,144,64], index: 3, kind: output, shape index: {}]  }
   0x1 LB: > { %s10041_s13 = sadd.s32 4294967295, %s13128_s12   ;;  %p10045_p0 = scmp.ge.s32.totalorder %s13128_s12, 1  ;;  %s13128_s12 = sphi %s13150_s12, %s13_s12  }
   0x2   : > { %p137_p1 = scmp.lt.s32.totalorder %s13128_s12, 9 }
   0x4   : > { %p138_p2 = pnand %p10045_p0, %p137_p1 }
   0x6   : > { %141 = sbr.rel (%p138_p2) target bundleno = 984 (0x3d8), region = 32 }
   0xd   : > { %v12873_v0 = vld [vmem:[%s15943_s1 + $0x10] sm:$0xff]   ;;  %p161_p3 = scmp.lt.s32.totalorder %s10041_s13, 7  ;;  %v13164_v1 = vld [vmem:[%s15943_s1 + $0x40] sm:$0xff]   ;;  %v12875_v2 = vld [vmem:[%s15943_s1 + $0x18] sm:$0xff]   ;;  %vm241_vm0 = vsmask.f32 7424 }
   0xe   : > { %11319 = vmatprep.subr.bf16.mxu1 %v12873_v0  ;;  %11399 = vmatprep.subr.bf16.mxu0 %v13164_v1  ;;  %v12876_v3 = vld [vmem:[%s15943_s1 + $0x48] sm:$0xff]   ;;  %v12879_v4 = vld [vmem:[%s15943_s1] sm:$0xff]   ;;  %v13188_v5 = vld [vmem:[%s15943_s1 + $0x50] sm:$0xff]   ;;  %vm322_vm1 = vcmask 261120   ;;  %vm985_vm2 = vsmask.f32 6400 }
   0xf   : > { %s15988_s13 = smov (!%p161_p3, %s10041_s13), 7  ;;  %11320 = vmatpush3.bf16.msra.mxu1 %v12873_v0  ;;  %11400 = vmatpush3.bf16.msra.mxu0 %v13164_v1  ;;  %vm1224_vm3 = vcmask 1045504   ;;  %v12889_v55 = vld [vmem:[%s15943_s1 + $0x58] sm:$0xff]   ;;  %v12891_v61 = vld [vmem:[%s15943_s1 + $0x8] sm:$0xff]   ;;  %vm578_vm4 = vcmask 1046528   ;;  %vm1870_vm5 = vcmask 1044480  }
  0x10   : > { %11321 = vmatprep.subr.bf16.mxu1 %v12875_v2  ;;  %s12863_s22 = smul.u32 352, %s15988_s13  ;;  %11401 = vmatprep.subr.bf16.mxu0 %v12876_v3  ;;  %vm1631_vm6 = vsmask.f32 5376  ;;  %vm2037_vm7 = vcmask 523264   ;;  %vm9558_vm8 = vcmask 519168   ;;  %vm9560_vm9 = vcmask 517120  }
  0x11   : > { %s12864_s5 = smul.u32 72, %s15988_s13  ;;  %vm9603_vm10 = vcmask 519170   ;;  %vm9594_vm11 = vcmask 1041408   ;;  %vm9595_vm12 = vcmask 1045508  }
  0x12   : > { %s13183_s27 = scalar_lea.vmem %s15942_s0, %s12863_s22  ;;  %vm14643_vm13 = vmor %vm9594_vm11, %vm9595_vm12 }
  0x13   : > { %11322 = vmatpush3.bf16.msra.mxu1 %v12875_v2  ;;  %v172_v6 = vld [vmem:[%s13183_s27] sm:$0xf]  ;;  %v13192_v7 = vld [vmem:[%s13183_s27 + $0x4] sm:$0xf]  ;;  %11402 = vmatpush3.bf16.msra.mxu0 %v12876_v3  ;;  %v13198_v9 = vld [vmem:[%s13183_s27 + $0x8] sm:$0xff]   ;;  %s14583_s7 = scalar_lea.vmem %s15945_s3, %s12864_s5 }
  0x14   : > { %v13195_v8 = vcombine.low %v172_v6, %v13192_v7  ;;  %11339 = vmatprep.subr.bf16.mxu1 %v12879_v4  ;;  %v745_v10 = vld [vmem:[%s13183_s27 + $0xc] sm:$0xe]  ;;  %v13202_v11 = vld [vmem:[%s13183_s27 + $0x10] sm:$0xf]  ;;  %11419 = vmatprep.subr.bf16.mxu0 %v13188_v5  ;;  %v250_v14 = vshll.u32 %v13198_v9, 16  ;;  %v254_v15 = vshrl.u32 %v13198_v9, 16 }
  0x15   : > { %v13210_v16 = vld [vmem:[%s13183_s27 + $0x14] sm:$0xff]   ;;  %v13216_v18 = vcombine.low %v745_v10, %v13202_v11  ;;  %v13224_v26 = vld [vmem:[%s13183_s27 + $0x1c] sm:$0xff]   ;;  %v13230_v32 = vld [vmem:[%s13183_s27 + $0x24] sm:$0xff]  }
  0x16   : > { %v243_v12 = vshrl.u32 %v13195_v8, 16  ;;  %v245_v13 = vshll.u32 %v13195_v8, 16  ;;  %v13213_v17 = vld [vmem:[%s13183_s27 + $0x10] sm:$0xff]   ;;  %v252_v20 = vrot.slane %v250_v14, 1  ;;  %v995_v21 = vshrl.u32 %v13210_v16, 16  ;;  %v13227_v31 = vld [vmem:[%s13183_s27 + $0x18] sm:$0xff]  }
  0x17   : > { %v998_v22 = vshll.u32 %v13210_v16, 16  ;;  %v987_v23 = vshrl.u32 %v13216_v18, 16  ;;  %v990_v24 = vshll.u32 %v13216_v18, 16  ;;  %v258_v25 = vshll.u32 %v13213_v17, 16  ;;  %v13240_v45 = vld [vmem:[%s13183_s27 + $0x20] sm:$0xff]   ;;  %v13243_v46 = vld [vmem:[%s13183_s27 + $0x2c] sm:$0xff]  }
  0x18   : > { %v247_v19 = vrot.slane %v245_v13, 1  ;;  %v256_v28 = vor.u32 %v254_v15, %v252_v20  ;;  %v997_v29 = vrot.slane %v995_v21, 1  ;;  %v1004_v36 = vshrl.u32 %v13224_v26, 16  ;;  %v13255_v56 = vld [vmem:[%s13183_s27 + $0x28] sm:$0xff]  }
  0x19   : > { %v1000_v30 = vrot.slane %v998_v22, 2  ;;  %v989_v33 = vrot.slane %v987_v23, 1  ;;  %v992_v34 = vrot.slane %v990_v24, 2  ;;  %v260_v35 = vrot.slane %v258_v25, 1  ;;  %v1215_v15 = vld [vmem:[%s13183_s27 + $0xc] sm:$0xc] }
  0x1a   : > { %v248_v27 = vor.u32 %v247_v19, %v243_v12  ;;  %v1007_v39 = vshll.u32 %v13224_v26, 16  ;;  %v262_v40 = vshrl.u32 %v13213_v17, 16  ;;  %v1006_v43 = vrot.slane %v1004_v36, 1  ;;  %v12897_v36 = vld [vmem:[%s15943_s1 + $0x20] sm:$0xff]  }
  0x1b   : > { %v1001_v38 = vor.u32 %v1000_v30, %v997_v29  ;;  %v993_v41 = vor.u32 %v992_v34, %v989_v33  ;;  %v261_v42 = vsel %vm241_vm0, %v256_v28, %v260_v35  ;;  %v266_v44 = vshll.u32 %v13227_v31, 16  ;;  %v13287_v29 = vld [vmem:[%s13183_s27 + $0x38] sm:$0xff]  }
  0x1c   : > { %v253_v37 = vsel %vm241_vm0, %v248_v27, %v252_v20  ;;  %v1009_v47 = vrot.slane %v1007_v39, 2  ;;  %v264_v48 = vor.u32 %v262_v40, %v260_v35  ;;  %v1013_v49 = vshrl.u32 %v13230_v32, 16  ;;  %v13273_v20 = vld [vmem:[%s13183_s27 + $0x30] sm:$0xff]   ;;  %v13300_v39 = vld [vmem:[%s13183_s27 + $0x40] ss:$0 sps:$4 sm:$0x11]  }
  0x1d   : > { %11323 = vmatprep.mubr.msk.bf16.mxu1 %vm322_vm1, %v253_v37  ;;  %v1016_v50 = vshll.u32 %v13230_v32, 16  ;;  %v1002_v51 = vsel %vm985_vm2, %v993_v41, %v1001_v38  ;;  %v268_v52 = vrot.slane %v266_v44, 1  ;;  %v270_v53 = vshrl.u32 %v13227_v31, 16 }
  0x1e   : > { %11324 = vmatmul.mubr.msk.bf16.vlgmr.msra.gmra.mrb[0].mxu1 %vm322_vm1, %v261_v42  ;;  %v274_v54 = vshll.u32 %v13240_v45, 16  ;;  %11403 = vmatprep.mubr.msk.bf16.mxu0 %vm322_vm1, %v1002_v51  ;;  %v1010_v57 = vor.u32 %v1009_v47, %v1006_v43  ;;  %v1015_v58 = vrot.slane %v1013_v49, 1  ;;  %v1022_v60 = vshrl.u32 %v13243_v46, 16 }
  0x1f   : > { %11340 = vmatpush3.bf16.msra.mxu1 %v12879_v4  ;;  %v1018_v59 = vrot.slane %v1016_v50, 2  ;;  %v269_v62 = vsel %vm241_vm0, %v264_v48, %v268_v52  ;;  %v272_v63 = vor.u32 %v270_v53, %v268_v52  ;;  %v1025_v2 = vshll.u32 %v13243_v46, 16 }
  0x20   : > { %v276_v0 = vrot.slane %v274_v54, 1  ;;  %v1011_v3 = vsel %vm985_vm2, %v1001_v38, %v1010_v57  ;;  %11327 = vmatprep.mubr.msk.bf16.mxu1 %vm322_vm1, %v269_v62  ;;  %v1024_v6 = vrot.slane %v1022_v60, 1  ;;  %v278_v10 = vshrl.u32 %v13240_v45, 16  ;;  %11341 = vmatprep.subr.bf16.mxu1 %v12891_v61  ;;  %v13315_v54 = vld [vmem:[%s13183_s27 + $0x34] sm:$0xff]   ;;  %v13335_v62 = vld [vmem:[%s13183_s27 + $0x3c] sm:$0xff]  }
  0x21   : > { %v1019_v4 = vor.u32 %v1018_v59, %v1015_v58  ;;  %11404 = vmatmul.mubr.msk.bf16.vlgmr.msra.gmra.mrb[0].mxu0 %vm322_vm1, %v1011_v3  ;;  %v1027_v13 = vrot.slane %v1025_v2, 2  ;;  %v282_v14 = vshll.u32 %v13255_v56, 16  ;;  %v1226_v19 = vrot.slane %v13210_v16, 2 }
  0x22   : > { %v277_v12 = vsel %vm241_vm0, %v272_v63, %v276_v0  ;;  %11420 = vmatpush3.bf16.msra.mxu0 %v13188_v5  ;;  %v280_v22 = vor.u32 %v278_v10, %v276_v0  ;;  %v10138_v23 = vcombine.low %v1215_v15, %v13202_v11  ;;  %v286_v24 = vshrl.u32 %v13255_v56, 16  ;;  %v12894_v5 = vld [vmem:[%s15943_s1 + $0x60] sm:$0xff]  }
  0x23   : > { %11342 = vmatpush3.bf16.msra.mxu1 %v12891_v61  ;;  %v1020_v21 = vsel %vm985_vm2, %v1010_v57, %v1019_v4  ;;  %v13280_v25 = vor.u32 %v1027_v13, %v1024_v6  ;;  %11421 = vmatprep.subr.bf16.mxu0 %v12889_v55  ;;  %v284_v27 = vrot.slane %v282_v14, 1  ;;  %v290_v28 = vshll.u32 %v13273_v20, 16  ;;  %v12900_v57 = vld [vmem:[%s15943_s1 + $0x68] sm:$0xff]   ;;  %v13329_v61 = vld [vmem:[%s15943_s1 + $0x70] sm:$0xff]  }
  0x24   : > { %11407 = vmatprep.mubr.msk.bf16.mxu0 %vm322_vm1, %v1020_v21  ;;  %v1225_v11 = vrot.slane %v10138_v23, 2  ;;  %v294_v30 = vshrl.u32 %v13273_v20, 16  ;;  %v298_v38 = vshll.u32 %v13287_v29, 16  ;;  %11359 = vmatprep.subr.bf16.mxu1 %v12897_v36  ;;  %v302_v44 = vshrl.u32 %v13287_v29, 16  ;;  %v12903_v13 = vld [vmem:[%s15943_s1 + $0x28] sm:$0xff]  }
  0x25   : > { %v285_v33 = vsel %vm241_vm0, %v280_v22, %v284_v27  ;;  %v288_v34 = vor.u32 %v286_v24, %v284_v27  ;;  %v292_v35 = vrot.slane %v290_v28, 1  ;;  %v1029_v37 = vsel %vm985_vm2, %v1019_v4, %v13280_v25  ;;  %v13342_v4 = vld [vmem:[%s13183_s27 + $0x44] sm:$0xff]   ;;  %v1391_v21 = vld [vmem:[%s13183_s27 + $0x18] sm:$0xc]  ;;  %v1392_v22 = vld [vmem:[%s13183_s27 + $0x1c] sm:$0xf] }
  0x26   : > { %11328 = vmatmul.mubr.msk.bf16.gmra.mrb[4].mxu1 %vm322_vm1, %v277_v12  ;;  %11422 = vmatpush3.bf16.msra.mxu0 %v12889_v55  ;;  %v1227_v40 = vsel %vm1224_vm3, %v1225_v11, %v1226_v19  ;;  %v300_v42 = vrot.slane %v298_v38, 1  ;;  %v306_v47 = vshll.u32 %v13300_v39, 16  ;;  %v1228_v48 = vrot.slane %v13224_v26, 2  ;;  %v13372_v23 = vld [vmem:[%s13183_s27 + $0x4c] ss:$0 sps:$4 sm:$0x33]  }
  0x27   : > { %11331 = vmatprep.mubr.msk.bf16.mxu1 %vm322_vm1, %v285_v33  ;;  %11439 = vmatprep.subr.bf16.mxu0 %v12894_v5  ;;  %v296_v41 = vor.u32 %v294_v30, %v292_v35  ;;  %v293_v43 = vsel %vm241_vm0, %v288_v34, %v292_v35  ;;  %v1230_v50 = vrot.slane %v13230_v32, 2  ;;  %v1232_v59 = vrot.slane %v13243_v46, 2  ;;  %v13377_v28 = vld [vmem:[%s13183_s27 + $0x20] sm:$0xff]  }
  0x28   : > { %v304_v51 = vor.u32 %v302_v44, %v300_v42  ;;  %v308_v52 = vrot.slane %v306_v47, 1  ;;  %v1229_v53 = vsel %vm1224_vm3, %v1226_v19, %v1228_v48  ;;  %v1234_v60 = vrot.slane %v13315_v54, 2 }
  0x29   : > { %11408 = vmatmul.mubr.msk.bf16.gmra.mrb[4].mxu0 %vm322_vm1, %v1029_v37  ;;  %v301_v49 = vsel %vm241_vm0, %v296_v41, %v300_v42  ;;  %v1231_v55 = vsel %vm1224_vm3, %v1228_v48, %v1230_v50  ;;  %v1233_v63 = vsel %vm1224_vm3, %v1230_v50, %v1232_v59  ;;  %v582_v0 = vrot.slane %v13213_v17, 1  ;;  %v13416_v48 = vld [vmem:[%s13183_s27 + $0x30] sm:$0xff]   ;;  %v569_v50 = vld [vmem:[%s13183_s27] sm:$0xe] }
  0x2a   : > { %11423 = vmatprep.mubr.msk.bf16.mxu0 %vm322_vm1, %v1227_v40  ;;  %v309_v58 = vsel %vm241_vm0, %v304_v51, %v308_v52  ;;  %v584_v2 = vrot.slane %v13227_v31, 1  ;;  %v1235_v3 = vsel %vm1224_vm3, %v1232_v59, %v1234_v60  ;;  %v586_v6 = vrot.slane %v13240_v45, 1  ;;  %v1861_v52 = vld [vmem:[%s13183_s27 + $0x18] sm:$0x8] }
  0x2b   : > { %v588_v10 = vrot.slane %v13255_v56, 1  ;;  %v1236_v12 = vrot.slane %v13335_v62, 2  ;;  %v1238_v14 = vrot.slane %v13342_v4, 2  ;;  %v590_v24 = vrot.slane %v13273_v20, 1 }
  0x2c   : > { %v13360_v15 = vsel %vm578_vm4, %v584_v2, %v586_v6  ;;  %v13385_v30 = vcombine.low %v1391_v21, %v1392_v22  ;;  %v592_v34 = vrot.slane %v13287_v29, 1  ;;  %v1240_v37 = vrot.slane %v13372_v23, 2 }
  0x2d   : > { %v13363_v19 = vsel %vm578_vm4, %v586_v6, %v588_v10  ;;  %v1237_v27 = vsel %vm1224_vm3, %v1234_v60, %v1236_v12  ;;  %v1239_v11 = vsel %vm1224_vm3, %v1236_v12, %v1238_v14  ;;  %v13388_v33 = vsel %vm578_vm4, %v588_v10, %v590_v24 }
  0x2e   : > { %11332 = vmatmul.mubr.msk.bf16.gmra.mrb[8].mxu1 %vm322_vm1, %v293_v43  ;;  %v13393_v35 = vsel %vm578_vm4, %v590_v24, %v592_v34  ;;  %v1457_v38 = vrot.slane %v13377_v28, 2  ;;  %v1456_v40 = vrot.slane %v13385_v30, 2  ;;  %v810_v42 = vrot.slane %v13216_v18, 1 }
  0x2f   : > { %11335 = vmatprep.mubr.msk.bf16.mxu1 %vm322_vm1, %v301_v49  ;;  %v811_v43 = vrot.slane %v13210_v16, 1  ;;  %v813_v44 = vrot.slane %v13224_v26, 1  ;;  %v1241_v47 = vsel %vm1224_vm3, %v1238_v14, %v1240_v37  ;;  %v815_v26 = vrot.slane %v13230_v32, 1 }
  0x30   : > { %v1458_v18 = vsel %vm1224_vm3, %v1456_v40, %v1457_v38  ;;  %v817_v51 = vrot.slane %v13243_v46, 1  ;;  %v13448_v46 = vld [vmem:[%s13183_s27 + $0x40] sm:$0xff]   ;;  %v10191_v60 = vcombine.low %v1861_v52, %v1392_v22  ;;  %v1876_v22 = vrot.slane %v13416_v48, 3 }
  0x31   : > { %11424 = vmatmul.mubr.msk.bf16.vlgmr.msra.gmra.mrb[0].mxu0 %vm322_vm1, %v1229_v53  ;;  %v13419_v49 = vsel %vm578_vm4, %v810_v42, %v811_v43  ;;  %v13427_v16 = vsel %vm578_vm4, %v811_v43, %v813_v44  ;;  %v10085_v53 = vcombine.low %v569_v50, %v13192_v7  ;;  %v819_v7 = vrot.slane %v13315_v54, 1 }
  0x32   : > { %11440 = vmatpush3.bf16.msra.mxu0 %v12894_v5  ;;  %11427 = vmatprep.mubr.msk.bf16.mxu0 %vm322_vm1, %v1231_v55  ;;  %v13382_v5 = vld [vmem:[%s15943_s1 + $0x30] sm:$0xff]   ;;  %v13437_v55 = vsel %vm578_vm4, %v813_v44, %v815_v26  ;;  %v13442_v59 = vsel %vm578_vm4, %v815_v26, %v817_v51  ;;  %v1871_v12 = vrot.slane %v10191_v60, 3  ;;  %v1031_v40 = vshrl.u32 %v13315_v54, 16 }
  0x33   : > { %11441 = vmatprep.subr.bf16.mxu0 %v12900_v57  ;;  %v13458_v10 = vsel %vm578_vm4, %v817_v51, %v819_v7  ;;  %v1034_v42 = vshll.u32 %v13315_v54, 16  ;;  %v13496_v44 = vld [vmem:[%s13183_s27 + $0x50] sm:$0xff]   ;;  %v1043_v50 = vshll.u32 %v13335_v62, 16  ;;  %v1052_v60 = vshll.u32 %v13342_v4, 16 }
  0x35   : > { %v1036_v26 = vrot.slane %v1034_v42, 2  ;;  %v12917_v42 = vld [vmem:[%s15943_s1 + $0x38] sm:$0xff]  }
  0x36   : > { %11336 = vmatmul.mubr.msk.bf16.gmra.mrb[12].mxu1 %vm322_vm1, %v309_v58  ;;  %11442 = vmatpush3.bf16.msra.mxu0 %v12900_v57  ;;  %v1461_v57 = vrot.slane %v13416_v48, 2 }
  0x37   : > { %11343 = vmatprep.mubr.msk.bf16.mxu1 %vm322_vm1, %v13195_v8  ;;  %11459 = vmatprep.subr.bf16.mxu0 %v13329_v61  ;;  %v13348_v8 = vsel %vm578_vm4, %v582_v0, %v584_v2  ;;  %v1872_v2 = vrot.slane %v13377_v28, 3 }
  0x39   : > { %11428 = vmatmul.mubr.msk.bf16.gmra.mrb[4].mxu0 %vm322_vm1, %v1233_v63  ;;  %v580_v63 = vrot.slane %v13198_v9, 1 }
  0x3a   : > { %11431 = vmatprep.mubr.msk.bf16.mxu0 %vm322_vm1, %v1235_v3  ;;  %v821_v3 = vrot.slane %v13335_v62, 1 }
  0x3e   : > { %11344 = vmatmul.mubr.msk.bf16.vlgmr.msra.gmra.mrb[0].mxu1 %vm322_vm1, %v13198_v9  ;;  %v12914_v9 = vld [vmem:[%s15943_s1 + $0x78] sm:$0xff]  }
  0x3f   : > { %11360 = vmatpush3.bf16.msra.mxu1 %v12897_v36  ;;  %11347 = vmatprep.mubr.msk.bf16.mxu1 %vm322_vm1, %v13213_v17  ;;  %v594_v36 = vrot.slane %v13300_v39, 1  ;;  %v13408_v39 = vld [vmem:[%s13183_s27 + $0x28] sm:$0xff]   ;;  %v1641_v17 = vshrl.u32 %v13377_v28, 16 }
  0x40   : > { %11361 = vmatprep.subr.bf16.mxu1 %v12903_v13  ;;  %v1874_v6 = vrot.slane %v13408_v39, 3 }
  0x41   : > { %11432 = vmatmul.mubr.msk.bf16.gmra.mrb[8].mxu0 %vm322_vm1, %v1237_v27  ;;  %v13402_v41 = vsel %vm578_vm4, %v592_v34, %v594_v36  ;;  %v1465_v27 = vrot.slane %v13448_v46, 2  ;;  %v13484_v36 = vld [vmem:[%s13183_s27 + $0x48] sm:$0xff]  }
  0x42   : > { %11435 = vmatprep.mubr.msk.bf16.mxu0 %vm322_vm1, %v1239_v11  ;;  %v13469_v21 = vsel %vm1870_vm5, %v1872_v2, %v1874_v6  ;;  %v13475_v11 = vsel %vm1870_vm5, %v1871_v12, %v1872_v2  ;;  %v13487_v37 = vsel %vm1870_vm5, %v1874_v6, %v1876_v22  ;;  %v1882_v51 = vrot.slane %v13484_v36, 3 }
  0x43   : > { %11362 = vmatpush3.bf16.msra.mxu1 %v12903_v13  ;;  %v823_v13 = vrot.slane %v13342_v4, 1  ;;  %v1884_v2 = vrot.slane %v13496_v44, 3  ;;  %v1058_v6 = vshrl.u32 %v13372_v23, 16 }
  0x44   : > { %11379 = vmatprep.subr.bf16.mxu1 %v13382_v5 }
  0x45   : > { %v13480_v34 = vsel %vm578_vm4, %v821_v3, %v823_v13 }
  0x46   : > { %11348 = vmatmul.mubr.msk.bf16.gmra.mrb[4].mxu1 %vm322_vm1, %v13227_v31  ;;  %v13423_v31 = vld [vmem:[%s13183_s27 + $0x38] sm:$0xff]  }
  0x47   : > { %11351 = vmatprep.mubr.msk.bf16.mxu1 %vm322_vm1, %v13240_v45  ;;  %v1459_v45 = vrot.slane %v13408_v39, 2  ;;  %v1463_v58 = vrot.slane %v13423_v31, 2 }
  0x49   : > { %11436 = vmatmul.mubr.msk.bf16.gmra.mrb[12].mxu0 %vm322_vm1, %v1241_v47  ;;  %v1460_v32 = vsel %vm1224_vm3, %v1457_v38, %v1459_v45  ;;  %v1462_v14 = vsel %vm1224_vm3, %v1459_v45, %v1461_v57  ;;  %v1464_v24 = vsel %vm1224_vm3, %v1461_v57, %v1463_v58  ;;  %v1878_v38 = vrot.slane %v13423_v31, 3  ;;  %v13504_v45 = vld [vmem:[%s15943_s1 + $0x80] sm:$0xff]  }
  0x4a   : > { %11443 = vmatprep.mubr.msk.bf16.mxu0 %vm322_vm1, %v1458_v18  ;;  %v1880_v47 = vrot.slane %v13448_v46, 3  ;;  %v1040_v18 = vshrl.u32 %v13335_v62, 16  ;;  %v1049_v57 = vshrl.u32 %v13342_v4, 16  ;;  %v1466_v12 = vsel %vm1224_vm3, %v1463_v58, %v1465_v27  ;;  %v13677_v4 = vld [vmem:[%s15943_s1] sm:$0xff]  }
  0x4b   : > { %v13507_v54 = vsel %vm1870_vm5, %v1876_v22, %v1878_v38  ;;  %v1054_v22 = vrot.slane %v1052_v60, 2  ;;  %v583_v58 = vsel %vm578_vm4, %v580_v63, %v582_v0  ;;  %v1644_v0 = vshll.u32 %v13377_v28, 16 }
  0x4c   : > { %v13513_v52 = vsel %vm1870_vm5, %v1878_v38, %v1880_v47  ;;  %v1042_v62 = vrot.slane %v1040_v18, 1  ;;  %v1633_v18 = vshrl.u32 %v13385_v30, 16 }
  0x4e   : > { %11352 = vmatmul.mubr.msk.bf16.gmra.mrb[8].mxu1 %vm322_vm1, %v13255_v56  ;;  %v579_v56 = vrot.slane %v10085_v53, 1  ;;  %v1045_v53 = vrot.slane %v1043_v50, 2  ;;  %v1635_v28 = vrot.slane %v1633_v18, 2 }
  0x4f   : > { %11355 = vmatprep.mubr.msk.bf16.mxu1 %vm322_vm1, %v13273_v20  ;;  %v13466_v20 = vsel %vm578_vm4, %v819_v7, %v821_v3  ;;  %v13518_v7 = vsel %vm1870_vm5, %v1880_v47, %v1882_v51  ;;  %v1469_v47 = vrot.slane %v13496_v44, 2 }
  0x50   : > { %v581_v43 = vsel %vm578_vm4, %v579_v56, %v580_v63  ;;  %v1046_v3 = vor.u32 %v1045_v53, %v1042_v62  ;;  %v1061_v56 = vshll.u32 %v13372_v23, 16  ;;  %v1060_v23 = vrot.slane %v1058_v6, 1 }
  0x51   : > { %11444 = vmatmul.mubr.msk.bf16.vlgmr.msra.gmra.mrb[0].mxu0 %vm322_vm1, %v1460_v32  ;;  %v1643_v53 = vrot.slane %v1641_v17, 2  ;;  %v1695_v17 = vshrl.u32 %v13496_v44, 16 }
  0x52   : > { %11460 = vmatpush3.bf16.msra.mxu0 %v13329_v61  ;;  %11447 = vmatprep.mubr.msk.bf16.mxu0 %vm322_vm1, %v1462_v14  ;;  %v1033_v61 = vrot.slane %v1031_v40, 1  ;;  %v1063_v40 = vrot.slane %v1061_v56, 2 }
  0x53   : > { %11461 = vmatprep.subr.bf16.mxu0 %v12914_v9 }
  0x54   : > { %v1037_v32 = vor.u32 %v1036_v26, %v1033_v61  ;;  %v1064_v50 = vor.u32 %v1063_v40, %v1060_v23  ;;  %v12916_v26 = vld [vmem:[%s13183_s27 + $0x58] ss:$0 sps:$4 sm:$0x33]  }
  0x56   : > { %11356 = vmatmul.mubr.msk.bf16.gmra.mrb[12].mxu1 %vm322_vm1, %v13287_v29  ;;  %11462 = vmatpush3.bf16.msra.mxu0 %v12914_v9  ;;  %v1051_v29 = vrot.slane %v1049_v57, 1  ;;  %v13530_v14 = vsel %vm985_vm2, %v13280_v25, %v1037_v32  ;;  %v13535_v9 = vsel %vm1870_vm5, %v1882_v51, %v1884_v2  ;;  %v13538_v38 = vsel %vm985_vm2, %v1037_v32, %v1046_v3 }
  0x57   : > { %11363 = vmatprep.mubr.msk.bf16.mxu1 %vm322_vm1, %v581_v43  ;;  %11479 = vmatprep.subr.bf16.mxu0 %v13504_v45  ;;  %v1467_v25 = vrot.slane %v13484_v36, 2  ;;  %v1646_v57 = vrot.slane %v1644_v0, 3  ;;  %v1653_v32 = vshll.u32 %v13408_v39, 16  ;;  %v12922_v0 = vld [vmem:[%s15943_s1 + $0x10] sm:$0xff]  }
  0x58   : > { %v1055_v43 = vor.u32 %v1054_v22, %v1051_v29  ;;  %v1662_v29 = vshll.u32 %v13416_v48, 16 }
  0x59   : > { %11448 = vmatmul.mubr.msk.bf16.gmra.mrb[4].mxu0 %vm322_vm1, %v1464_v24  ;;  %v1636_v24 = vshll.u32 %v13385_v30, 16  ;;  %v1468_v30 = vsel %vm1224_vm3, %v1465_v27, %v1467_v25  ;;  %v1470_v51 = vsel %vm1224_vm3, %v1467_v25, %v1469_v47  ;;  %v1647_v60 = vor.u32 %v1646_v57, %v1643_v53 }
  0x5a   : > { %11451 = vmatprep.mubr.msk.bf16.mxu0 %vm322_vm1, %v1466_v12  ;;  %v13555_v63 = vsel %vm985_vm2, %v1046_v3, %v1055_v43  ;;  %v13559_v61 = vsel %vm985_vm2, %v1055_v43, %v1064_v50  ;;  %v1659_v3 = vshrl.u32 %v13416_v48, 16  ;;  %v1664_v22 = vrot.slane %v1662_v29, 3  ;;  %v12919_v43 = vld [vmem:[%s15943_s1 + $0x88] sm:$0xff]  }
  0x5b   : > { %v1638_v62 = vrot.slane %v1636_v24, 3  ;;  %v1668_v48 = vshrl.u32 %v13423_v31, 16  ;;  %v1686_v50 = vshrl.u32 %v13484_v36, 16 }
  0x5d   : > { %v1639_v27 = vor.u32 %v1638_v62, %v1635_v28 }
  0x5e   : > { %11364 = vmatmul.mubr.msk.bf16.vlgmr.msra.gmra.mrb[0].mxu1 %vm322_vm1, %v583_v58  ;;  %v1680_v58 = vshll.u32 %v13448_v46, 16 }
  0x5f   : > { %11380 = vmatpush3.bf16.msra.mxu1 %v13382_v5  ;;  %11367 = vmatprep.mubr.msk.bf16.mxu1 %vm322_vm1, %v13348_v8  ;;  %v1650_v5 = vshrl.u32 %v13408_v39, 16  ;;  %v1471_v8 = vrot.slane %v12916_v26, 2  ;;  %v1655_v39 = vrot.slane %v1653_v32, 3  ;;  %v1648_v12 = vsel %vm1631_vm6, %v1639_v27, %v1647_v60 }
  0x60   : > { %11381 = vmatprep.subr.bf16.mxu1 %v12917_v42  ;;  %v1682_v24 = vrot.slane %v1680_v58, 3  ;;  %v1688_v26 = vrot.slane %v1686_v50, 2  ;;  %v13717_v50 = vld [vmem:[%s13183_s27 + $0x90] sm:$0xff]  }
  0x61   : > { %11452 = vmatmul.mubr.msk.bf16.gmra.mrb[8].mxu0 %vm322_vm1, %v1468_v30  ;;  %v1652_v6 = vrot.slane %v1650_v5, 2  ;;  %v1472_v56 = vsel %vm1224_vm3, %v1469_v47, %v1471_v8  ;;  %v13597_v47 = vld [vmem:[%s13183_s27 + $0x58] ss:$0 sps:$4 sm:$0x77]  }
  0x62   : > { %11455 = vmatprep.mubr.msk.bf16.mxu0 %vm322_vm1, %v1470_v51  ;;  %v1697_v51 = vrot.slane %v1695_v17, 2  ;;  %v1704_v62 = vshrl.u32 %v13597_v47, 16  ;;  %v1707_v57 = vshll.u32 %v13597_v47, 16  ;;  %v13729_v17 = vld [vmem:[%s13183_s27 + $0x98] sm:$0xff]  }
  0x63   : > { %11382 = vmatpush3.bf16.msra.mxu1 %v12917_v42  ;;  %v1656_v23 = vor.u32 %v1655_v39, %v1652_v6  ;;  %v1670_v42 = vrot.slane %v1668_v48, 2  ;;  %v12923_v39 = vld [vmem:[%s13183_s27 + $0x4c] ss:$0 sps:$4 sm:$0x11]   ;;  %v13691_v48 = vld [vmem:[%s13183_s27 + $0x50] sm:$0xff]  }
  0x64   : > { %12219 = vmatprep.subr.bf16.mxu1 %v13164_v1  ;;  %v1661_v1 = vrot.slane %v1659_v3, 2  ;;  %v1709_v27 = vrot.slane %v1707_v57, 3  ;;  %v4012_v57 = vshll.u32 %v13729_v17, 16 }
  0x65   : > { %v1657_v25 = vsel %vm1631_vm6, %v1647_v60, %v1656_v23  ;;  %v13119_v60 = vld [vmem:[%s15943_s1 + $0x40] sm:$0xff]  }
  0x66   : > { %11368 = vmatmul.mubr.msk.bf16.gmra.mrb[4].mxu1 %vm322_vm1, %v13360_v15  ;;  %v1671_v15 = vshll.u32 %v13423_v31, 16  ;;  %v1665_v40 = vor.u32 %v1664_v22, %v1661_v1  ;;  %v3920_v1 = vld [vmem:[%s13183_s27 + $0x80] sm:$0xf]  ;;  %v13672_v22 = vld [vmem:[%s13183_s27 + $0x84] sm:$0xf] }
  0x67   : > { %11371 = vmatprep.mubr.msk.bf16.mxu1 %vm322_vm1, %v13363_v19  ;;  %v1677_v19 = vshrl.u32 %v13448_v46, 16  ;;  %v1689_v46 = vshll.u32 %v13484_v36, 16 }
  0x68   : > { %v1673_v31 = vrot.slane %v1671_v15, 3 }
  0x69   : > { %11456 = vmatmul.mubr.msk.bf16.gmra.mrb[12].mxu0 %vm322_vm1, %v1472_v56  ;;  %v1679_v18 = vrot.slane %v1677_v19, 2  ;;  %v1691_v36 = vrot.slane %v1689_v46, 3  ;;  %v2054_v56 = vld [vmem:[%s13183_s27 + $0x40] sm:$0xf]  ;;  %v13701_v19 = vld [vmem:[%s13183_s27 + $0x58] sm:$0xff]  }
  0x6a   : > { %11463 = vmatprep.mubr.msk.bf16.mxu0 %vm322_vm1, %v1648_v12  ;;  %v1674_v30 = vor.u32 %v1673_v31, %v1670_v42  ;;  %v13655_v12 = vld [vmem:[%s13183_s27 + $0x44] sm:$0xf]  ;;  %v2138_v31 = vshll.u32 %v13691_v48, 16 }
  0x6b   : > { %v1683_v28 = vor.u32 %v1682_v24, %v1679_v18  ;;  %v1692_v32 = vor.u32 %v1691_v36, %v1688_v26  ;;  %v2142_v24 = vshrl.u32 %v13691_v48, 16  ;;  %v4008_v36 = vshrl.u32 %v13717_v50, 16 }
  0x6c   : > { %v2140_v26 = vrot.slane %v2138_v31, 1  ;;  %v13792_v31 = vld [vmem:[%s13183_s27 + $0xb0] sm:$0xff]  }
  0x6d   : > { %v1684_v5 = vsel %vm1631_vm6, %v1674_v30, %v1683_v28  ;;  %v1693_v3 = vsel %vm1631_vm6, %v1683_v28, %v1692_v32  ;;  %v13740_v28 = vld [vmem:[%s13183_s27 + $0x68] sm:$0xff]  }
  0x6e   : > { %11372 = vmatmul.mubr.msk.bf16.gmra.mrb[8].mxu1 %vm322_vm1, %v13388_v33  ;;  %v1666_v33 = vsel %vm1631_vm6, %v1656_v23, %v1665_v40  ;;  %v13688_v23 = vcombine.low %v3920_v1, %v13672_v22 }
  0x6f   : > { %11375 = vmatprep.mubr.msk.bf16.mxu1 %vm322_vm1, %v13393_v35  ;;  %v1698_v35 = vshll.u32 %v13496_v44, 16  ;;  %v13753_v44 = vld [vmem:[%s13183_s27 + $0xa0] sm:$0xff]  }
  0x70   : > { %v3991_v58 = vshll.u32 %v13688_v23, 16 }
  0x71   : > { %11464 = vmatmul.mubr.msk.bf16.vlgmr.msra.gmra.mrb[0].mxu0 %vm322_vm1, %v1657_v25  ;;  %v1700_v53 = vrot.slane %v1698_v35, 3  ;;  %v13732_v35 = vld [vmem:[%s13183_s27 + $0x60] sm:$0xff]  }
  0x72   : > { %11480 = vmatpush3.bf16.msra.mxu0 %v13504_v45  ;;  %11467 = vmatprep.mubr.msk.bf16.mxu0 %vm322_vm1, %v1666_v33  ;;  %v1675_v45 = vsel %vm1631_vm6, %v1665_v40, %v1674_v30  ;;  %v3993_v18 = vrot.slane %v3991_v58, 1  ;;  %v1886_v33 = vrot.slane %v13597_v47, 3  ;;  %v13785_v58 = vld [vmem:[%s15943_s1 + $0x20] sm:$0xff]  }
  0x73   : > { %11481 = vmatprep.subr.bf16.mxu0 %v12919_v43  ;;  %v1701_v8 = vor.u32 %v1700_v53, %v1697_v51  ;;  %v2144_v53 = vor.u32 %v2142_v24, %v2140_v26  ;;  %v13800_v24 = vld [vmem:[%s13183_s27 + $0xb8] sm:$0xff]  }
  0x75   : > { %v1702_v29 = vsel %vm1631_vm6, %v1692_v32, %v1701_v8 }
  0x76   : > { %11376 = vmatmul.mubr.msk.bf16.gmra.mrb[12].mxu1 %vm322_vm1, %v13402_v41  ;;  %11482 = vmatpush3.bf16.msra.mxu0 %v12919_v43  ;;  %v1706_v41 = vrot.slane %v1704_v62, 2  ;;  %v3989_v43 = vshrl.u32 %v13688_v23, 16  ;;  %v1887_v62 = vsel %vm1870_vm5, %v1884_v2, %v1886_v33 }
  0x77   : > { %11383 = vmatprep.mubr.msk.bf16.mxu1 %vm322_vm1, %v13419_v49  ;;  %11679 = vmatprep.subr.bf16.mxu0 %v12922_v0  ;;  %v12924_v49 = vld [vmem:[%s15943_s1 + $0x10] sm:$0xff]  }
  0x78   : > { %v1710_v6 = vor.u32 %v1709_v27, %v1706_v41  ;;  %v2158_v27 = vshrl.u32 %v13732_v35, 16 }
  0x79   : > { %11468 = vmatmul.mubr.msk.bf16.gmra.mrb[4].mxu0 %vm322_vm1, %v1675_v45 }
  0x7a   : > { %11471 = vmatprep.mubr.msk.bf16.mxu0 %vm322_vm1, %v1684_v5 }
  0x7e   : > { %11384 = vmatmul.mubr.msk.bf16.vlgmr.msra.gmra.mrb[0].mxu1 %vm322_vm1, %v13427_v16  ;;  %v13120_v16 = vld [vmem:[%s15943_s1 + $0x48] sm:$0xff]  }
  0x7f   : > { %12221 = vmatpush3.bf16.msra.mxu1 %v13119_v60  ;;  %11387 = vmatprep.mubr.msk.bf16.mxu1 %vm322_vm1, %v13437_v55  ;;  %v1711_v55 = vsel %vm1631_vm6, %v1701_v8, %v1710_v6  ;;  %v2150_v8 = vshrl.u32 %v13701_v19, 16  ;;  %v12940_v60 = vld [vmem:[%s15943_s1 + $0x8] sm:$0xff]  }
  0x80   : > { %12220 = vmatprep.subr.bf16.mxu1 %v13120_v16 }
  0x81   : > { %11472 = vmatmul.mubr.msk.bf16.gmra.mrb[8].mxu0 %vm322_vm1, %v1693_v3 }
  0x82   : > { %11475 = vmatprep.mubr.msk.bf16.mxu0 %vm322_vm1, %v1702_v29  ;;  %v13763_v29 = vld [vmem:[%s13183_s27 + $0xa8] sm:$0xff]  }
  0x83   : > { %12222 = vmatpush3.bf16.msra.mxu1 %v13120_v16  ;;  %v4014_v16 = vrot.slane %v4012_v57, 1  ;;  %v4044_v57 = vshll.u32 %v13800_v24, 16 }
  0x84   : > { %11499 = vmatprep.subr.bf16.mxu1 %v12924_v49 }
  0x86   : > { %11388 = vmatmul.mubr.msk.bf16.gmra.mrb[4].mxu1 %vm322_vm1, %v13442_v59  ;;  %v825_v59 = vrot.slane %v12923_v39, 1  ;;  %v13770_v39 = vld [vmem:[%s13183_s27 + $0x78] sm:$0xff]  }
  0x87   : > { %11391 = vmatprep.mubr.msk.bf16.mxu1 %vm322_vm1, %v13458_v10  ;;  %v12925_v10 = vld [vmem:[%s15943_s1 + $0x18] sm:$0xff]  }
  0x89   : > { %11476 = vmatmul.mubr.msk.bf16.gmra.mrb[12].mxu0 %vm322_vm1, %v1711_v55  ;;  %v13767_v55 = vld [vmem:[%s13183_s27 + $0x70] sm:$0xff]  }
  0x8a   : > { %11483 = vmatprep.mubr.msk.bf16.mxu0 %vm322_vm1, %v13475_v11  ;;  %v826_v11 = vsel %vm578_vm4, %v823_v13, %v825_v59  ;;  %v13683_v13 = vld [vmem:[%s13183_s27 + $0x88] sm:$0xff]  }
  0x8b   : > { %v3996_v42 = vshll.u32 %v13683_v13, 16  ;;  %v4000_v30 = vshrl.u32 %v13683_v13, 16 }
  0x8e   : > { %11392 = vmatmul.mubr.msk.bf16.gmra.mrb[8].mxu1 %vm322_vm1, %v13466_v20  ;;  %v13663_v20 = vld [vmem:[%s13183_s27 + $0x48] sm:$0xff]  }
  0x8f   : > { %11395 = vmatprep.mubr.msk.bf16.mxu1 %vm322_vm1, %v13480_v34  ;;  %v13668_v34 = vcombine.low %v2054_v56, %v13655_v12  ;;  %v2134_v46 = vshrl.u32 %v13663_v20, 16  ;;  %v4020_v56 = vshll.u32 %v13753_v44, 16 }
  0x91   : > { %11484 = vmatmul.mubr.msk.bf16.vlgmr.msra.gmra.mrb[0].mxu0 %vm322_vm1, %v13469_v21  ;;  %v2125_v21 = vshll.u32 %v13668_v34, 16  ;;  %v2123_v15 = vshrl.u32 %v13668_v34, 16 }
  0x92   : > { %11680 = vmatpush3.bf16.msra.mxu0 %v12922_v0  ;;  %11487 = vmatprep.mubr.msk.bf16.mxu0 %vm322_vm1, %v13487_v37  ;;  %v2130_v37 = vshll.u32 %v13663_v20, 16  ;;  %v3994_v0 = vor.u32 %v3993_v18, %v3989_v43  ;;  %v2166_v43 = vshrl.u32 %v13740_v28, 16 }
  0x93   : > { %11681 = vmatprep.subr.bf16.mxu0 %v12925_v10  ;;  %v2127_v40 = vrot.slane %v2125_v21, 1 }
  0x94   : > { %v2132_v25 = vrot.slane %v2130_v37, 1 }
  0x96   : > { %11396 = vmatmul.mubr.msk.bf16.gmra.mrb[12].mxu1 %vm322_vm1, %v826_v11  ;;  %11682 = vmatpush3.bf16.msra.mxu0 %v12925_v10  ;;  %v2136_v51 = vor.u32 %v2134_v46, %v2132_v25  ;;  %v4016_v10 = vshrl.u32 %v13729_v17, 16  ;;  %v12944_v11 = vld [vmem:[%s15943_s1 + $0x8] sm:$0xff]   ;;  %v2174_v46 = vshrl.u32 %v13767_v55, 16 }
  0x97   : > { %11411 = vmatprep.mubr.msk.bf16.mxu1 %vm322_vm1, %v13530_v14  ;;  %11699 = vmatprep.subr.bf16.mxu0 %v13677_v4  ;;  %v12926_v14 = vld [vmem:[%s15943_s1 + $0x18] sm:$0xff]  }
  0x98   : > { %v2141_v5 = vsel %vm241_vm0, %v2136_v51, %v2140_v26  ;;  %v4018_v18 = vor.u32 %v4016_v10, %v4014_v16 }
  0x99   : > { %11488 = vmatmul.mubr.msk.bf16.gmra.mrb[4].mxu0 %vm322_vm1, %v13507_v54  ;;  %v12929_v54 = vld [vmem:[%s15943_s1] sm:$0xff]  }
  0x9a   : > { %11491 = vmatprep.mubr.msk.bf16.mxu0 %vm322_vm1, %v13513_v52  ;;  %v2128_v52 = vor.u32 %v2127_v40, %v2123_v15  ;;  %v4028_v40 = vshll.u32 %v13763_v29, 16 }
  0x9e   : > { %11412 = vmatmul.mubr.msk.bf16.vlgmr.msra.gmra.mrb[8].mxu1 %vm322_vm1, %v13538_v38  ;;  %v2146_v38 = vshll.u32 %v13701_v19, 16 }
  0x9f   : > { %11500 = vmatpush3.bf16.msra.mxu1 %v12924_v49  ;;  %11415 = vmatprep.mubr.msk.bf16.mxu1 %vm322_vm1, %v13555_v63  ;;  %v2133_v63 = vsel %vm241_vm0, %v2128_v52, %v2132_v25  ;;  %v2162_v49 = vshll.u32 %v13740_v28, 16  ;;  %v2170_v25 = vshll.u32 %v13767_v55, 16  ;;  %v2178_v52 = vshll.u32 %v13770_v39, 16 }
  0xa0   : > { %11501 = vmatprep.subr.bf16.mxu1 %v12926_v14  ;;  %v2148_v47 = vrot.slane %v2146_v38, 1 }
  0xa1   : > { %11492 = vmatmul.mubr.msk.bf16.gmra.mrb[8].mxu0 %vm322_vm1, %v13518_v7  ;;  %v3998_v7 = vrot.slane %v3996_v42, 1  ;;  %v2164_v37 = vrot.slane %v2162_v49, 1  ;;  %v4046_v49 = vrot.slane %v4044_v57, 1  ;;  %v13901_v57 = vld [vmem:[%s13183_s27 + $0x6c] sm:$0xff]  }
  0xa2   : > { %11495 = vmatprep.mubr.msk.bf16.mxu0 %vm322_vm1, %v13535_v9  ;;  %v4004_v9 = vshll.u32 %v13717_v50, 16  ;;  %v2149_v41 = vsel %vm241_vm0, %v2144_v53, %v2148_v47  ;;  %v2152_v59 = vor.u32 %v2150_v8, %v2148_v47  ;;  %v2180_v47 = vrot.slane %v2178_v52, 1  ;;  %v3089_v52 = vld [vmem:[%s13183_s27 + $0x4c] sm:$0xc] }
  0xa3   : > { %11502 = vmatpush3.bf16.msra.mxu1 %v12926_v14  ;;  %v3999_v45 = vsel %vm241_vm0, %v3994_v0, %v3998_v7  ;;  %v4002_v2 = vor.u32 %v4000_v30, %v3998_v7  ;;  %v4024_v14 = vshrl.u32 %v13753_v44, 16  ;;  %v13803_v0 = vld [vmem:[%s13183_s27 + $0x80] ss:$0 sps:$4 sm:$0x11]   ;;  %v2172_v7 = vrot.slane %v2170_v25, 1 }
  0xa4   : > { %11519 = vmatprep.subr.bf16.mxu1 %v12929_v54  ;;  %v4006_v32 = vrot.slane %v4004_v9, 1  ;;  %v4032_v30 = vshrl.u32 %v13763_v29, 16  ;;  %v2168_v26 = vor.u32 %v2166_v43, %v2164_v37  ;;  %v4036_v9 = vshll.u32 %v13792_v31, 16  ;;  %v13853_v25 = vld [vmem:[%s13183_s27 + $0x90] sm:$0xf] }
  0xa5   : > { %v2176_v51 = vor.u32 %v2174_v46, %v2172_v7  ;;  %v4040_v53 = vshrl.u32 %v13792_v31, 16  ;;  %v2186_v8 = vshll.u32 %v13803_v0, 16  ;;  %v2448_v43 = vld [vmem:[%s13183_s27 + $0x40] sm:$0xe] }
  0xa6   : > { %11416 = vmatmul.mubr.msk.bf16.gmra.mrb[12].mxu1 %vm322_vm1, %v13559_v61  ;;  %v2154_v61 = vshll.u32 %v13732_v35, 16  ;;  %v4010_v3 = vor.u32 %v4008_v36, %v4006_v32  ;;  %v4007_v1 = vsel %vm241_vm0, %v4002_v2, %v4006_v32  ;;  %v2182_v32 = vshrl.u32 %v13770_v39, 16 }
  0xa7   : > { %11503 = vmatprep.mubr.msk.bf16.mxu1 %vm322_vm1, %v2133_v63  ;;  %v4030_v63 = vrot.slane %v4028_v40, 1  ;;  %v13850_v40 = vld [vmem:[%s13183_s27 + $0x50] sm:$0xf] }
  0xa8   : > { %v2156_v6 = vrot.slane %v2154_v61, 1  ;;  %v4015_v15 = vsel %vm241_vm0, %v4010_v3, %v4014_v16  ;;  %v13820_v61 = vld [vmem:[%s13183_s27 + $0xc0] ss:$0 sps:$4 sm:$0x11]   ;;  %v2184_v3 = vor.u32 %v2182_v32, %v2180_v47  ;;  %v2188_v16 = vrot.slane %v2186_v8, 1  ;;  %v13917_v8 = vld [vmem:[%s15943_s1 + $0x30] sm:$0xff]  }
  0xa9   : > { %11496 = vmatmul.mubr.msk.bf16.gmra.mrb[12].mxu0 %vm322_vm1, %v1887_v62  ;;  %v4034_v2 = vor.u32 %v4032_v30, %v4030_v63  ;;  %v10292_v46 = vcombine.low %v3089_v52, %v13850_v40 }
  0xaa   : > { %11683 = vmatprep.mubr.msk.bf16.mxu0 %vm322_vm1, %v3999_v45  ;;  %v2160_v21 = vor.u32 %v2158_v27, %v2156_v6  ;;  %v2157_v42 = vsel %vm241_vm0, %v2152_v59, %v2156_v6  ;;  %v2173_v45 = vsel %vm241_vm0, %v2168_v26, %v2172_v7  ;;  %v4052_v6 = vshll.u32 %v13820_v61, 16 }
  0xab   : > { %v3097_v30 = vrot.slane %v10292_v46, 2 }
  0xac   : > { %v2165_v38 = vsel %vm241_vm0, %v2160_v21, %v2164_v37  ;;  %v13842_v21 = vld [vmem:[%s13183_s27 + $0x54] sm:$0xff]  }
  0xae   : > { %11504 = vmatmul.mubr.msk.bf16.vlgmr.msra.gmra.mrb[16].mxu1 %vm322_vm1, %v2141_v5  ;;  %v4038_v5 = vrot.slane %v4036_v9, 1 }
  0xaf   : > { %11520 = vmatpush3.bf16.msra.mxu1 %v12929_v54  ;;  %11507 = vmatprep.mubr.msk.bf16.mxu1 %vm322_vm1, %v2149_v41  ;;  %v4022_v54 = vrot.slane %v4020_v56, 1  ;;  %v2181_v41 = vsel %vm241_vm0, %v2176_v51, %v2180_v47  ;;  %v2189_v56 = vsel %vm241_vm0, %v2184_v3, %v2188_v16  ;;  %v10239_v47 = vcombine.low %v2448_v43, %v13655_v12 }
  0xb0   : > { %11521 = vmatprep.subr.bf16.mxu1 %v12940_v60  ;;  %v4042_v27 = vor.u32 %v4040_v53, %v4038_v5  ;;  %v4039_v59 = vsel %vm241_vm0, %v4034_v2, %v4038_v5  ;;  %v4323_v51 = vrot.slane %v13683_v13, 1  ;;  %v13898_v53 = vld [vmem:[%s13183_s27 + $0xa4] sm:$0xff]   ;;  %v13923_v2 = vld [vmem:[%s13183_s27 + $0xac] sm:$0xff]  }
  0xb1   : > { %11684 = vmatmul.mubr.msk.bf16.vlgmr.msra.gmra.mrb[16].mxu0 %vm322_vm1, %v4007_v1  ;;  %v4026_v33 = vor.u32 %v4024_v14, %v4022_v54  ;;  %v4023_v36 = vsel %vm241_vm0, %v4018_v18, %v4022_v54  ;;  %v4054_v1 = vrot.slane %v4052_v6, 1  ;;  %v13846_v14 = vld [vmem:[%s13183_s27 + $0x94] sm:$0xff]   ;;  %v12951_v54 = vld [vmem:[%s15943_s1 + $0x28] sm:$0xff]   ;;  %v3098_v18 = vrot.slane %v13842_v21, 2 }
  0xb2   : > { %11700 = vmatpush3.bf16.msra.mxu0 %v13677_v4  ;;  %11687 = vmatprep.mubr.msk.bf16.mxu0 %vm322_vm1, %v4015_v15  ;;  %v13809_v4 = vld [vmem:[%s15943_s1 + $0x20] sm:$0xff]   ;;  %v4047_v10 = vsel %vm241_vm0, %v4042_v27, %v4046_v49  ;;  %v2457_v15 = vrot.slane %v13663_v20, 1  ;;  %v2456_v32 = vrot.slane %v10239_v47, 1  ;;  %v4968_v27 = vrot.slane %v13898_v53, 2  ;;  %v13944_v6 = vld [vmem:[%s13183_s27 + $0x74] sm:$0xff]  }
  0xb3   : > { %11522 = vmatpush3.bf16.msra.mxu1 %v12940_v60  ;;  %11701 = vmatprep.subr.bf16.mxu0 %v12944_v11  ;;  %v4031_v62 = vsel %vm241_vm0, %v4026_v33, %v4030_v63  ;;  %v4048_v60 = vshrl.u32 %v13800_v24, 16  ;;  %v4964_v63 = vrot.slane %v13846_v14, 2  ;;  %v4970_v16 = vrot.slane %v13923_v2, 2 }
  0xb4   : > { %11539 = vmatprep.subr.bf16.mxu1 %v13785_v58  ;;  %v4325_v47 = vrot.slane %v13717_v50, 1 }
  0xb6   : > { %11508 = vmatmul.mubr.msk.bf16.gmra.mrb[20].mxu1 %vm322_vm1, %v2157_v42  ;;  %11702 = vmatpush3.bf16.msra.mxu0 %v12944_v11  ;;  %v4050_v11 = vor.u32 %v4048_v60, %v4046_v49  ;;  %v13856_v42 = vld [vmem:[%s13183_s27 + $0x5c] sm:$0xff]   ;;  %v3104_v49 = vrot.slane %v13901_v57, 2 }
  0xb7   : > { %11511 = vmatprep.mubr.msk.bf16.mxu1 %vm322_vm1, %v2165_v38  ;;  %11719 = vmatprep.subr.bf16.mxu0 %v13809_v4  ;;  %v4955_v38 = vld [vmem:[%s13183_s27 + $0x8c] sm:$0xc]  ;;  %v3100_v7 = vrot.slane %v13856_v42, 2 }
  0xb8   : > { %v4055_v37 = vsel %vm241_vm0, %v4050_v11, %v4054_v1  ;;  %v10446_v33 = vcombine.low %v4955_v38, %v13853_v25  ;;  %v4314_v11 = vld [vmem:[%s13183_s27 + $0x80] sm:$0xe] }
  0xb9   : > { %11688 = vmatmul.mubr.msk.bf16.gmra.mrb[20].mxu0 %vm322_vm1, %v4023_v36  ;;  %v13878_v9 = vsel %vm1224_vm3, %v3098_v18, %v3100_v7  ;;  %v13890_v36 = vld [vmem:[%s15943_s1 + $0x30] sm:$0xff]   ;;  %v13962_v1 = vld [vmem:[%s13183_s27 + $0xbc] sm:$0xff]  }
  0xba   : > { %11691 = vmatprep.mubr.msk.bf16.mxu0 %vm322_vm1, %v4031_v62  ;;  %v4963_v26 = vrot.slane %v10446_v33, 2  ;;  %v4974_v46 = vrot.slane %v13962_v1, 2  ;;  %v10393_v33 = vcombine.low %v4314_v11, %v13672_v22  ;;  %v2459_v22 = vrot.slane %v13691_v48, 1 }
  0xbb   : > { %v2463_v11 = vrot.slane %v13732_v35, 1 }
  0xbc   : > { %v13907_v12 = vsel %vm1224_vm3, %v4963_v26, %v4964_v63  ;;  %v13991_v26 = vld [vmem:[%s13183_s27 + $0xc4] sm:$0xff]  }
  0xbe   : > { %11512 = vmatmul.mubr.msk.bf16.gmra.mrb[24].mxu1 %vm322_vm1, %v2173_v45  ;;  %v13904_v45 = vsel %vm1224_vm3, %v3097_v30, %v3098_v18  ;;  %v13988_v30 = vld [vmem:[%s13183_s27 + $0x84] sm:$0xff]  }
  0xbf   : > { %11515 = vmatprep.mubr.msk.bf16.mxu1 %vm322_vm1, %v2181_v41 }
  0xc1   : > { %11692 = vmatmul.mubr.msk.bf16.gmra.mrb[24].mxu0 %vm322_vm1, %v4039_v59  ;;  %v13947_v59 = vld [vmem:[%s13183_s27 + $0xb4] sm:$0xff]  }
  0xc2   : > { %11695 = vmatprep.mubr.msk.bf16.mxu0 %vm322_vm1, %v4047_v10  ;;  %v13950_v10 = vld [vmem:[%s13183_s27 + $0x7c] sm:$0xff]  }
  0xc3   : > { %v3108_v43 = vrot.slane %v13950_v10, 2 }
  0xc6   : > { %11516 = vmatmul.mubr.msk.bf16.gmra.mrb[28].mxu1 %vm322_vm1, %v2189_v56  ;;  %v13953_v56 = vsel %vm1224_vm3, %v4968_v27, %v4970_v16 }
  0xc7   : > { %11523 = vmatprep.mubr.msk.bf16.mxu1 %vm322_vm1, %v13668_v34  ;;  %v13864_v34 = vld [vmem:[%s13183_s27 + $0x9c] sm:$0xff]  }
  0xc8   : > { %v4966_v62 = vrot.slane %v13864_v34, 2 }
  0xc9   : > { %11696 = vmatmul.mubr.msk.bf16.gmra.mrb[28].mxu0 %vm322_vm1, %v4055_v37  ;;  %v3106_v37 = vrot.slane %v13944_v6, 2 }
  0xca   : > { %11703 = vmatprep.mubr.msk.bf16.mxu0 %vm322_vm1, %v13688_v23  ;;  %v12952_v23 = vld [vmem:[%s15943_s1 + $0x28] sm:$0xff]   ;;  %v13910_v5 = vsel %vm1224_vm3, %v4964_v63, %v4966_v62  ;;  %v13935_v60 = vsel %vm1224_vm3, %v4966_v62, %v4968_v27  ;;  %v15947_v62 = vrot.slane %v13988_v30, 2  ;;  %v2461_v27 = vrot.slane %v13701_v19, 1 }
  0xcb   : > { %v13970_v52 = vsel %vm1224_vm3, %v3104_v49, %v3106_v37  ;;  %v13976_v38 = vsel %vm1224_vm3, %v3106_v37, %v3108_v43  ;;  %v4326_v37 = vsel %vm578_vm4, %v4323_v51, %v4325_v47 }
  0xce   : > { %11524 = vmatmul.mubr.msk.bf16.vlgmr.msra.gmra.mrb[16].mxu1 %vm322_vm1, %v13663_v20  ;;  %v2465_v20 = vrot.slane %v13740_v28, 1 }
  0xcf   : > { %11540 = vmatpush3.bf16.msra.mxu1 %v13785_v58  ;;  %11527 = vmatprep.mubr.msk.bf16.mxu1 %vm322_vm1, %v13691_v48  ;;  %v13895_v58 = vld [vmem:[%s13183_s27 + $0x64] sm:$0xff]  }
  0xd0   : > { %11541 = vmatprep.subr.bf16.mxu1 %v12951_v54  ;;  %v3102_v41 = vrot.slane %v13895_v58, 2 }
  0xd1   : > { %11704 = vmatmul.mubr.msk.bf16.vlgmr.msra.gmra.mrb[16].mxu0 %vm322_vm1, %v13683_v13  ;;  %v4329_v13 = vrot.slane %v13753_v44, 1 }
  0xd2   : > { %11720 = vmatpush3.bf16.msra.mxu0 %v13809_v4  ;;  %11707 = vmatprep.mubr.msk.bf16.mxu0 %vm322_vm1, %v13717_v50  ;;  %v13932_v4 = vsel %vm1224_vm3, %v3100_v7, %v3102_v41  ;;  %v13938_v3 = vsel %vm1224_vm3, %v3102_v41, %v3104_v49  ;;  %v4322_v7 = vrot.slane %v10393_v33, 1  ;;  %v15946_v41 = vrot.slane %v13991_v26, 2  ;;  %v2622_v33 = vld [vmem:[%s13183_s27 + $0x4c] sm:$0xe] }
  0xd3   : > { %11542 = vmatpush3.bf16.msra.mxu1 %v12951_v54  ;;  %11721 = vmatprep.subr.bf16.mxu0 %v12952_v23  ;;  %v4972_v54 = vrot.slane %v13947_v59, 2  ;;  %v4327_v49 = vrot.slane %v13729_v17, 1  ;;  %v2460_v50 = vsel %vm578_vm4, %v2457_v15, %v2459_v22 }
  0xd4   : > { %11559 = vmatprep.subr.bf16.mxu1 %v13890_v36  ;;  %v14018_v48 = vsel %vm1224_vm3, %v4974_v46, %v15946_v41 }
  0xd5   : > { %v13973_v18 = vsel %vm1224_vm3, %v4970_v16, %v4972_v54  ;;  %v13983_v63 = vsel %vm1224_vm3, %v4972_v54, %v4974_v46  ;;  %v14013_v16 = vsel %vm1224_vm3, %v3108_v43, %v15947_v62  ;;  %v12958_v54 = vld [vmem:[%s15943_s1 + $0x38] sm:$0xff]   ;;  %v12966_v43 = vld [vmem:[%s15943_s1 + $0x40] sm:$0xff]   ;;  %v4330_v46 = vsel %vm578_vm4, %v4327_v49, %v4329_v13 }
  0xd6   : > { %11528 = vmatmul.mubr.msk.bf16.gmra.mrb[20].mxu1 %vm322_vm1, %v13701_v19  ;;  %11722 = vmatpush3.bf16.msra.mxu0 %v12952_v23  ;;  %v2458_v23 = vsel %vm578_vm4, %v2456_v32, %v2457_v15  ;;  %v4324_v32 = vsel %vm578_vm4, %v4322_v7, %v4323_v51  ;;  %v12957_v19 = vld [vmem:[%s15943_s1 + $0x38] sm:$0xff]   ;;  %v4328_v15 = vsel %vm578_vm4, %v4325_v47, %v4327_v49  ;;  %v4331_v51 = vrot.slane %v13763_v29, 1 }
  0xd7   : > { %11531 = vmatprep.mubr.msk.bf16.mxu1 %vm322_vm1, %v13732_v35  ;;  %11739 = vmatprep.subr.bf16.mxu0 %v13917_v8  ;;  %v2464_v35 = vsel %vm578_vm4, %v2461_v27, %v2463_v11  ;;  %v4335_v47 = vrot.slane %v13800_v24, 1 }
  0xd9   : > { %11708 = vmatmul.mubr.msk.bf16.gmra.mrb[20].mxu0 %vm322_vm1, %v13729_v17  ;;  %v2462_v17 = vsel %vm578_vm4, %v2459_v22, %v2461_v27  ;;  %v2471_v27 = vrot.slane %v13803_v0, 1 }
  0xda   : > { %11711 = vmatprep.mubr.msk.bf16.mxu0 %vm322_vm1, %v13753_v44  ;;  %v2469_v44 = vrot.slane %v13770_v39, 1 }
  0xde   : > { %11532 = vmatmul.mubr.msk.bf16.gmra.mrb[24].mxu1 %vm322_vm1, %v13740_v28  ;;  %v2466_v28 = vsel %vm578_vm4, %v2463_v11, %v2465_v20  ;;  %v4553_v11 = vrot.slane %v13846_v14, 1 }
  0xdf   : > { %11535 = vmatprep.mubr.msk.bf16.mxu1 %vm322_vm1, %v13767_v55 }
  0xe1   : > { %11712 = vmatmul.mubr.msk.bf16.gmra.mrb[24].mxu0 %vm322_vm1, %v13763_v29  ;;  %v4332_v29 = vsel %vm578_vm4, %v4329_v13, %v4331_v51  ;;  %v12972_v13 = vld [vmem:[%s15943_s1 + $0x48] sm:$0xff]  }
  0xe2   : > { %11715 = vmatprep.mubr.msk.bf16.mxu0 %vm322_vm1, %v13792_v31 }
  0xe6   : > { %11536 = vmatmul.mubr.msk.bf16.gmra.mrb[28].mxu1 %vm322_vm1, %v13770_v39  ;;  %v4488_v39 = vld [vmem:[%s13183_s27 + $0x8c] sm:$0xe] }
  0xe7   : > { %11543 = vmatprep.mubr.msk.bf16.mxu1 %vm322_vm1, %v2458_v23  ;;  %v4333_v23 = vrot.slane %v13792_v31, 1  ;;  %v2687_v31 = vrot.slane %v13842_v21, 1 }
  0xe9   : > { %11716 = vmatmul.mubr.msk.bf16.gmra.mrb[28].mxu0 %vm322_vm1, %v13800_v24  ;;  %v4334_v49 = vsel %vm578_vm4, %v4331_v51, %v4333_v23  ;;  %v2472_v24 = vsel %vm578_vm4, %v2469_v44, %v2471_v27  ;;  %v2693_v51 = vrot.slane %v13901_v57, 1 }
  0xea   : > { %11723 = vmatprep.mubr.msk.bf16.mxu0 %vm322_vm1, %v4324_v32 }
  0xee   : > { %11544 = vmatmul.mubr.msk.bf16.vlgmr.msra.gmra.mrb[16].mxu1 %vm322_vm1, %v2460_v50  ;;  %v4337_v50 = vrot.slane %v13820_v61, 1 }
  0xef   : > { %11560 = vmatpush3.bf16.msra.mxu1 %v13890_v36  ;;  %11547 = vmatprep.mubr.msk.bf16.mxu1 %vm322_vm1, %v2462_v17  ;;  %v12961_v36 = vld [vmem:[%s15943_s1 + $0x40] sm:$0xff]  }
  0xf0   : > { %11561 = vmatprep.subr.bf16.mxu1 %v12957_v19 }
  0xf1   : > { %11724 = vmatmul.mubr.msk.bf16.vlgmr.msra.gmra.mrb[16].mxu0 %vm322_vm1, %v4326_v37  ;;  %v4338_v37 = vsel %vm578_vm4, %v4335_v47, %v4337_v50  ;;  %v12979_v50 = vld [vmem:[%s13183_s27 + $0x8c] ss:$0 sps:$4 sm:$0x11]  }
  0xf2   : > { %11740 = vmatpush3.bf16.msra.mxu0 %v13917_v8  ;;  %11727 = vmatprep.mubr.msk.bf16.mxu0 %vm322_vm1, %v4328_v15  ;;  %v2467_v8 = vrot.slane %v13767_v55, 1  ;;  %v14068_v55 = vcombine.low %v2622_v33, %v13850_v40  ;;  %v14080_v40 = vcombine.low %v4488_v39, %v13853_v25  ;;  %v2689_v25 = vrot.slane %v13856_v42, 1  ;;  %v14116_v33 = vld [vmem:[%s15943_s1 + $0x50] sm:$0xff]  }
  0xf3   : > { %11562 = vmatpush3.bf16.msra.mxu1 %v12957_v19  ;;  %11741 = vmatprep.subr.bf16.mxu0 %v12958_v54  ;;  %v4336_v19 = vsel %vm578_vm4, %v4333_v23, %v4335_v47  ;;  %v14128_v47 = vld [vmem:[%s15943_s1 + $0x50] sm:$0xff]   ;;  %v2697_v39 = vrot.slane %v13950_v10, 1 }
  0xf4   : > { %11579 = vmatprep.subr.bf16.mxu1 %v12961_v36  ;;  %v2468_v7 = vsel %vm578_vm4, %v2465_v20, %v2467_v8  ;;  %v2470_v22 = vsel %vm578_vm4, %v2467_v8, %v2469_v44  ;;  %v2686_v32 = vrot.slane %v14068_v55, 1  ;;  %v4552_v17 = vrot.slane %v14080_v40, 1 }
  0xf5   : > { %v2691_v20 = vrot.slane %v13895_v58, 1  ;;  %v2690_v61 = vsel %vm578_vm4, %v2687_v31, %v2689_v25 }
  0xf6   : > { %11548 = vmatmul.mubr.msk.bf16.gmra.mrb[20].mxu1 %vm322_vm1, %v2464_v35  ;;  %11742 = vmatpush3.bf16.msra.mxu0 %v12958_v54  ;;  %v2688_v0 = vsel %vm578_vm4, %v2686_v32, %v2687_v31  ;;  %v4554_v15 = vsel %vm578_vm4, %v4552_v17, %v4553_v11  ;;  %v4555_v54 = vrot.slane %v13864_v34, 1  ;;  %v2864_v32 = vshll.u32 %v14068_v55, 16 }
  0xf7   : > { %11551 = vmatprep.mubr.msk.bf16.mxu1 %vm322_vm1, %v2466_v28  ;;  %11759 = vmatprep.subr.bf16.mxu0 %v12966_v43  ;;  %v2692_v35 = vsel %vm578_vm4, %v2689_v25, %v2691_v20  ;;  %v4557_v28 = vrot.slane %v13898_v53, 1  ;;  %v2869_v31 = vshrl.u32 %v13842_v21, 16  ;;  %v4563_v17 = vrot.slane %v13962_v1, 1 }
  0xf8   : > { %v4556_v8 = vsel %vm578_vm4, %v4553_v11, %v4555_v54  ;;  %v4727_v25 = vshrl.u32 %v14080_v40, 16 }
  0xf9   : > { %11728 = vmatmul.mubr.msk.bf16.gmra.mrb[20].mxu0 %vm322_vm1, %v4330_v46  ;;  %v2695_v46 = vrot.slane %v13944_v6, 1  ;;  %v4558_v44 = vsel %vm578_vm4, %v4555_v54, %v4557_v28 }
  0xfa   : > { %11731 = vmatprep.mubr.msk.bf16.mxu0 %vm322_vm1, %v4332_v29  ;;  %v12976_v29 = vld [vmem:[%s15943_s1 + $0x48] sm:$0xff]  }
  0xfb   : > { %v2696_v23 = vsel %vm578_vm4, %v2693_v51, %v2695_v46 }
  0xfe   : > { %11552 = vmatmul.mubr.msk.bf16.gmra.mrb[24].mxu1 %vm322_vm1, %v2468_v7  ;;  %v4559_v7 = vrot.slane %v13923_v2, 1 }
  0xff   : > { %11555 = vmatprep.mubr.msk.bf16.mxu1 %vm322_vm1, %v2470_v22  ;;  %v4561_v22 = vrot.slane %v13947_v59, 1 }
 0x100   : > { %v4560_v27 = vsel %vm578_vm4, %v4557_v28, %v4559_v7  ;;  %v2878_v28 = vshrl.u32 %v13856_v42, 16 }
 0x101   : > { %11732 = vmatmul.mubr.msk.bf16.gmra.mrb[24].mxu0 %vm322_vm1, %v4334_v49  ;;  %v2861_v49 = vshrl.u32 %v14068_v55, 16  ;;  %v4730_v55 = vshll.u32 %v14080_v40, 16  ;;  %v4564_v40 = vsel %vm578_vm4, %v4561_v22, %v4563_v17 }
 0x102   : > { %11735 = vmatprep.mubr.msk.bf16.mxu0 %vm322_vm1, %v4336_v19  ;;  %v2872_v19 = vshll.u32 %v13842_v21, 16  ;;  %v4738_v21 = vshll.u32 %v13846_v14, 16 }
 0x104   : > { %v2874_v54 = vrot.slane %v2872_v19, 2 }
 0x106   : > { %11556 = vmatmul.mubr.msk.bf16.gmra.mrb[28].mxu1 %vm322_vm1, %v2472_v24  ;;  %v4562_v24 = vsel %vm578_vm4, %v4559_v7, %v4561_v22  ;;  %v12980_v7 = vld [vmem:[%s13183_s27 + $0xcc] ss:$0 sps:$4 sm:$0x11]  }
 0x107   : > { %11563 = vmatprep.mubr.msk.bf16.mxu1 %vm322_vm1, %v2688_v0  ;;  %v2698_v0 = vsel %vm578_vm4, %v2695_v46, %v2697_v39  ;;  %v4729_v46 = vrot.slane %v4727_v25, 1  ;;  %v2899_v25 = vshll.u32 %v13901_v57, 16 }
 0x109   : > { %11736 = vmatmul.mubr.msk.bf16.gmra.mrb[28].mxu0 %vm322_vm1, %v4338_v37  ;;  %v4735_v37 = vshrl.u32 %v13846_v14, 16  ;;  %v4744_v14 = vshrl.u32 %v13864_v34, 16 }
 0x10a   : > { %11743 = vmatprep.mubr.msk.bf16.mxu0 %vm322_vm1, %v4554_v15  ;;  %v2866_v15 = vrot.slane %v2864_v32, 2  ;;  %v2880_v32 = vrot.slane %v2878_v28, 1  ;;  %v2901_v28 = vrot.slane %v2899_v25, 2 }
 0x10e   : > { %11564 = vmatmul.mubr.msk.bf16.vlgmr.msra.gmra.mrb[16].mxu1 %vm322_vm1, %v2690_v61  ;;  %v2871_v61 = vrot.slane %v2869_v31, 1 }
 0x10f   : > { %11580 = vmatpush3.bf16.msra.mxu1 %v12961_v36  ;;  %11567 = vmatprep.mubr.msk.bf16.mxu1 %vm322_vm1, %v2692_v35  ;;  %v2694_v36 = vsel %vm578_vm4, %v2691_v20, %v2693_v51  ;;  %v2863_v20 = vrot.slane %v2861_v49, 1  ;;  %v4565_v35 = vrot.slane %v13991_v26, 1  ;;  %v2881_v51 = vshll.u32 %v13856_v42, 16 }
 0x110   : > { %11581 = vmatprep.subr.bf16.mxu1 %v12972_v13  ;;  %v4737_v42 = vrot.slane %v4735_v37, 1 }
 0x111   : > { %11744 = vmatmul.mubr.msk.bf16.vlgmr.msra.gmra.mrb[16].mxu0 %vm322_vm1, %v4556_v8  ;;  %v4747_v8 = vshll.u32 %v13864_v34, 16  ;;  %v4566_v49 = vsel %vm578_vm4, %v4563_v17, %v4565_v35  ;;  %v2883_v31 = vrot.slane %v2881_v51, 2  ;;  %v4746_v34 = vrot.slane %v4744_v14, 1 }
 0x112   : > { %11760 = vmatpush3.bf16.msra.mxu0 %v12966_v43  ;;  %11747 = vmatprep.mubr.msk.bf16.mxu0 %vm322_vm1, %v4558_v44  ;;  %v2699_v43 = vrot.slane %v13988_v30, 1  ;;  %v4732_v44 = vrot.slane %v4730_v55, 2  ;;  %v4567_v17 = vrot.slane %v12980_v7, 1  ;;  %v2908_v51 = vshll.u32 %v13944_v6, 16  ;;  %v14185_v7 = vld [vmem:[%s13183_s27 + $0x60] sm:$0xff]  }
 0x113   : > { %11582 = vmatpush3.bf16.msra.mxu1 %v12972_v13  ;;  %11761 = vmatprep.subr.bf16.mxu0 %v12976_v29  ;;  %v2701_v13 = vrot.slane %v12979_v50, 1  ;;  %v4749_v19 = vrot.slane %v4747_v8, 2  ;;  %v4756_v50 = vshll.u32 %v13898_v53, 16 }
 0x114   : > { %11599 = vmatprep.subr.bf16.mxu1 %v14116_v33  ;;  %v2700_v11 = vsel %vm578_vm4, %v2697_v39, %v2699_v43  ;;  %v2875_v39 = vor.u32 %v2874_v54, %v2871_v61  ;;  %v4733_v55 = vor.u32 %v4732_v44, %v4729_v46  ;;  %v2905_v54 = vshrl.u32 %v13944_v6, 16 }
 0x115   : > { %v2702_v22 = vsel %vm578_vm4, %v2699_v43, %v2701_v13  ;;  %v4758_v61 = vrot.slane %v4756_v50, 2  ;;  %v4765_v44 = vshll.u32 %v13923_v2, 16 }
 0x116   : > { %11568 = vmatmul.mubr.msk.bf16.gmra.mrb[20].mxu1 %vm322_vm1, %v2694_v36  ;;  %11762 = vmatpush3.bf16.msra.mxu0 %v12976_v29  ;;  %v2887_v29 = vshrl.u32 %v13895_v58, 16  ;;  %v2890_v36 = vshll.u32 %v13895_v58, 16 }
 0x117   : > { %11571 = vmatprep.mubr.msk.bf16.mxu1 %vm322_vm1, %v2696_v23  ;;  %11779 = vmatprep.subr.bf16.mxu0 %v14128_v47  ;;  %v2867_v23 = vor.u32 %v2866_v15, %v2863_v20  ;;  %v4762_v20 = vshrl.u32 %v13923_v2, 16  ;;  %v14198_v2 = vld [vmem:[%s13183_s27 + $0x68] sm:$0xff]   ;;  %v4767_v25 = vrot.slane %v4765_v44, 2 }
 0x118   : > { %v2889_v58 = vrot.slane %v2887_v29, 1  ;;  %v4771_v29 = vshrl.u32 %v13947_v59, 16 }
 0x119   : > { %11748 = vmatmul.mubr.msk.bf16.gmra.mrb[20].mxu0 %vm322_vm1, %v4560_v27  ;;  %v4740_v27 = vrot.slane %v4738_v21, 2  ;;  %v2876_v43 = vsel %vm985_vm2, %v2867_v23, %v2875_v39  ;;  %v2884_v21 = vor.u32 %v2883_v31, %v2880_v32  ;;  %v4764_v46 = vrot.slane %v4762_v20, 1  ;;  %v3730_v31 = vld [vmem:[%s13183_s27 + $0x58] sm:$0x8] }
 0x11a   : > { %11751 = vmatprep.mubr.msk.bf16.mxu0 %vm322_vm1, %v4562_v24  ;;  %v4753_v24 = vshrl.u32 %v13898_v53, 16  ;;  %v4750_v53 = vor.u32 %v4749_v19, %v4746_v34  ;;  %v2910_v32 = vrot.slane %v2908_v51, 2  ;;  %v3739_v34 = vrot.slane %v14185_v7, 3  ;;  %v5596_v19 = vld [vmem:[%s13183_s27 + $0x98] sm:$0x8] }
 0x11b   : > { %v4741_v37 = vor.u32 %v4740_v27, %v4737_v42  ;;  %v2885_v8 = vsel %vm985_vm2, %v2875_v39, %v2884_v21  ;;  %v4774_v42 = vshll.u32 %v13947_v59, 16  ;;  %v14192_v39 = vld [vmem:[%s13183_s27 + $0x9c] sm:$0xf]  ;;  %v14195_v27 = vld [vmem:[%s13183_s27 + $0xa0] sm:$0xff]  }
 0x11c   : > { %v4755_v15 = vrot.slane %v4753_v24, 1  ;;  %v12983_v59 = vld [vmem:[%s15943_s1 + $0x58] sm:$0xff]   ;;  %v14210_v24 = vld [vmem:[%s13183_s27 + $0xa8] sm:$0xff]  }
 0x11d   : > { %v4742_v14 = vsel %vm985_vm2, %v4733_v55, %v4741_v37  ;;  %v4751_v23 = vsel %vm985_vm2, %v4741_v37, %v4750_v53  ;;  %v4780_v55 = vshrl.u32 %v13962_v1, 16 }
 0x11e   : > { %11572 = vmatmul.mubr.msk.bf16.gmra.mrb[24].mxu1 %vm322_vm1, %v2698_v0  ;;  %v2892_v0 = vrot.slane %v2890_v36, 2  ;;  %v14182_v36 = vld [vmem:[%s13183_s27 + $0x5c] sm:$0xf]  ;;  %v14188_v6 = vor.u32 %v4758_v61, %v4755_v15  ;;  %v5607_v15 = vrot.slane %v14210_v24, 3 }
 0x11f   : > { %11575 = vmatprep.mubr.msk.bf16.mxu1 %vm322_vm1, %v2700_v11  ;;  %v2896_v11 = vshrl.u32 %v13901_v57, 16  ;;  %v10345_v50 = vcombine.low %v3730_v31, %v14182_v36  ;;  %v14250_v31 = vld [vmem:[%s13183_s27 + $0x70] sm:$0xff]  }
 0x120   : > { %v2893_v57 = vor.u32 %v2892_v0, %v2889_v58  ;;  %v10499_v58 = vcombine.low %v5596_v19, %v14192_v39  ;;  %v5605_v0 = vrot.slane %v14195_v27, 3 }
 0x121   : > { %11752 = vmatmul.mubr.msk.bf16.gmra.mrb[24].mxu0 %vm322_vm1, %v4564_v40  ;;  %v2898_v13 = vrot.slane %v2896_v11, 1  ;;  %v4568_v40 = vsel %vm578_vm4, %v4565_v35, %v4567_v17  ;;  %v2907_v35 = vrot.slane %v2905_v54, 1  ;;  %v3741_v11 = vrot.slane %v14198_v2, 3 }
 0x122   : > { %11755 = vmatprep.mubr.msk.bf16.mxu0 %vm322_vm1, %v4566_v49  ;;  %v2894_v49 = vsel %vm985_vm2, %v2884_v21, %v2893_v57  ;;  %v2914_v17 = vshrl.u32 %v13950_v10, 16  ;;  %v3738_v37 = vrot.slane %v10345_v50, 3  ;;  %v5604_v21 = vrot.slane %v10499_v58, 3 }
 0x123   : > { %v14221_v20 = vsel %vm1870_vm5, %v3739_v34, %v3741_v11  ;;  %v2911_v61 = vor.u32 %v2910_v32, %v2907_v35  ;;  %v4773_v54 = vrot.slane %v4771_v29, 1  ;;  %v4783_v29 = vshll.u32 %v13962_v1, 16  ;;  %v12984_v35 = vld [vmem:[%s15943_s1 + $0x58] sm:$0xff]  }
 0x124   : > { %v14229_v51 = vsel %vm1870_vm5, %v3738_v37, %v3739_v34  ;;  %v4768_v32 = vor.u32 %v4767_v25, %v4764_v46  ;;  %v14256_v34 = vld [vmem:[%s13183_s27 + $0x78] sm:$0xff]   ;;  %v4782_v50 = vrot.slane %v4780_v55, 1  ;;  %v3743_v25 = vrot.slane %v14250_v31, 3 }
 0x125   : > { %v14266_v46 = vld [vmem:[%s13183_s27 + $0xb8] sm:$0xff]   ;;  %v4792_v55 = vshll.u32 %v13991_v26, 16 }
 0x126   : > { %11576 = vmatmul.mubr.msk.bf16.gmra.mrb[28].mxu1 %vm322_vm1, %v2702_v22  ;;  %v2902_v22 = vor.u32 %v2901_v28, %v2898_v13  ;;  %v4776_v13 = vrot.slane %v4774_v42, 2  ;;  %v2926_v28 = vshll.u32 %v13988_v30, 16  ;;  %v14246_v42 = vld [vmem:[%s15943_s1 + $0x60] sm:$0xff]   ;;  %v14281_v37 = vsel %vm1870_vm5, %v3741_v11, %v3743_v25 }
 0x127   : > { %11583 = vmatprep.mubr.msk.bf16.mxu1 %vm322_vm1, %v2876_v43  ;;  %v2917_v43 = vshll.u32 %v13950_v10, 16  ;;  %v2923_v10 = vshrl.u32 %v13988_v30, 16  ;;  %v4769_v11 = vsel %vm985_vm2, %v14188_v6, %v4768_v32 }
 0x128   : > { %v2912_v1 = vsel %vm985_vm2, %v2902_v22, %v2911_v61  ;;  %v4777_v19 = vor.u32 %v4776_v13, %v4773_v54  ;;  %v5611_v13 = vrot.slane %v14266_v46, 3 }
 0x129   : > { %11756 = vmatmul.mubr.msk.bf16.gmra.mrb[28].mxu0 %vm322_vm1, %v4568_v40  ;;  %v14232_v40 = vsel %vm1870_vm5, %v5604_v21, %v5605_v0  ;;  %v2919_v44 = vrot.slane %v2917_v43, 2  ;;  %v2925_v58 = vrot.slane %v2923_v10, 1  ;;  %v4785_v43 = vrot.slane %v4783_v29, 2 }
 0x12a   : > { %11763 = vmatprep.mubr.msk.bf16.mxu0 %vm322_vm1, %v4742_v14  ;;  %v4760_v14 = vsel %vm985_vm2, %v4750_v53, %v14188_v6  ;;  %v14253_v53 = vld [vmem:[%s13183_s27 + $0xb0] sm:$0xff]  }
 0x12e   : > { %11584 = vmatmul.mubr.msk.bf16.vlgmr.msra.gmra.mrb[16].mxu1 %vm322_vm1, %v2885_v8  ;;  %v2916_v8 = vrot.slane %v2914_v17, 1  ;;  %v5609_v17 = vrot.slane %v14253_v53, 3 }
 0x12f   : > { %11600 = vmatpush3.bf16.msra.mxu1 %v14116_v33  ;;  %11587 = vmatprep.mubr.msk.bf16.mxu1 %vm322_vm1, %v2894_v49  ;;  %v14235_v33 = vsel %vm1870_vm5, %v5605_v0, %v5607_v15  ;;  %v2903_v49 = vsel %vm985_vm2, %v2893_v57, %v2902_v22  ;;  %v14261_v0 = vld [vmem:[%s13183_s27 + $0x8c] ss:$0 sps:$4 sm:$0x33]   ;;  %v2928_v57 = vrot.slane %v2926_v28, 2 }
 0x130   : > { %11601 = vmatprep.subr.bf16.mxu1 %v12983_v59  ;;  %v2920_v22 = vor.u32 %v2919_v44, %v2916_v8  ;;  %v14284_v21 = vsel %vm1870_vm5, %v5607_v15, %v5609_v17  ;;  %v2932_v10 = vshrl.u32 %v14261_v0, 16  ;;  %v2935_v28 = vshll.u32 %v14261_v0, 16  ;;  %v14296_v15 = vld [vmem:[%s13183_s27 + $0xcc] ss:$0 sps:$4 sm:$0x33]  }
 0x131   : > { %11764 = vmatmul.mubr.msk.bf16.vlgmr.msra.gmra.mrb[16].mxu0 %vm322_vm1, %v4751_v23  ;;  %v3745_v23 = vrot.slane %v14256_v34, 3  ;;  %v14299_v8 = vsel %vm1870_vm5, %v5609_v17, %v5611_v13  ;;  %v4778_v44 = vsel %vm985_vm2, %v4768_v32, %v4777_v19  ;;  %v4798_v41 = vshrl.u32 %v14296_v15, 16 }
 0x132   : > { %11780 = vmatpush3.bf16.msra.mxu0 %v14128_v47  ;;  %11767 = vmatprep.mubr.msk.bf16.mxu0 %vm322_vm1, %v4760_v14  ;;  %v14277_v47 = vld [vmem:[%s15943_s1 + $0x60] sm:$0xff]   ;;  %v2929_v14 = vor.u32 %v2928_v57, %v2925_v58  ;;  %15956 = vst [vmem:[#allocation4_spill] sm:$0xff] %v14299_v8  ;;  %v2921_v6 = vsel %vm985_vm2, %v2911_v61, %v2920_v22  ;;  %v14311_v58 = vld [vmem:[%s13183_s27 + $0x88] sm:$0xff]   ;;  %v2934_v57 = vrot.slane %v2932_v10, 1  ;;  %v2937_v17 = vrot.slane %v2935_v28, 2 }
 0x133   : > { %11602 = vmatpush3.bf16.msra.mxu1 %v12983_v59  ;;  %11781 = vmatprep.subr.bf16.mxu0 %v12984_v35  ;;  %v4789_v59 = vshrl.u32 %v13991_v26, 16  ;;  %v14287_v54 = vsel %vm1870_vm5, %v3743_v25, %v3745_v23  ;;  %v14307_v25 = vld [vmem:[%s13183_s27 + $0xc0] sm:$0xff]   ;;  %v4801_v62 = vshll.u32 %v14296_v15, 16  ;;  %v14321_v61 = vld [vmem:[%s13183_s27 + $0xc8] sm:$0xff]  }
 0x134   : > { %11619 = vmatprep.subr.bf16.mxu1 %v14246_v42  ;;  %15955 = vst [vmem:[#allocation3_spill] sm:$0xff] %v14287_v54  ;;  %v4800_v54 = vrot.slane %v4798_v41, 1 }
 0x135   : > { %v4791_v29 = vrot.slane %v4789_v59, 1  ;;  %v5613_v59 = vrot.slane %v14307_v25, 3 }
 0x136   : > { %11588 = vmatmul.mubr.msk.bf16.gmra.mrb[20].mxu1 %vm322_vm1, %v2903_v49  ;;  %11782 = vmatpush3.bf16.msra.mxu0 %v12984_v35  ;;  %v4794_v49 = vrot.slane %v4792_v55, 2  ;;  %v4786_v35 = vor.u32 %v4785_v43, %v4782_v50  ;;  %v2930_v55 = vsel %vm985_vm2, %v2920_v22, %v2929_v14  ;;  %v3749_v50 = vrot.slane %v14311_v58, 3 }
 0x137   : > { %11591 = vmatprep.mubr.msk.bf16.mxu1 %vm322_vm1, %v2912_v1  ;;  %11799 = vmatprep.subr.bf16.mxu0 %v14277_v47  ;;  %v14304_v1 = vld [vmem:[%s13183_s27 + $0x80] sm:$0xff]   ;;  %v14328_v28 = vsel %vm1870_vm5, %v5611_v13, %v5613_v59 }
 0x138   : > { %v3747_v32 = vrot.slane %v14304_v1, 3  ;;  %v4795_v43 = vor.u32 %v4794_v49, %v4791_v29  ;;  %v4787_v8 = vsel %vm985_vm2, %v4777_v19, %v4786_v35  ;;  %v4803_v29 = vrot.slane %v4801_v62, 2  ;;  %v14342_v49 = vld [vmem:[%s13183_s27 + $0x90] sm:$0xff]  }
 0x139   : > { %11768 = vmatmul.mubr.msk.bf16.gmra.mrb[20].mxu0 %vm322_vm1, %v4769_v11  ;;  %v5615_v11 = vrot.slane %v14321_v61, 3 }
 0x13a   : > { %11771 = vmatprep.mubr.msk.bf16.mxu0 %vm322_vm1, %v4778_v44  ;;  %v14325_v10 = vsel %vm1870_vm5, %v3745_v23, %v3747_v32  ;;  %v14332_v22 = vsel %vm1870_vm5, %v3747_v32, %v3749_v50  ;;  %v2938_v44 = vor.u32 %v2937_v17, %v2934_v57  ;;  %v4796_v13 = vsel %vm985_vm2, %v4786_v35, %v4795_v43 }
 0x13b   : > { %v14338_v23 = vsel %vm1870_vm5, %v5613_v59, %v5615_v11  ;;  %v4804_v62 = vor.u32 %v4803_v29, %v4800_v54  ;;  %v12991_v54 = vld [vmem:[%s15943_s1 + $0x68] sm:$0xff]  }
 0x13c   : > { %v2939_v32 = vsel %vm985_vm2, %v2929_v14, %v2938_v44  ;;  %v5194_v44 = vrot.slane %v14195_v27, 2 }
 0x13d   : > { %v4805_v14 = vsel %vm985_vm2, %v4795_v43, %v4804_v62  ;;  %v3328_v43 = vrot.slane %v14185_v7, 2  ;;  %v3332_v62 = vrot.slane %v14250_v31, 2 }
 0x13e   : > { %11592 = vmatmul.mubr.msk.bf16.gmra.mrb[24].mxu1 %vm322_vm1, %v2921_v6  ;;  %v14345_v6 = vld [vmem:[%s13183_s27 + $0xd0] sm:$0xff]  }
 0x13f   : > { %11595 = vmatprep.mubr.msk.bf16.mxu1 %vm322_vm1, %v2930_v55  ;;  %v15949_v55 = vrot.slane %v14342_v49, 3  ;;  %v15948_v57 = vrot.slane %v14345_v6, 3 }
 0x141   : > { %11772 = vmatmul.mubr.msk.bf16.gmra.mrb[24].mxu0 %vm322_vm1, %v4787_v8  ;;  %v14355_v41 = vsel %vm1870_vm5, %v3749_v50, %v15949_v55  ;;  %v14360_v19 = vsel %vm1870_vm5, %v5615_v11, %v15948_v57  ;;  %v12992_v8 = vld [vmem:[%s15943_s1 + $0x68] sm:$0xff]   ;;  %v3112_v50 = vrot.slane %v14261_v0, 2 }
 0x142   : > { %11775 = vmatprep.mubr.msk.bf16.mxu0 %vm322_vm1, %v4796_v13 }
 0x146   : > { %11596 = vmatmul.mubr.msk.bf16.gmra.mrb[28].mxu1 %vm322_vm1, %v2939_v32 }
 0x147   : > { %11603 = vmatprep.mubr.msk.bf16.mxu1 %vm322_vm1, %v13904_v45 }
 0x149   : > { %11776 = vmatmul.mubr.msk.bf16.gmra.mrb[28].mxu0 %vm322_vm1, %v4805_v14 }
 0x14a   : > { %11783 = vmatprep.mubr.msk.bf16.mxu0 %vm322_vm1, %v13907_v12  ;;  %v14383_v12 = vld [vmem:[%s15943_s1 + $0x70] sm:$0xff]  }
 0x14e   : > { %11604 = vmatmul.mubr.msk.bf16.vlgmr.msra.gmra.mrb[16].mxu1 %vm322_vm1, %v13878_v9 }
 0x14f   : > { %11620 = vmatpush3.bf16.msra.mxu1 %v14246_v42  ;;  %11607 = vmatprep.mubr.msk.bf16.mxu1 %vm322_vm1, %v13932_v4  ;;  %v14394_v42 = vld [vmem:[%s15943_s1 + $0x70] sm:$0xff]  }
 0x150   : > { %11621 = vmatprep.subr.bf16.mxu1 %v12991_v54 }
 0x151   : > { %v11385_v45 = vpop.f32.mrb[0].mxu1  ;;  %11784 = vmatmul.mubr.msk.bf16.vlgmr.msra.gmra.mrb[16].mxu0 %vm322_vm1, %v13910_v5 }
 0x152   : > { %v897_v35 = vpop.f32.mrb[1].mxu1  ;;  %11800 = vmatpush3.bf16.msra.mxu0 %v14277_v47  ;;  %11787 = vmatprep.mubr.msk.bf16.mxu0 %vm322_vm1, %v13935_v60  ;;  %v3263_v47 = vld [vmem:[%s13183_s27 + $0x58] sm:$0xc] }
 0x153   : > { %v11386_v9 = vpop.f32.mrb[2].mxu1  ;;  %11622 = vmatpush3.bf16.msra.mxu1 %v12991_v54  ;;  %11801 = vmatprep.subr.bf16.mxu0 %v12992_v8 }
 0x154   : > { %v900_v4 = vpop.f32.mrb[3].mxu1  ;;  %11639 = vmatprep.subr.bf16.mxu1 %v14383_v12 }
 0x156   : > { %11608 = vmatmul.mubr.msk.bf16.gmra.mrb[20].mxu1 %vm322_vm1, %v13938_v3  ;;  %11802 = vmatpush3.bf16.msra.mxu0 %v12992_v8  ;;  %v14409_v3 = vcombine.low %v3263_v47, %v14182_v36  ;;  %v13006_v47 = vld [vmem:[%s15943_s1 + $0x78] sm:$0xff]  }
 0x157   : > { %11611 = vmatprep.mubr.msk.bf16.mxu1 %vm322_vm1, %v13970_v52  ;;  %11819 = vmatprep.subr.bf16.mxu0 %v14394_v42  ;;  %v5129_v52 = vld [vmem:[%s13183_s27 + $0x98] sm:$0xc] }
 0x158   : > { %v14420_v11 = vcombine.low %v5129_v52, %v14192_v39 }
 0x159   : > { %v11389_v5 = vpop.f32.mrb[4].mxu1  ;;  %11788 = vmatmul.mubr.msk.bf16.gmra.mrb[20].mxu0 %vm322_vm1, %v13953_v56  ;;  %v3327_v56 = vrot.slane %v14409_v3, 2 }
 0x15a   : > { %v913_v60 = vpop.f32.mrb[5].mxu1  ;;  %11791 = vmatprep.mubr.msk.bf16.mxu0 %vm322_vm1, %v13973_v18  ;;  %v15957_v18 = vrot.slane %v13988_v30, 2  ;;  %v5193_v0 = vrot.slane %v14420_v11, 2  ;;  %v3330_v30 = vrot.slane %v14198_v2, 2 }
 0x15b   : > { %v11390_v17 = vpop.f32.mrb[6].mxu1  ;;  %v3329_v36 = vsel %vm1224_vm3, %v3327_v56, %v3328_v43 }
 0x15c   : > { %v14404_v59 = vpop.f32.mrb[7].mxu1  ;;  %v5195_v8 = vsel %vm1224_vm3, %v5193_v0, %v5194_v44 }
 0x15e   : > { %11612 = vmatmul.mubr.msk.bf16.gmra.mrb[24].mxu1 %vm322_vm1, %v13976_v38  ;;  %v3113_v38 = vsel %vm1224_vm3, %v15957_v18, %v3112_v50 }
 0x15f   : > { %11615 = vmatprep.mubr.msk.bf16.mxu1 %vm322_vm1, %v14013_v16  ;;  %v4978_v16 = vrot.slane %v14296_v15, 2  ;;  %v15958_v15 = vrot.slane %v13991_v26, 2  ;;  %v5196_v26 = vrot.slane %v14210_v24, 2 }
 0x161   : > { %11792 = vmatmul.mubr.msk.bf16.gmra.mrb[24].mxu0 %vm322_vm1, %v13983_v63  ;;  %v4979_v32 = vsel %vm1224_vm3, %v15958_v15, %v4978_v16  ;;  %v3336_v16 = vrot.slane %v14304_v1, 2 }
 0x162   : > { %11795 = vmatprep.mubr.msk.bf16.mxu0 %vm322_vm1, %v14018_v48 }
 0x164   : > { %v11485_v39 = vpop.f32.mrb[0].mxu0 }
 0x165   : > { %v12223_v63 = vadd.f32 %v11485_v39, %v11385_v45  ;;  %v1958_v29 = vpop.f32.mrb[1].mxu0 }
 0x166   : > { %11616 = vmatmul.mubr.msk.bf16.gmra.mrb[28].mxu1 %vm322_vm1, %v3113_v38  ;;  %v12224_v13 = vadd.f32 %v1958_v29, %v897_v35  ;;  %v11486_v48 = vpop.f32.mrb[2].mxu0  ;;  %v3331_v35 = vsel %vm1224_vm3, %v3328_v43, %v3330_v30  ;;  %v3334_v43 = vrot.slane %v14256_v34, 2  ;;  %v5197_v38 = vsel %vm1224_vm3, %v5194_v44, %v5196_v26 }
 0x167   : > { %11623 = vmatprep.mubr.msk.bf16.mxu1 %vm322_vm1, %v3329_v36  ;;  %2040 = vst.msk [vmem:[#allocation2 + $0x10] sm:$0xff] %vm2037_vm7, %v12223_v63  ;;  %v12225_v14 = vadd.f32 %v11486_v48, %v11386_v9  ;;  %v1961_v54 = vpop.f32.mrb[3].mxu0  ;;  %v3333_v9 = vsel %vm1224_vm3, %v3330_v30, %v3332_v62  ;;  %v5200_v29 = vrot.slane %v14266_v46, 2  ;;  %v5202_v30 = vrot.slane %v14307_v25, 2 }
 0x168   : > { %2038 = vst.msk [vmem:[#allocation2] sm:$0xff] %vm2037_vm7, %v12224_v13  ;;  %v12226_v45 = vadd.f32 %v1961_v54, %v900_v4  ;;  %v5198_v4 = vrot.slane %v14253_v53, 2  ;;  %v15950_v13 = vrot.slane %v14311_v58, 2  ;;  %v3502_v54 = vshrl.u32 %v14409_v3, 16 }
 0x169   : > { %2041 = vst.msk [vmem:[#allocation2 + $0x18] sm:$0xff] %vm2037_vm7, %v12225_v14  ;;  %11796 = vmatmul.mubr.msk.bf16.gmra.mrb[28].mxu0 %vm322_vm1, %v4979_v32  ;;  %v3335_v32 = vsel %vm1224_vm3, %v3332_v62, %v3334_v43  ;;  %v5204_v14 = vrot.slane %v14321_v61, 2 }
 0x16a   : > { %2039 = vst.msk [vmem:[#allocation2 + $0x8] sm:$0xff] %vm2037_vm7, %v12226_v45  ;;  %11803 = vmatprep.mubr.msk.bf16.mxu0 %vm322_vm1, %v5195_v8  ;;  %v5199_v39 = vsel %vm1224_vm3, %v5196_v26, %v5198_v4  ;;  %v3340_v45 = vrot.slane %v14342_v49, 2  ;;  %v14491_v26 = vld [vmem:[%s13183_s27 + $0xd8] ss:$0 sps:$4 sm:$0x33]  }
 0x16c   : > { %v11489_v52 = vpop.f32.mrb[4].mxu0 }
 0x16d   : > { %v12227_v50 = vadd.f32 %v11489_v52, %v11389_v5  ;;  %v1974_v56 = vpop.f32.mrb[5].mxu0  ;;  %v14468_v5 = vld [vmem:[%s15943_s1 + $0x80] sm:$0xff]   ;;  %v5371_v52 = vshll.u32 %v14420_v11, 16 }
 0x16e   : > { %11624 = vmatmul.mubr.msk.bf16.vlgmr.msra.gmra.mrb[16].mxu1 %vm322_vm1, %v3331_v35  ;;  %v12228_v18 = vadd.f32 %v1974_v56, %v913_v60  ;;  %v11490_v36 = vpop.f32.mrb[6].mxu0  ;;  %v3505_v35 = vshll.u32 %v14409_v3, 16  ;;  %v9521_v3 = vld [vmem:[#allocation2 + $0x10] ss:$2 sm:$0xf] }
 0x16f   : > { %11640 = vmatpush3.bf16.msra.mxu1 %v14383_v12  ;;  %11627 = vmatprep.mubr.msk.bf16.mxu1 %vm322_vm1, %v3333_v9  ;;  %2044 = vst.msk [vmem:[#allocation2 + $0x30] sm:$0xff] %vm2037_vm7, %v12227_v50  ;;  %v13010_v12 = vld [vmem:[%s15943_s1 + $0x78] sm:$0xff]   ;;  %v12229_v60 = vadd.f32 %v11490_v36, %v11390_v17  ;;  %v1977_v44 = vpop.f32.mrb[7].mxu0  ;;  %v3510_v9 = vshrl.u32 %v14185_v7, 16  ;;  %v14501_v50 = vld [vmem:[%s15943_s1 + $0x80] sm:$0xff]   ;;  %v14524_v62 = vrot.slane %v5371_v52, 3 }
 0x170   : > { %11641 = vmatprep.subr.bf16.mxu1 %v13006_v47  ;;  %2042 = vst.msk [vmem:[#allocation2 + $0x20] sm:$0xff] %vm2037_vm7, %v12228_v18  ;;  %v12230_v48 = vadd.f32 %v1977_v44, %v14404_v59  ;;  %v14479_v17 = vld [vmem:[%s13183_s27 + $0x98] ss:$0 sps:$4 sm:$0x33]   ;;  %v3337_v59 = vsel %vm1224_vm3, %v3334_v43, %v3336_v16  ;;  %v5376_v43 = vshrl.u32 %v14195_v27, 16  ;;  %v5379_v18 = vshll.u32 %v14195_v27, 16 }
 0x171   : > { %v11413_v0 = vpop.f32.mrb[8].mxu1  ;;  %11804 = vmatmul.mubr.msk.bf16.vlgmr.msra.gmra.mrb[16].mxu0 %vm322_vm1, %v5197_v38  ;;  %2045 = vst.msk [vmem:[#allocation2 + $0x38] sm:$0xff] %vm2037_vm7, %v12229_v60  ;;  %v14509_v60 = vrot.slane %v3502_v54, 2  ;;  %v9519_v44 = vld [vmem:[#allocation2] ss:$2 sm:$0xff]  ;;  %v3339_v27 = vsel %vm1224_vm3, %v3336_v16, %v15950_v13  ;;  %v15959_v52 = vrot.slane %v14311_v58, 2 }
 0x172   : > { %v1168_v63 = vpop.f32.mrb[9].mxu1  ;;  %11820 = vmatpush3.bf16.msra.mxu0 %v14394_v42  ;;  %11807 = vmatprep.mubr.msk.bf16.mxu0 %vm322_vm1, %v5199_v39  ;;  %2043 = vst.msk [vmem:[#allocation2 + $0x28] sm:$0xff] %vm2037_vm7, %v12230_v48  ;;  %v3513_v42 = vshll.u32 %v14185_v7, 16  ;;  %v9525_v7 = vld [vmem:[#allocation2 + $0x11] ss:$2 sm:$0xf]  ;;  %v5201_v39 = vsel %vm1224_vm3, %v5198_v4, %v5200_v29 }
 0x173   : > { %v11414_v15 = vpop.f32.mrb[10].mxu1  ;;  %11642 = vmatpush3.bf16.msra.mxu1 %v13006_v47  ;;  %11821 = vmatprep.subr.bf16.mxu0 %v13010_v12  ;;  %v5368_v47 = vshrl.u32 %v14420_v11, 16  ;;  %v3342_v11 = vrot.slane %v14479_v17, 2  ;;  %v9523_v48 = vld [vmem:[#allocation2 + $0x1] ss:$2 sm:$0xff]  ;;  %v14517_v4 = vrot.slane %v3505_v35, 3  ;;  %v9527_v35 = vmax.f32 %v9521_v3, %v9525_v7 }
 0x174   : > { %v1171_v8 = vpop.f32.mrb[11].mxu1  ;;  %11659 = vmatprep.subr.bf16.mxu1 %v14468_v5  ;;  %v11493_v56 = vpop.f32.mrb[8].mxu0  ;;  %v5378_v16 = vrot.slane %v5376_v43, 2  ;;  %v9526_v13 = vmax.f32 %v9519_v44, %v9523_v48  ;;  %v3341_v3 = vsel %vm1224_vm3, %v15959_v52, %v3340_v45  ;;  %v14545_v43 = vld [vmem:[%s15944_s2] ss:$0 sm:$0xff] }
 0x175   : > { %v12231_v38 = vadd.f32 %v11493_v56, %v11413_v0  ;;  %v1990_v36 = vpop.f32.mrb[9].mxu0  ;;  %v3515_v56 = vrot.slane %v3513_v42, 3 }
 0x176   : > { %11628 = vmatmul.mubr.msk.bf16.gmra.mrb[20].mxu1 %vm322_vm1, %v3335_v32  ;;  %v12232_v57 = vadd.f32 %v1990_v36, %v1168_v63  ;;  %v11494_v55 = vpop.f32.mrb[10].mxu0  ;;  %v5203_v32 = vsel %vm1224_vm3, %v5200_v29, %v5202_v30  ;;  %11822 = vmatpush3.bf16.msra.mxu0 %v13010_v12  ;;  %v14520_v63 = vrot.slane %v5368_v47, 2  ;;  %v5381_v12 = vrot.slane %v5379_v18, 3 }
 0x177   : > { %11631 = vmatprep.mubr.msk.bf16.mxu1 %vm322_vm1, %v3337_v59  ;;  %2048 = vst.msk [vmem:[#allocation2 + $0x50] sm:$0xff] %vm2037_vm7, %v12231_v38  ;;  %v12233_v0 = vadd.f32 %v11494_v55, %v11414_v15  ;;  %v1993_v17 = vpop.f32.mrb[11].mxu0  ;;  %v3512_v59 = vrot.slane %v3510_v9, 2  ;;  %11839 = vmatprep.subr.bf16.mxu0 %v14501_v50  ;;  %v5208_v15 = vrot.slane %v14491_v26, 2  ;;  %v3519_v9 = vshrl.u32 %v14198_v2, 16 }
 0x178   : > { %2046 = vst.msk [vmem:[#allocation2 + $0x40] sm:$0xff] %vm2037_vm7, %v12232_v57  ;;  %v12234_v29 = vadd.f32 %v1993_v17, %v1171_v8  ;;  %v5205_v8 = vsel %vm1224_vm3, %v5202_v30, %v5204_v14  ;;  %v15960_v38 = vrot.slane %v14345_v6, 2  ;;  %v3343_v30 = vsel %vm1224_vm3, %v3340_v45, %v3342_v11 }
 0x179   : > { %v11417_v54 = vpop.f32.mrb[12].mxu1  ;;  %2049 = vst.msk [vmem:[#allocation2 + $0x58] sm:$0xff] %vm2037_vm7, %v12233_v0  ;;  %11808 = vmatmul.mubr.msk.bf16.gmra.mrb[20].mxu0 %vm322_vm1, %v5201_v39  ;;  %v9529_v42 = vld [vmem:[#allocation2 + $0x1a] ss:$2 sm:$0xff]  ;;  %v9535_v44 = vld [vmem:[#allocation2 + $0x1b] ss:$2 sm:$0xff]  ;;  %v14558_v0 = vor.u32 %v3515_v56, %v3512_v59  ;;  %v5374_v17 = vor.u32 %v14524_v62, %v14520_v63 }
 0x17a   : > { %v1184_v36 = vpop.f32.mrb[13].mxu1  ;;  %v9531_v47 = vld [vmem:[#allocation2 + $0x2a] ss:$2 sm:$0xf]  ;;  %2047 = vst.msk [vmem:[#allocation2 + $0x48] sm:$0xff] %vm2037_vm7, %v12234_v29  ;;  %11811 = vmatprep.mubr.msk.bf16.mxu0 %vm322_vm1, %v5203_v32  ;;  %v9532_v18 = vmax.f32 %v9526_v13, %v9529_v42  ;;  %v5207_v39 = vsel %vm1224_vm3, %v5204_v14, %v15960_v38  ;;  %v3508_v13 = vor.u32 %v14517_v4, %v14509_v60  ;;  %v3522_v45 = vshll.u32 %v14198_v2, 16 }
 0x17b   : > { %v11418_v55 = vpop.f32.mrb[14].mxu1  ;;  %v9533_v7 = vmax.f32 %v9527_v35, %v9531_v47  ;;  %v9537_v48 = vld [vmem:[#allocation2 + $0x2b] ss:$2 sm:$0xf]  ;;  %v14562_v29 = vor.u32 %v5381_v12, %v5378_v16  ;;  %v3521_v52 = vrot.slane %v3519_v9, 2  ;;  %v3528_v60 = vshrl.u32 %v14250_v31, 16 }
 0x17c   : > { %v1187_v57 = vpop.f32.mrb[15].mxu1  ;;  %v11497_v32 = vpop.f32.mrb[12].mxu0  ;;  %v9538_v14 = vmax.f32 %v9532_v18, %v9535_v44  ;;  %v3531_v4 = vshll.u32 %v14250_v31, 16  ;;  %v5385_v2 = vshrl.u32 %v14210_v24, 16  ;;  %v3517_v9 = vsel %vm1631_vm6, %v3508_v13, %v14558_v0 }
 0x17d   : > { %v9539_v35 = vmax.f32 %v9533_v7, %v9537_v48  ;;  %v12235_v42 = vadd.f32 %v11497_v32, %v11417_v54  ;;  %v2006_v47 = vpop.f32.mrb[13].mxu0  ;;  %v5388_v31 = vshll.u32 %v14210_v24, 16  ;;  %v3524_v7 = vrot.slane %v3522_v45, 3 }
 0x17e   : > { %11632 = vmatmul.mubr.msk.bf16.gmra.mrb[24].mxu1 %vm322_vm1, %v3339_v27  ;;  %v12236_v11 = vadd.f32 %v2006_v47, %v1184_v36  ;;  %v11498_v27 = vpop.f32.mrb[14].mxu0  ;;  %v9546_v62 = vadd.f32 %v14545_v43, %v9538_v14  ;;  %v3530_v24 = vrot.slane %v3528_v60, 2  ;;  %v3533_v38 = vrot.slane %v3531_v4, 3 }
 0x17f   : > { %11635 = vmatprep.mubr.msk.bf16.mxu1 %vm322_vm1, %v3341_v3  ;;  %v9547_v59 = vadd.f32 %v14545_v43, %v9539_v35  ;;  %v9563_v56 = vld [vmem:[#allocation2 + $0x34] ss:$2 sm:$0xff]  ;;  %v9567_v63 = vld [vmem:[#allocation2 + $0x35] ss:$2 sm:$0xff]  ;;  %2052 = vst.msk [vmem:[#allocation2 + $0x70] sm:$0xff] %vm2037_vm7, %v12235_v42  ;;  %v12237_v54 = vadd.f32 %v11498_v27, %v11418_v55  ;;  %v2009_v16 = vpop.f32.mrb[15].mxu0  ;;  %v3525_v27 = vor.u32 %v3524_v7, %v3521_v52 }
 0x180   : > { %v9570_v12 = vmax.f32 %v9563_v56, %v9567_v63  ;;  %2050 = vst.msk [vmem:[#allocation2 + $0x60] sm:$0xff] %vm2037_vm7, %v12236_v11  ;;  %v12238_v36 = vadd.f32 %v2009_v16, %v1187_v57  ;;  %v9548_v3 = vmax.f32 %v9546_v62, 0.0  ;;  %v5394_v55 = vshrl.u32 %v14253_v53, 16 }
 0x181   : > { %v9549_v18 = vmax.f32 %v9547_v59, 0.0  ;;  %2053 = vst.msk [vmem:[#allocation2 + $0x78] sm:$0xff] %vm2037_vm7, %v12237_v54  ;;  %11812 = vmatmul.mubr.msk.bf16.gmra.mrb[24].mxu0 %vm322_vm1, %v5205_v8  ;;  %v9573_v57 = vld [vmem:[#allocation2 + $0x4e] ss:$2 sm:$0xff]  ;;  %v5397_v44 = vshll.u32 %v14253_v53, 16  ;;  %v3537_v8 = vshrl.u32 %v14256_v34, 16  ;;  %v5383_v53 = vsel %vm1631_vm6, %v5374_v17, %v14562_v29 }
 0x182   : > { %2051 = vst.msk [vmem:[#allocation2 + $0x68] sm:$0xff] %vm2037_vm7, %v12238_v36  ;;  %11815 = vmatprep.mubr.msk.bf16.mxu0 %vm322_vm1, %v5207_v39  ;;  %v10845_v48 = vpack.c.bf16 %v9548_v3, %v9548_v3  ;;  %v9565_v13 = vld [vmem:[#allocation2 + $0x44] ss:$2 sm:$0xf]  ;;  %v9576_v35 = vmax.f32 %v9570_v12, %v9573_v57  ;;  %v9579_v42 = vld [vmem:[#allocation2 + $0x4f] ss:$2 sm:$0xff]  ;;  %v3534_v62 = vor.u32 %v3533_v38, %v3530_v24 }
 0x183   : > { %v10846_v32 = vpack.c.bf16 %v9549_v18, %v9549_v18  ;;  %v9569_v14 = vld [vmem:[#allocation2 + $0x45] ss:$2 sm:$0xf]  ;;  %v15961_v39 = vrot.slane %v14345_v6, 2  ;;  %v3540_v45 = vshll.u32 %v14256_v34, 16  ;;  %v3549_v26 = vshll.u32 %v14304_v1, 16 }
 0x184   : > { %9559 = vst.msk [vmem:[%s14583_s7] sm:$0xf] %vm9558_vm8, %v10845_v48  ;;  %v9582_v11 = vmax.f32 %v9576_v35, %v9579_v42  ;;  %v9571_v60 = vmax.f32 %v9565_v13, %v9569_v14  ;;  %v5390_v4 = vrot.slane %v5388_v31, 3  ;;  %v5396_v59 = vrot.slane %v5394_v55, 2 }
 0x185   : > { %v5209_v47 = vsel %vm1224_vm3, %v15961_v39, %v5208_v15  ;;  %9561 = vst.msk [vmem:[%s14583_s7 + $0x4] sm:$0x3] %vm9560_vm9, %v10846_v32  ;;  %v5387_v15 = vrot.slane %v5385_v2, 2  ;;  %v5399_v56 = vrot.slane %v5397_v44, 3  ;;  %v3539_v63 = vrot.slane %v3537_v8, 2 }
 0x186   : > { %11636 = vmatmul.mubr.msk.bf16.gmra.mrb[28].mxu1 %vm322_vm1, %v3343_v30  ;;  %v3546_v30 = vshrl.u32 %v14304_v1, 16  ;;  %v9584_v17 = vadd.f32 %v14545_v43, %v9582_v11  ;;  %v3542_v16 = vrot.slane %v3540_v45, 3  ;;  %v5403_v12 = vshrl.u32 %v14266_v46, 16 }
 0x187   : > { %11643 = vmatprep.mubr.msk.bf16.mxu1 %vm322_vm1, %v3517_v9  ;;  %v9575_v34 = vld [vmem:[#allocation2 + $0x5e] ss:$2 sm:$0xf]  ;;  %v5406_v52 = vshll.u32 %v14266_v46, 16  ;;  %v3526_v1 = vsel %vm1631_vm6, %v14558_v0, %v3525_v27  ;;  %v3551_v31 = vrot.slane %v3549_v26, 3  ;;  %v5391_v18 = vor.u32 %v5390_v4, %v5387_v15  ;;  %v13017_v46 = vld [vmem:[%s15943_s1 + $0x88] sm:$0xff]  }
 0x188   : > { %v9577_v54 = vmax.f32 %v9571_v60, %v9575_v34  ;;  %v9586_v36 = vmax.f32 %v9584_v17, 0.0  ;;  %v9581_v9 = vld [vmem:[#allocation2 + $0x5f] ss:$2 sm:$0xf]  ;;  %v3548_v2 = vrot.slane %v3546_v30, 2  ;;  %v3535_v7 = vsel %vm1631_vm6, %v3525_v27, %v3534_v62 }
 0x189   : > { %11816 = vmatmul.mubr.msk.bf16.gmra.mrb[28].mxu0 %vm322_vm1, %v5209_v47  ;;  %v5400_v57 = vor.u32 %v5399_v56, %v5396_v59  ;;  %v5412_v24 = vshrl.u32 %v14307_v25, 16  ;;  %v5415_v38 = vshll.u32 %v14307_v25, 16  ;;  %v3543_v44 = vor.u32 %v3542_v16, %v3539_v63 }
 0x18a   : > { %v9583_v3 = vmax.f32 %v9577_v54, %v9581_v9  ;;  %11823 = vmatprep.mubr.msk.bf16.mxu0 %vm322_vm1, %v5383_v53  ;;  %v10847_v55 = vpack.c.bf16 %v9586_v36, %v9586_v36  ;;  %v5405_v8 = vrot.slane %v5403_v12, 2  ;;  %v5408_v48 = vrot.slane %v5406_v52, 3 }
 0x18b   : > { %v3552_v13 = vor.u32 %v3551_v31, %v3548_v2  ;;  %v3555_v14 = vshrl.u32 %v14311_v58, 16  ;;  %v3558_v35 = vshll.u32 %v14311_v58, 16  ;;  %v5392_v25 = vsel %vm1631_vm6, %v14562_v29, %v5391_v18  ;;  %v13018_v58 = vld [vmem:[%s15943_s1 + $0x88] sm:$0xff]   ;;  %v14637_v29 = vld [vmem:[%s15943_s1 + $0x10] sm:$0xff]  }
 0x18c   : > { %v9585_v0 = vadd.f32 %v14545_v43, %v9583_v3  ;;  %v9597_v32 = vrot.slane %v10847_v55, 6  ;;  %v3564_v43 = vshrl.u32 %v14342_v49, 16  ;;  %v3567_v39 = vshll.u32 %v14342_v49, 16 }
 0x18d   : > { %v5414_v47 = vrot.slane %v5412_v24, 2  ;;  %v5417_v53 = vrot.slane %v5415_v38, 3  ;;  %v3544_v11 = vsel %vm1631_vm6, %v3534_v62, %v3543_v44  ;;  %v5409_v27 = vor.u32 %v5408_v48, %v5405_v8  ;;  %v14651_v62 = vld [vmem:[%s13183_s27 + $0x98] ss:$0 sps:$4 sm:$0x77]  }
 0x18e   : > { %11644 = vmatmul.mubr.msk.bf16.vlgmr.msra.gmra.mrb[16].mxu1 %vm322_vm1, %v3526_v1  ;;  %v9587_v42 = vmax.f32 %v9585_v0, 0.0  ;;  %9604 = vst.msk [vmem:[%s14583_s7 + $0x4] sm:$0xc] %vm9603_vm10, %v9597_v32  ;;  %v5421_v30 = vshrl.u32 %v14321_v61, 16  ;;  %v3553_v60 = vsel %vm1631_vm6, %v3543_v44, %v3552_v13  ;;  %v3557_v15 = vrot.slane %v3555_v14, 2 }
 0x18f   : > { %11660 = vmatpush3.bf16.msra.mxu1 %v14468_v5  ;;  %11647 = vmatprep.mubr.msk.bf16.mxu1 %vm322_vm1, %v3535_v7  ;;  %v5401_v5 = vsel %vm1631_vm6, %v5391_v18, %v5400_v57  ;;  %v3560_v4 = vrot.slane %v3558_v35, 3  ;;  %v5424_v17 = vshll.u32 %v14321_v61, 16  ;;  %v9598_v34 = vrot.slane %v9597_v32, 4  ;;  %v13022_v61 = vld [vmem:[%s15943_s1 + $0x10] sm:$0xff]  }
 0x190   : > { %11661 = vmatprep.subr.bf16.mxu1 %v13017_v46  ;;  %v10848_v45 = vpack.c.bf16 %v9587_v42, %v9587_v42  ;;  %v3566_v56 = vrot.slane %v3564_v43, 2  ;;  %v3569_v63 = vrot.slane %v3567_v39, 3  ;;  %v5418_v54 = vor.u32 %v5417_v53, %v5414_v47  ;;  %v14671_v18 = vld [vmem:[%s13183_s27 + $0xd8] ss:$0 sps:$4 sm:$0x77]  }
 0x191   : > { %11824 = vmatmul.mubr.msk.bf16.vlgmr.msra.gmra.mrb[16].mxu0 %vm322_vm1, %v5392_v25  ;;  %v5430_v16 = vshrl.u32 %v14345_v6, 16  ;;  %v5433_v12 = vshll.u32 %v14345_v6, 16  ;;  %v3561_v52 = vor.u32 %v3560_v4, %v3557_v15  ;;  %v3573_v36 = vshrl.u32 %v14651_v62, 16  ;;  %v13023_v47 = vld [vmem:[%s15943_s1 + $0x18] sm:$0xff]   ;;  %v14707_v53 = vld [vmem:[%s13183_s27 + $0xc4] sm:$0xf] }
 0x192   : > { %v9599_v59 = vrot.slane %v10848_v45, 6  ;;  %11840 = vmatpush3.bf16.msra.mxu0 %v14501_v50  ;;  %11827 = vmatprep.mubr.msk.bf16.mxu0 %vm322_vm1, %v5401_v5  ;;  %v3576_v9 = vshll.u32 %v14651_v62, 16  ;;  %v5410_v1 = vsel %vm1631_vm6, %v5400_v57, %v5409_v27  ;;  %v5423_v2 = vrot.slane %v5421_v30, 2  ;;  %v14731_v45 = vld [vmem:[%s13183_s27 + $0x104] sm:$0xf]  ;;  %v15965_v30 = vld [vmem:[#allocation4_spill] sm:$0xff] }
 0x193   : > { %11662 = vmatpush3.bf16.msra.mxu1 %v13017_v46  ;;  %11841 = vmatprep.subr.bf16.mxu0 %v13018_v58  ;;  %v5426_v31 = vrot.slane %v5424_v17, 3  ;;  %v3570_v3 = vor.u32 %v3569_v63, %v3566_v56  ;;  %v5419_v7 = vsel %vm1631_vm6, %v5409_v27, %v5418_v54  ;;  %v5432_v46 = vrot.slane %v5430_v16, 2  ;;  %v14750_v4 = vld [vmem:[%s13183_s27 + $0x108] sm:$0xff]   ;;  %v14762_v63 = vld [vmem:[%s13183_s27 + $0xd8] sm:$0xff]  }
 0x194   : > { %11859 = vmatprep.subr.bf16.mxu1 %v14637_v29  ;;  %v9600_v50 = vsel %vm14643_vm13, %v9598_v34, %v9599_v59  ;;  %v5435_v55 = vrot.slane %v5433_v12, 3  ;;  %v3562_v24 = vsel %vm1631_vm6, %v3552_v13, %v3561_v52  ;;  %v3575_v38 = vrot.slane %v3573_v36, 2  ;;  %v14756_v34 = vld [vmem:[%s13183_s27 + $0xd0] sm:$0xff]  }
 0x195   : > { %9605 = vst.msk [vmem:[%s14583_s7 + $0x8] sm:$0xf] %vm9558_vm8, %v9600_v50  ;;  %v3578_v0 = vrot.slane %v3576_v9, 3  ;;  %v5427_v57 = vor.u32 %v5426_v31, %v5423_v2  ;;  %v3571_v44 = vsel %vm1631_vm6, %v3561_v52, %v3570_v3  ;;  %v5439_v8 = vshrl.u32 %v14671_v18, 16  ;;  %v14774_v50 = vld [vmem:[%s13183_s27 + $0x110] sm:$0xff]   ;;  %v14783_v2 = vld [vmem:[%s13183_s27 + $0x118] sm:$0xff]  }
 0x196   : > { %11648 = vmatmul.mubr.msk.bf16.gmra.mrb[20].mxu1 %vm322_vm1, %v3544_v11  ;;  %11842 = vmatpush3.bf16.msra.mxu0 %v13018_v58  ;;  %v5442_v48 = vshll.u32 %v14671_v18, 16  ;;  %v5436_v32 = vor.u32 %v5435_v55, %v5432_v46  ;;  %v14725_v58 = vld [vmem:[%s15943_s1] sm:$0xff]   ;;  %v7728_v12 = vshll.u32 %v14750_v4, 16  ;;  %v5619_v52 = vrot.slane %v14671_v18, 3 }
 0x197   : > { %11651 = vmatprep.mubr.msk.bf16.mxu1 %vm322_vm1, %v3553_v60  ;;  %12039 = vmatprep.subr.bf16.mxu0 %v13022_v61  ;;  %v3579_v14 = vor.u32 %v3578_v0, %v3575_v38  ;;  %v5428_v35 = vsel %vm1631_vm6, %v5418_v54, %v5427_v57  ;;  %v5441_v13 = vrot.slane %v5439_v8, 2  ;;  %v5874_v9 = vshrl.u32 %v14756_v34, 16  ;;  %v14796_v0 = vld [vmem:[%s13183_s27 + $0xe8] sm:$0xff]  }
 0x198   : > { %v5444_v42 = vrot.slane %v5442_v48, 3  ;;  %v5437_v25 = vsel %vm1631_vm6, %v5427_v57, %v5436_v32  ;;  %v15967_v18 = vrot.slane %v14345_v6, 3  ;;  %v7732_v55 = vshrl.u32 %v14750_v4, 16 }
 0x199   : > { %11828 = vmatmul.mubr.msk.bf16.gmra.mrb[20].mxu0 %vm322_vm1, %v5410_v1  ;;  %v3580_v43 = vsel %vm1631_vm6, %v3570_v3, %v3579_v14  ;;  %v14787_v3 = vld [vmem:[%s13183_s27 + $0xe0] sm:$0xff]   ;;  %v7744_v8 = vshll.u32 %v14783_v2, 16  ;;  %v5882_v14 = vshrl.u32 %v14762_v63, 16 }
 0x19a   : > { %11831 = vmatprep.mubr.msk.bf16.mxu0 %vm322_vm1, %v5419_v7  ;;  %v5445_v39 = vor.u32 %v5444_v42, %v5441_v13  ;;  %v5620_v46 = vsel %vm1870_vm5, %v15967_v18, %v5619_v52  ;;  %v5886_v48 = vshll.u32 %v14787_v3, 16  ;;  %v14866_v18 = vld [vmem:[%s13183_s27 + $0x100] ss:$0 sps:$4 sm:$0x11]  }
 0x19c   : > { %v5446_v5 = vsel %vm1631_vm6, %v5436_v32, %v5445_v39  ;;  %v13038_v39 = vld [vmem:[%s15943_s1 + $0x8] sm:$0xff]  }
 0x19e   : > { %11652 = vmatmul.mubr.msk.bf16.gmra.mrb[24].mxu1 %vm322_vm1, %v3562_v24 }
 0x19f   : > { %11655 = vmatprep.mubr.msk.bf16.mxu1 %vm322_vm1, %v3571_v44  ;;  %v7740_v44 = vshrl.u32 %v14774_v50, 16 }
 0x1a1   : > { %11832 = vmatmul.mubr.msk.bf16.gmra.mrb[24].mxu0 %vm322_vm1, %v5428_v35  ;;  %v14806_v35 = vld [vmem:[%s13183_s27 + $0x120] sm:$0xff]  }
 0x1a2   : > { %11835 = vmatprep.mubr.msk.bf16.mxu0 %vm322_vm1, %v5437_v25  ;;  %v5890_v25 = vshrl.u32 %v14787_v3, 16 }
 0x1a6   : > { %11656 = vmatmul.mubr.msk.bf16.gmra.mrb[28].mxu1 %vm322_vm1, %v3580_v43  ;;  %v5894_v43 = vshll.u32 %v14796_v0, 16 }
 0x1a7   : > { %11663 = vmatprep.mubr.msk.bf16.mxu1 %vm322_vm1, %v14229_v51  ;;  %v13024_v51 = vld [vmem:[%s15943_s1 + $0x18] sm:$0xff]  }
 0x1a9   : > { %11836 = vmatmul.mubr.msk.bf16.gmra.mrb[28].mxu0 %vm322_vm1, %v5446_v5 }
 0x1aa   : > { %11843 = vmatprep.mubr.msk.bf16.mxu0 %vm322_vm1, %v14232_v40  ;;  %v5786_v40 = vld [vmem:[%s13183_s27 + $0xc0] sm:$0xf] }
 0x1ae   : > { %11664 = vmatmul.mubr.msk.bf16.vlgmr.msra.gmra.mrb[16].mxu1 %vm322_vm1, %v14221_v20  ;;  %v14712_v20 = vld [vmem:[%s15943_s1] sm:$0xff]  }
 0x1af   : > { %11860 = vmatpush3.bf16.msra.mxu1 %v14637_v29  ;;  %11667 = vmatprep.mubr.msk.bf16.mxu1 %vm322_vm1, %v14281_v37  ;;  %v14719_v37 = vcombine.low %v5786_v40, %v14707_v53  ;;  %v15964_v29 = vld [vmem:[#allocation3_spill] sm:$0xff]  ;;  %v5888_v40 = vrot.slane %v5886_v48, 1 }
 0x1b0   : > { %11861 = vmatprep.subr.bf16.mxu1 %v13023_v47 }
 0x1b1   : > { %11844 = vmatmul.mubr.msk.bf16.vlgmr.msra.gmra.mrb[16].mxu0 %vm322_vm1, %v14235_v33  ;;  %v7652_v33 = vld [vmem:[%s13183_s27 + $0x100] sm:$0xf]  ;;  %v5857_v11 = vshll.u32 %v14719_v37, 16  ;;  %v5855_v60 = vshrl.u32 %v14719_v37, 16 }
 0x1b2   : > { %12040 = vmatpush3.bf16.msra.mxu0 %v13022_v61  ;;  %11847 = vmatprep.mubr.msk.bf16.mxu0 %vm322_vm1, %v14284_v21  ;;  %v14736_v21 = vld [vmem:[%s13183_s27 + $0xc8] sm:$0xff]   ;;  %v14740_v27 = vcombine.low %v7652_v33, %v14731_v45 }
 0x1b3   : > { %11862 = vmatpush3.bf16.msra.mxu1 %v13023_v47  ;;  %12041 = vmatprep.subr.bf16.mxu0 %v13024_v51  ;;  %v5862_v15 = vshll.u32 %v14736_v21, 16  ;;  %v5866_v61 = vshrl.u32 %v14736_v21, 16  ;;  %v7746_v47 = vrot.slane %v7744_v8, 1 }
 0x1b4   : > { %11879 = vmatprep.subr.bf16.mxu1 %v14712_v20  ;;  %v7723_v17 = vshll.u32 %v14740_v27, 16  ;;  %v7721_v54 = vshrl.u32 %v14740_v27, 16 }
 0x1b5   : > { %v5864_v56 = vrot.slane %v5862_v15, 1  ;;  %v5896_v15 = vrot.slane %v5894_v43, 1 }
 0x1b6   : > { %11668 = vmatmul.mubr.msk.bf16.gmra.mrb[20].mxu1 %vm322_vm1, %v15964_v29  ;;  %12042 = vmatpush3.bf16.msra.mxu0 %v13024_v51  ;;  %v7725_v16 = vrot.slane %v7723_v17, 1  ;;  %v14816_v51 = vld [vmem:[%s13183_s27 + $0x128] sm:$0xff]   ;;  %v14820_v29 = vld [vmem:[%s13183_s27 + $0xf0] sm:$0xff]   ;;  %v14828_v17 = vld [vmem:[%s13183_s27 + $0xf8] sm:$0xff]  }
 0x1b7   : > { %11671 = vmatprep.mubr.msk.bf16.mxu1 %vm322_vm1, %v14325_v10  ;;  %12059 = vmatprep.subr.bf16.mxu0 %v14725_v58  ;;  %v5859_v10 = vrot.slane %v5857_v11, 1  ;;  %v5868_v7 = vor.u32 %v5866_v61, %v5864_v56  ;;  %v7752_v11 = vshll.u32 %v14806_v35, 16 }
 0x1b8   : > { %v7726_v1 = vor.u32 %v7725_v16, %v7721_v54  ;;  %v14839_v54 = vld [vmem:[%s15943_s1 + $0x20] sm:$0xff]   ;;  %v5902_v16 = vshll.u32 %v14820_v29, 16 }
 0x1b9   : > { %11848 = vmatmul.mubr.msk.bf16.gmra.mrb[20].mxu0 %vm322_vm1, %v15965_v30  ;;  %v5860_v59 = vor.u32 %v5859_v10, %v5855_v60  ;;  %v7748_v60 = vshrl.u32 %v14783_v2, 16  ;;  %v5892_v10 = vor.u32 %v5890_v25, %v5888_v40  ;;  %v14881_v25 = vld [vmem:[%s13183_s27 + $0x140] ss:$0 sps:$4 sm:$0x11]  }
 0x1ba   : > { %11851 = vmatprep.mubr.msk.bf16.mxu0 %vm322_vm1, %v14328_v28  ;;  %v3753_v28 = vrot.slane %v14651_v62, 3 }
 0x1bb   : > { %v5865_v36 = vsel %vm241_vm0, %v5860_v59, %v5864_v56  ;;  %v7756_v59 = vshrl.u32 %v14806_v35, 16  ;;  %v13042_v56 = vld [vmem:[%s15943_s1 + $0x8] sm:$0xff]   ;;  %v7750_v61 = vor.u32 %v7748_v60, %v7746_v47  ;;  %v5897_v52 = vsel %vm241_vm0, %v5892_v10, %v5896_v15 }
 0x1be   : > { %11672 = vmatmul.mubr.msk.bf16.gmra.mrb[24].mxu1 %vm322_vm1, %v14332_v22  ;;  %v5870_v22 = vshll.u32 %v14756_v34, 16 }
 0x1bf   : > { %11675 = vmatprep.mubr.msk.bf16.mxu1 %vm322_vm1, %v14355_v41  ;;  %v15966_v41 = vrot.slane %v14342_v49, 3  ;;  %v7730_v49 = vrot.slane %v7728_v12, 1 }
 0x1c0   : > { %v5872_v31 = vrot.slane %v5870_v22, 1  ;;  %v7754_v22 = vrot.slane %v7752_v11, 1  ;;  %v7784_v11 = vshll.u32 %v14881_v25, 16 }
 0x1c1   : > { %11852 = vmatmul.mubr.msk.bf16.gmra.mrb[24].mxu0 %vm322_vm1, %v14338_v23  ;;  %v3754_v62 = vsel %vm1870_vm5, %v15966_v41, %v3753_v28  ;;  %v5878_v23 = vshll.u32 %v14762_v63, 16  ;;  %v7731_v57 = vsel %vm241_vm0, %v7726_v1, %v7730_v49  ;;  %v7734_v13 = vor.u32 %v7732_v55, %v7730_v49  ;;  %v14854_v49 = vld [vmem:[%s13183_s27 + $0x138] sm:$0xff]  }
 0x1c2   : > { %11855 = vmatprep.mubr.msk.bf16.mxu0 %vm322_vm1, %v14360_v19  ;;  %v7736_v19 = vshll.u32 %v14774_v50, 16  ;;  %v5876_v24 = vor.u32 %v5874_v9, %v5872_v31  ;;  %v5873_v6 = vsel %vm241_vm0, %v5868_v7, %v5872_v31  ;;  %v5898_v41 = vshrl.u32 %v14796_v0, 16 }
 0x1c3   : > { %v5880_v38 = vrot.slane %v5878_v23, 1  ;;  %v5910_v9 = vshll.u32 %v14828_v17, 16  ;;  %v7758_v23 = vor.u32 %v7756_v59, %v7754_v22  ;;  %v5904_v31 = vrot.slane %v5902_v16, 1  ;;  %v14897_v59 = vld [vmem:[%s13183_s27 + $0xd4] sm:$0xff]  }
 0x1c4   : > { %v7738_v32 = vrot.slane %v7736_v19, 1  ;;  %v5900_v7 = vor.u32 %v5898_v41, %v5896_v15  ;;  %v7764_v55 = vshrl.u32 %v14816_v51, 16  ;;  %v7776_v8 = vshll.u32 %v14854_v49, 16  ;;  %v14906_v16 = vld [vmem:[%s13183_s27 + $0x114] sm:$0xff]  }
 0x1c5   : > { %v5881_v42 = vsel %vm241_vm0, %v5876_v24, %v5880_v38  ;;  %v5884_v33 = vor.u32 %v5882_v14, %v5880_v38  ;;  %v5912_v38 = vrot.slane %v5910_v9, 1  ;;  %v5918_v14 = vshll.u32 %v14866_v18, 16 }
 0x1c6   : > { %11676 = vmatmul.mubr.msk.bf16.gmra.mrb[28].mxu1 %vm322_vm1, %v3754_v62  ;;  %v7742_v5 = vor.u32 %v7740_v44, %v7738_v32  ;;  %v7739_v30 = vsel %vm241_vm0, %v7734_v13, %v7738_v32  ;;  %v14846_v62 = vld [vmem:[%s13183_s27 + $0x130] sm:$0xff]   ;;  %v5905_v48 = vsel %vm241_vm0, %v5900_v7, %v5904_v31  ;;  %v5914_v32 = vshrl.u32 %v14828_v17, 16 }
 0x1c7   : > { %11863 = vmatprep.mubr.msk.bf16.mxu1 %vm322_vm1, %v5865_v36  ;;  %v5889_v12 = vsel %vm241_vm0, %v5884_v33, %v5888_v40  ;;  %v5906_v36 = vshrl.u32 %v14820_v29, 16  ;;  %v7768_v19 = vshll.u32 %v14846_v62, 16  ;;  %v7772_v44 = vshrl.u32 %v14846_v62, 16 }
 0x1c8   : > { %v7747_v28 = vsel %vm241_vm0, %v7742_v5, %v7746_v47  ;;  %v5916_v5 = vor.u32 %v5914_v32, %v5912_v38  ;;  %v5920_v47 = vrot.slane %v5918_v14, 1  ;;  %v7780_v33 = vshrl.u32 %v14854_v49, 16 }
 0x1c9   : > { %11856 = vmatmul.mubr.msk.bf16.gmra.mrb[28].mxu0 %vm322_vm1, %v5620_v46  ;;  %v7755_v46 = vsel %vm241_vm0, %v7750_v61, %v7754_v22  ;;  %v5908_v24 = vor.u32 %v5906_v36, %v5904_v31  ;;  %v7786_v15 = vrot.slane %v7784_v11, 1  ;;  %v6821_v22 = vld [vmem:[%s13183_s27 + $0xcc] sm:$0xc]  ;;  %v6830_v41 = vrot.slane %v14897_v59, 2  ;;  %v15005_v11 = vld [vmem:[%s13183_s27 + $0xfc] sm:$0xff]  }
 0x1ca   : > { %12043 = vmatprep.mubr.msk.bf16.mxu0 %vm322_vm1, %v7731_v57  ;;  %v5921_v60 = vsel %vm241_vm0, %v5916_v5, %v5920_v47  ;;  %v8687_v61 = vld [vmem:[%s13183_s27 + $0x10c] sm:$0xc]  ;;  %v8696_v9 = vrot.slane %v14906_v16, 2  ;;  %v6180_v47 = vld [vmem:[%s13183_s27 + $0xc0] sm:$0xe] }
 0x1ce   : > { %11864 = vmatmul.mubr.msk.bf16.vlgmr.msra.gmra.mrb[32].mxu1 %vm322_vm1, %v5873_v6  ;;  %v7770_v6 = vrot.slane %v7768_v19, 1 }
 0x1cf   : > { %11880 = vmatpush3.bf16.msra.mxu1 %v14712_v20  ;;  %11867 = vmatprep.mubr.msk.bf16.mxu1 %vm322_vm1, %v5881_v42  ;;  %v7760_v20 = vshll.u32 %v14816_v51, 16  ;;  %v5913_v42 = vsel %vm241_vm0, %v5908_v24, %v5912_v38  ;;  %v14948_v24 = vld [vmem:[%s15943_s1 + $0x30] sm:$0xff]  }
 0x1d0   : > { %11881 = vmatprep.subr.bf16.mxu1 %v13038_v39  ;;  %v7774_v43 = vor.u32 %v7772_v44, %v7770_v6  ;;  %v14957_v44 = vld [vmem:[%s13183_s27 + $0x124] sm:$0xff]  }
 0x1d1   : > { %12044 = vmatmul.mubr.msk.bf16.vlgmr.msra.gmra.mrb[32].mxu0 %vm322_vm1, %v7739_v30  ;;  %v7762_v1 = vrot.slane %v7760_v20, 1  ;;  %v14900_v20 = vld [vmem:[%s13183_s27 + $0xd0] sm:$0xf]  ;;  %v8700_v32 = vrot.slane %v14957_v44, 2 }
 0x1d2   : > { %12060 = vmatpush3.bf16.msra.mxu0 %v14725_v58  ;;  %12047 = vmatprep.mubr.msk.bf16.mxu0 %vm322_vm1, %v7747_v28  ;;  %v14860_v58 = vld [vmem:[%s15943_s1 + $0x20] sm:$0xff]  }
 0x1d3   : > { %11882 = vmatpush3.bf16.msra.mxu1 %v13038_v39  ;;  %12061 = vmatprep.subr.bf16.mxu0 %v13042_v56  ;;  %v7763_v57 = vsel %vm241_vm0, %v7758_v23, %v7762_v1  ;;  %v7766_v13 = vor.u32 %v7764_v55, %v7762_v1  ;;  %v7778_v39 = vrot.slane %v7776_v8, 1  ;;  %v14924_v23 = vld [vmem:[%s13183_s27 + $0x11c] sm:$0xff]   ;;  %v14960_v8 = vld [vmem:[%s13183_s27 + $0xec] sm:$0xff]  }
 0x1d4   : > { %11899 = vmatprep.subr.bf16.mxu1 %v14839_v54  ;;  %v8698_v19 = vrot.slane %v14924_v23, 2  ;;  %v6836_v14 = vrot.slane %v14960_v8, 2 }
 0x1d5   : > { %v7771_v40 = vsel %vm241_vm0, %v7766_v13, %v7770_v6  ;;  %v7779_v30 = vsel %vm241_vm0, %v7774_v43, %v7778_v39  ;;  %v7782_v10 = vor.u32 %v7780_v33, %v7778_v39  ;;  %v15002_v33 = vld [vmem:[%s13183_s27 + $0x134] sm:$0xff]  }
 0x1d6   : > { %11868 = vmatmul.mubr.msk.bf16.gmra.mrb[36].mxu1 %vm322_vm1, %v5889_v12  ;;  %12062 = vmatpush3.bf16.msra.mxu0 %v13042_v56  ;;  %v14903_v56 = vld [vmem:[%s13183_s27 + $0x110] sm:$0xf]  ;;  %v14910_v12 = vld [vmem:[%s13183_s27 + $0xdc] sm:$0xff]   ;;  %v14951_v38 = vsel %vm1224_vm3, %v8696_v9, %v8698_v19 }
 0x1d7   : > { %11871 = vmatprep.mubr.msk.bf16.mxu1 %vm322_vm1, %v5897_v52  ;;  %12079 = vmatprep.subr.bf16.mxu0 %v14860_v58  ;;  %v7787_v28 = vsel %vm241_vm0, %v7782_v10, %v7786_v15  ;;  %v10600_v52 = vcombine.low %v6821_v22, %v14900_v20  ;;  %v10754_v36 = vcombine.low %v8687_v61, %v14903_v56  ;;  %v6832_v1 = vrot.slane %v14910_v12, 2  ;;  %v15015_v15 = vld [vmem:[%s13183_s27 + $0x13c] sm:$0xff]  }
 0x1d8   : > { %v10547_v10 = vcombine.low %v6180_v47, %v14707_v53  ;;  %v8046_v61 = vld [vmem:[%s13183_s27 + $0x100] sm:$0xe]  ;;  %v8706_v53 = vrot.slane %v15015_v15, 2  ;;  %v8057_v47 = vrot.slane %v14774_v50, 1 }
 0x1d9   : > { %12048 = vmatmul.mubr.msk.bf16.gmra.mrb[36].mxu0 %vm322_vm1, %v7755_v46  ;;  %v8695_v31 = vrot.slane %v10754_v36, 2  ;;  %v14933_v7 = vsel %vm1224_vm3, %v6830_v41, %v6832_v1  ;;  %v6189_v36 = vrot.slane %v14736_v21, 1 }
 0x1da   : > { %12051 = vmatprep.mubr.msk.bf16.mxu0 %vm322_vm1, %v7763_v57  ;;  %v14954_v57 = vld [vmem:[%s13183_s27 + $0xe4] sm:$0xff]  }
 0x1db   : > { %v14940_v55 = vsel %vm1224_vm3, %v8695_v31, %v8696_v9  ;;  %v6834_v6 = vrot.slane %v14954_v57, 2 }
 0x1dd   : > { %v14982_v13 = vsel %vm1224_vm3, %v6832_v1, %v6834_v6  ;;  %v14988_v43 = vsel %vm1224_vm3, %v6834_v6, %v6836_v14  ;;  %v10701_v1 = vcombine.low %v8046_v61, %v14731_v45  ;;  %v15052_v45 = vld [vmem:[%s13183_s27 + $0x144] sm:$0xff]   ;;  %v6193_v6 = vrot.slane %v14762_v63, 1 }
 0x1de   : > { %11872 = vmatmul.mubr.msk.bf16.gmra.mrb[40].mxu1 %vm322_vm1, %v5905_v48  ;;  %v14968_v48 = vld [vmem:[%s13183_s27 + $0x12c] sm:$0xff]  }
 0x1df   : > { %11875 = vmatprep.mubr.msk.bf16.mxu1 %vm322_vm1, %v5913_v42  ;;  %v14985_v42 = vsel %vm1224_vm3, %v8698_v19, %v8700_v32  ;;  %v8702_v39 = vrot.slane %v14968_v48, 2  ;;  %v8054_v31 = vrot.slane %v10701_v1, 1  ;;  %v8055_v19 = vrot.slane %v14750_v4, 1  ;;  %v13064_v1 = vld [vmem:[%s15943_s1 + $0x40] sm:$0xff]  }
 0x1e1   : > { %12052 = vmatmul.mubr.msk.bf16.gmra.mrb[40].mxu0 %vm322_vm1, %v7771_v40  ;;  %v14994_v5 = vsel %vm1224_vm3, %v8700_v32, %v8702_v39  ;;  %v14999_v40 = vld [vmem:[%s13183_s27 + $0xf4] sm:$0xff]   ;;  %v8056_v32 = vsel %vm578_vm4, %v8054_v31, %v8055_v19  ;;  %v8058_v61 = vsel %vm578_vm4, %v8055_v19, %v8057_v47  ;;  %v6354_v31 = vld [vmem:[%s13183_s27 + $0xcc] sm:$0xe] }
 0x1e2   : > { %12055 = vmatprep.mubr.msk.bf16.mxu0 %vm322_vm1, %v7779_v30  ;;  %v6838_v30 = vrot.slane %v14999_v40, 2 }
 0x1e4   : > { %v15019_v22 = vsel %vm1224_vm3, %v6836_v14, %v6838_v30 }
 0x1e6   : > { %11876 = vmatmul.mubr.msk.bf16.gmra.mrb[44].mxu1 %vm322_vm1, %v5921_v60  ;;  %v8704_v60 = vrot.slane %v15002_v33, 2 }
 0x1e7   : > { %11883 = vmatprep.mubr.msk.bf16.mxu1 %vm322_vm1, %v14719_v37  ;;  %v13049_v37 = vld [vmem:[%s15943_s1 + $0x28] sm:$0xff]  }
 0x1e8   : > { %v15035_v9 = vsel %vm1224_vm3, %v8704_v60, %v8706_v53 }
 0x1e9   : > { %12056 = vmatmul.mubr.msk.bf16.gmra.mrb[44].mxu0 %vm322_vm1, %v7787_v28  ;;  %v6840_v28 = vrot.slane %v15005_v11, 2 }
 0x1ea   : > { %12063 = vmatprep.mubr.msk.bf16.mxu0 %vm322_vm1, %v14740_v27  ;;  %v6829_v27 = vrot.slane %v10600_v52, 2  ;;  %v6188_v52 = vrot.slane %v10547_v10, 1  ;;  %v8059_v10 = vrot.slane %v14783_v2, 1 }
 0x1ec   : > { %v14937_v46 = vsel %vm1224_vm3, %v6829_v27, %v6830_v41  ;;  %v15022_v41 = vsel %vm1224_vm3, %v8702_v39, %v8704_v60  ;;  %v6190_v27 = vsel %vm578_vm4, %v6188_v52, %v6189_v36  ;;  %v15951_v39 = vrot.slane %v15052_v45, 2  ;;  %v13055_v60 = vld [vmem:[%s15943_s1 + $0x38] sm:$0xff]  }
 0x1ed   : > { %v13056_v52 = vld [vmem:[%s15943_s1 + $0x38] sm:$0xff]  }
 0x1ee   : > { %11884 = vmatmul.mubr.msk.bf16.vlgmr.msra.gmra.mrb[32].mxu1 %vm322_vm1, %v14736_v21  ;;  %v6191_v21 = vrot.slane %v14756_v34, 1 }
 0x1ef   : > { %11900 = vmatpush3.bf16.msra.mxu1 %v14839_v54  ;;  %11887 = vmatprep.mubr.msk.bf16.mxu1 %vm322_vm1, %v14756_v34  ;;  %v13050_v54 = vld [vmem:[%s15943_s1 + $0x28] sm:$0xff]  }
 0x1f0   : > { %11901 = vmatprep.subr.bf16.mxu1 %v13049_v37 }
 0x1f1   : > { %12064 = vmatmul.mubr.msk.bf16.vlgmr.msra.gmra.mrb[32].mxu0 %vm322_vm1, %v14750_v4  ;;  %v6192_v4 = vsel %vm578_vm4, %v6189_v36, %v6191_v21  ;;  %v8063_v36 = vrot.slane %v14816_v51, 1 }
 0x1f2   : > { %12080 = vmatpush3.bf16.msra.mxu0 %v14860_v58  ;;  %12067 = vmatprep.mubr.msk.bf16.mxu0 %vm322_vm1, %v14774_v50  ;;  %v14977_v58 = vld [vmem:[%s15943_s1 + $0x30] sm:$0xff]   ;;  %v6197_v50 = vrot.slane %v14796_v0, 1 }
 0x1f3   : > { %11902 = vmatpush3.bf16.msra.mxu1 %v13049_v37  ;;  %12081 = vmatprep.subr.bf16.mxu0 %v13050_v54  ;;  %v15028_v37 = vsel %vm1224_vm3, %v6838_v30, %v6840_v28  ;;  %v6194_v30 = vsel %vm578_vm4, %v6191_v21, %v6193_v6  ;;  %v8065_v21 = vrot.slane %v14846_v62, 1 }
 0x1f4   : > { %11919 = vmatprep.subr.bf16.mxu1 %v14948_v24 }
 0x1f6   : > { %11888 = vmatmul.mubr.msk.bf16.gmra.mrb[36].mxu1 %vm322_vm1, %v14762_v63  ;;  %12082 = vmatpush3.bf16.msra.mxu0 %v13050_v54  ;;  %v15049_v54 = vld [vmem:[%s13183_s27 + $0x104] sm:$0xff]   ;;  %v15069_v63 = vsel %vm1224_vm3, %v8706_v53, %v15951_v39  ;;  %v8060_v53 = vsel %vm578_vm4, %v8057_v47, %v8059_v10  ;;  %v8066_v47 = vsel %vm578_vm4, %v8063_v36, %v8065_v21 }
 0x1f7   : > { %11891 = vmatprep.mubr.msk.bf16.mxu1 %vm322_vm1, %v14787_v3  ;;  %12099 = vmatprep.subr.bf16.mxu0 %v14977_v58  ;;  %v15952_v14 = vrot.slane %v15049_v54, 2  ;;  %v15357_v39 = vld [vmem:[%s13183_s27 + $0x140] sm:$0xff]  }
 0x1f9   : > { %12068 = vmatmul.mubr.msk.bf16.gmra.mrb[36].mxu0 %vm322_vm1, %v14783_v2  ;;  %v15064_v34 = vsel %vm1224_vm3, %v6840_v28, %v15952_v14  ;;  %v6195_v28 = vrot.slane %v14787_v3, 1  ;;  %v13059_v2 = vld [vmem:[%s15943_s1 + $0x40] sm:$0xff]   ;;  %v8061_v3 = vrot.slane %v14806_v35, 1 }
 0x1fa   : > { %12071 = vmatprep.mubr.msk.bf16.mxu0 %vm322_vm1, %v14806_v35  ;;  %v6201_v35 = vrot.slane %v14828_v17, 1 }
 0x1fe   : > { %11892 = vmatmul.mubr.msk.bf16.gmra.mrb[40].mxu1 %vm322_vm1, %v14796_v0  ;;  %v6198_v0 = vsel %vm578_vm4, %v6195_v28, %v6197_v50 }
 0x1ff   : > { %11895 = vmatprep.mubr.msk.bf16.mxu1 %vm322_vm1, %v14820_v29 }
 0x201   : > { %12072 = vmatmul.mubr.msk.bf16.gmra.mrb[40].mxu0 %vm322_vm1, %v14816_v51  ;;  %v8064_v51 = vsel %vm578_vm4, %v8061_v3, %v8063_v36  ;;  %v8289_v36 = vrot.slane %v14957_v44, 1 }
 0x202   : > { %12075 = vmatprep.mubr.msk.bf16.mxu0 %vm322_vm1, %v14846_v62  ;;  %v6419_v62 = vrot.slane %v14897_v59, 1 }
 0x206   : > { %11896 = vmatmul.mubr.msk.bf16.gmra.mrb[44].mxu1 %vm322_vm1, %v14828_v17  ;;  %v8220_v17 = vld [vmem:[%s13183_s27 + $0x10c] sm:$0xe] }
 0x207   : > { %11903 = vmatprep.mubr.msk.bf16.mxu1 %vm322_vm1, %v6190_v27  ;;  %v8062_v27 = vsel %vm578_vm4, %v8059_v10, %v8061_v3  ;;  %v8069_v10 = vrot.slane %v14881_v25, 1 }
 0x209   : > { %12076 = vmatmul.mubr.msk.bf16.gmra.mrb[44].mxu0 %vm322_vm1, %v14854_v49 }
 0x20a   : > { %12083 = vmatprep.mubr.msk.bf16.mxu0 %vm322_vm1, %v8056_v32  ;;  %v8067_v32 = vrot.slane %v14854_v49, 1 }
 0x20e   : > { %11904 = vmatmul.mubr.msk.bf16.vlgmr.msra.gmra.mrb[32].mxu1 %vm322_vm1, %v6192_v4  ;;  %v6203_v4 = vrot.slane %v14866_v18, 1 }
 0x20f   : > { %11920 = vmatpush3.bf16.msra.mxu1 %v14948_v24  ;;  %11907 = vmatprep.mubr.msk.bf16.mxu1 %vm322_vm1, %v6194_v30  ;;  %v6196_v24 = vsel %vm578_vm4, %v6193_v6, %v6195_v28 }
 0x210   : > { %11921 = vmatprep.subr.bf16.mxu1 %v13055_v60  ;;  %v6204_v49 = vsel %vm578_vm4, %v6201_v35, %v6203_v4  ;;  %v6429_v4 = vrot.slane %v15005_v11, 1 }
 0x211   : > { %12084 = vmatmul.mubr.msk.bf16.vlgmr.msra.gmra.mrb[32].mxu0 %vm322_vm1, %v8058_v61  ;;  %v8285_v61 = vrot.slane %v14906_v16, 1 }
 0x212   : > { %12100 = vmatpush3.bf16.msra.mxu0 %v14977_v58  ;;  %12087 = vmatprep.mubr.msk.bf16.mxu0 %vm322_vm1, %v8060_v53  ;;  %v6199_v58 = vrot.slane %v14820_v29, 1  ;;  %v15114_v29 = vcombine.low %v6354_v31, %v14900_v20  ;;  %v15126_v20 = vcombine.low %v8220_v17, %v14903_v56  ;;  %v6421_v56 = vrot.slane %v14910_v12, 1  ;;  %v13074_v31 = vld [vmem:[%s15943_s1 + $0x48] sm:$0xff]   ;;  %v15174_v17 = vld [vmem:[%s15943_s1 + $0x50] sm:$0xff]  }
 0x213   : > { %11922 = vmatpush3.bf16.msra.mxu1 %v13055_v60  ;;  %12101 = vmatprep.subr.bf16.mxu0 %v13056_v52  ;;  %v8068_v60 = vsel %vm578_vm4, %v8065_v21, %v8067_v32  ;;  %v6423_v53 = vrot.slane %v14954_v57, 1  ;;  %v8291_v21 = vrot.slane %v14968_v48, 1 }
 0x214   : > { %11939 = vmatprep.subr.bf16.mxu1 %v13059_v2  ;;  %v6200_v19 = vsel %vm578_vm4, %v6197_v50, %v6199_v58  ;;  %v6202_v6 = vsel %vm578_vm4, %v6199_v58, %v6201_v35  ;;  %v6418_v30 = vrot.slane %v15114_v29, 1  ;;  %v8284_v28 = vrot.slane %v15126_v20, 1 }
 0x215   : > { %v8070_v50 = vsel %vm578_vm4, %v8067_v32, %v8069_v10  ;;  %v6422_v25 = vsel %vm578_vm4, %v6419_v62, %v6421_v56  ;;  %v6424_v3 = vsel %vm578_vm4, %v6421_v56, %v6423_v53  ;;  %v6425_v58 = vrot.slane %v14960_v8, 1 }
 0x216   : > { %11908 = vmatmul.mubr.msk.bf16.gmra.mrb[36].mxu1 %vm322_vm1, %v6196_v24  ;;  %12102 = vmatpush3.bf16.msra.mxu0 %v13056_v52  ;;  %v6420_v18 = vsel %vm578_vm4, %v6418_v30, %v6419_v62  ;;  %v8286_v52 = vsel %vm578_vm4, %v8284_v28, %v8285_v61  ;;  %v8287_v24 = vrot.slane %v14924_v23, 1  ;;  %v6427_v35 = vrot.slane %v14999_v40, 1 }
 0x217   : > { %11911 = vmatprep.mubr.msk.bf16.mxu1 %vm322_vm1, %v6198_v0  ;;  %12119 = vmatprep.subr.bf16.mxu0 %v13064_v1  ;;  %v13070_v0 = vld [vmem:[%s15943_s1 + $0x48] sm:$0xff]   ;;  %v8293_v32 = vrot.slane %v15002_v33, 1  ;;  %v6593_v30 = vshrl.u32 %v15114_v29, 16  ;;  %v6596_v62 = vshll.u32 %v15114_v29, 16  ;;  %v8295_v28 = vrot.slane %v15015_v15, 1 }
 0x218   : > { %v8297_v56 = vrot.slane %v15052_v45, 1  ;;  %v8459_v29 = vshrl.u32 %v15126_v20, 16 }
 0x219   : > { %12088 = vmatmul.mubr.msk.bf16.gmra.mrb[36].mxu0 %vm322_vm1, %v8062_v27  ;;  %v8288_v27 = vsel %vm578_vm4, %v8285_v61, %v8287_v24  ;;  %v8294_v10 = vsel %vm578_vm4, %v8291_v21, %v8293_v32 }
 0x21a   : > { %12091 = vmatprep.mubr.msk.bf16.mxu0 %vm322_vm1, %v8064_v51  ;;  %v8290_v51 = vsel %vm578_vm4, %v8287_v24, %v8289_v36  ;;  %v6598_v24 = vrot.slane %v6596_v62, 2 }
 0x21e   : > { %11912 = vmatmul.mubr.msk.bf16.gmra.mrb[40].mxu1 %vm322_vm1, %v6200_v19  ;;  %v15162_v19 = vld [vmem:[%s15943_s1 + $0x50] sm:$0xff]  }
 0x21f   : > { %11915 = vmatprep.mubr.msk.bf16.mxu1 %vm322_vm1, %v6202_v6  ;;  %v6428_v6 = vsel %vm578_vm4, %v6425_v58, %v6427_v35 }
 0x221   : > { %12092 = vmatmul.mubr.msk.bf16.gmra.mrb[40].mxu0 %vm322_vm1, %v8066_v47  ;;  %v8292_v47 = vsel %vm578_vm4, %v8289_v36, %v8291_v21  ;;  %v6610_v36 = vshrl.u32 %v14910_v12, 16  ;;  %v6619_v21 = vshrl.u32 %v14954_v57, 16 }
 0x222   : > { %12095 = vmatprep.mubr.msk.bf16.mxu0 %vm322_vm1, %v8068_v60  ;;  %v6601_v60 = vshrl.u32 %v14897_v59, 16 }
 0x223   : > { %v6612_v62 = vrot.slane %v6610_v36, 1 }
 0x226   : > { %11916 = vmatmul.mubr.msk.bf16.gmra.mrb[44].mxu1 %vm322_vm1, %v6204_v49  ;;  %v6604_v49 = vshll.u32 %v14897_v59, 16  ;;  %v8467_v59 = vshrl.u32 %v14906_v16, 16 }
 0x227   : > { %11923 = vmatprep.mubr.msk.bf16.mxu1 %vm322_vm1, %v6420_v18  ;;  %v6430_v18 = vsel %vm578_vm4, %v6427_v35, %v6429_v4  ;;  %v8479_v35 = vshll.u32 %v14924_v23, 16 }
 0x229   : > { %12096 = vmatmul.mubr.msk.bf16.gmra.mrb[44].mxu0 %vm322_vm1, %v8070_v50  ;;  %v13077_v50 = vld [vmem:[%s13183_s27 + $0x10c] ss:$0 sps:$4 sm:$0x11]  }
 0x22a   : > { %12103 = vmatprep.mubr.msk.bf16.mxu0 %vm322_vm1, %v8286_v52  ;;  %v8470_v52 = vshll.u32 %v14906_v16, 16  ;;  %v8298_v16 = vsel %vm578_vm4, %v8295_v28, %v8297_v56 }
 0x22e   : > { %11924 = vmatmul.mubr.msk.bf16.vlgmr.msra.gmra.mrb[32].mxu1 %vm322_vm1, %v6422_v25  ;;  %v6595_v25 = vrot.slane %v6593_v30, 1  ;;  %v8469_v30 = vrot.slane %v8467_v59, 1 }
 0x22f   : > { %11940 = vmatpush3.bf16.msra.mxu1 %v13059_v2  ;;  %11927 = vmatprep.mubr.msk.bf16.mxu1 %vm322_vm1, %v6424_v3  ;;  %v6426_v2 = vsel %vm578_vm4, %v6423_v53, %v6425_v58  ;;  %v8462_v53 = vshll.u32 %v15126_v20, 16  ;;  %v6603_v3 = vrot.slane %v6601_v60, 1  ;;  %v6613_v58 = vshll.u32 %v14910_v12, 16  ;;  %v13078_v12 = vld [vmem:[%s13183_s27 + $0x14c] ss:$0 sps:$4 sm:$0x11]  }
 0x230   : > { %11941 = vmatprep.subr.bf16.mxu1 %v13070_v0  ;;  %v8296_v20 = vsel %vm578_vm4, %v8293_v32, %v8295_v28  ;;  %v8481_v32 = vrot.slane %v8479_v35, 2  ;;  %v8488_v28 = vshll.u32 %v14957_v44, 16 }
 0x231   : > { %12104 = vmatmul.mubr.msk.bf16.vlgmr.msra.gmra.mrb[32].mxu0 %vm322_vm1, %v8288_v27  ;;  %v8476_v27 = vshrl.u32 %v14924_v23, 16  ;;  %v8472_v23 = vrot.slane %v8470_v52, 2  ;;  %v6615_v60 = vrot.slane %v6613_v58, 2 }
 0x232   : > { %12120 = vmatpush3.bf16.msra.mxu0 %v13064_v1  ;;  %12107 = vmatprep.mubr.msk.bf16.mxu0 %vm322_vm1, %v8290_v51  ;;  %v6431_v1 = vrot.slane %v15049_v54, 1  ;;  %v6433_v51 = vrot.slane %v13077_v50, 1 }
 0x233   : > { %11942 = vmatpush3.bf16.msra.mxu1 %v13070_v0  ;;  %12121 = vmatprep.subr.bf16.mxu0 %v13074_v31  ;;  %v6606_v0 = vrot.slane %v6604_v49, 2  ;;  %v8478_v49 = vrot.slane %v8476_v27, 1 }
 0x234   : > { %11959 = vmatprep.subr.bf16.mxu1 %v15162_v19  ;;  %v6432_v61 = vsel %vm578_vm4, %v6429_v4, %v6431_v1  ;;  %v6599_v4 = vor.u32 %v6598_v24, %v6595_v25  ;;  %v8473_v25 = vor.u32 %v8472_v23, %v8469_v30  ;;  %v15242_v30 = vld [vmem:[%s13183_s27 + $0x11c] sm:$0xf]  ;;  %v15245_v23 = vld [vmem:[%s13183_s27 + $0x120] sm:$0xff]  }
 0x235   : > { %v15217_v24 = vor.u32 %v8481_v32, %v8478_v49  ;;  %v6649_v49 = vshll.u32 %v15005_v11, 16  ;;  %v7462_v32 = vld [vmem:[%s13183_s27 + $0xd8] sm:$0x8] }
 0x236   : > { %11928 = vmatmul.mubr.msk.bf16.gmra.mrb[36].mxu1 %vm322_vm1, %v6426_v2  ;;  %12122 = vmatpush3.bf16.msra.mxu0 %v13074_v31  ;;  %v8461_v31 = vrot.slane %v8459_v29, 1  ;;  %v8464_v2 = vrot.slane %v8462_v53, 2  ;;  %v6631_v29 = vshll.u32 %v14960_v8, 16  ;;  %v8299_v53 = vrot.slane %v13078_v12, 1 }
 0x237   : > { %11931 = vmatprep.mubr.msk.bf16.mxu1 %vm322_vm1, %v6428_v6  ;;  %12139 = vmatprep.subr.bf16.mxu0 %v15174_v17  ;;  %v6622_v6 = vshll.u32 %v14954_v57, 16  ;;  %v6628_v57 = vshrl.u32 %v14960_v8, 16  ;;  %v6640_v8 = vshll.u32 %v14999_v40, 16  ;;  %v8483_v12 = vsel %vm985_vm2, %v8473_v25, %v15217_v24 }
 0x238   : > { %v8465_v52 = vor.u32 %v8464_v2, %v8461_v31  ;;  %v6633_v27 = vrot.slane %v6631_v29, 2  ;;  %v8300_v35 = vsel %vm578_vm4, %v8297_v56, %v8299_v53  ;;  %v8506_v2 = vshll.u32 %v15002_v33, 16  ;;  %v15235_v56 = vld [vmem:[%s13183_s27 + $0xe0] sm:$0xff]  }
 0x239   : > { %12108 = vmatmul.mubr.msk.bf16.gmra.mrb[36].mxu0 %vm322_vm1, %v8292_v47  ;;  %v6607_v47 = vor.u32 %v6606_v0, %v6603_v3  ;;  %v6624_v50 = vrot.slane %v6622_v6, 2  ;;  %v8490_v3 = vrot.slane %v8488_v28, 2  ;;  %v6637_v0 = vshrl.u32 %v14999_v40, 16  ;;  %v15232_v6 = vld [vmem:[%s13183_s27 + $0xdc] sm:$0xf] }
 0x23a   : > { %12111 = vmatprep.mubr.msk.bf16.mxu0 %vm322_vm1, %v8294_v10  ;;  %v6434_v10 = vsel %vm578_vm4, %v6431_v1, %v6433_v51  ;;  %v6616_v1 = vor.u32 %v6615_v60, %v6612_v62  ;;  %v6630_v58 = vrot.slane %v6628_v57, 1  ;;  %v8497_v51 = vshll.u32 %v14968_v48, 16  ;;  %v13081_v28 = vld [vmem:[%s15943_s1 + $0x58] sm:$0xff]  }
 0x23b   : > { %v6608_v59 = vsel %vm985_vm2, %v6599_v4, %v6607_v47  ;;  %v8503_v40 = vshrl.u32 %v15002_v33, 16  ;;  %v15248_v33 = vld [vmem:[%s13183_s27 + $0xe8] sm:$0xff]   ;;  %v9337_v29 = vrot.slane %v15245_v23, 3 }
 0x23c   : > { %v6617_v31 = vsel %vm985_vm2, %v6607_v47, %v6616_v1  ;;  %v6642_v47 = vrot.slane %v6640_v8, 2  ;;  %v6634_v60 = vor.u32 %v6633_v27, %v6630_v58  ;;  %v6651_v27 = vrot.slane %v6649_v49, 2 }
 0x23d   : > { %v8512_v49 = vshrl.u32 %v15015_v15, 16 }
 0x23e   : > { %11932 = vmatmul.mubr.msk.bf16.gmra.mrb[40].mxu1 %vm322_vm1, %v6430_v18  ;;  %v8485_v18 = vshrl.u32 %v14957_v44, 16 }
 0x23f   : > { %11935 = vmatprep.mubr.msk.bf16.mxu1 %vm322_vm1, %v6432_v61  ;;  %v6621_v61 = vrot.slane %v6619_v21, 1  ;;  %v6646_v21 = vshrl.u32 %v15005_v11, 16  ;;  %v7473_v11 = vrot.slane %v15248_v33, 3 }
 0x240   : > { %v8487_v44 = vrot.slane %v8485_v18, 1  ;;  %v9328_v18 = vld [vmem:[%s13183_s27 + $0x118] sm:$0x8] }
 0x241   : > { %12112 = vmatmul.mubr.msk.bf16.gmra.mrb[40].mxu0 %vm322_vm1, %v8296_v20  ;;  %v6625_v36 = vor.u32 %v6624_v50, %v6621_v61  ;;  %v8474_v20 = vsel %vm985_vm2, %v8465_v52, %v8473_v25  ;;  %v15261_v61 = vld [vmem:[%s13183_s27 + $0x128] sm:$0xff]   ;;  %v10653_v50 = vcombine.low %v7462_v32, %v15232_v6  ;;  %v10807_v57 = vcombine.low %v9328_v18, %v15242_v30 }
 0x242   : > { %12115 = vmatprep.mubr.msk.bf16.mxu0 %vm322_vm1, %v8298_v16  ;;  %v8494_v16 = vshrl.u32 %v14968_v48, 16  ;;  %v15239_v4 = vor.u32 %v8490_v3, %v8487_v44  ;;  %v6639_v48 = vrot.slane %v6637_v0, 1  ;;  %v8505_v52 = vrot.slane %v8503_v40, 1 }
 0x243   : > { %v6626_v62 = vsel %vm985_vm2, %v6616_v1, %v6625_v36  ;;  %v8508_v25 = vrot.slane %v8506_v2, 2  ;;  %v7470_v1 = vrot.slane %v10653_v50, 3  ;;  %v9336_v44 = vrot.slane %v10807_v57, 3  ;;  %v15294_v2 = vld [vmem:[%s15943_s1 + $0x60] sm:$0xff]  }
 0x244   : > { %v8496_v53 = vrot.slane %v8494_v16, 1  ;;  %v9339_v0 = vrot.slane %v15261_v61, 3  ;;  %v6643_v8 = vor.u32 %v6642_v47, %v6639_v48  ;;  %v6648_v58 = vrot.slane %v6646_v21, 1  ;;  %v15297_v21 = vld [vmem:[%s13183_s27 + $0xf0] sm:$0xff]  }
 0x245   : > { %v6658_v16 = vshll.u32 %v15049_v54, 16  ;;  %v8492_v40 = vsel %vm985_vm2, %v15217_v24, %v15239_v4  ;;  %v15300_v48 = vld [vmem:[%s13183_s27 + $0x130] sm:$0xff]   ;;  %v6635_v47 = vsel %vm985_vm2, %v6625_v36, %v6634_v60  ;;  %v8515_v32 = vshll.u32 %v15015_v15, 16  ;;  %v15311_v50 = vld [vmem:[%s13183_s27 + $0x10c] ss:$0 sps:$4 sm:$0x33]  }
 0x246   : > { %11936 = vmatmul.mubr.msk.bf16.gmra.mrb[44].mxu1 %vm322_vm1, %v6434_v10  ;;  %v7471_v10 = vrot.slane %v15235_v56, 3  ;;  %v6644_v24 = vsel %vm985_vm2, %v6634_v60, %v6643_v8  ;;  %v8509_v18 = vor.u32 %v8508_v25, %v8505_v52  ;;  %v7475_v57 = vrot.slane %v15297_v21, 3 }
 0x247   : > { %11943 = vmatprep.mubr.msk.bf16.mxu1 %vm322_vm1, %v6608_v59  ;;  %v8499_v59 = vrot.slane %v8497_v51, 2  ;;  %v9341_v36 = vrot.slane %v15300_v48, 3  ;;  %v8521_v60 = vshrl.u32 %v15052_v45, 16 }
 0x248   : > { %v15269_v3 = vsel %vm1870_vm5, %v7471_v10, %v7473_v11  ;;  %v15280_v51 = vsel %vm1870_vm5, %v7470_v1, %v7471_v10  ;;  %v15306_v10 = vld [vmem:[%s13183_s27 + $0xf8] sm:$0xff]   ;;  %v15330_v52 = vsel %vm1870_vm5, %v7473_v11, %v7475_v57  ;;  %v8514_v1 = vrot.slane %v8512_v49, 1 }
 0x249   : > { %12116 = vmatmul.mubr.msk.bf16.gmra.mrb[44].mxu0 %vm322_vm1, %v8300_v35  ;;  %v6655_v35 = vshrl.u32 %v15049_v54, 16  ;;  %v15333_v25 = vsel %vm1870_vm5, %v9339_v0, %v9341_v36  ;;  %v6664_v11 = vshrl.u32 %v15311_v50, 16 }
 0x24a   : > { %12123 = vmatprep.mubr.msk.bf16.mxu0 %vm322_vm1, %v8474_v20  ;;  %v13082_v20 = vld [vmem:[%s15943_s1 + $0x58] sm:$0xff]   ;;  %15968 = vst [vmem:[#allocation3_spill] sm:$0xff] %v15333_v25 }
 0x24b   : > { %v6657_v15 = vrot.slane %v6655_v35, 1  ;;  %v6667_v35 = vshll.u32 %v15311_v50, 16 }
 0x24e   : > { %11944 = vmatmul.mubr.msk.bf16.vlgmr.msra.gmra.mrb[32].mxu1 %vm322_vm1, %v6617_v31  ;;  %v15286_v31 = vsel %vm1870_vm5, %v9337_v29, %v9339_v0 }
 0x24f   : > { %11960 = vmatpush3.bf16.msra.mxu1 %v15162_v19  ;;  %11947 = vmatprep.mubr.msk.bf16.mxu1 %vm322_vm1, %v6626_v62  ;;  %v15283_v19 = vsel %vm1870_vm5, %v9336_v44, %v9337_v29  ;;  %v8500_v62 = vor.u32 %v8499_v59, %v8496_v53  ;;  %v6652_v29 = vor.u32 %v6651_v27, %v6648_v58  ;;  %v6660_v53 = vrot.slane %v6658_v16, 2  ;;  %v15318_v59 = vld [vmem:[%s13183_s27 + $0x138] sm:$0xff]  }
 0x250   : > { %11961 = vmatprep.subr.bf16.mxu1 %v13081_v28  ;;  %v8517_v44 = vrot.slane %v8515_v32, 2  ;;  %v9343_v27 = vrot.slane %v15318_v59, 3  ;;  %v8523_v32 = vrot.slane %v8521_v60, 1  ;;  %v9345_v60 = vrot.slane %v15357_v39, 3 }
 0x251   : > { %12124 = vmatmul.mubr.msk.bf16.vlgmr.msra.gmra.mrb[32].mxu0 %vm322_vm1, %v8483_v12  ;;  %v7477_v12 = vrot.slane %v15306_v10, 3  ;;  %v8501_v0 = vsel %vm985_vm2, %v15239_v4, %v8500_v62  ;;  %v6661_v16 = vor.u32 %v6660_v53, %v6657_v15  ;;  %v8510_v49 = vsel %vm985_vm2, %v8500_v62, %v8509_v18  ;;  %v15361_v15 = vld [vmem:[%s13183_s27 + $0x108] sm:$0xff]  }
 0x252   : > { %12140 = vmatpush3.bf16.msra.mxu0 %v15174_v17  ;;  %12127 = vmatprep.mubr.msk.bf16.mxu0 %vm322_vm1, %v8492_v40  ;;  %v15327_v17 = vld [vmem:[%s15943_s1 + $0x60] sm:$0xff]   ;;  %v15346_v40 = vld [vmem:[%s13183_s27 + $0x14c] ss:$0 sps:$4 sm:$0x33]   ;;  %v6653_v4 = vsel %vm985_vm2, %v6643_v8, %v6652_v29  ;;  %v6669_v53 = vrot.slane %v6667_v35, 2  ;;  %v15378_v35 = vsel %vm1870_vm5, %v9343_v27, %v9345_v60 }
 0x253   : > { %11962 = vmatpush3.bf16.msra.mxu1 %v13081_v28  ;;  %12141 = vmatprep.subr.bf16.mxu0 %v13082_v20  ;;  %v8524_v28 = vshll.u32 %v15052_v45, 16  ;;  %v15337_v58 = vsel %vm1870_vm5, %v7475_v57, %v7477_v12  ;;  %v8530_v14 = vshrl.u32 %v15346_v40, 16  ;;  %v15371_v8 = vld [vmem:[%s13183_s27 + $0x148] sm:$0xff]  }
 0x254   : > { %11979 = vmatprep.subr.bf16.mxu1 %v15294_v2  ;;  %15969 = vst [vmem:[#allocation4_spill] sm:$0xff] %v15337_v58 }
 0x255   : > { %v8526_v57 = vrot.slane %v8524_v28, 2  ;;  %v6662_v28 = vsel %vm985_vm2, %v6652_v29, %v6661_v16  ;;  %v8532_v25 = vrot.slane %v8530_v14, 1 }
 0x256   : > { %11948 = vmatmul.mubr.msk.bf16.gmra.mrb[36].mxu1 %vm322_vm1, %v6635_v47  ;;  %12142 = vmatpush3.bf16.msra.mxu0 %v13082_v20  ;;  %v15349_v47 = vsel %vm1870_vm5, %v9341_v36, %v9343_v27  ;;  %v8518_v20 = vor.u32 %v8517_v44, %v8514_v1  ;;  %v6666_v36 = vrot.slane %v6664_v11, 1  ;;  %v7481_v1 = vrot.slane %v15361_v15, 3 }
 0x257   : > { %11951 = vmatprep.mubr.msk.bf16.mxu1 %vm322_vm1, %v6644_v24  ;;  %15970 = vst [vmem:[#allocation5_spill] sm:$0xff] %v15349_v47  ;;  %12159 = vmatprep.subr.bf16.mxu0 %v15327_v17  ;;  %v15354_v24 = vld [vmem:[%s13183_s27 + $0x100] sm:$0xff]   ;;  %v8533_v47 = vshll.u32 %v15346_v40, 16  ;;  %v8527_v44 = vor.u32 %v8526_v57, %v8523_v32  ;;  %v15392_v57 = vld [vmem:[%s13183_s27 + $0x110] sm:$0xff]  }
 0x258   : > { %v7479_v62 = vrot.slane %v15354_v24, 3  ;;  %v8519_v58 = vsel %vm985_vm2, %v8509_v18, %v8518_v20 }
 0x259   : > { %12128 = vmatmul.mubr.msk.bf16.gmra.mrb[36].mxu0 %vm322_vm1, %v8501_v0  ;;  %v9347_v0 = vrot.slane %v15371_v8, 3  ;;  %v8535_v32 = vrot.slane %v8533_v47, 2  ;;  %v8528_v27 = vsel %vm985_vm2, %v8518_v20, %v8527_v44 }
 0x25a   : > { %12131 = vmatprep.mubr.msk.bf16.mxu0 %vm322_vm1, %v8510_v49  ;;  %v15375_v11 = vsel %vm1870_vm5, %v7477_v12, %v7479_v62  ;;  %v15382_v29 = vsel %vm1870_vm5, %v7479_v62, %v7481_v1  ;;  %v6670_v49 = vor.u32 %v6669_v53, %v6666_v36 }
 0x25b   : > { %v15388_v12 = vsel %vm1870_vm5, %v9345_v60, %v9347_v0  ;;  %v8536_v14 = vor.u32 %v8535_v32, %v8532_v25  ;;  %v13089_v25 = vld [vmem:[%s15943_s1 + $0x68] sm:$0xff]   ;;  %v8930_v32 = vrot.slane %v15300_v48, 2 }
 0x25c   : > { %15971 = vst [vmem:[#allocation6_spill] sm:$0xff] %v15388_v12  ;;  %v6671_v62 = vsel %vm985_vm2, %v6661_v16, %v6670_v49  ;;  %v9613_v16 = vld [vmem:[#allocation2 + $0x79] ss:$2 sm:$0xf]  ;;  %v9607_v60 = vld [vmem:[#allocation2 + $0x68] ss:$2 sm:$0xff] }
 0x25d   : > { %v8928_v49 = vrot.slane %v15261_v61, 2 }
 0x25e   : > { %11952 = vmatmul.mubr.msk.bf16.gmra.mrb[40].mxu1 %vm322_vm1, %v6653_v4  ;;  %v15395_v4 = vld [vmem:[%s13183_s27 + $0x150] sm:$0xff]  }
 0x25f   : > { %11955 = vmatprep.mubr.msk.bf16.mxu1 %vm322_vm1, %v6662_v28  ;;  %v15954_v28 = vrot.slane %v15392_v57, 3  ;;  %v15953_v36 = vrot.slane %v15395_v4, 3 }
 0x261   : > { %12132 = vmatmul.mubr.msk.bf16.gmra.mrb[40].mxu0 %vm322_vm1, %v8519_v58  ;;  %v15405_v18 = vsel %vm1870_vm5, %v7481_v1, %v15954_v28  ;;  %v15410_v47 = vsel %vm1870_vm5, %v9347_v0, %v15953_v36  ;;  %v8537_v58 = vsel %vm985_vm2, %v8527_v44, %v8536_v14  ;;  %v7062_v1 = vrot.slane %v15248_v33, 2  ;;  %v9611_v44 = vld [vmem:[#allocation2 + $0x69] ss:$2 sm:$0xff]  ;;  %v15576_v28 = vld [vmem:[%s15943_s1 + $0x80] sm:$0xff]  }
 0x262   : > { %12135 = vmatprep.mubr.msk.bf16.mxu0 %vm322_vm1, %v8528_v27  ;;  %15972 = vst [vmem:[#allocation7_spill] sm:$0xff] %v15410_v47  ;;  %v15974_v14 = vrot.slane %v15052_v45, 2 }
 0x266   : > { %11956 = vmatmul.mubr.msk.bf16.gmra.mrb[44].mxu1 %vm322_vm1, %v6671_v62 }
 0x267   : > { %11963 = vmatprep.mubr.msk.bf16.mxu1 %vm322_vm1, %v14937_v46  ;;  %v13090_v46 = vld [vmem:[%s15943_s1 + $0x68] sm:$0xff]  }
 0x269   : > { %12136 = vmatmul.mubr.msk.bf16.gmra.mrb[44].mxu0 %vm322_vm1, %v8537_v58 }
 0x26a   : > { %12143 = vmatprep.mubr.msk.bf16.mxu0 %vm322_vm1, %v14940_v55  ;;  %v15433_v55 = vld [vmem:[%s15943_s1 + $0x70] sm:$0xff]  }
 0x26e   : > { %11964 = vmatmul.mubr.msk.bf16.vlgmr.msra.gmra.mrb[32].mxu1 %vm322_vm1, %v14933_v7  ;;  %v15444_v7 = vld [vmem:[%s15943_s1 + $0x70] sm:$0xff]  }
 0x26f   : > { %11980 = vmatpush3.bf16.msra.mxu1 %v15294_v2  ;;  %11967 = vmatprep.mubr.msk.bf16.mxu1 %vm322_vm1, %v14982_v13  ;;  %v7060_v2 = vrot.slane %v15235_v56, 2 }
 0x270   : > { %11981 = vmatprep.subr.bf16.mxu1 %v13089_v25 }
 0x271   : > { %12144 = vmatmul.mubr.msk.bf16.vlgmr.msra.gmra.mrb[32].mxu0 %vm322_vm1, %v14951_v38  ;;  %v6995_v38 = vld [vmem:[%s13183_s27 + $0xd8] sm:$0xc] }
 0x272   : > { %12160 = vmatpush3.bf16.msra.mxu0 %v15327_v17  ;;  %12147 = vmatprep.mubr.msk.bf16.mxu0 %vm322_vm1, %v14985_v42  ;;  %v15457_v13 = vcombine.low %v6995_v38, %v15232_v6  ;;  %v8861_v42 = vld [vmem:[%s13183_s27 + $0x118] sm:$0xc] }
 0x273   : > { %11982 = vmatpush3.bf16.msra.mxu1 %v13089_v25  ;;  %12161 = vmatprep.subr.bf16.mxu0 %v13090_v46  ;;  %v15468_v17 = vcombine.low %v8861_v42, %v15242_v30  ;;  %v9609_v6 = vld [vmem:[#allocation2 + $0x78] ss:$2 sm:$0xf]  ;;  %v8710_v30 = vrot.slane %v15346_v40, 2  ;;  %v7066_v25 = vrot.slane %v15306_v10, 2 }
 0x274   : > { %11999 = vmatprep.subr.bf16.mxu1 %v15433_v55  ;;  %v9615_v27 = vmax.f32 %v9609_v6, %v9613_v16  ;;  %v15513_v16 = vld [vmem:[%s13183_s27 + $0x158] ss:$0 sps:$4 sm:$0x33]  }
 0x275   : > { %v8711_v58 = vsel %vm1224_vm3, %v15974_v14, %v8710_v30  ;;  %v7070_v30 = vrot.slane %v15361_v15, 2 }
 0x276   : > { %11968 = vmatmul.mubr.msk.bf16.gmra.mrb[36].mxu1 %vm322_vm1, %v14988_v43  ;;  %12162 = vmatpush3.bf16.msra.mxu0 %v13090_v46  ;;  %v6844_v43 = vrot.slane %v15311_v50, 2  ;;  %v9614_v46 = vmax.f32 %v9607_v60, %v9611_v44  ;;  %v7072_v60 = vrot.slane %v15392_v57, 2 }
 0x277   : > { %11971 = vmatprep.mubr.msk.bf16.mxu1 %vm322_vm1, %v15019_v22  ;;  %12179 = vmatprep.subr.bf16.mxu0 %v15444_v7  ;;  %v7059_v22 = vrot.slane %v15457_v13, 2 }
 0x279   : > { %12148 = vmatmul.mubr.msk.bf16.gmra.mrb[36].mxu0 %vm322_vm1, %v14994_v5  ;;  %v7061_v53 = vsel %vm1224_vm3, %v7059_v22, %v7060_v2  ;;  %v7063_v22 = vsel %vm1224_vm3, %v7060_v2, %v7062_v1 }
 0x27a   : > { %12151 = vmatprep.mubr.msk.bf16.mxu0 %vm322_vm1, %v15022_v41 }
 0x27e   : > { %11972 = vmatmul.mubr.msk.bf16.gmra.mrb[40].mxu1 %vm322_vm1, %v15028_v37 }
 0x27f   : > { %11975 = vmatprep.mubr.msk.bf16.mxu1 %vm322_vm1, %v15064_v34  ;;  %v15973_v34 = vrot.slane %v15049_v54, 2  ;;  %v8926_v54 = vrot.slane %v15245_v23, 2 }
 0x281   : > { %v11665_v5 = vpop.f32.mrb[16].mxu1  ;;  %12152 = vmatmul.mubr.msk.bf16.gmra.mrb[40].mxu0 %vm322_vm1, %v15035_v9  ;;  %v6845_v50 = vsel %vm1224_vm3, %v15973_v34, %v6844_v43  ;;  %v8925_v9 = vrot.slane %v15468_v17, 2  ;;  %v15507_v6 = vsel %vm1224_vm3, %v8926_v54, %v8928_v49  ;;  %v8932_v34 = vrot.slane %v15318_v59, 2 }
 0x282   : > { %3906 = vst.msk [vmem:[#allocation2 + $0x90] sm:$0xff] %vm2037_vm7, %v11665_v5  ;;  %v3825_v41 = vpop.f32.mrb[17].mxu1  ;;  %12155 = vmatprep.mubr.msk.bf16.mxu0 %vm322_vm1, %v15069_v63  ;;  %v7064_v63 = vrot.slane %v15297_v21, 2  ;;  %v7068_v5 = vrot.slane %v15354_v24, 2 }
 0x283   : > { %3904 = vst.msk [vmem:[#allocation2 + $0x80] sm:$0xff] %vm2037_vm7, %v3825_v41  ;;  %v11666_v37 = vpop.f32.mrb[18].mxu1  ;;  %v8927_v43 = vsel %vm1224_vm3, %v8925_v9, %v8926_v54  ;;  %v15502_v41 = vld [vmem:[%s13183_s27 + $0x118] ss:$0 sps:$4 sm:$0x33]  }
 0x284   : > { %3907 = vst.msk [vmem:[#allocation2 + $0x98] sm:$0xff] %vm2037_vm7, %v11666_v37  ;;  %v3828_v20 = vpop.f32.mrb[19].mxu1  ;;  %v11845_v0 = vpop.f32.mrb[16].mxu0  ;;  %v7065_v37 = vsel %vm1224_vm3, %v7062_v1, %v7064_v63  ;;  %v15527_v44 = vsel %vm1224_vm3, %v7064_v63, %v7066_v25  ;;  %v7237_v63 = vshll.u32 %v15457_v13, 16 }
 0x285   : > { %3905 = vst.msk [vmem:[#allocation2 + $0x88] sm:$0xff] %vm2037_vm7, %v3828_v20  ;;  %5772 = vst.msk [vmem:[#allocation2 + $0x110] sm:$0xff] %vm2037_vm7, %v11845_v0  ;;  %v5691_v40 = vpop.f32.mrb[17].mxu0  ;;  %v15520_v20 = vsel %vm1224_vm3, %v8928_v49, %v8930_v32  ;;  %v13104_v0 = vld [vmem:[%s15943_s1 + $0x78] sm:$0xff]  }
 0x286   : > { %11976 = vmatmul.mubr.msk.bf16.gmra.mrb[44].mxu1 %vm322_vm1, %v6845_v50  ;;  %5770 = vst.msk [vmem:[#allocation2 + $0x100] sm:$0xff] %vm2037_vm7, %v5691_v40  ;;  %v11846_v62 = vpop.f32.mrb[18].mxu0  ;;  %v8934_v50 = vrot.slane %v15357_v39, 2  ;;  %v7234_v40 = vshrl.u32 %v15457_v13, 16 }
 0x287   : > { %11983 = vmatprep.mubr.msk.bf16.mxu1 %vm322_vm1, %v7061_v53  ;;  %5773 = vst.msk [vmem:[#allocation2 + $0x118] sm:$0xff] %vm2037_vm7, %v11846_v62  ;;  %v5694_v38 = vpop.f32.mrb[19].mxu0  ;;  %v8936_v53 = vrot.slane %v15371_v8, 2 }
 0x288   : > { %5771 = vst.msk [vmem:[#allocation2 + $0x108] sm:$0xff] %vm2037_vm7, %v5694_v38  ;;  %v7242_v38 = vshrl.u32 %v15235_v56, 16  ;;  %v15569_v36 = vrot.slane %v7234_v40, 2  ;;  %v9117_v40 = vshrl.u32 %v15261_v61, 16 }
 0x289   : > { %v11669_v42 = vpop.f32.mrb[20].mxu1  ;;  %12156 = vmatmul.mubr.msk.bf16.gmra.mrb[44].mxu0 %vm322_vm1, %v8711_v58  ;;  %v15538_v58 = vsel %vm1224_vm3, %v7066_v25, %v7068_v5 }
 0x28a   : > { %3910 = vst.msk [vmem:[#allocation2 + $0xb0] sm:$0xff] %vm2037_vm7, %v11669_v42  ;;  %v3841_v45 = vpop.f32.mrb[21].mxu1  ;;  %12163 = vmatprep.mubr.msk.bf16.mxu0 %vm322_vm1, %v8927_v43 }
 0x28b   : > { %v9619_v2 = vld [vmem:[#allocation2 + $0x92] ss:$2 sm:$0xf]  ;;  %3908 = vst.msk [vmem:[#allocation2 + $0xa0] sm:$0xff] %vm2037_vm7, %v3841_v45  ;;  %v11670_v1 = vpop.f32.mrb[22].mxu1 }
 0x28c   : > { %v9621_v9 = vmax.f32 %v9615_v27, %v9619_v2  ;;  %v9617_v54 = vld [vmem:[#allocation2 + $0x82] ss:$2 sm:$0xff]  ;;  %v9625_v62 = vld [vmem:[#allocation2 + $0x93] ss:$2 sm:$0xf]  ;;  %3911 = vst.msk [vmem:[#allocation2 + $0xb8] sm:$0xff] %vm2037_vm7, %v11670_v1 }
 0x28d   : > { %v9620_v14 = vmax.f32 %v9614_v46, %v9617_v54  ;;  %v3844_v27 = vpop.f32.mrb[23].mxu1  ;;  %v9623_v43 = vld [vmem:[#allocation2 + $0x83] ss:$2 sm:$0xff]  ;;  %v11849_v45 = vpop.f32.mrb[20].mxu0  ;;  %v7245_v2 = vshll.u32 %v15235_v56, 16  ;;  %v9100_v54 = vshrl.u32 %v15468_v17, 16 }
 0x28e   : > { %v9627_v42 = vmax.f32 %v9621_v9, %v9625_v62  ;;  %3909 = vst.msk [vmem:[#allocation2 + $0xa8] sm:$0xff] %vm2037_vm7, %v3844_v27  ;;  %11984 = vmatmul.mubr.msk.bf16.vlgmr.msra.gmra.mrb[32].mxu1 %vm322_vm1, %v7063_v22  ;;  %5776 = vst.msk [vmem:[#allocation2 + $0x130] sm:$0xff] %vm2037_vm7, %v11849_v45  ;;  %v5707_v25 = vpop.f32.mrb[21].mxu0  ;;  %v9103_v9 = vshll.u32 %v15468_v17, 16  ;;  %v9108_v22 = vshrl.u32 %v15245_v23, 16  ;;  %v7251_v17 = vshrl.u32 %v15248_v33, 16 }
 0x28f   : > { %v9626_v1 = vmax.f32 %v9620_v14, %v9623_v43  ;;  %12000 = vmatpush3.bf16.msra.mxu1 %v15433_v55  ;;  %11987 = vmatprep.mubr.msk.bf16.mxu1 %vm322_vm1, %v7065_v37  ;;  %v15556_v56 = vld [vmem:[%s15944_s2] ss:$0 sm:$0xff]  ;;  %5774 = vst.msk [vmem:[#allocation2 + $0x120] sm:$0xff] %vm2037_vm7, %v5707_v25  ;;  %v15563_v55 = vld [vmem:[%s15943_s1 + $0x78] sm:$0xff]   ;;  %v9111_v37 = vshll.u32 %v15245_v23, 16  ;;  %v7254_v14 = vshll.u32 %v15248_v33, 16 }
 0x290   : > { %v9629_v62 = vadd.f32 %v15556_v56, %v9627_v42  ;;  %12001 = vmatprep.subr.bf16.mxu1 %v13104_v0  ;;  %v11850_v43 = vpop.f32.mrb[22].mxu0  ;;  %v15571_v42 = vrot.slane %v7237_v63, 3  ;;  %v7244_v25 = vrot.slane %v7242_v38, 2  ;;  %v15580_v46 = vrot.slane %v9100_v54, 2 }
 0x291   : > { %v9628_v27 = vadd.f32 %v15556_v56, %v9626_v1  ;;  %v11673_v45 = vpop.f32.mrb[24].mxu1  ;;  %5777 = vst.msk [vmem:[#allocation2 + $0x138] sm:$0xff] %vm2037_vm7, %v11850_v43  ;;  %v5710_v23 = vpop.f32.mrb[23].mxu0  ;;  %v7247_v1 = vrot.slane %v7245_v2, 3  ;;  %12164 = vmatmul.mubr.msk.bf16.vlgmr.msra.gmra.mrb[32].mxu0 %vm322_vm1, %v15507_v6  ;;  %v15589_v43 = vrot.slane %v9108_v22, 2  ;;  %v9120_v2 = vshll.u32 %v15261_v61, 16 }
 0x292   : > { %v9631_v13 = vmax.f32 %v9629_v62, 0.0  ;;  %3914 = vst.msk [vmem:[#allocation2 + $0xd0] sm:$0xff] %vm2037_vm7, %v11673_v45  ;;  %v3857_v33 = vpop.f32.mrb[25].mxu1  ;;  %5775 = vst.msk [vmem:[#allocation2 + $0x128] sm:$0xff] %vm2037_vm7, %v5710_v23  ;;  %v15587_v62 = vrot.slane %v9103_v9, 3  ;;  %12180 = vmatpush3.bf16.msra.mxu0 %v15444_v7  ;;  %12167 = vmatprep.mubr.msk.bf16.mxu0 %vm322_vm1, %v15520_v20  ;;  %v15596_v6 = vrot.slane %v9111_v37, 3 }
 0x293   : > { %v9630_v63 = vmax.f32 %v9628_v27, 0.0  ;;  %3912 = vst.msk [vmem:[#allocation2 + $0xc0] sm:$0xff] %vm2037_vm7, %v3857_v33  ;;  %v11674_v38 = vpop.f32.mrb[26].mxu1  ;;  %12002 = vmatpush3.bf16.msra.mxu1 %v13104_v0  ;;  %v15598_v45 = vrot.slane %v7251_v17, 2  ;;  %v15600_v0 = vrot.slane %v7254_v14, 3  ;;  %v15605_v61 = vld [vmem:[%s15943_s1 + $0x80] sm:$0xff]   ;;  %12181 = vmatprep.subr.bf16.mxu0 %v15563_v55  ;;  %v8933_v17 = vsel %vm1224_vm3, %v8930_v32, %v8932_v34 }
 0x294   : > { %v10850_v54 = vpack.c.bf16 %v9631_v13, %v9631_v13  ;;  %3915 = vst.msk [vmem:[#allocation2 + $0xd8] sm:$0xff] %vm2037_vm7, %v11674_v38  ;;  %v3860_v27 = vpop.f32.mrb[27].mxu1  ;;  %v9721_v13 = vld [vmem:[#allocation2 + $0x114] ss:$2 sm:$0xf]  ;;  %12019 = vmatprep.subr.bf16.mxu1 %v15576_v28  ;;  %v11853_v37 = vpop.f32.mrb[24].mxu0 }
 0x295   : > { %v9725_v7 = vld [vmem:[#allocation2 + $0x115] ss:$2 sm:$0xf]  ;;  %v10849_v9 = vpack.c.bf16 %v9630_v63, %v9630_v63  ;;  %3913 = vst.msk [vmem:[#allocation2 + $0xc8] sm:$0xff] %vm2037_vm7, %v3860_v27  ;;  %v9719_v20 = vld [vmem:[#allocation2 + $0x104] ss:$2 sm:$0xff] }
 0x296   : > { %9641 = vst.msk [vmem:[%s14583_s7 + $0x10] sm:$0x3] %vm9560_vm9, %v10850_v54  ;;  %v9723_v22 = vld [vmem:[#allocation2 + $0x105] ss:$2 sm:$0xff]  ;;  %11988 = vmatmul.mubr.msk.bf16.gmra.mrb[36].mxu1 %vm322_vm1, %v15527_v44  ;;  %v15619_v14 = vrot.slane %v9117_v40, 2  ;;  %v5723_v33 = vpop.f32.mrb[25].mxu0  ;;  %v8935_v44 = vsel %vm1224_vm3, %v8932_v34, %v8934_v50  ;;  %v15644_v34 = vsel %vm1224_vm3, %v8934_v50, %v8936_v53  ;;  %12182 = vmatpush3.bf16.msra.mxu0 %v15563_v55 }
 0x297   : > { %9640 = vst.msk [vmem:[%s14583_s7 + $0xc] sm:$0xf] %vm9558_vm8, %v10849_v9  ;;  %v9643_v23 = vld [vmem:[#allocation2 + $0x9c] ss:$2 sm:$0xff]  ;;  %11991 = vmatprep.mubr.msk.bf16.mxu1 %vm322_vm1, %v15538_v58  ;;  %v9122_v63 = vrot.slane %v9120_v2, 3  ;;  %v7260_v32 = vshrl.u32 %v15297_v21, 16  ;;  %v7071_v58 = vsel %vm1224_vm3, %v7068_v5, %v7070_v30  ;;  %v7240_v2 = vor.u32 %v15571_v42, %v15569_v36  ;;  %12199 = vmatprep.subr.bf16.mxu0 %v15605_v61 }
 0x298   : > { %5780 = vst.msk [vmem:[#allocation2 + $0x150] sm:$0xff] %vm2037_vm7, %v11853_v37  ;;  %v9645_v38 = vld [vmem:[#allocation2 + $0xac] ss:$2 sm:$0xf]  ;;  %v9647_v54 = vld [vmem:[#allocation2 + $0x9d] ss:$2 sm:$0xff]  ;;  %v15649_v9 = vor.u32 %v7247_v1, %v7244_v25  ;;  %v9727_v37 = vmax.f32 %v9721_v13, %v9725_v7  ;;  %v7073_v50 = vsel %vm1224_vm3, %v7070_v30, %v7072_v60 }
 0x299   : > { %5778 = vst.msk [vmem:[#allocation2 + $0x140] sm:$0xff] %vm2037_vm7, %v5723_v33  ;;  %v11854_v27 = vpop.f32.mrb[26].mxu0  ;;  %v9726_v33 = vmax.f32 %v9719_v20, %v9723_v22  ;;  %v9649_v40 = vld [vmem:[#allocation2 + $0xad] ss:$2 sm:$0xf]  ;;  %v11677_v49 = vpop.f32.mrb[28].mxu1  ;;  %12168 = vmatmul.mubr.msk.bf16.gmra.mrb[36].mxu0 %vm322_vm1, %v8933_v17 }
 0x29a   : > { %5781 = vst.msk [vmem:[#allocation2 + $0x158] sm:$0xff] %vm2037_vm7, %v11854_v27  ;;  %v5726_v5 = vpop.f32.mrb[27].mxu0  ;;  %v9126_v55 = vshrl.u32 %v15300_v48, 16  ;;  %v9729_v36 = vld [vmem:[#allocation2 + $0x11e] ss:$2 sm:$0xff]  ;;  %3918 = vst.msk [vmem:[#allocation2 + $0xf0] sm:$0xff] %vm2037_vm7, %v11677_v49  ;;  %v9106_v27 = vor.u32 %v15587_v62, %v15580_v46  ;;  %12171 = vmatprep.mubr.msk.bf16.mxu0 %vm322_vm1, %v8935_v44  ;;  %v15691_v46 = vsel %vm1631_vm6, %v7240_v2, %v15649_v9 }
 0x29b   : > { %v9731_v42 = vld [vmem:[#allocation2 + $0x12e] ss:$2 sm:$0xf]  ;;  %5779 = vst.msk [vmem:[#allocation2 + $0x148] sm:$0xff] %vm2037_vm7, %v5726_v5  ;;  %v3873_v25 = vpop.f32.mrb[29].mxu1  ;;  %v15975_v1 = vrot.slane %v15395_v4, 2  ;;  %v9650_v5 = vmax.f32 %v9643_v23, %v9647_v54  ;;  %v9114_v62 = vor.u32 %v15596_v6, %v15589_v43  ;;  %v15701_v44 = vor.u32 %v15600_v0, %v15598_v45 }
 0x29c   : > { %v15976_v30 = vrot.slane %v15502_v41, 2  ;;  %v15977_v20 = vrot.slane %v15513_v16, 2  ;;  %v9735_v47 = vld [vmem:[#allocation2 + $0x11f] ss:$2 sm:$0xff]  ;;  %3916 = vst.msk [vmem:[#allocation2 + $0xe0] sm:$0xff] %vm2037_vm7, %v3873_v25  ;;  %v11678_v41 = vpop.f32.mrb[30].mxu1  ;;  %v9651_v16 = vmax.f32 %v9645_v38, %v9649_v40  ;;  %v15704_v43 = vor.u32 %v9122_v63, %v15619_v14 }
 0x29d   : > { %v15666_v13 = vsel %vm1224_vm3, %v8936_v53, %v15975_v1  ;;  %v15978_v22 = vmov %v15975_v1  ;;  %v9732_v53 = vmax.f32 %v9726_v33, %v9729_v36  ;;  %v9733_v1 = vmax.f32 %v9727_v37, %v9731_v42  ;;  %v9653_v12 = vld [vmem:[#allocation2 + $0xb6] ss:$2 sm:$0xff]  ;;  %3919 = vst.msk [vmem:[#allocation2 + $0xf8] sm:$0xff] %vm2037_vm7, %v11678_v41  ;;  %v3876_v40 = vpop.f32.mrb[31].mxu1  ;;  %v9659_v33 = vld [vmem:[#allocation2 + $0xb7] ss:$2 sm:$0xff] }
 0x29e   : > { %v15673_v7 = vsel %vm1224_vm3, %v7072_v60, %v15976_v30  ;;  %v15680_v49 = vsel %vm1224_vm3, %v15978_v22, %v15977_v20  ;;  %v9129_v60 = vshll.u32 %v15300_v48, 16  ;;  %v9737_v30 = vld [vmem:[#allocation2 + $0x12f] ss:$2 sm:$0xf]  ;;  %v7269_v17 = vshrl.u32 %v15306_v10, 16  ;;  %v11857_v42 = vpop.f32.mrb[28].mxu0  ;;  %11992 = vmatmul.mubr.msk.bf16.gmra.mrb[40].mxu1 %vm322_vm1, %v7071_v58 }
 0x29f   : > { %v9738_v23 = vmax.f32 %v9732_v53, %v9735_v47  ;;  %v9739_v54 = vmax.f32 %v9733_v1, %v9737_v30  ;;  %v9656_v37 = vmax.f32 %v9650_v5, %v9653_v12  ;;  %v9655_v48 = vld [vmem:[#allocation2 + $0xc6] ss:$2 sm:$0xf]  ;;  %v7272_v38 = vshll.u32 %v15306_v10, 16  ;;  %3917 = vst.msk [vmem:[#allocation2 + $0xe8] sm:$0xff] %vm2037_vm7, %v3876_v40  ;;  %5784 = vst.msk [vmem:[#allocation2 + $0x170] sm:$0xff] %vm2037_vm7, %v11857_v42 }
 0x2a0   : > { %v9657_v36 = vmax.f32 %v9651_v16, %v9655_v48  ;;  %v7262_v47 = vrot.slane %v7260_v32, 2  ;;  %v9661_v2 = vld [vmem:[#allocation2 + $0xc7] ss:$2 sm:$0xf]  ;;  %v5739_v25 = vpop.f32.mrb[29].mxu0  ;;  %11995 = vmatprep.mubr.msk.bf16.mxu1 %vm322_vm1, %v7073_v50  ;;  %v15979_v58 = vshll.u32 %v15297_v21, 16 }
 0x2a1   : > { %v9740_v12 = vadd.f32 %v15556_v56, %v9738_v23  ;;  %v9741_v6 = vadd.f32 %v15556_v56, %v9739_v54  ;;  %v9662_v10 = vmax.f32 %v9656_v37, %v9659_v33  ;;  %v9683_v45 = vld [vmem:[#allocation2 + $0xd0] ss:$2 sm:$0xff]  ;;  %5782 = vst.msk [vmem:[#allocation2 + $0x160] sm:$0xff] %vm2037_vm7, %v5739_v25  ;;  %v11858_v14 = vpop.f32.mrb[30].mxu0  ;;  %v9128_v63 = vrot.slane %v9126_v55, 2  ;;  %12172 = vmatmul.mubr.msk.bf16.gmra.mrb[40].mxu0 %vm322_vm1, %v15644_v34 }
 0x2a2   : > { %v7265_v20 = vrot.slane %v15979_v58, 3  ;;  %v9663_v0 = vmax.f32 %v9657_v36, %v9661_v2  ;;  %v9131_v32 = vrot.slane %v9129_v60, 3  ;;  %v15713_v22 = vrot.slane %v7269_v17, 2  ;;  %v9687_v41 = vld [vmem:[#allocation2 + $0xd1] ss:$2 sm:$0xff]  ;;  %5785 = vst.msk [vmem:[#allocation2 + $0x178] sm:$0xff] %vm2037_vm7, %v11858_v14  ;;  %12175 = vmatprep.mubr.msk.bf16.mxu0 %vm322_vm1, %v15666_v13 }
 0x2a3   : > { %v9742_v5 = vmax.f32 %v9740_v12, 0.0  ;;  %v9743_v53 = vmax.f32 %v9741_v6, 0.0  ;;  %v9664_v1 = vadd.f32 %v15556_v56, %v9662_v10  ;;  %v5742_v50 = vpop.f32.mrb[31].mxu0  ;;  %v7274_v16 = vrot.slane %v7272_v38, 3  ;;  %v9759_v21 = vld [vmem:[#allocation2 + $0x138] ss:$2 sm:$0xff] }
 0x2a4   : > { %v9665_v30 = vadd.f32 %v15556_v56, %v9663_v0  ;;  %v9685_v23 = vld [vmem:[#allocation2 + $0xe0] ss:$2 sm:$0xf]  ;;  %5783 = vst.msk [vmem:[#allocation2 + $0x168] sm:$0xff] %vm2037_vm7, %v5742_v50  ;;  %v15720_v55 = vsel %vm1631_vm6, %v9106_v27, %v9114_v62  ;;  %v15725_v60 = vsel %vm1631_vm6, %v15649_v9, %v15701_v44  ;;  %v9135_v17 = vshrl.u32 %v15318_v59, 16 }
 0x2a5   : > { %v10855_v54 = vpack.c.bf16 %v9742_v5, %v9742_v5  ;;  %v10856_v37 = vpack.c.bf16 %v9743_v53, %v9743_v53  ;;  %v9666_v48 = vmax.f32 %v9664_v1, 0.0  ;;  %v9763_v40 = vld [vmem:[#allocation2 + $0x139] ss:$2 sm:$0xff]  ;;  %v9761_v38 = vld [vmem:[#allocation2 + $0x148] ss:$2 sm:$0xf]  ;;  %v15732_v27 = vsel %vm1631_vm6, %v9114_v62, %v15704_v43 }
 0x2a6   : > { %v9689_v33 = vld [vmem:[#allocation2 + $0xe1] ss:$2 sm:$0xf]  ;;  %v9667_v36 = vmax.f32 %v9665_v30, 0.0  ;;  %v15736_v9 = vor.u32 %v7265_v20, %v7262_v47  ;;  %v9138_v6 = vshll.u32 %v15318_v59, 16  ;;  %v9690_v25 = vmax.f32 %v9683_v45, %v9687_v41  ;;  %11996 = vmatmul.mubr.msk.bf16.gmra.mrb[44].mxu1 %vm322_vm1, %v15673_v7 }
 0x2a7   : > { %v9691_v42 = vmax.f32 %v9685_v23, %v9689_v33  ;;  %v9695_v12 = vld [vmem:[#allocation2 + $0xfa] ss:$2 sm:$0xf]  ;;  %v9750_v10 = vrot.slane %v10855_v54, 6  ;;  %v10851_v2 = vpack.c.bf16 %v9666_v48, %v9666_v48  ;;  %v7278_v34 = vshrl.u32 %v15354_v24, 16  ;;  %12003 = vmatprep.mubr.msk.bf16.mxu1 %vm322_vm1, %v15691_v46 }
 0x2a8   : > { %v9765_v58 = vld [vmem:[#allocation2 + $0x149] ss:$2 sm:$0xf]  ;;  %v9766_v0 = vmax.f32 %v9759_v21, %v9763_v40  ;;  %v10852_v62 = vpack.c.bf16 %v9667_v36, %v9667_v36  ;;  %v9701_v5 = vld [vmem:[#allocation2 + $0xfb] ss:$2 sm:$0xf]  ;;  %v15751_v33 = vor.u32 %v9131_v32, %v9128_v63 }
 0x2a9   : > { %v9697_v14 = vmax.f32 %v9691_v42, %v9695_v12  ;;  %v9693_v53 = vld [vmem:[#allocation2 + $0xea] ss:$2 sm:$0xff]  ;;  %v7281_v13 = vshll.u32 %v15354_v24, 16  ;;  %v9751_v47 = vrot.slane %v9750_v10, 4  ;;  %v9752_v20 = vrot.slane %v10856_v37, 6  ;;  %12176 = vmatmul.mubr.msk.bf16.gmra.mrb[44].mxu0 %vm322_vm1, %v15680_v49 }
 0x2aa   : > { %9756 = vst.msk [vmem:[%s14583_s7 + $0x1c] sm:$0xc] %vm9603_vm10, %v9750_v10  ;;  %v9674_v1 = vrot.slane %v10851_v2, 6  ;;  %v9769_v45 = vld [vmem:[#allocation2 + $0x152] ss:$2 sm:$0xff]  ;;  %v9696_v41 = vmax.f32 %v9690_v25, %v9693_v53  ;;  %v9676_v50 = vrot.slane %v10852_v62, 6  ;;  %v9767_v21 = vmax.f32 %v9761_v38, %v9765_v58  ;;  %12183 = vmatprep.mubr.msk.bf16.mxu0 %vm322_vm1, %v15720_v55 }
 0x2ab   : > { %v9772_v30 = vmax.f32 %v9766_v0, %v9769_v45  ;;  %v9703_v23 = vmax.f32 %v9697_v14, %v9701_v5  ;;  %v9699_v54 = vld [vmem:[#allocation2 + $0xeb] ss:$2 sm:$0xff]  ;;  %v9753_v7 = vsel %vm14643_vm13, %v9751_v47, %v9752_v20  ;;  %v9771_v40 = vld [vmem:[#allocation2 + $0x162] ss:$2 sm:$0xf]  ;;  %v7275_v42 = vor.u32 %v7274_v16, %v15713_v22 }
 0x2ac   : > { %v9675_v24 = vrot.slane %v9674_v1, 4  ;;  %9680 = vst.msk [vmem:[%s14583_s7 + $0x10] sm:$0xc] %vm9603_vm10, %v9674_v1  ;;  %v9775_v37 = vld [vmem:[#allocation2 + $0x153] ss:$2 sm:$0xff]  ;;  %v9702_v48 = vmax.f32 %v9696_v41, %v9699_v54  ;;  %v9773_v36 = vmax.f32 %v9767_v21, %v9771_v40  ;;  %v7280_v25 = vrot.slane %v7278_v34, 2 }
 0x2ad   : > { %9757 = vst.msk [vmem:[%s14583_s7 + $0x20] sm:$0xf] %vm9558_vm8, %v9753_v7  ;;  %v9778_v46 = vmax.f32 %v9772_v30, %v9775_v37  ;;  %v9705_v38 = vadd.f32 %v15556_v56, %v9703_v23  ;;  %v9777_v2 = vld [vmem:[#allocation2 + $0x163] ss:$2 sm:$0xf]  ;;  %v7283_v63 = vrot.slane %v7281_v13, 3  ;;  %v7267_v22 = vsel %vm1631_vm6, %v15701_v44, %v15736_v9 }
 0x2ae   : > { %v9677_v12 = vsel %vm14643_vm13, %v9675_v24, %v9676_v50  ;;  %v9704_v10 = vadd.f32 %v15556_v56, %v9702_v48  ;;  %v9779_v0 = vmax.f32 %v9773_v36, %v9777_v2  ;;  %v13115_v16 = vld [vmem:[%s15943_s1 + $0x88] sm:$0xff]   ;;  %v9137_v34 = vrot.slane %v9135_v17, 2  ;;  %12004 = vmatmul.mubr.msk.bf16.vlgmr.msra.gmra.mrb[32].mxu1 %vm322_vm1, %v15725_v60  ;;  %v15804_v54 = vld [vmem:[%s13183_s27 + $0x118] ss:$0 sps:$4 sm:$0x77]  }
 0x2af   : > { %9681 = vst.msk [vmem:[%s14583_s7 + $0x14] sm:$0xf] %vm9558_vm8, %v9677_v12  ;;  %v9780_v32 = vadd.f32 %v15556_v56, %v9778_v46  ;;  %v9707_v58 = vmax.f32 %v9705_v38, 0.0  ;;  %v9144_v62 = vshrl.u32 %v15357_v39, 16  ;;  %v9147_v14 = vshll.u32 %v15357_v39, 16  ;;  %12020 = vmatpush3.bf16.msra.mxu1 %v15576_v28  ;;  %12007 = vmatprep.mubr.msk.bf16.mxu1 %vm322_vm1, %v7267_v22 }
 0x2b0   : > { %v9706_v49 = vmax.f32 %v9704_v10, 0.0  ;;  %v9781_v55 = vadd.f32 %v15556_v56, %v9779_v0  ;;  %v9140_v44 = vrot.slane %v9138_v6, 3  ;;  %v7284_v59 = vor.u32 %v7283_v63, %v7280_v25  ;;  %12021 = vmatprep.subr.bf16.mxu1 %v13115_v16  ;;  %v13118_v10 = vld [vmem:[%s13183_s27 + $0x158] ss:$0 sps:$4 sm:$0x77]  }
 0x2b1   : > { %v9782_v5 = vmax.f32 %v9780_v32, 0.0  ;;  %v10854_v53 = vpack.c.bf16 %v9707_v58, %v9707_v58  ;;  %v7287_v17 = vshrl.u32 %v15361_v15, 16  ;;  %v7290_v39 = vshll.u32 %v15361_v15, 16  ;;  %v13116_v15 = vld [vmem:[%s15943_s1 + $0x88] sm:$0xff]   ;;  %12184 = vmatmul.mubr.msk.bf16.vlgmr.msra.gmra.mrb[32].mxu0 %vm322_vm1, %v15732_v27 }
 0x2b2   : > { %v10853_v13 = vpack.c.bf16 %v9706_v49, %v9706_v49  ;;  %v9783_v20 = vmax.f32 %v9781_v55, 0.0  ;;  %v7296_v1 = vshrl.u32 %v15392_v57, 16  ;;  %v7299_v60 = vshll.u32 %v15392_v57, 16  ;;  %12200 = vmatpush3.bf16.msra.mxu0 %v15605_v61 }
 0x2b3   : > { %v10857_v47 = vpack.c.bf16 %v9782_v5, %v9782_v5  ;;  %9717 = vst.msk [vmem:[%s14583_s7 + $0x1c] sm:$0x3] %vm9560_vm9, %v10854_v53  ;;  %v9133_v28 = vsel %vm1631_vm6, %v15704_v43, %v15751_v33  ;;  %v9146_v6 = vrot.slane %v9144_v62, 2  ;;  %v9149_v45 = vrot.slane %v9147_v14, 3  ;;  %12022 = vmatpush3.bf16.msra.mxu1 %v13115_v16  ;;  %12201 = vmatprep.subr.bf16.mxu0 %v13116_v15 }
 0x2b4   : > { %9716 = vst.msk [vmem:[%s14583_s7 + $0x18] sm:$0xf] %vm9558_vm8, %v10853_v13  ;;  %v10858_v41 = vpack.c.bf16 %v9783_v20, %v9783_v20  ;;  %v7276_v50 = vsel %vm1631_vm6, %v15736_v9, %v7275_v42  ;;  %v9141_v21 = vor.u32 %v9140_v44, %v9137_v34  ;;  %v7289_v30 = vrot.slane %v7287_v17, 2  ;;  %12187 = vmatprep.mubr.msk.bf16.mxu0 %vm322_vm1, %v9133_v28  ;;  %v15980_v17 = vld [vmem:[#allocation3_spill] sm:$0xff]  ;;  %v9795_v28 = vld [vmem:[#allocation2 + $0x16c] ss:$2 sm:$0xff] }
 0x2b5   : > { %9792 = vst.msk [vmem:[%s14583_s7 + $0x24] sm:$0xf] %vm9558_vm8, %v10857_v47  ;;  %v7292_v23 = vrot.slane %v7290_v39, 3  ;;  %v9153_v43 = vshrl.u32 %v15371_v8, 16  ;;  %v7285_v7 = vsel %vm1631_vm6, %v7275_v42, %v7284_v59  ;;  %v9156_v9 = vshll.u32 %v15371_v8, 16  ;;  %v15982_v39 = vld [vmem:[#allocation5_spill] sm:$0xff] }
 0x2b6   : > { %9793 = vst.msk [vmem:[%s14583_s7 + $0x28] sm:$0x3] %vm9560_vm9, %v10858_v41  ;;  %v7298_v24 = vrot.slane %v7296_v1, 2  ;;  %v7301_v27 = vrot.slane %v7299_v60, 3  ;;  %v9150_v37 = vor.u32 %v9149_v45, %v9146_v6  ;;  %v9162_v48 = vshrl.u32 %v15395_v4, 16  ;;  %12008 = vmatmul.mubr.msk.bf16.gmra.mrb[36].mxu1 %vm322_vm1, %v7276_v50  ;;  %12202 = vmatpush3.bf16.msra.mxu0 %v13116_v15 }
 0x2b7   : > { %v9165_v40 = vshll.u32 %v15395_v4, 16  ;;  %12011 = vmatprep.mubr.msk.bf16.mxu1 %vm322_vm1, %v7285_v7  ;;  %v7293_v61 = vor.u32 %v7292_v23, %v7289_v30  ;;  %v7305_v46 = vshrl.u32 %v15804_v54, 16  ;;  %v7308_v38 = vshll.u32 %v15804_v54, 16  ;;  %v9799_v6 = vld [vmem:[#allocation2 + $0x16d] ss:$2 sm:$0xff] }
 0x2b8   : > { %v9142_v8 = vsel %vm1631_vm6, %v15751_v33, %v9141_v21  ;;  %v9155_v36 = vrot.slane %v9153_v43, 2  ;;  %v9158_v42 = vrot.slane %v9156_v9, 3  ;;  %v7302_v12 = vor.u32 %v7301_v27, %v7298_v24 }
 0x2b9   : > { %v9151_v2 = vsel %vm1631_vm6, %v9141_v21, %v9150_v37  ;;  %v9164_v25 = vrot.slane %v9162_v48, 2  ;;  %v9167_v63 = vrot.slane %v9165_v40, 3  ;;  %12188 = vmatmul.mubr.msk.bf16.gmra.mrb[36].mxu0 %vm322_vm1, %v9142_v8  ;;  %v7294_v32 = vsel %vm1631_vm6, %v7284_v59, %v7293_v61 }
 0x2ba   : > { %v7307_v58 = vrot.slane %v7305_v46, 2  ;;  %v7310_v0 = vrot.slane %v7308_v38, 3  ;;  %12191 = vmatprep.mubr.msk.bf16.mxu0 %vm322_vm1, %v9151_v2  ;;  %v9159_v22 = vor.u32 %v9158_v42, %v9155_v36  ;;  %v7303_v33 = vsel %vm1631_vm6, %v7293_v61, %v7302_v12 }
 0x2bb   : > { %v9171_v16 = vshrl.u32 %v13118_v10, 16  ;;  %v9174_v49 = vshll.u32 %v13118_v10, 16  ;;  %v9168_v34 = vor.u32 %v9167_v63, %v9164_v25  ;;  %v9351_v47 = vrot.slane %v13118_v10, 3 }
 0x2bc   : > { %v7311_v62 = vor.u32 %v7310_v0, %v7307_v58  ;;  %v9160_v14 = vsel %vm1631_vm6, %v9150_v37, %v9159_v22  ;;  %v9802_v30 = vmax.f32 %v9795_v28, %v9799_v6 }
 0x2bd   : > { %v9173_v5 = vrot.slane %v9171_v16, 2  ;;  %v9176_v53 = vrot.slane %v9174_v49, 3  ;;  %v9169_v55 = vsel %vm1631_vm6, %v9159_v22, %v9168_v34 }
 0x2be   : > { %12012 = vmatmul.mubr.msk.bf16.gmra.mrb[40].mxu1 %vm322_vm1, %v7294_v32  ;;  %v7312_v44 = vsel %vm1631_vm6, %v7302_v12, %v7311_v62 }
 0x2bf   : > { %12015 = vmatprep.mubr.msk.bf16.mxu1 %vm322_vm1, %v7303_v33  ;;  %v9177_v13 = vor.u32 %v9176_v53, %v9173_v5 }
 0x2c1   : > { %12192 = vmatmul.mubr.msk.bf16.gmra.mrb[40].mxu0 %vm322_vm1, %v9160_v14  ;;  %v9178_v59 = vsel %vm1631_vm6, %v9168_v34, %v9177_v13 }
 0x2c2   : > { %12195 = vmatprep.mubr.msk.bf16.mxu0 %vm322_vm1, %v9169_v55 }
 0x2c6   : > { %12016 = vmatmul.mubr.msk.bf16.gmra.mrb[44].mxu1 %vm322_vm1, %v7312_v44 }
 0x2c7   : > { %12023 = vmatprep.mubr.msk.bf16.mxu1 %vm322_vm1, %v15280_v51  ;;  %v15981_v51 = vld [vmem:[#allocation4_spill] sm:$0xff] }
 0x2c9   : > { %12196 = vmatmul.mubr.msk.bf16.gmra.mrb[44].mxu0 %vm322_vm1, %v9178_v59 }
 0x2ca   : > { %12203 = vmatprep.mubr.msk.bf16.mxu0 %vm322_vm1, %v15283_v19  ;;  %v15983_v19 = vld [vmem:[#allocation6_spill] sm:$0xff] }
 0x2ce   : > { %12024 = vmatmul.mubr.msk.bf16.vlgmr.msra.gmra.mrb[32].mxu1 %vm322_vm1, %v15269_v3  ;;  %v7485_v3 = vrot.slane %v15804_v54, 3 }
 0x2cf   : > { %12027 = vmatprep.mubr.msk.bf16.mxu1 %vm322_vm1, %v15330_v52 }
 0x2d1   : > { %12204 = vmatmul.mubr.msk.bf16.vlgmr.msra.gmra.mrb[32].mxu0 %vm322_vm1, %v15286_v31  ;;  %v15984_v31 = vrot.slane %v15392_v57, 3 }
 0x2d2   : > { %12207 = vmatprep.mubr.msk.bf16.mxu0 %vm322_vm1, %v15980_v17 }
 0x2d3   : > { %v7486_v52 = vsel %vm1870_vm5, %v15984_v31, %v7485_v3 }
 0x2d6   : > { %12028 = vmatmul.mubr.msk.bf16.gmra.mrb[36].mxu1 %vm322_vm1, %v15981_v51 }
 0x2d7   : > { %12031 = vmatprep.mubr.msk.bf16.mxu1 %vm322_vm1, %v15375_v11  ;;  %v15985_v11 = vld [vmem:[#allocation7_spill] sm:$0xff] }
 0x2d9   : > { %12208 = vmatmul.mubr.msk.bf16.gmra.mrb[36].mxu0 %vm322_vm1, %v15982_v39 }
 0x2da   : > { %12211 = vmatprep.mubr.msk.bf16.mxu0 %vm322_vm1, %v15378_v35  ;;  %v15986_v35 = vrot.slane %v15395_v4, 3 }
 0x2de   : > { %12032 = vmatmul.mubr.msk.bf16.gmra.mrb[40].mxu1 %vm322_vm1, %v15382_v29  ;;  %v9352_v29 = vsel %vm1870_vm5, %v15986_v35, %v9351_v47 }
 0x2df   : > { %12035 = vmatprep.mubr.msk.bf16.mxu1 %vm322_vm1, %v15405_v18 }
 0x2e1   : > { %12212 = vmatmul.mubr.msk.bf16.gmra.mrb[40].mxu0 %vm322_vm1, %v15983_v19 }
 0x2e2   : > { %12215 = vmatprep.mubr.msk.bf16.mxu0 %vm322_vm1, %v15985_v11 }
 0x2e6   : > { %12036 = vmatmul.mubr.msk.bf16.gmra.mrb[44].mxu1 %vm322_vm1, %v7486_v52 }
 0x2e9   : > { %12216 = vmatmul.mubr.msk.bf16.gmra.mrb[44].mxu0 %vm322_vm1, %v9352_v29 }
 0x3a1   : > { %v12025_v18 = vpop.f32.mrb[32].mxu1 }
 0x3a2   : > { %7638 = vst.msk [vmem:[#allocation2 + $0x190] sm:$0xff] %vm2037_vm7, %v12025_v18  ;;  %v7557_v20 = vpop.f32.mrb[33].mxu1 }
 0x3a3   : > { %7636 = vst.msk [vmem:[#allocation2 + $0x180] sm:$0xff] %vm2037_vm7, %v7557_v20  ;;  %v12026_v57 = vpop.f32.mrb[34].mxu1 }
 0x3a4   : > { %7639 = vst.msk [vmem:[#allocation2 + $0x198] sm:$0xff] %vm2037_vm7, %v12026_v57  ;;  %v7560_v1 = vpop.f32.mrb[35].mxu1  ;;  %v12205_v60 = vpop.f32.mrb[32].mxu0 }
 0x3a5   : > { %7637 = vst.msk [vmem:[#allocation2 + $0x188] sm:$0xff] %vm2037_vm7, %v7560_v1  ;;  %9504 = vst.msk [vmem:[#allocation2 + $0x210] sm:$0xff] %vm2037_vm7, %v12205_v60  ;;  %v9423_v4 = vpop.f32.mrb[33].mxu0 }
 0x3a6   : > { %9502 = vst.msk [vmem:[#allocation2 + $0x200] sm:$0xff] %vm2037_vm7, %v9423_v4  ;;  %v12206_v45 = vpop.f32.mrb[34].mxu0 }
 0x3a7   : > { %9505 = vst.msk [vmem:[#allocation2 + $0x218] sm:$0xff] %vm2037_vm7, %v12206_v45  ;;  %v9426_v15 = vpop.f32.mrb[35].mxu0 }
 0x3a8   : > { %9503 = vst.msk [vmem:[#allocation2 + $0x208] sm:$0xff] %vm2037_vm7, %v9426_v15 }
 0x3a9   : > { %v12029_v41 = vpop.f32.mrb[36].mxu1 }
 0x3aa   : > { %v9797_v50 = vld [vmem:[#allocation2 + $0x17c] ss:$2 sm:$0xf]  ;;  %v9801_v21 = vld [vmem:[#allocation2 + $0x17d] ss:$2 sm:$0xf] }
 0x3ab   : > { %7642 = vst.msk [vmem:[#allocation2 + $0x1b0] sm:$0xff] %vm2037_vm7, %v12029_v41  ;;  %v9803_v23 = vmax.f32 %v9797_v50, %v9801_v21  ;;  %v9807_v43 = vld [vmem:[#allocation2 + $0x196] ss:$2 sm:$0xf]  ;;  %v7573_v7 = vpop.f32.mrb[37].mxu1 }
 0x3ac   : > { %v9805_v54 = vld [vmem:[#allocation2 + $0x186] ss:$2 sm:$0xff]  ;;  %v9813_v24 = vld [vmem:[#allocation2 + $0x197] ss:$2 sm:$0xf]  ;;  %7640 = vst.msk [vmem:[#allocation2 + $0x1a0] sm:$0xff] %vm2037_vm7, %v7573_v7 }
 0x3ad   : > { %v9809_v9 = vmax.f32 %v9803_v23, %v9807_v43  ;;  %v9808_v27 = vmax.f32 %v9802_v30, %v9805_v54  ;;  %v12030_v37 = vpop.f32.mrb[38].mxu1  ;;  %v9811_v48 = vld [vmem:[#allocation2 + $0x187] ss:$2 sm:$0xff]  ;;  %v12209_v40 = vpop.f32.mrb[36].mxu0 }
 0x3ae   : > { %7643 = vst.msk [vmem:[#allocation2 + $0x1b8] sm:$0xff] %vm2037_vm7, %v12030_v37  ;;  %v7576_v61 = vpop.f32.mrb[39].mxu1  ;;  %9508 = vst.msk [vmem:[#allocation2 + $0x230] sm:$0xff] %vm2037_vm7, %v12209_v40  ;;  %v9439_v8 = vpop.f32.mrb[37].mxu0 }
 0x3af   : > { %v9815_v46 = vmax.f32 %v9809_v9, %v9813_v24  ;;  %v9814_v38 = vmax.f32 %v9808_v27, %v9811_v48  ;;  %7641 = vst.msk [vmem:[#allocation2 + $0x1a8] sm:$0xff] %vm2037_vm7, %v7576_v61  ;;  %9506 = vst.msk [vmem:[#allocation2 + $0x220] sm:$0xff] %vm2037_vm7, %v9439_v8  ;;  %v12210_v12 = vpop.f32.mrb[38].mxu0  ;;  %v9913_v58 = vld [vmem:[#allocation2 + $0x218] ss:$2 sm:$0xf] }
 0x3b0   : > { %9509 = vst.msk [vmem:[#allocation2 + $0x238] sm:$0xff] %vm2037_vm7, %v12210_v12  ;;  %v9442_v63 = vpop.f32.mrb[39].mxu0  ;;  %v9917_v33 = vld [vmem:[#allocation2 + $0x219] ss:$2 sm:$0xf] }
 0x3b1   : > { %v9817_v36 = vadd.f32 %v15556_v56, %v9815_v46  ;;  %v9816_v42 = vadd.f32 %v15556_v56, %v9814_v38  ;;  %v12033_v10 = vpop.f32.mrb[40].mxu1  ;;  %9507 = vst.msk [vmem:[#allocation2 + $0x228] sm:$0xff] %vm2037_vm7, %v9442_v63  ;;  %v9911_v34 = vld [vmem:[#allocation2 + $0x208] ss:$2 sm:$0xff]  ;;  %v9915_v62 = vld [vmem:[#allocation2 + $0x209] ss:$2 sm:$0xff]  ;;  %v9919_v59 = vmax.f32 %v9913_v58, %v9917_v33 }
 0x3b2   : > { %7646 = vst.msk [vmem:[#allocation2 + $0x1d0] sm:$0xff] %vm2037_vm7, %v12033_v10  ;;  %v7589_v32 = vpop.f32.mrb[41].mxu1  ;;  %v9837_v53 = vld [vmem:[#allocation2 + $0x1b0] ss:$2 sm:$0xf]  ;;  %v9918_v11 = vmax.f32 %v9911_v34, %v9915_v62 }
 0x3b3   : > { %v9819_v2 = vmax.f32 %v9817_v36, 0.0  ;;  %v9818_v25 = vmax.f32 %v9816_v42, 0.0  ;;  %7644 = vst.msk [vmem:[#allocation2 + $0x1c0] sm:$0xff] %vm2037_vm7, %v7589_v32  ;;  %v12034_v0 = vpop.f32.mrb[42].mxu1 }
 0x3b4   : > { %7647 = vst.msk [vmem:[#allocation2 + $0x1d8] sm:$0xff] %vm2037_vm7, %v12034_v0  ;;  %v7592_v49 = vpop.f32.mrb[43].mxu1  ;;  %v12213_v14 = vpop.f32.mrb[40].mxu0  ;;  %v9841_v55 = vld [vmem:[#allocation2 + $0x1b1] ss:$2 sm:$0xf] }
 0x3b5   : > { %v10860_v22 = vpack.c.bf16 %v9819_v2, %v9819_v2  ;;  %v10859_v16 = vpack.c.bf16 %v9818_v25, %v9818_v25  ;;  %7645 = vst.msk [vmem:[#allocation2 + $0x1c8] sm:$0xff] %vm2037_vm7, %v7592_v49  ;;  %9512 = vst.msk [vmem:[#allocation2 + $0x250] sm:$0xff] %vm2037_vm7, %v12213_v14  ;;  %v9455_v44 = vpop.f32.mrb[41].mxu0  ;;  %v9843_v1 = vmax.f32 %v9837_v53, %v9841_v55 }
 0x3b6   : > { %v9835_v17 = vld [vmem:[#allocation2 + $0x1a0] ss:$2 sm:$0xff]  ;;  %v9839_v51 = vld [vmem:[#allocation2 + $0x1a1] ss:$2 sm:$0xff]  ;;  %9510 = vst.msk [vmem:[#allocation2 + $0x240] sm:$0xff] %vm2037_vm7, %v9455_v44  ;;  %v12214_v39 = vpop.f32.mrb[42].mxu0 }
 0x3b7   : > { %v9826_v5 = vrot.slane %v10859_v16, 6  ;;  %v9828_v13 = vrot.slane %v10860_v22, 6  ;;  %v9923_v19 = vld [vmem:[#allocation2 + $0x232] ss:$2 sm:$0xf]  ;;  %9513 = vst.msk [vmem:[#allocation2 + $0x258] sm:$0xff] %vm2037_vm7, %v12214_v39  ;;  %v9842_v4 = vmax.f32 %v9835_v17, %v9839_v51 }
 0x3b8   : > { %v9458_v31 = vpop.f32.mrb[43].mxu0  ;;  %v9925_v47 = vmax.f32 %v9919_v59, %v9923_v19  ;;  %v9929_v18 = vld [vmem:[#allocation2 + $0x233] ss:$2 sm:$0xf]  ;;  %v9921_v20 = vld [vmem:[#allocation2 + $0x222] ss:$2 sm:$0xff] }
 0x3b9   : > { %v9827_v3 = vrot.slane %v9826_v5, 4  ;;  %9832 = vst.msk [vmem:[%s14583_s7 + $0x28] sm:$0xc] %vm9603_vm10, %v9826_v5  ;;  %v12037_v52 = vpop.f32.mrb[44].mxu1  ;;  %v9924_v28 = vmax.f32 %v9918_v11, %v9921_v20  ;;  %v9927_v6 = vld [vmem:[#allocation2 + $0x223] ss:$2 sm:$0xff] }
 0x3ba   : > { %9511 = vst.msk [vmem:[#allocation2 + $0x248] sm:$0xff] %vm2037_vm7, %v9458_v31  ;;  %7650 = vst.msk [vmem:[#allocation2 + $0x1f0] sm:$0xff] %vm2037_vm7, %v12037_v52  ;;  %v7605_v35 = vpop.f32.mrb[45].mxu1  ;;  %v9931_v60 = vmax.f32 %v9925_v47, %v9929_v18 }
 0x3bb   : > { %v9829_v29 = vsel %vm14643_vm13, %v9827_v3, %v9828_v13  ;;  %7648 = vst.msk [vmem:[#allocation2 + $0x1e0] sm:$0xff] %vm2037_vm7, %v7605_v35  ;;  %v12038_v57 = vpop.f32.mrb[46].mxu1  ;;  %v9930_v21 = vmax.f32 %v9924_v28, %v9927_v6 }
 0x3bc   : > { %9833 = vst.msk [vmem:[%s14583_s7 + $0x2c] sm:$0xf] %vm9558_vm8, %v9829_v29  ;;  %v7608_v45 = vpop.f32.mrb[47].mxu1  ;;  %v9845_v15 = vld [vmem:[#allocation2 + $0x1ba] ss:$2 sm:$0xff]  ;;  %v9933_v50 = vadd.f32 %v15556_v56, %v9931_v60  ;;  %v12217_v43 = vpop.f32.mrb[44].mxu0 }
 0x3bd   : > { %7651 = vst.msk [vmem:[#allocation2 + $0x1f8] sm:$0xff] %vm2037_vm7, %v12038_v57  ;;  %v9847_v41 = vld [vmem:[#allocation2 + $0x1ca] ss:$2 sm:$0xf]  ;;  %7649 = vst.msk [vmem:[#allocation2 + $0x1e8] sm:$0xff] %vm2037_vm7, %v7608_v45  ;;  %v9848_v30 = vmax.f32 %v9842_v4, %v9845_v15  ;;  %v9471_v9 = vpop.f32.mrb[45].mxu0  ;;  %v9932_v27 = vadd.f32 %v15556_v56, %v9930_v21 }
 0x3be   : > { %v9849_v23 = vmax.f32 %v9843_v1, %v9847_v41  ;;  %v9851_v54 = vld [vmem:[#allocation2 + $0x1bb] ss:$2 sm:$0xff]  ;;  %v9853_v7 = vld [vmem:[#allocation2 + $0x1cb] ss:$2 sm:$0xf]  ;;  %v9935_v24 = vmax.f32 %v9933_v50, 0.0 }
 0x3bf   : > { %v9854_v37 = vmax.f32 %v9848_v30, %v9851_v54  ;;  %9514 = vst.msk [vmem:[#allocation2 + $0x260] sm:$0xff] %vm2037_vm7, %v9471_v9  ;;  %v12218_v40 = vpop.f32.mrb[46].mxu0  ;;  %v9934_v38 = vmax.f32 %v9932_v27, 0.0 }
 0x3c0   : > { %v9855_v48 = vmax.f32 %v9849_v23, %v9853_v7  ;;  %v9474_v61 = vpop.f32.mrb[47].mxu0  ;;  %v10866_v46 = vpack.c.bf16 %v9935_v24, %v9935_v24 }
 0x3c1   : > { %v9856_v8 = vadd.f32 %v15556_v56, %v9854_v37  ;;  %v9947_v42 = vld [vmem:[#allocation2 + $0x23c] ss:$2 sm:$0xff]  ;;  %9515 = vst.msk [vmem:[#allocation2 + $0x268] sm:$0xff] %vm2037_vm7, %v9474_v61  ;;  %v9951_v12 = vld [vmem:[#allocation2 + $0x23d] ss:$2 sm:$0xff]  ;;  %v10865_v25 = vpack.c.bf16 %v9934_v38, %v9934_v38 }
 0x3c2   : > { %v9857_v36 = vadd.f32 %v15556_v56, %v9855_v48  ;;  %v9871_v10 = vld [vmem:[#allocation2 + $0x1d4] ss:$2 sm:$0xff]  ;;  %v9875_v2 = vld [vmem:[#allocation2 + $0x1d5] ss:$2 sm:$0xff]  ;;  %9945 = vst.msk [vmem:[%s14583_s7 + $0x40] sm:$0x3] %vm9560_vm9, %v10866_v46  ;;  %v9954_v34 = vmax.f32 %v9947_v42, %v9951_v12 }
 0x3c3   : > { %v9858_v63 = vmax.f32 %v9856_v8, 0.0  ;;  %v9949_v58 = vld [vmem:[#allocation2 + $0x24c] ss:$2 sm:$0xf]  ;;  %v9878_v0 = vmax.f32 %v9871_v10, %v9875_v2  ;;  %9944 = vst.msk [vmem:[%s14583_s7 + $0x3c] sm:$0xf] %vm9558_vm8, %v10865_v25 }
 0x3c4   : > { %v9859_v32 = vmax.f32 %v9857_v36, 0.0  ;;  %v9953_v22 = vld [vmem:[#allocation2 + $0x24d] ss:$2 sm:$0xf]  ;;  %v9881_v14 = vld [vmem:[#allocation2 + $0x1ee] ss:$2 sm:$0xff] }
 0x3c5   : > { %v9873_v33 = vld [vmem:[#allocation2 + $0x1e4] ss:$2 sm:$0xf]  ;;  %v10861_v16 = vpack.c.bf16 %v9858_v63, %v9858_v63  ;;  %v9877_v62 = vld [vmem:[#allocation2 + $0x1e5] ss:$2 sm:$0xf]  ;;  %v9884_v55 = vmax.f32 %v9878_v0, %v9881_v14  ;;  %v9955_v44 = vmax.f32 %v9949_v58, %v9953_v22 }
 0x3c6   : > { %v10862_v49 = vpack.c.bf16 %v9859_v32, %v9859_v32  ;;  %v9957_v5 = vld [vmem:[#allocation2 + $0x256] ss:$2 sm:$0xff]  ;;  %v9879_v53 = vmax.f32 %v9873_v33, %v9877_v62  ;;  %v9887_v17 = vld [vmem:[#allocation2 + $0x1ef] ss:$2 sm:$0xff] }
 0x3c7   : > { %9868 = vst.msk [vmem:[%s14583_s7 + $0x30] sm:$0xf] %vm9558_vm8, %v10861_v16  ;;  %v9960_v13 = vmax.f32 %v9954_v34, %v9957_v5  ;;  %v9883_v59 = vld [vmem:[#allocation2 + $0x1fe] ss:$2 sm:$0xf]  ;;  %v9890_v3 = vmax.f32 %v9884_v55, %v9887_v17 }
 0x3c8   : > { %9869 = vst.msk [vmem:[%s14583_s7 + $0x34] sm:$0x3] %vm9560_vm9, %v10862_v49  ;;  %v9963_v51 = vld [vmem:[#allocation2 + $0x257] ss:$2 sm:$0xff]  ;;  %v9885_v39 = vmax.f32 %v9879_v53, %v9883_v59 }
 0x3c9   : > { %v9959_v19 = vld [vmem:[#allocation2 + $0x266] ss:$2 sm:$0xf]  ;;  %v9966_v31 = vmax.f32 %v9960_v13, %v9963_v51  ;;  %v9889_v52 = vld [vmem:[#allocation2 + $0x1ff] ss:$2 sm:$0xf]  ;;  %v9892_v35 = vadd.f32 %v15556_v56, %v9890_v3 }
 0x3ca   : > { %v9961_v11 = vmax.f32 %v9955_v44, %v9959_v19  ;;  %v9891_v47 = vmax.f32 %v9885_v39, %v9889_v52  ;;  %v9965_v29 = vld [vmem:[#allocation2 + $0x267] ss:$2 sm:$0xf] }
 0x3cb   : > { %v9968_v18 = vadd.f32 %v15556_v56, %v9966_v31  ;;  %v9894_v1 = vmax.f32 %v9892_v35, 0.0 }
 0x3cc   : > { %v9967_v20 = vmax.f32 %v9961_v11, %v9965_v29  ;;  %v9893_v57 = vadd.f32 %v15556_v56, %v9891_v47 }
 0x3cd   : > { %v9970_v60 = vmax.f32 %v9968_v18, 0.0  ;;  %v10863_v6 = vpack.c.bf16 %v9894_v1, %v9894_v1 }
 0x3ce   : > { %v9969_v4 = vadd.f32 %v15556_v56, %v9967_v20  ;;  %v9895_v28 = vmax.f32 %v9893_v57, 0.0 }
 0x3cf   : > { %v10867_v45 = vpack.c.bf16 %v9970_v60, %v9970_v60  ;;  %v9902_v50 = vrot.slane %v10863_v6, 6 }
 0x3d0   : > { %v9971_v15 = vmax.f32 %v9969_v4, 0.0  ;;  %v10864_v41 = vpack.c.bf16 %v9895_v28, %v9895_v28 }
 0x3d1   : > { %v9978_v21 = vrot.slane %v10867_v45, 6  ;;  %v9903_v23 = vrot.slane %v9902_v50, 4  ;;  %9908 = vst.msk [vmem:[%s14583_s7 + $0x34] sm:$0xc] %vm9603_vm10, %v9902_v50 }
 0x3d2   : > { %v10868_v30 = vpack.c.bf16 %v9971_v15, %v9971_v15  ;;  %v9904_v43 = vrot.slane %v10864_v41, 6 }
 0x3d3   : > { %v9979_v54 = vrot.slane %v9978_v21, 4  ;;  %9984 = vst.msk [vmem:[%s14583_s7 + $0x40] sm:$0xc] %vm9603_vm10, %v9978_v21 }
 0x3d4   : > { %v9980_v7 = vrot.slane %v10868_v30, 6  ;;  %v9905_v56 = vsel %vm14643_vm13, %v9903_v23, %v9904_v43 }
 0x3d5   : > { %9909 = vst.msk [vmem:[%s14583_s7 + $0x38] sm:$0xf] %vm9558_vm8, %v9905_v56 }
 0x3d6   : > { %v9981_v9 = vsel %vm14643_vm13, %v9979_v54, %v9980_v7 }
 0x3d7   : > { %9985 = vst.msk [vmem:[%s14583_s7 + $0x44] sm:$0xf] %vm9558_vm8, %v9981_v9 }
 0x3d8 PF: > { %s13_s12 = sadd.s32 1, %s13128_s12  }
 0x3d9   : > { %p10_p4 = scmp.ge.s32.totalorder %s13_s12, 10  }
 0x3db   :  { %12 = sbr.rel (!%p10_p4) target bundleno = 1 (0x1), region = 165 }

// kernel: net_forward.3
= control target key start
LH: loop header
LB: loop body
LE: loop exit
PB: predicated region body
PF: predicated region fallthrough
CT: control target
= control target key end

     0   :  { %s10610_s0 = inlined_call_operand.vmem [shape: bf16[8,9216], index: 0, kind: input, shape index: {}]   ;;  %s10611_s1 = inlined_call_operand.vmem [shape: bf16[9216,128], index: 1, kind: input, shape index: {}]   ;;  %s10612_s2 = inlined_call_operand.vmem [shape: f32[1,128], index: 2, kind: input, shape index: {}]   ;;  %s10613_s3 = inlined_call_operand.vmem [shape: bf16[128,128], index: 3, kind: input, shape index: {}]   ;;  %s10614_s4 = inlined_call_operand.vmem [shape: f32[1,128], index: 4, kind: input, shape index: {}]   ;;  %s10615_s5 = inlined_call_operand.hbm [shape: f32[8,128], index: 5, kind: output, shape index: {}]  }
   0x1   :  { %v7985_v0 = vld [vmem:[%s10611_s1 + $0x40] sm:$0xff]   ;;  %v7989_v4 = vld [vmem:[%s10611_s1 + $0x48] sm:$0xff]   ;;  %v7993_v8 = vld [vmem:[%s10611_s1 + $0x50] sm:$0xff]  }
   0x2   :  { %v7986_v1 = vld [vmem:[%s10611_s1 + $0xc0] sm:$0xff]   ;;  %7161 = vmatprep.subr.bf16.mxu0 %v7985_v0  ;;  %v7990_v5 = vld [vmem:[%s10611_s1 + $0xc8] sm:$0xff]   ;;  %v7994_v9 = vld [vmem:[%s10611_s1 + $0xd0] sm:$0xff]  }
   0x3   :  { %v7987_v2 = vld [vmem:[%s10611_s1] sm:$0xff]   ;;  %7183 = vmatprep.subr.bf16.mxu1 %v7986_v1  ;;  %v7991_v6 = vld [vmem:[%s10611_s1 + $0x8] sm:$0xff]   ;;  %v7995_v10 = vld [vmem:[%s10611_s1 + $0x10] sm:$0xff]  }
   0x4   :  { %v7988_v3 = vld [vmem:[%s10611_s1 + $0x80] sm:$0xff]   ;;  %7162 = vmatpush3.bf16.msra.mxu0 %v7987_v2  ;;  %v7992_v7 = vld [vmem:[%s10611_s1 + $0x88] sm:$0xff]   ;;  %v7996_v11 = vld [vmem:[%s10611_s1 + $0x90] sm:$0xff]  }
   0x5   :  { %7184 = vmatpush3.bf16.msra.mxu1 %v7988_v3  ;;  %7163 = vmatprep.subr.bf16.mxu0 %v7989_v4  ;;  %v7997_v12 = vld [vmem:[%s10611_s1 + $0x58] sm:$0xff]   ;;  %v8001_v16 = vld [vmem:[%s10611_s1 + $0x60] sm:$0xff]   ;;  %v8005_v20 = vld [vmem:[%s10611_s1 + $0x68] sm:$0xff]  }
   0x6   :  { %7185 = vmatprep.subr.bf16.mxu1 %v7990_v5  ;;  %v7998_v13 = vld [vmem:[%s10611_s1 + $0xd8] sm:$0xff]   ;;  %v8002_v17 = vld [vmem:[%s10611_s1 + $0xe0] sm:$0xff]   ;;  %v8006_v21 = vld [vmem:[%s10611_s1 + $0xe8] sm:$0xff]  }
   0x7   :  { %v7999_v14 = vld [vmem:[%s10611_s1 + $0x18] sm:$0xff]   ;;  %v8003_v18 = vld [vmem:[%s10611_s1 + $0x20] sm:$0xff]   ;;  %v8007_v22 = vld [vmem:[%s10611_s1 + $0x28] sm:$0xff]  }
   0x8   :  { %7164 = vmatpush3.bf16.msra.mxu0 %v7991_v6  ;;  %v8000_v15 = vld [vmem:[%s10611_s1 + $0x98] sm:$0xff]   ;;  %v8004_v19 = vld [vmem:[%s10611_s1 + $0xa0] sm:$0xff]   ;;  %v8008_v23 = vld [vmem:[%s10611_s1 + $0xa8] sm:$0xff]  }
   0x9   :  { %7186 = vmatpush3.bf16.msra.mxu1 %v7992_v7  ;;  %7165 = vmatprep.subr.bf16.mxu0 %v7993_v8  ;;  %v8009_v24 = vld [vmem:[%s10611_s1 + $0x70] sm:$0xff]   ;;  %v8013_v28 = vld [vmem:[%s10611_s1 + $0x78] sm:$0xff]   ;;  %v22_v32 = vld [vmem:[%s10610_s0] sm:$0xff] }
   0xa   :  { %7187 = vmatprep.subr.bf16.mxu1 %v7994_v9  ;;  %v8010_v25 = vld [vmem:[%s10611_s1 + $0xf0] sm:$0xff]   ;;  %v8014_v29 = vld [vmem:[%s10611_s1 + $0xf8] sm:$0xff]   ;;  %v23_v33 = vld [vmem:[%s10610_s0 + $0x8] sm:$0xff]  ;;  %v6504_v34 = vcombine.low %v22_v32, %v22_v32  ;;  %v6505_v35 = vcombine.high %v22_v32, %v22_v32 }
   0xb   :  { %v8011_v26 = vld [vmem:[%s10611_s1 + $0x30] sm:$0xff]   ;;  %v8015_v30 = vld [vmem:[%s10611_s1 + $0x38] sm:$0xff]   ;;  %v6506_v36 = vcombine.low %v23_v33, %v23_v33  ;;  %v6507_v37 = vcombine.high %v23_v33, %v23_v33  ;;  %v8021_v38 = vld [vmem:[%s10611_s1 + $0x140] sm:$0xff]  }
   0xc   :  { %7166 = vmatpush3.bf16.msra.mxu0 %v7995_v10  ;;  %v8012_v27 = vld [vmem:[%s10611_s1 + $0xb0] sm:$0xff]   ;;  %v8016_v31 = vld [vmem:[%s10611_s1 + $0xb8] sm:$0xff]   ;;  %v8022_v39 = vld [vmem:[%s10611_s1 + $0x1c0] sm:$0xff]   ;;  %4957 = vmatprep.mubr.bf16.mxu0 %v6505_v35 }
   0xd   :  { %7188 = vmatpush3.bf16.msra.mxu1 %v7996_v11  ;;  %7167 = vmatprep.subr.bf16.mxu0 %v7997_v12  ;;  %v8023_v40 = vld [vmem:[%s10611_s1 + $0x100] sm:$0xff]   ;;  %v8025_v42 = vld [vmem:[%s10611_s1 + $0x148] sm:$0xff]   ;;  %v8029_v46 = vld [vmem:[%s10611_s1 + $0x150] sm:$0xff]  }
   0xe   :  { %7189 = vmatprep.subr.bf16.mxu1 %v7998_v13  ;;  %4997 = vmatprep.mubr.bf16.mxu1 %v6507_v37  ;;  %v8024_v41 = vld [vmem:[%s10611_s1 + $0x180] sm:$0xff]   ;;  %v8026_v43 = vld [vmem:[%s10611_s1 + $0x1c8] sm:$0xff]   ;;  %v8030_v47 = vld [vmem:[%s10611_s1 + $0x1d0] sm:$0xff]  }
   0xf   :  { %v8027_v44 = vld [vmem:[%s10611_s1 + $0x108] sm:$0xff]   ;;  %v8031_v48 = vld [vmem:[%s10611_s1 + $0x110] sm:$0xff]   ;;  %v8033_v50 = vld [vmem:[%s10611_s1 + $0x158] sm:$0xff]  }
  0x10   :  { %7168 = vmatpush3.bf16.msra.mxu0 %v7999_v14  ;;  %v8028_v45 = vld [vmem:[%s10611_s1 + $0x188] sm:$0xff]   ;;  %v8032_v49 = vld [vmem:[%s10611_s1 + $0x190] sm:$0xff]   ;;  %v8034_v51 = vld [vmem:[%s10611_s1 + $0x1d8] sm:$0xff]  }
  0x11   :  { %7190 = vmatpush3.bf16.msra.mxu1 %v8000_v15  ;;  %7169 = vmatprep.subr.bf16.mxu0 %v8001_v16  ;;  %v8035_v52 = vld [vmem:[%s10611_s1 + $0x118] sm:$0xff]   ;;  %v8037_v54 = vld [vmem:[%s10611_s1 + $0x160] sm:$0xff]   ;;  %v8041_v58 = vld [vmem:[%s10611_s1 + $0x168] sm:$0xff]  }
  0x12   :  { %7191 = vmatprep.subr.bf16.mxu1 %v8002_v17  ;;  %v8036_v53 = vld [vmem:[%s10611_s1 + $0x198] sm:$0xff]   ;;  %v8038_v55 = vld [vmem:[%s10611_s1 + $0x1e0] sm:$0xff]   ;;  %v8042_v59 = vld [vmem:[%s10611_s1 + $0x1e8] sm:$0xff]  }
  0x13   :  { %v8039_v56 = vld [vmem:[%s10611_s1 + $0x120] sm:$0xff]   ;;  %v8043_v60 = vld [vmem:[%s10611_s1 + $0x128] sm:$0xff]   ;;  %v8045_v62 = vld [vmem:[%s10611_s1 + $0x170] sm:$0xff]  }
  0x14   :  { %7170 = vmatpush3.bf16.msra.mxu0 %v8003_v18  ;;  %v8040_v57 = vld [vmem:[%s10611_s1 + $0x1a0] sm:$0xff]   ;;  %v8044_v61 = vld [vmem:[%s10611_s1 + $0x1a8] sm:$0xff]   ;;  %v8046_v63 = vld [vmem:[%s10611_s1 + $0x1f0] sm:$0xff]  }
  0x15   :  { %7192 = vmatpush3.bf16.msra.mxu1 %v8004_v19  ;;  %7171 = vmatprep.subr.bf16.mxu0 %v8005_v20  ;;  %v8047_v0 = vld [vmem:[%s10611_s1 + $0x130] sm:$0xff]   ;;  %v8049_v2 = vld [vmem:[%s10611_s1 + $0x178] sm:$0xff]   ;;  %v8057_v12 = vld [vmem:[%s10611_s1 + $0x240] sm:$0xff]  }
  0x16   :  { %7193 = vmatprep.subr.bf16.mxu1 %v8006_v21  ;;  %v8048_v1 = vld [vmem:[%s10611_s1 + $0x1b0] sm:$0xff]   ;;  %v8050_v3 = vld [vmem:[%s10611_s1 + $0x1f8] sm:$0xff]   ;;  %v8058_v13 = vld [vmem:[%s10611_s1 + $0x2c0] sm:$0xff]  }
  0x17   :  { %v8051_v4 = vld [vmem:[%s10611_s1 + $0x138] sm:$0xff]   ;;  %v24_v6 = vld [vmem:[%s10610_s0 + $0x10] sm:$0xff]  ;;  %v8059_v14 = vld [vmem:[%s10611_s1 + $0x200] sm:$0xff]  }
  0x18   :  { %7172 = vmatpush3.bf16.msra.mxu0 %v8007_v22  ;;  %v8052_v5 = vld [vmem:[%s10611_s1 + $0x1b8] sm:$0xff]   ;;  %v6508_v7 = vcombine.low %v24_v6, %v24_v6  ;;  %v6509_v8 = vcombine.high %v24_v6, %v24_v6  ;;  %v8060_v15 = vld [vmem:[%s10611_s1 + $0x280] sm:$0xff]   ;;  %v8061_v16 = vld [vmem:[%s10611_s1 + $0x248] sm:$0xff]  }
  0x19   :  { %7194 = vmatpush3.bf16.msra.mxu1 %v8008_v23  ;;  %7173 = vmatprep.subr.bf16.mxu0 %v8009_v24  ;;  %v25_v9 = vld [vmem:[%s10610_s0 + $0x18] sm:$0xff]  ;;  %v8062_v17 = vld [vmem:[%s10611_s1 + $0x2c8] sm:$0xff]   ;;  %v8065_v20 = vld [vmem:[%s10611_s1 + $0x250] sm:$0xff]  }
  0x1a   :  { %7195 = vmatprep.subr.bf16.mxu1 %v8010_v25  ;;  %v6510_v10 = vcombine.low %v25_v9, %v25_v9  ;;  %v6511_v11 = vcombine.high %v25_v9, %v25_v9  ;;  %v8063_v18 = vld [vmem:[%s10611_s1 + $0x208] sm:$0xff]   ;;  %v8066_v21 = vld [vmem:[%s10611_s1 + $0x2d0] sm:$0xff]   ;;  %v8069_v24 = vld [vmem:[%s10611_s1 + $0x258] sm:$0xff]  }
  0x1b   :  { %v8064_v19 = vld [vmem:[%s10611_s1 + $0x288] sm:$0xff]   ;;  %v8067_v22 = vld [vmem:[%s10611_s1 + $0x210] sm:$0xff]   ;;  %v8070_v25 = vld [vmem:[%s10611_s1 + $0x2d8] sm:$0xff]  }
  0x1c   :  { %7174 = vmatpush3.bf16.msra.mxu0 %v8011_v26  ;;  %v8068_v23 = vld [vmem:[%s10611_s1 + $0x290] sm:$0xff]   ;;  %v8071_v26 = vld [vmem:[%s10611_s1 + $0x218] sm:$0xff]   ;;  %v8077_v32 = vld [vmem:[%s10611_s1 + $0x268] sm:$0xff]  }
  0x1d   :  { %7196 = vmatpush3.bf16.msra.mxu1 %v8012_v27  ;;  %7175 = vmatprep.subr.bf16.mxu0 %v8013_v28  ;;  %v8072_v27 = vld [vmem:[%s10611_s1 + $0x298] sm:$0xff]   ;;  %v8073_v28 = vld [vmem:[%s10611_s1 + $0x260] sm:$0xff]   ;;  %v8078_v33 = vld [vmem:[%s10611_s1 + $0x2e8] sm:$0xff]  }
  0x1e   :  { %7197 = vmatprep.subr.bf16.mxu1 %v8014_v29  ;;  %v8074_v29 = vld [vmem:[%s10611_s1 + $0x2e0] sm:$0xff]   ;;  %v8080_v35 = vld [vmem:[%s10611_s1 + $0x2a8] sm:$0xff]   ;;  %v8082_v37 = vld [vmem:[%s10611_s1 + $0x2f0] sm:$0xff]  }
  0x1f   :  { %v8113_v6 = vld [vmem:[%s10611_s1 + $0x368] sm:$0xff]  }
  0x20   :  { %7176 = vmatpush3.bf16.msra.mxu0 %v8015_v30  ;;  %v8075_v30 = vld [vmem:[%s10611_s1 + $0x220] sm:$0xff]   ;;  %v8116_v9 = vld [vmem:[%s10611_s1 + $0x3a8] sm:$0xff]  }
  0x21   :  { %7198 = vmatpush3.bf16.msra.mxu1 %v8016_v31  ;;  %7205 = vmatprep.subr.bf16.mxu0 %v8021_v38  ;;  %v8076_v31 = vld [vmem:[%s10611_s1 + $0x2a0] sm:$0xff]   ;;  %v8083_v38 = vld [vmem:[%s10611_s1 + $0x230] sm:$0xff]  }
  0x22   :  { %7227 = vmatprep.subr.bf16.mxu1 %v8022_v39  ;;  %v8084_v39 = vld [vmem:[%s10611_s1 + $0x2b0] sm:$0xff]  }
  0x23   :  { %4958 = vmatmul.mubr.bf16.vlgmr.msra.gmra.mrb[0].mxu0 %v6504_v34  ;;  %v8079_v34 = vld [vmem:[%s10611_s1 + $0x228] sm:$0xff]  }
  0x24   :  { %4998 = vmatmul.mubr.bf16.vlgmr.msra.gmra.mrb[0].mxu1 %v6506_v36  ;;  %7206 = vmatpush3.bf16.msra.mxu0 %v8023_v40  ;;  %v8081_v36 = vld [vmem:[%s10611_s1 + $0x270] sm:$0xff]   ;;  %v8085_v40 = vld [vmem:[%s10611_s1 + $0x278] sm:$0xff]  }
  0x25   :  { %7228 = vmatpush3.bf16.msra.mxu1 %v8024_v41  ;;  %7207 = vmatprep.subr.bf16.mxu0 %v8025_v42  ;;  %v8086_v41 = vld [vmem:[%s10611_s1 + $0x2f8] sm:$0xff]  }
  0x26   :  { %7229 = vmatprep.subr.bf16.mxu1 %v8026_v43  ;;  %5037 = vmatprep.mubr.bf16.mxu0 %v6509_v8  ;;  %v8087_v42 = vld [vmem:[%s10611_s1 + $0x238] sm:$0xff]   ;;  %v8115_v8 = vld [vmem:[%s10611_s1 + $0x328] sm:$0xff]  }
  0x27   :  { %5077 = vmatprep.mubr.bf16.mxu1 %v6511_v11  ;;  %v8088_v43 = vld [vmem:[%s10611_s1 + $0x2b8] sm:$0xff]   ;;  %v8118_v11 = vld [vmem:[%s10611_s1 + $0x3f0] sm:$0xff]  }
  0x28   :  { %7208 = vmatpush3.bf16.msra.mxu0 %v8027_v44  ;;  %v26_v44 = vld [vmem:[%s10610_s0 + $0x20] sm:$0xff] }
  0x29   :  { %7230 = vmatpush3.bf16.msra.mxu1 %v8028_v45  ;;  %7209 = vmatprep.subr.bf16.mxu0 %v8029_v46  ;;  %v27_v45 = vld [vmem:[%s10610_s0 + $0x28] sm:$0xff]  ;;  %v6512_v46 = vcombine.low %v26_v44, %v26_v44 }
  0x2a   :  { %7231 = vmatprep.subr.bf16.mxu1 %v8030_v47  ;;  %v6513_v47 = vcombine.high %v26_v44, %v26_v44  ;;  %v8149_v44 = vld [vmem:[%s10611_s1 + $0x468] sm:$0xff]  }
  0x2c   :  { %7210 = vmatpush3.bf16.msra.mxu0 %v8031_v48  ;;  %v6514_v48 = vcombine.low %v27_v45, %v27_v45 }
  0x2d   :  { %7232 = vmatpush3.bf16.msra.mxu1 %v8032_v49  ;;  %7211 = vmatprep.subr.bf16.mxu0 %v8033_v50  ;;  %v6515_v49 = vcombine.high %v27_v45, %v27_v45  ;;  %v8093_v50 = vld [vmem:[%s10611_s1 + $0x340] sm:$0xff]   ;;  %v8150_v45 = vld [vmem:[%s10611_s1 + $0x4e8] sm:$0xff]  }
  0x2e   :  { %7233 = vmatprep.subr.bf16.mxu1 %v8034_v51  ;;  %v8094_v51 = vld [vmem:[%s10611_s1 + $0x3c0] sm:$0xff]  }
  0x30   :  { %7212 = vmatpush3.bf16.msra.mxu0 %v8035_v52  ;;  %v8095_v52 = vld [vmem:[%s10611_s1 + $0x300] sm:$0xff]  }
  0x31   :  { %7234 = vmatpush3.bf16.msra.mxu1 %v8036_v53  ;;  %7213 = vmatprep.subr.bf16.mxu0 %v8037_v54  ;;  %v8096_v53 = vld [vmem:[%s10611_s1 + $0x380] sm:$0xff]   ;;  %v8097_v54 = vld [vmem:[%s10611_s1 + $0x348] sm:$0xff]  }
  0x32   :  { %7235 = vmatprep.subr.bf16.mxu1 %v8038_v55  ;;  %v8098_v55 = vld [vmem:[%s10611_s1 + $0x3c8] sm:$0xff]  }
  0x34   :  { %7214 = vmatpush3.bf16.msra.mxu0 %v8039_v56  ;;  %v8099_v56 = vld [vmem:[%s10611_s1 + $0x308] sm:$0xff]  }
  0x35   :  { %7236 = vmatpush3.bf16.msra.mxu1 %v8040_v57  ;;  %7215 = vmatprep.subr.bf16.mxu0 %v8041_v58  ;;  %v8100_v57 = vld [vmem:[%s10611_s1 + $0x388] sm:$0xff]   ;;  %v8101_v58 = vld [vmem:[%s10611_s1 + $0x350] sm:$0xff]  }
  0x36   :  { %7237 = vmatprep.subr.bf16.mxu1 %v8042_v59  ;;  %v8102_v59 = vld [vmem:[%s10611_s1 + $0x3d0] sm:$0xff]  }
  0x38   :  { %7216 = vmatpush3.bf16.msra.mxu0 %v8043_v60  ;;  %v8103_v60 = vld [vmem:[%s10611_s1 + $0x310] sm:$0xff]  }
  0x39   :  { %7238 = vmatpush3.bf16.msra.mxu1 %v8044_v61  ;;  %7217 = vmatprep.subr.bf16.mxu0 %v8045_v62  ;;  %v8104_v61 = vld [vmem:[%s10611_s1 + $0x390] sm:$0xff]   ;;  %v8105_v62 = vld [vmem:[%s10611_s1 + $0x358] sm:$0xff]  }
  0x3a   :  { %7239 = vmatprep.subr.bf16.mxu1 %v8046_v63  ;;  %v8106_v63 = vld [vmem:[%s10611_s1 + $0x3d8] sm:$0xff]  }
  0x3c   :  { %7218 = vmatpush3.bf16.msra.mxu0 %v8047_v0  ;;  %v8107_v0 = vld [vmem:[%s10611_s1 + $0x318] sm:$0xff]  }
  0x3d   :  { %7240 = vmatpush3.bf16.msra.mxu1 %v8048_v1  ;;  %7219 = vmatprep.subr.bf16.mxu0 %v8049_v2  ;;  %v8108_v1 = vld [vmem:[%s10611_s1 + $0x398] sm:$0xff]   ;;  %v8109_v2 = vld [vmem:[%s10611_s1 + $0x360] sm:$0xff]  }
  0x3e   :  { %7241 = vmatprep.subr.bf16.mxu1 %v8050_v3  ;;  %v8110_v3 = vld [vmem:[%s10611_s1 + $0x3e0] sm:$0xff]  }
  0x40   :  { %7220 = vmatpush3.bf16.msra.mxu0 %v8051_v4  ;;  %v8111_v4 = vld [vmem:[%s10611_s1 + $0x320] sm:$0xff]  }
  0x41   :  { %7242 = vmatpush3.bf16.msra.mxu1 %v8052_v5  ;;  %7249 = vmatprep.subr.bf16.mxu0 %v8057_v12  ;;  %v8112_v5 = vld [vmem:[%s10611_s1 + $0x3a0] sm:$0xff]   ;;  %v8119_v12 = vld [vmem:[%s10611_s1 + $0x330] sm:$0xff]  }
  0x42   :  { %7271 = vmatprep.subr.bf16.mxu1 %v8058_v13  ;;  %v8120_v13 = vld [vmem:[%s10611_s1 + $0x3b0] sm:$0xff]  }
  0x43   :  { %5038 = vmatmul.mubr.bf16.vlgmr.msra.gmra.mrb[4].mxu0 %v6508_v7  ;;  %v8114_v7 = vld [vmem:[%s10611_s1 + $0x3e8] sm:$0xff]  }
  0x44   :  { %5078 = vmatmul.mubr.bf16.vlgmr.msra.gmra.mrb[4].mxu1 %v6510_v10  ;;  %7250 = vmatpush3.bf16.msra.mxu0 %v8059_v14  ;;  %v8117_v10 = vld [vmem:[%s10611_s1 + $0x370] sm:$0xff]   ;;  %v8121_v14 = vld [vmem:[%s10611_s1 + $0x378] sm:$0xff]  }
  0x45   :  { %7272 = vmatpush3.bf16.msra.mxu1 %v8060_v15  ;;  %7251 = vmatprep.subr.bf16.mxu0 %v8061_v16  ;;  %v8122_v15 = vld [vmem:[%s10611_s1 + $0x3f8] sm:$0xff]  }
  0x46   :  { %7273 = vmatprep.subr.bf16.mxu1 %v8062_v17  ;;  %5117 = vmatprep.mubr.bf16.mxu0 %v6513_v47  ;;  %v8123_v16 = vld [vmem:[%s10611_s1 + $0x338] sm:$0xff]   ;;  %v8152_v47 = vld [vmem:[%s10611_s1 + $0x4a8] sm:$0xff]  }
  0x47   :  { %5157 = vmatprep.mubr.bf16.mxu1 %v6515_v49  ;;  %v8124_v17 = vld [vmem:[%s10611_s1 + $0x3b8] sm:$0xff]   ;;  %v8154_v49 = vld [vmem:[%s10611_s1 + $0x4f0] sm:$0xff]  }
  0x48   :  { %7252 = vmatpush3.bf16.msra.mxu0 %v8063_v18  ;;  %v28_v18 = vld [vmem:[%s10610_s0 + $0x30] sm:$0xff] }
  0x49   :  { %7274 = vmatpush3.bf16.msra.mxu1 %v8064_v19  ;;  %7253 = vmatprep.subr.bf16.mxu0 %v8065_v20  ;;  %v29_v19 = vld [vmem:[%s10610_s0 + $0x38] sm:$0xff]  ;;  %v6516_v20 = vcombine.low %v28_v18, %v28_v18 }
  0x4a   :  { %7275 = vmatprep.subr.bf16.mxu1 %v8066_v21  ;;  %v6517_v21 = vcombine.high %v28_v18, %v28_v18  ;;  %v8185_v18 = vld [vmem:[%s10611_s1 + $0x568] sm:$0xff]  }
  0x4c   :  { %7254 = vmatpush3.bf16.msra.mxu0 %v8067_v22  ;;  %v6518_v22 = vcombine.low %v29_v19, %v29_v19 }
  0x4d   :  { %7276 = vmatpush3.bf16.msra.mxu1 %v8068_v23  ;;  %7255 = vmatprep.subr.bf16.mxu0 %v8069_v24  ;;  %v8129_v23 = vld [vmem:[%s10611_s1 + $0x440] sm:$0xff]   ;;  %v6519_v24 = vcombine.high %v29_v19, %v29_v19  ;;  %v8186_v19 = vld [vmem:[%s10611_s1 + $0x5e8] sm:$0xff]  }
  0x4e   :  { %7277 = vmatprep.subr.bf16.mxu1 %v8070_v25  ;;  %v8130_v25 = vld [vmem:[%s10611_s1 + $0x4c0] sm:$0xff]  }
  0x50   :  { %7256 = vmatpush3.bf16.msra.mxu0 %v8071_v26  ;;  %v8131_v26 = vld [vmem:[%s10611_s1 + $0x400] sm:$0xff]  }
  0x51   :  { %7278 = vmatpush3.bf16.msra.mxu1 %v8072_v27  ;;  %7257 = vmatprep.subr.bf16.mxu0 %v8073_v28  ;;  %v8132_v27 = vld [vmem:[%s10611_s1 + $0x480] sm:$0xff]   ;;  %v8133_v28 = vld [vmem:[%s10611_s1 + $0x448] sm:$0xff]  }
  0x52   :  { %7279 = vmatprep.subr.bf16.mxu1 %v8074_v29  ;;  %v8134_v29 = vld [vmem:[%s10611_s1 + $0x4c8] sm:$0xff]  }
  0x54   :  { %7258 = vmatpush3.bf16.msra.mxu0 %v8075_v30  ;;  %v8135_v30 = vld [vmem:[%s10611_s1 + $0x408] sm:$0xff]  }
  0x55   :  { %7280 = vmatpush3.bf16.msra.mxu1 %v8076_v31  ;;  %7259 = vmatprep.subr.bf16.mxu0 %v8077_v32  ;;  %v8136_v31 = vld [vmem:[%s10611_s1 + $0x488] sm:$0xff]   ;;  %v8137_v32 = vld [vmem:[%s10611_s1 + $0x450] sm:$0xff]  }
  0x56   :  { %7281 = vmatprep.subr.bf16.mxu1 %v8078_v33  ;;  %v8138_v33 = vld [vmem:[%s10611_s1 + $0x4d0] sm:$0xff]  }
  0x58   :  { %7260 = vmatpush3.bf16.msra.mxu0 %v8079_v34  ;;  %v8139_v34 = vld [vmem:[%s10611_s1 + $0x410] sm:$0xff]  }
  0x59   :  { %7282 = vmatpush3.bf16.msra.mxu1 %v8080_v35  ;;  %7261 = vmatprep.subr.bf16.mxu0 %v8081_v36  ;;  %v8140_v35 = vld [vmem:[%s10611_s1 + $0x490] sm:$0xff]   ;;  %v8141_v36 = vld [vmem:[%s10611_s1 + $0x458] sm:$0xff]  }
  0x5a   :  { %7283 = vmatprep.subr.bf16.mxu1 %v8082_v37  ;;  %v8142_v37 = vld [vmem:[%s10611_s1 + $0x4d8] sm:$0xff]  }
  0x5c   :  { %7262 = vmatpush3.bf16.msra.mxu0 %v8083_v38  ;;  %v8143_v38 = vld [vmem:[%s10611_s1 + $0x418] sm:$0xff]  }
  0x5d   :  { %7284 = vmatpush3.bf16.msra.mxu1 %v8084_v39  ;;  %7263 = vmatprep.subr.bf16.mxu0 %v8085_v40  ;;  %v8144_v39 = vld [vmem:[%s10611_s1 + $0x498] sm:$0xff]   ;;  %v8145_v40 = vld [vmem:[%s10611_s1 + $0x460] sm:$0xff]  }
  0x5e   :  { %7285 = vmatprep.subr.bf16.mxu1 %v8086_v41  ;;  %v8146_v41 = vld [vmem:[%s10611_s1 + $0x4e0] sm:$0xff]  }
  0x60   :  { %7264 = vmatpush3.bf16.msra.mxu0 %v8087_v42  ;;  %v8147_v42 = vld [vmem:[%s10611_s1 + $0x420] sm:$0xff]  }
  0x61   :  { %7286 = vmatpush3.bf16.msra.mxu1 %v8088_v43  ;;  %7293 = vmatprep.subr.bf16.mxu0 %v8093_v50  ;;  %v8148_v43 = vld [vmem:[%s10611_s1 + $0x4a0] sm:$0xff]   ;;  %v8155_v50 = vld [vmem:[%s10611_s1 + $0x430] sm:$0xff]  }
  0x62   :  { %7315 = vmatprep.subr.bf16.mxu1 %v8094_v51  ;;  %v8156_v51 = vld [vmem:[%s10611_s1 + $0x4b0] sm:$0xff]  }
  0x63   :  { %5118 = vmatmul.mubr.bf16.vlgmr.msra.gmra.mrb[8].mxu0 %v6512_v46  ;;  %v8151_v46 = vld [vmem:[%s10611_s1 + $0x428] sm:$0xff]  }
  0x64   :  { %5158 = vmatmul.mubr.bf16.vlgmr.msra.gmra.mrb[8].mxu1 %v6514_v48  ;;  %7294 = vmatpush3.bf16.msra.mxu0 %v8095_v52  ;;  %v8153_v48 = vld [vmem:[%s10611_s1 + $0x470] sm:$0xff]   ;;  %v8157_v52 = vld [vmem:[%s10611_s1 + $0x478] sm:$0xff]  }
  0x65   :  { %7316 = vmatpush3.bf16.msra.mxu1 %v8096_v53  ;;  %7295 = vmatprep.subr.bf16.mxu0 %v8097_v54  ;;  %v8158_v53 = vld [vmem:[%s10611_s1 + $0x4f8] sm:$0xff]  }
  0x66   :  { %7317 = vmatprep.subr.bf16.mxu1 %v8098_v55  ;;  %5197 = vmatprep.mubr.bf16.mxu0 %v6517_v21  ;;  %v8159_v54 = vld [vmem:[%s10611_s1 + $0x438] sm:$0xff]   ;;  %v8188_v21 = vld [vmem:[%s10611_s1 + $0x5a8] sm:$0xff]  }
  0x67   :  { %5237 = vmatprep.mubr.bf16.mxu1 %v6519_v24  ;;  %v8160_v55 = vld [vmem:[%s10611_s1 + $0x4b8] sm:$0xff]   ;;  %v8191_v24 = vld [vmem:[%s10611_s1 + $0x530] sm:$0xff]  }
  0x68   :  { %7296 = vmatpush3.bf16.msra.mxu0 %v8099_v56  ;;  %v30_v56 = vld [vmem:[%s10610_s0 + $0x40] sm:$0xff] }
  0x69   :  { %7318 = vmatpush3.bf16.msra.mxu1 %v8100_v57  ;;  %7297 = vmatprep.subr.bf16.mxu0 %v8101_v58  ;;  %v6520_v57 = vcombine.low %v30_v56, %v30_v56  ;;  %v6521_v58 = vcombine.high %v30_v56, %v30_v56  ;;  %v8221_v56 = vld [vmem:[%s10611_s1 + $0x668] sm:$0xff]  }
  0x6a   :  { %7319 = vmatprep.subr.bf16.mxu1 %v8102_v59  ;;  %v31_v59 = vld [vmem:[%s10610_s0 + $0x48] sm:$0xff] }
  0x6c   :  { %7298 = vmatpush3.bf16.msra.mxu0 %v8103_v60  ;;  %v6522_v60 = vcombine.low %v31_v59, %v31_v59 }
  0x6d   :  { %7320 = vmatpush3.bf16.msra.mxu1 %v8104_v61  ;;  %7299 = vmatprep.subr.bf16.mxu0 %v8105_v62  ;;  %v6523_v61 = vcombine.high %v31_v59, %v31_v59  ;;  %v8165_v62 = vld [vmem:[%s10611_s1 + $0x540] sm:$0xff]   ;;  %v8224_v59 = vld [vmem:[%s10611_s1 + $0x6a8] sm:$0xff]  }
  0x6e   :  { %7321 = vmatprep.subr.bf16.mxu1 %v8106_v63  ;;  %v8166_v63 = vld [vmem:[%s10611_s1 + $0x5c0] sm:$0xff]  }
  0x70   :  { %7300 = vmatpush3.bf16.msra.mxu0 %v8107_v0  ;;  %v8167_v0 = vld [vmem:[%s10611_s1 + $0x500] sm:$0xff]  }
  0x71   :  { %7322 = vmatpush3.bf16.msra.mxu1 %v8108_v1  ;;  %7301 = vmatprep.subr.bf16.mxu0 %v8109_v2  ;;  %v8168_v1 = vld [vmem:[%s10611_s1 + $0x580] sm:$0xff]   ;;  %v8169_v2 = vld [vmem:[%s10611_s1 + $0x548] sm:$0xff]  }
  0x72   :  { %7323 = vmatprep.subr.bf16.mxu1 %v8110_v3  ;;  %v8170_v3 = vld [vmem:[%s10611_s1 + $0x5c8] sm:$0xff]  }
  0x74   :  { %7302 = vmatpush3.bf16.msra.mxu0 %v8111_v4  ;;  %v8171_v4 = vld [vmem:[%s10611_s1 + $0x508] sm:$0xff]  }
  0x75   :  { %7324 = vmatpush3.bf16.msra.mxu1 %v8112_v5  ;;  %7303 = vmatprep.subr.bf16.mxu0 %v8113_v6  ;;  %v8172_v5 = vld [vmem:[%s10611_s1 + $0x588] sm:$0xff]   ;;  %v8173_v6 = vld [vmem:[%s10611_s1 + $0x550] sm:$0xff]  }
  0x76   :  { %7325 = vmatprep.subr.bf16.mxu1 %v8114_v7  ;;  %v8174_v7 = vld [vmem:[%s10611_s1 + $0x5d0] sm:$0xff]  }
  0x78   :  { %7304 = vmatpush3.bf16.msra.mxu0 %v8115_v8  ;;  %v8175_v8 = vld [vmem:[%s10611_s1 + $0x510] sm:$0xff]  }
  0x79   :  { %7326 = vmatpush3.bf16.msra.mxu1 %v8116_v9  ;;  %7305 = vmatprep.subr.bf16.mxu0 %v8117_v10  ;;  %v8176_v9 = vld [vmem:[%s10611_s1 + $0x590] sm:$0xff]   ;;  %v8177_v10 = vld [vmem:[%s10611_s1 + $0x558] sm:$0xff]  }
  0x7a   :  { %7327 = vmatprep.subr.bf16.mxu1 %v8118_v11  ;;  %v8178_v11 = vld [vmem:[%s10611_s1 + $0x5d8] sm:$0xff]  }
  0x7c   :  { %7306 = vmatpush3.bf16.msra.mxu0 %v8119_v12  ;;  %v8179_v12 = vld [vmem:[%s10611_s1 + $0x518] sm:$0xff]  }
  0x7d   :  { %7328 = vmatpush3.bf16.msra.mxu1 %v8120_v13  ;;  %7307 = vmatprep.subr.bf16.mxu0 %v8121_v14  ;;  %v8180_v13 = vld [vmem:[%s10611_s1 + $0x598] sm:$0xff]   ;;  %v8181_v14 = vld [vmem:[%s10611_s1 + $0x560] sm:$0xff]  }
  0x7e   :  { %7329 = vmatprep.subr.bf16.mxu1 %v8122_v15  ;;  %v8182_v15 = vld [vmem:[%s10611_s1 + $0x5e0] sm:$0xff]  }
  0x80   :  { %7308 = vmatpush3.bf16.msra.mxu0 %v8123_v16  ;;  %v8183_v16 = vld [vmem:[%s10611_s1 + $0x520] sm:$0xff]  }
  0x81   :  { %7330 = vmatpush3.bf16.msra.mxu1 %v8124_v17  ;;  %7337 = vmatprep.subr.bf16.mxu0 %v8129_v23  ;;  %v8184_v17 = vld [vmem:[%s10611_s1 + $0x5a0] sm:$0xff]   ;;  %v8190_v23 = vld [vmem:[%s10611_s1 + $0x5f0] sm:$0xff]  }
  0x82   :  { %7359 = vmatprep.subr.bf16.mxu1 %v8130_v25  ;;  %v8192_v25 = vld [vmem:[%s10611_s1 + $0x5b0] sm:$0xff]  }
  0x83   :  { %5198 = vmatmul.mubr.bf16.vlgmr.msra.gmra.mrb[12].mxu0 %v6516_v20  ;;  %v8187_v20 = vld [vmem:[%s10611_s1 + $0x528] sm:$0xff]  }
  0x84   :  { %5238 = vmatmul.mubr.bf16.vlgmr.msra.gmra.mrb[12].mxu1 %v6518_v22  ;;  %7338 = vmatpush3.bf16.msra.mxu0 %v8131_v26  ;;  %v8189_v22 = vld [vmem:[%s10611_s1 + $0x570] sm:$0xff]   ;;  %v8193_v26 = vld [vmem:[%s10611_s1 + $0x578] sm:$0xff]  }
  0x85   :  { %7360 = vmatpush3.bf16.msra.mxu1 %v8132_v27  ;;  %7339 = vmatprep.subr.bf16.mxu0 %v8133_v28  ;;  %v8194_v27 = vld [vmem:[%s10611_s1 + $0x5f8] sm:$0xff]  }
  0x86   :  { %7361 = vmatprep.subr.bf16.mxu1 %v8134_v29  ;;  %5277 = vmatprep.mubr.bf16.mxu0 %v6521_v58  ;;  %v8195_v28 = vld [vmem:[%s10611_s1 + $0x538] sm:$0xff]   ;;  %v8223_v58 = vld [vmem:[%s10611_s1 + $0x628] sm:$0xff]  }
  0x87   :  { %5317 = vmatprep.mubr.bf16.mxu1 %v6523_v61  ;;  %v8196_v29 = vld [vmem:[%s10611_s1 + $0x5b8] sm:$0xff]   ;;  %v8226_v61 = vld [vmem:[%s10611_s1 + $0x6f0] sm:$0xff]  }
  0x88   :  { %7340 = vmatpush3.bf16.msra.mxu0 %v8135_v30  ;;  %v32_v30 = vld [vmem:[%s10610_s0 + $0x50] sm:$0xff] }
  0x89   :  { %7362 = vmatpush3.bf16.msra.mxu1 %v8136_v31  ;;  %7341 = vmatprep.subr.bf16.mxu0 %v8137_v32  ;;  %v33_v31 = vld [vmem:[%s10610_s0 + $0x58] sm:$0xff]  ;;  %v6524_v32 = vcombine.low %v32_v30, %v32_v30 }
  0x8a   :  { %7363 = vmatprep.subr.bf16.mxu1 %v8138_v33  ;;  %v6525_v33 = vcombine.high %v32_v30, %v32_v30  ;;  %v8256_v30 = vld [vmem:[%s10611_s1 + $0x7a0] sm:$0xff]  }
  0x8c   :  { %7342 = vmatpush3.bf16.msra.mxu0 %v8139_v34  ;;  %v6526_v34 = vcombine.low %v33_v31, %v33_v31 }
  0x8d   :  { %7364 = vmatpush3.bf16.msra.mxu1 %v8140_v35  ;;  %7343 = vmatprep.subr.bf16.mxu0 %v8141_v36  ;;  %v6527_v35 = vcombine.high %v33_v31, %v33_v31  ;;  %v8201_v36 = vld [vmem:[%s10611_s1 + $0x640] sm:$0xff]  }
  0x8e   :  { %7365 = vmatprep.subr.bf16.mxu1 %v8142_v37  ;;  %v8202_v37 = vld [vmem:[%s10611_s1 + $0x6c0] sm:$0xff]  }
  0x90   :  { %7344 = vmatpush3.bf16.msra.mxu0 %v8143_v38  ;;  %v8203_v38 = vld [vmem:[%s10611_s1 + $0x600] sm:$0xff]  }
  0x91   :  { %7366 = vmatpush3.bf16.msra.mxu1 %v8144_v39  ;;  %7345 = vmatprep.subr.bf16.mxu0 %v8145_v40  ;;  %v8204_v39 = vld [vmem:[%s10611_s1 + $0x680] sm:$0xff]   ;;  %v8205_v40 = vld [vmem:[%s10611_s1 + $0x648] sm:$0xff]  }
  0x92   :  { %7367 = vmatprep.subr.bf16.mxu1 %v8146_v41  ;;  %v8206_v41 = vld [vmem:[%s10611_s1 + $0x6c8] sm:$0xff]  }
  0x94   :  { %7346 = vmatpush3.bf16.msra.mxu0 %v8147_v42  ;;  %v8207_v42 = vld [vmem:[%s10611_s1 + $0x608] sm:$0xff]  }
  0x95   :  { %7368 = vmatpush3.bf16.msra.mxu1 %v8148_v43  ;;  %7347 = vmatprep.subr.bf16.mxu0 %v8149_v44  ;;  %v8208_v43 = vld [vmem:[%s10611_s1 + $0x688] sm:$0xff]   ;;  %v8209_v44 = vld [vmem:[%s10611_s1 + $0x650] sm:$0xff]  }
  0x96   :  { %7369 = vmatprep.subr.bf16.mxu1 %v8150_v45  ;;  %v8210_v45 = vld [vmem:[%s10611_s1 + $0x6d0] sm:$0xff]  }
  0x98   :  { %7348 = vmatpush3.bf16.msra.mxu0 %v8151_v46  ;;  %v8211_v46 = vld [vmem:[%s10611_s1 + $0x610] sm:$0xff]  }
  0x99   :  { %7370 = vmatpush3.bf16.msra.mxu1 %v8152_v47  ;;  %7349 = vmatprep.subr.bf16.mxu0 %v8153_v48  ;;  %v8212_v47 = vld [vmem:[%s10611_s1 + $0x690] sm:$0xff]   ;;  %v8213_v48 = vld [vmem:[%s10611_s1 + $0x658] sm:$0xff]  }
  0x9a   :  { %7371 = vmatprep.subr.bf16.mxu1 %v8154_v49  ;;  %v8214_v49 = vld [vmem:[%s10611_s1 + $0x6d8] sm:$0xff]  }
  0x9c   :  { %7350 = vmatpush3.bf16.msra.mxu0 %v8155_v50  ;;  %v8215_v50 = vld [vmem:[%s10611_s1 + $0x618] sm:$0xff]  }
  0x9d   :  { %7372 = vmatpush3.bf16.msra.mxu1 %v8156_v51  ;;  %7351 = vmatprep.subr.bf16.mxu0 %v8157_v52  ;;  %v8216_v51 = vld [vmem:[%s10611_s1 + $0x698] sm:$0xff]   ;;  %v8217_v52 = vld [vmem:[%s10611_s1 + $0x660] sm:$0xff]  }
  0x9e   :  { %7373 = vmatprep.subr.bf16.mxu1 %v8158_v53  ;;  %v8218_v53 = vld [vmem:[%s10611_s1 + $0x6e0] sm:$0xff]  }
  0xa0   :  { %7352 = vmatpush3.bf16.msra.mxu0 %v8159_v54  ;;  %v8219_v54 = vld [vmem:[%s10611_s1 + $0x620] sm:$0xff]  }
  0xa1   :  { %7374 = vmatpush3.bf16.msra.mxu1 %v8160_v55  ;;  %7381 = vmatprep.subr.bf16.mxu0 %v8165_v62  ;;  %v8220_v55 = vld [vmem:[%s10611_s1 + $0x6a0] sm:$0xff]   ;;  %v8227_v62 = vld [vmem:[%s10611_s1 + $0x630] sm:$0xff]  }
  0xa2   :  { %7403 = vmatprep.subr.bf16.mxu1 %v8166_v63  ;;  %v8228_v63 = vld [vmem:[%s10611_s1 + $0x6b0] sm:$0xff]  }
  0xa3   :  { %5278 = vmatmul.mubr.bf16.vlgmr.msra.gmra.mrb[16].mxu0 %v6520_v57  ;;  %v8222_v57 = vld [vmem:[%s10611_s1 + $0x6e8] sm:$0xff]  }
  0xa4   :  { %5318 = vmatmul.mubr.bf16.vlgmr.msra.gmra.mrb[16].mxu1 %v6522_v60  ;;  %7382 = vmatpush3.bf16.msra.mxu0 %v8167_v0  ;;  %v8225_v60 = vld [vmem:[%s10611_s1 + $0x670] sm:$0xff]   ;;  %v8229_v0 = vld [vmem:[%s10611_s1 + $0x678] sm:$0xff]  }
  0xa5   :  { %7404 = vmatpush3.bf16.msra.mxu1 %v8168_v1  ;;  %7383 = vmatprep.subr.bf16.mxu0 %v8169_v2  ;;  %v8230_v1 = vld [vmem:[%s10611_s1 + $0x6f8] sm:$0xff]  }
  0xa6   :  { %7405 = vmatprep.subr.bf16.mxu1 %v8170_v3  ;;  %5357 = vmatprep.mubr.bf16.mxu0 %v6525_v33  ;;  %v8231_v2 = vld [vmem:[%s10611_s1 + $0x638] sm:$0xff]  }
  0xa7   :  { %5397 = vmatprep.mubr.bf16.mxu1 %v6527_v35  ;;  %v8232_v3 = vld [vmem:[%s10611_s1 + $0x6b8] sm:$0xff]  }
  0xa8   :  { %7384 = vmatpush3.bf16.msra.mxu0 %v8171_v4  ;;  %v34_v4 = vld [vmem:[%s10610_s0 + $0x60] sm:$0xff] }
  0xa9   :  { %7406 = vmatpush3.bf16.msra.mxu1 %v8172_v5  ;;  %7385 = vmatprep.subr.bf16.mxu0 %v8173_v6  ;;  %v35_v5 = vld [vmem:[%s10610_s0 + $0x68] sm:$0xff]  ;;  %v6528_v6 = vcombine.low %v34_v4, %v34_v4 }
  0xaa   :  { %7407 = vmatprep.subr.bf16.mxu1 %v8174_v7  ;;  %v6529_v7 = vcombine.high %v34_v4, %v34_v4  ;;  %v8280_v4 = vld [vmem:[%s10611_s1 + $0x888] sm:$0xff]  }
  0xac   :  { %7386 = vmatpush3.bf16.msra.mxu0 %v8175_v8  ;;  %v6530_v8 = vcombine.low %v35_v5, %v35_v5 }
  0xad   :  { %7408 = vmatpush3.bf16.msra.mxu1 %v8176_v9  ;;  %7387 = vmatprep.subr.bf16.mxu0 %v8177_v10  ;;  %v8237_v9 = vld [vmem:[%s10611_s1 + $0x740] sm:$0xff]   ;;  %v6531_v10 = vcombine.high %v35_v5, %v35_v5  ;;  %v8281_v5 = vld [vmem:[%s10611_s1 + $0x850] sm:$0xff]  }
  0xae   :  { %7409 = vmatprep.subr.bf16.mxu1 %v8178_v11  ;;  %v8238_v11 = vld [vmem:[%s10611_s1 + $0x7c0] sm:$0xff]  }
  0xb0   :  { %7388 = vmatpush3.bf16.msra.mxu0 %v8179_v12  ;;  %v8239_v12 = vld [vmem:[%s10611_s1 + $0x700] sm:$0xff]  }
  0xb1   :  { %7410 = vmatpush3.bf16.msra.mxu1 %v8180_v13  ;;  %7389 = vmatprep.subr.bf16.mxu0 %v8181_v14  ;;  %v8240_v13 = vld [vmem:[%s10611_s1 + $0x780] sm:$0xff]   ;;  %v8241_v14 = vld [vmem:[%s10611_s1 + $0x748] sm:$0xff]  }
  0xb2   :  { %7411 = vmatprep.subr.bf16.mxu1 %v8182_v15  ;;  %v8242_v15 = vld [vmem:[%s10611_s1 + $0x7c8] sm:$0xff]  }
  0xb4   :  { %7390 = vmatpush3.bf16.msra.mxu0 %v8183_v16  ;;  %v8243_v16 = vld [vmem:[%s10611_s1 + $0x708] sm:$0xff]  }
  0xb5   :  { %7412 = vmatpush3.bf16.msra.mxu1 %v8184_v17  ;;  %7391 = vmatprep.subr.bf16.mxu0 %v8185_v18  ;;  %v8244_v17 = vld [vmem:[%s10611_s1 + $0x788] sm:$0xff]   ;;  %v8245_v18 = vld [vmem:[%s10611_s1 + $0x750] sm:$0xff]  }
  0xb6   :  { %7413 = vmatprep.subr.bf16.mxu1 %v8186_v19  ;;  %v8246_v19 = vld [vmem:[%s10611_s1 + $0x7d0] sm:$0xff]  }
  0xb8   :  { %7392 = vmatpush3.bf16.msra.mxu0 %v8187_v20  ;;  %v8247_v20 = vld [vmem:[%s10611_s1 + $0x710] sm:$0xff]  }
  0xb9   :  { %7414 = vmatpush3.bf16.msra.mxu1 %v8188_v21  ;;  %7393 = vmatprep.subr.bf16.mxu0 %v8189_v22  ;;  %v8248_v21 = vld [vmem:[%s10611_s1 + $0x790] sm:$0xff]   ;;  %v8249_v22 = vld [vmem:[%s10611_s1 + $0x758] sm:$0xff]  }
  0xba   :  { %7415 = vmatprep.subr.bf16.mxu1 %v8190_v23  ;;  %v8250_v23 = vld [vmem:[%s10611_s1 + $0x7d8] sm:$0xff]  }
  0xbc   :  { %7394 = vmatpush3.bf16.msra.mxu0 %v8191_v24  ;;  %v8251_v24 = vld [vmem:[%s10611_s1 + $0x718] sm:$0xff]  }
  0xbd   :  { %7416 = vmatpush3.bf16.msra.mxu1 %v8192_v25  ;;  %7395 = vmatprep.subr.bf16.mxu0 %v8193_v26  ;;  %v8252_v25 = vld [vmem:[%s10611_s1 + $0x798] sm:$0xff]   ;;  %v8253_v26 = vld [vmem:[%s10611_s1 + $0x760] sm:$0xff]  }
  0xbe   :  { %7417 = vmatprep.subr.bf16.mxu1 %v8194_v27  ;;  %v8254_v27 = vld [vmem:[%s10611_s1 + $0x7e0] sm:$0xff]  }
  0xc0   :  { %7396 = vmatpush3.bf16.msra.mxu0 %v8195_v28  ;;  %v8255_v28 = vld [vmem:[%s10611_s1 + $0x720] sm:$0xff]  }
  0xc1   :  { %7418 = vmatpush3.bf16.msra.mxu1 %v8196_v29  ;;  %7425 = vmatprep.subr.bf16.mxu0 %v8201_v36 }
  0xc2   :  { %7447 = vmatprep.subr.bf16.mxu1 %v8202_v37  ;;  %v8257_v37 = vld [vmem:[%s10611_s1 + $0x768] sm:$0xff]  }
  0xc3   :  { %5358 = vmatmul.mubr.bf16.vlgmr.msra.gmra.mrb[20].mxu0 %v6524_v32  ;;  %v6503_v32 = vld [vmem:[%s10612_s2] ss:$0 sm:$0xff] }
  0xc4   :  { %5398 = vmatmul.mubr.bf16.vlgmr.msra.gmra.mrb[20].mxu1 %v6526_v34  ;;  %7426 = vmatpush3.bf16.msra.mxu0 %v8203_v38 }
  0xc5   :  { %7448 = vmatpush3.bf16.msra.mxu1 %v8204_v39  ;;  %7427 = vmatprep.subr.bf16.mxu0 %v8205_v40  ;;  %v8258_v39 = vld [vmem:[%s10611_s1 + $0x7e8] sm:$0xff]  }
  0xc6   :  { %7449 = vmatprep.subr.bf16.mxu1 %v8206_v41  ;;  %5437 = vmatprep.mubr.bf16.mxu0 %v6529_v7  ;;  %v8283_v7 = vld [vmem:[%s10611_s1 + $0x810] sm:$0xff]  }
  0xc7   :  { %5477 = vmatprep.mubr.bf16.mxu1 %v6531_v10  ;;  %v8286_v10 = vld [vmem:[%s10611_s1 + $0x8d8] sm:$0xff]  }
  0xc8   :  { %7428 = vmatpush3.bf16.msra.mxu0 %v8207_v42  ;;  %v8259_v42 = vld [vmem:[%s10611_s1 + $0x728] sm:$0xff]  }
  0xc9   :  { %7450 = vmatpush3.bf16.msra.mxu1 %v8208_v43  ;;  %7429 = vmatprep.subr.bf16.mxu0 %v8209_v44  ;;  %v8260_v44 = vld [vmem:[%s10611_s1 + $0x7a8] sm:$0xff]  }
  0xca   :  { %7451 = vmatprep.subr.bf16.mxu1 %v8210_v45 }
  0xcc   :  { %7430 = vmatpush3.bf16.msra.mxu0 %v8211_v46 }
  0xcd   :  { %7452 = vmatpush3.bf16.msra.mxu1 %v8212_v47  ;;  %7431 = vmatprep.subr.bf16.mxu0 %v8213_v48  ;;  %v8261_v47 = vld [vmem:[%s10611_s1 + $0x770] sm:$0xff]  }
  0xce   :  { %7453 = vmatprep.subr.bf16.mxu1 %v8214_v49  ;;  %v8262_v48 = vld [vmem:[%s10611_s1 + $0x7f0] sm:$0xff]  }
  0xcf   :  { %v8263_v49 = vld [vmem:[%s10611_s1 + $0x730] sm:$0xff]  }
  0xd0   :  { %7432 = vmatpush3.bf16.msra.mxu0 %v8215_v50  ;;  %v8264_v50 = vld [vmem:[%s10611_s1 + $0x7b0] sm:$0xff]  }
  0xd1   :  { %7454 = vmatpush3.bf16.msra.mxu1 %v8216_v51  ;;  %7433 = vmatprep.subr.bf16.mxu0 %v8217_v52  ;;  %v8265_v51 = vld [vmem:[%s10611_s1 + $0x778] sm:$0xff]  }
  0xd2   :  { %7455 = vmatprep.subr.bf16.mxu1 %v8218_v53  ;;  %v8266_v52 = vld [vmem:[%s10611_s1 + $0x7f8] sm:$0xff]  }
  0xd3   :  { %v8267_v53 = vld [vmem:[%s10611_s1 + $0x738] sm:$0xff]  }
  0xd4   :  { %7434 = vmatpush3.bf16.msra.mxu0 %v8219_v54  ;;  %v8268_v54 = vld [vmem:[%s10611_s1 + $0x7b8] sm:$0xff]  }
  0xd5   :  { %7456 = vmatpush3.bf16.msra.mxu1 %v8220_v55  ;;  %7435 = vmatprep.subr.bf16.mxu0 %v8221_v56  ;;  %v36_v55 = vld [vmem:[%s10610_s0 + $0x70] sm:$0xff]  ;;  %v37_v56 = vld [vmem:[%s10610_s0 + $0x78] sm:$0xff] }
  0xd6   :  { %7457 = vmatprep.subr.bf16.mxu1 %v8222_v57  ;;  %v6532_v57 = vcombine.low %v36_v55, %v36_v55 }
  0xd8   :  { %7436 = vmatpush3.bf16.msra.mxu0 %v8223_v58  ;;  %v6533_v58 = vcombine.high %v36_v55, %v36_v55  ;;  %v8317_v55 = vld [vmem:[%s10611_s1 + $0x950] sm:$0xff]  }
  0xd9   :  { %7458 = vmatpush3.bf16.msra.mxu1 %v8224_v59  ;;  %7437 = vmatprep.subr.bf16.mxu0 %v8225_v60  ;;  %v6534_v59 = vcombine.low %v37_v56, %v37_v56  ;;  %v6535_v60 = vcombine.high %v37_v56, %v37_v56  ;;  %v8318_v56 = vld [vmem:[%s10611_s1 + $0x9d0] sm:$0xff]  }
  0xda   :  { %7459 = vmatprep.subr.bf16.mxu1 %v8226_v61  ;;  %v8273_v61 = vld [vmem:[%s10611_s1 + $0x840] sm:$0xff]  }
  0xdc   :  { %7438 = vmatpush3.bf16.msra.mxu0 %v8227_v62  ;;  %v8274_v62 = vld [vmem:[%s10611_s1 + $0x8c0] sm:$0xff]  }
  0xdd   :  { %7460 = vmatpush3.bf16.msra.mxu1 %v8228_v63  ;;  %7439 = vmatprep.subr.bf16.mxu0 %v8229_v0  ;;  %v8275_v63 = vld [vmem:[%s10611_s1 + $0x800] sm:$0xff]  }
  0xde   :  { %7461 = vmatprep.subr.bf16.mxu1 %v8230_v1  ;;  %v8276_v0 = vld [vmem:[%s10611_s1 + $0x880] sm:$0xff]   ;;  %v8277_v1 = vld [vmem:[%s10611_s1 + $0x848] sm:$0xff]  }
  0xe0   :  { %7440 = vmatpush3.bf16.msra.mxu0 %v8231_v2  ;;  %v8278_v2 = vld [vmem:[%s10611_s1 + $0x8c8] sm:$0xff]  }
  0xe1   :  { %7462 = vmatpush3.bf16.msra.mxu1 %v8232_v3  ;;  %7469 = vmatprep.subr.bf16.mxu0 %v8237_v9  ;;  %v8279_v3 = vld [vmem:[%s10611_s1 + $0x808] sm:$0xff]   ;;  %v8285_v9 = vld [vmem:[%s10611_s1 + $0x858] sm:$0xff]  }
  0xe2   :  { %7491 = vmatprep.subr.bf16.mxu1 %v8238_v11  ;;  %v8287_v11 = vld [vmem:[%s10611_s1 + $0x818] sm:$0xff]  }
  0xe3   :  { %5438 = vmatmul.mubr.bf16.vlgmr.msra.gmra.mrb[24].mxu0 %v6528_v6  ;;  %v8282_v6 = vld [vmem:[%s10611_s1 + $0x8d0] sm:$0xff]  }
  0xe4   :  { %5478 = vmatmul.mubr.bf16.vlgmr.msra.gmra.mrb[24].mxu1 %v6530_v8  ;;  %7470 = vmatpush3.bf16.msra.mxu0 %v8239_v12  ;;  %v8284_v8 = vld [vmem:[%s10611_s1 + $0x890] sm:$0xff]   ;;  %v8288_v12 = vld [vmem:[%s10611_s1 + $0x898] sm:$0xff]  }
  0xe5   :  { %7492 = vmatpush3.bf16.msra.mxu1 %v8240_v13  ;;  %7471 = vmatprep.subr.bf16.mxu0 %v8241_v14  ;;  %v8289_v13 = vld [vmem:[%s10611_s1 + $0x860] sm:$0xff]  }
  0xe6   :  { %7493 = vmatprep.subr.bf16.mxu1 %v8242_v15  ;;  %5517 = vmatprep.mubr.bf16.mxu0 %v6533_v58  ;;  %v8290_v14 = vld [vmem:[%s10611_s1 + $0x8e0] sm:$0xff]   ;;  %v8320_v58 = vld [vmem:[%s10611_s1 + $0x990] sm:$0xff]  }
  0xe7   :  { %5557 = vmatprep.mubr.bf16.mxu1 %v6535_v60  ;;  %v8291_v15 = vld [vmem:[%s10611_s1 + $0x820] sm:$0xff]   ;;  %v8322_v60 = vld [vmem:[%s10611_s1 + $0x9d8] sm:$0xff]  }
  0xe8   :  { %7472 = vmatpush3.bf16.msra.mxu0 %v8243_v16 }
  0xe9   :  { %7494 = vmatpush3.bf16.msra.mxu1 %v8244_v17  ;;  %7473 = vmatprep.subr.bf16.mxu0 %v8245_v18  ;;  %v8292_v17 = vld [vmem:[%s10611_s1 + $0x8a0] sm:$0xff]  }
  0xea   :  { %7495 = vmatprep.subr.bf16.mxu1 %v8246_v19 }
  0xec   :  { %7474 = vmatpush3.bf16.msra.mxu0 %v8247_v20 }
  0xed   :  { %7496 = vmatpush3.bf16.msra.mxu1 %v8248_v21  ;;  %7475 = vmatprep.subr.bf16.mxu0 %v8249_v22 }
  0xee   :  { %7497 = vmatprep.subr.bf16.mxu1 %v8250_v23  ;;  %v8293_v23 = vld [vmem:[%s10611_s1 + $0x868] sm:$0xff]  }
  0xf0   :  { %7476 = vmatpush3.bf16.msra.mxu0 %v8251_v24 }
  0xf1   :  { %7498 = vmatpush3.bf16.msra.mxu1 %v8252_v25  ;;  %7477 = vmatprep.subr.bf16.mxu0 %v8253_v26  ;;  %v8294_v25 = vld [vmem:[%s10611_s1 + $0x8e8] sm:$0xff]  }
  0xf2   :  { %7499 = vmatprep.subr.bf16.mxu1 %v8254_v27 }
  0xf4   :  { %7478 = vmatpush3.bf16.msra.mxu0 %v8255_v28  ;;  %v8295_v28 = vld [vmem:[%s10611_s1 + $0x828] sm:$0xff]  }
  0xf5   :  { %7500 = vmatpush3.bf16.msra.mxu1 %v8256_v30  ;;  %7479 = vmatprep.subr.bf16.mxu0 %v8257_v37  ;;  %v8296_v30 = vld [vmem:[%s10611_s1 + $0x8a8] sm:$0xff]   ;;  %v8301_v37 = vld [vmem:[%s10611_s1 + $0x878] sm:$0xff]  }
  0xf6   :  { %v7177_v29 = vpop.f32.mrb[0].mxu0  ;;  %7501 = vmatprep.subr.bf16.mxu1 %v8258_v39  ;;  %v8303_v39 = vld [vmem:[%s10611_s1 + $0x838] sm:$0xff]  }
  0xf7   :  { %v7199_v31 = vpop.f32.mrb[0].mxu1  ;;  %v7178_v33 = vpop.f32.mrb[1].mxu0 }
  0xf8   :  { %v7200_v34 = vpop.f32.mrb[1].mxu1  ;;  %v7179_v35 = vadd.f32 %v7178_v33, %v7177_v29  ;;  %v7180_v38 = vpop.f32.mrb[2].mxu0  ;;  %7480 = vmatpush3.bf16.msra.mxu0 %v8259_v42  ;;  %v8297_v33 = vld [vmem:[%s10611_s1 + $0x870] sm:$0xff]   ;;  %v39_v42 = vld [vmem:[%s10610_s0 + $0x88] sm:$0xff] }
  0xf9   :  { %v7201_v36 = vadd.f32 %v7200_v34, %v7199_v31  ;;  %v7202_v40 = vpop.f32.mrb[2].mxu1  ;;  %v7181_v43 = vpop.f32.mrb[3].mxu0  ;;  %7502 = vmatpush3.bf16.msra.mxu1 %v8260_v44  ;;  %7481 = vmatprep.subr.bf16.mxu0 %v8261_v47  ;;  %v8298_v34 = vld [vmem:[%s10611_s1 + $0x8f0] sm:$0xff]   ;;  %v8302_v38 = vld [vmem:[%s10611_s1 + $0x8f8] sm:$0xff]   ;;  %v8309_v47 = vld [vmem:[%s10611_s1 + $0x940] sm:$0xff]  }
  0xfa   :  { %v4960_v41 = vadd.f32 %v7179_v35, %v6503_v32  ;;  %v7203_v45 = vpop.f32.mrb[3].mxu1  ;;  %7503 = vmatprep.subr.bf16.mxu1 %v8262_v48  ;;  %v8299_v35 = vld [vmem:[%s10611_s1 + $0x830] sm:$0xff]   ;;  %v8304_v40 = vld [vmem:[%s10611_s1 + $0x8b8] sm:$0xff]   ;;  %v8310_v48 = vld [vmem:[%s10611_s1 + $0x9c0] sm:$0xff]  }
  0xfb   :  { %v6538_v45 = vcombine.low %v39_v42, %v39_v42 }
  0xfc   :  { %v9491_v46 = vadd.f32 %v7201_v36, %v4960_v41  ;;  %7482 = vmatpush3.bf16.msra.mxu0 %v8263_v49  ;;  %v8300_v36 = vld [vmem:[%s10611_s1 + $0x8b0] sm:$0xff]   ;;  %v38_v41 = vld [vmem:[%s10610_s0 + $0x80] sm:$0xff] }
  0xfd   :  { %7504 = vmatpush3.bf16.msra.mxu1 %v8264_v50  ;;  %7483 = vmatprep.subr.bf16.mxu0 %v8265_v51  ;;  %v6536_v43 = vcombine.low %v38_v41, %v38_v41  ;;  %v6537_v44 = vcombine.high %v38_v41, %v38_v41  ;;  %v8311_v49 = vld [vmem:[%s10611_s1 + $0x900] sm:$0xff]   ;;  %v8313_v51 = vld [vmem:[%s10611_s1 + $0x948] sm:$0xff]   ;;  %v8353_v41 = vld [vmem:[%s10611_s1 + $0xa50] sm:$0xff]  }
  0xfe   :  { %7505 = vmatprep.subr.bf16.mxu1 %v8266_v52  ;;  %v8312_v50 = vld [vmem:[%s10611_s1 + $0x980] sm:$0xff]   ;;  %v8314_v52 = vld [vmem:[%s10611_s1 + $0x9c8] sm:$0xff]  }
 0x100   :  { %7484 = vmatpush3.bf16.msra.mxu0 %v8267_v53  ;;  %v8315_v53 = vld [vmem:[%s10611_s1 + $0x908] sm:$0xff]  }
 0x101   :  { %7506 = vmatpush3.bf16.msra.mxu1 %v8268_v54  ;;  %7513 = vmatprep.subr.bf16.mxu0 %v8273_v61  ;;  %v8316_v54 = vld [vmem:[%s10611_s1 + $0x988] sm:$0xff]   ;;  %v8323_v61 = vld [vmem:[%s10611_s1 + $0x918] sm:$0xff]  }
 0x102   :  { %7535 = vmatprep.subr.bf16.mxu1 %v8274_v62  ;;  %v8324_v62 = vld [vmem:[%s10611_s1 + $0x998] sm:$0xff]  }
 0x103   :  { %5518 = vmatmul.mubr.bf16.vlgmr.msra.gmra.mrb[28].mxu0 %v6532_v57  ;;  %v8319_v57 = vld [vmem:[%s10611_s1 + $0x910] sm:$0xff]  }
 0x104   :  { %5558 = vmatmul.mubr.bf16.vlgmr.msra.gmra.mrb[28].mxu1 %v6534_v59  ;;  %7514 = vmatpush3.bf16.msra.mxu0 %v8275_v63  ;;  %v8321_v59 = vld [vmem:[%s10611_s1 + $0x958] sm:$0xff]   ;;  %v8325_v63 = vld [vmem:[%s10611_s1 + $0x960] sm:$0xff]  }
 0x105   :  { %7536 = vmatpush3.bf16.msra.mxu1 %v8276_v0  ;;  %7515 = vmatprep.subr.bf16.mxu0 %v8277_v1  ;;  %v8326_v0 = vld [vmem:[%s10611_s1 + $0x9e0] sm:$0xff]  }
 0x106   :  { %7537 = vmatprep.subr.bf16.mxu1 %v8278_v2  ;;  %5597 = vmatprep.mubr.bf16.mxu0 %v6537_v44  ;;  %v8327_v2 = vld [vmem:[%s10611_s1 + $0x920] sm:$0xff]   ;;  %v8356_v44 = vld [vmem:[%s10611_s1 + $0xa90] sm:$0xff]  }
 0x108   :  { %7516 = vmatpush3.bf16.msra.mxu0 %v8279_v3 }
 0x109   :  { %7538 = vmatpush3.bf16.msra.mxu1 %v8280_v4  ;;  %7517 = vmatprep.subr.bf16.mxu0 %v8281_v5  ;;  %v8328_v4 = vld [vmem:[%s10611_s1 + $0x9a0] sm:$0xff]  }
 0x10a   :  { %7539 = vmatprep.subr.bf16.mxu1 %v8282_v6 }
 0x10c   :  { %7518 = vmatpush3.bf16.msra.mxu0 %v8283_v7 }
 0x10d   :  { %7540 = vmatpush3.bf16.msra.mxu1 %v8284_v8  ;;  %7519 = vmatprep.subr.bf16.mxu0 %v8285_v9  ;;  %v8329_v8 = vld [vmem:[%s10611_s1 + $0x968] sm:$0xff]  }
 0x10e   :  { %7541 = vmatprep.subr.bf16.mxu1 %v8286_v10  ;;  %v8330_v10 = vld [vmem:[%s10611_s1 + $0x9e8] sm:$0xff]  }
 0x110   :  { %7520 = vmatpush3.bf16.msra.mxu0 %v8287_v11 }
 0x111   :  { %7542 = vmatpush3.bf16.msra.mxu1 %v8288_v12  ;;  %7521 = vmatprep.subr.bf16.mxu0 %v8289_v13 }
 0x112   :  { %7543 = vmatprep.subr.bf16.mxu1 %v8290_v14  ;;  %v8331_v14 = vld [vmem:[%s10611_s1 + $0x928] sm:$0xff]  }
 0x114   :  { %7522 = vmatpush3.bf16.msra.mxu0 %v8291_v15  ;;  %v8332_v15 = vld [vmem:[%s10611_s1 + $0x9a8] sm:$0xff]  }
 0x115   :  { %7544 = vmatpush3.bf16.msra.mxu1 %v8292_v17  ;;  %7523 = vmatprep.subr.bf16.mxu0 %v8293_v23  ;;  %v8337_v23 = vld [vmem:[%s10611_s1 + $0x978] sm:$0xff]  }
 0x116   :  { %v7221_v16 = vpop.f32.mrb[4].mxu0  ;;  %7545 = vmatprep.subr.bf16.mxu1 %v8294_v25  ;;  %v8339_v25 = vld [vmem:[%s10611_s1 + $0x938] sm:$0xff]  }
 0x117   :  { %v7243_v18 = vpop.f32.mrb[4].mxu1  ;;  %v7222_v19 = vpop.f32.mrb[5].mxu0 }
 0x118   :  { %v7244_v20 = vpop.f32.mrb[5].mxu1  ;;  %v7223_v21 = vadd.f32 %v7222_v19, %v7221_v16  ;;  %v7224_v24 = vpop.f32.mrb[6].mxu0  ;;  %7524 = vmatpush3.bf16.msra.mxu0 %v8295_v28  ;;  %v8333_v19 = vld [vmem:[%s10611_s1 + $0x970] sm:$0xff]   ;;  %v41_v28 = vld [vmem:[%s10610_s0 + $0x98] sm:$0xff] }
 0x119   :  { %v7245_v22 = vadd.f32 %v7244_v20, %v7243_v18  ;;  %v7246_v26 = vpop.f32.mrb[6].mxu1  ;;  %v7225_v29 = vpop.f32.mrb[7].mxu0  ;;  %7546 = vmatpush3.bf16.msra.mxu1 %v8296_v30  ;;  %7525 = vmatprep.subr.bf16.mxu0 %v8297_v33  ;;  %v8334_v20 = vld [vmem:[%s10611_s1 + $0x9f0] sm:$0xff]   ;;  %v8338_v24 = vld [vmem:[%s10611_s1 + $0x9f8] sm:$0xff]   ;;  %v6543_v33 = vcombine.high %v41_v28, %v41_v28 }
 0x11a   :  { %v5040_v27 = vadd.f32 %v7223_v21, %v9491_v46  ;;  %v7247_v31 = vpop.f32.mrb[7].mxu1  ;;  %7547 = vmatprep.subr.bf16.mxu1 %v8298_v34  ;;  %v6539_v46 = vcombine.high %v39_v42, %v39_v42  ;;  %v8335_v21 = vld [vmem:[%s10611_s1 + $0x930] sm:$0xff]   ;;  %v8340_v26 = vld [vmem:[%s10611_s1 + $0x9b8] sm:$0xff]   ;;  %v8346_v34 = vld [vmem:[%s10611_s1 + $0xac0] sm:$0xff]  }
 0x11b   :  { %v6542_v31 = vcombine.low %v41_v28, %v41_v28  ;;  %v8354_v42 = vld [vmem:[%s10611_s1 + $0xad0] sm:$0xff]  }
 0x11c   :  { %v9596_v32 = vadd.f32 %v7245_v22, %v5040_v27  ;;  %7526 = vmatpush3.bf16.msra.mxu0 %v8299_v35  ;;  %5637 = vmatprep.mubr.bf16.mxu1 %v6539_v46  ;;  %v8336_v22 = vld [vmem:[%s10611_s1 + $0x9b0] sm:$0xff]   ;;  %v8347_v35 = vld [vmem:[%s10611_s1 + $0xa00] sm:$0xff]   ;;  %v8358_v46 = vld [vmem:[%s10611_s1 + $0xad8] sm:$0xff]  }
 0x11d   :  { %7548 = vmatpush3.bf16.msra.mxu1 %v8300_v36  ;;  %7527 = vmatprep.subr.bf16.mxu0 %v8301_v37  ;;  %v40_v27 = vld [vmem:[%s10610_s0 + $0x90] sm:$0xff]  ;;  %v8348_v36 = vld [vmem:[%s10611_s1 + $0xa80] sm:$0xff]   ;;  %v8349_v37 = vld [vmem:[%s10611_s1 + $0xa48] sm:$0xff]  }
 0x11e   :  { %7549 = vmatprep.subr.bf16.mxu1 %v8302_v38  ;;  %v6540_v29 = vcombine.low %v40_v27, %v40_v27  ;;  %v6541_v30 = vcombine.high %v40_v27, %v40_v27  ;;  %v8350_v38 = vld [vmem:[%s10611_s1 + $0xac8] sm:$0xff]   ;;  %v8389_v27 = vld [vmem:[%s10611_s1 + $0xb50] sm:$0xff]  }
 0x11f   :  { %v8390_v28 = vld [vmem:[%s10611_s1 + $0xbd0] sm:$0xff]  }
 0x120   :  { %7528 = vmatpush3.bf16.msra.mxu0 %v8303_v39  ;;  %v8351_v39 = vld [vmem:[%s10611_s1 + $0xa08] sm:$0xff]  }
 0x121   :  { %7550 = vmatpush3.bf16.msra.mxu1 %v8304_v40  ;;  %7557 = vmatprep.subr.bf16.mxu0 %v8309_v47  ;;  %v8352_v40 = vld [vmem:[%s10611_s1 + $0xa88] sm:$0xff]   ;;  %v8359_v47 = vld [vmem:[%s10611_s1 + $0xa18] sm:$0xff]  }
 0x122   :  { %7579 = vmatprep.subr.bf16.mxu1 %v8310_v48  ;;  %v8360_v48 = vld [vmem:[%s10611_s1 + $0xa98] sm:$0xff]  }
 0x123   :  { %5598 = vmatmul.mubr.bf16.vlgmr.msra.gmra.mrb[32].mxu0 %v6536_v43  ;;  %v8355_v43 = vld [vmem:[%s10611_s1 + $0xa10] sm:$0xff]  }
 0x124   :  { %5638 = vmatmul.mubr.bf16.vlgmr.msra.gmra.mrb[32].mxu1 %v6538_v45  ;;  %7558 = vmatpush3.bf16.msra.mxu0 %v8311_v49  ;;  %v8357_v45 = vld [vmem:[%s10611_s1 + $0xa58] sm:$0xff]   ;;  %v8361_v49 = vld [vmem:[%s10611_s1 + $0xa60] sm:$0xff]  }
 0x125   :  { %7580 = vmatpush3.bf16.msra.mxu1 %v8312_v50  ;;  %7559 = vmatprep.subr.bf16.mxu0 %v8313_v51  ;;  %v8362_v50 = vld [vmem:[%s10611_s1 + $0xae0] sm:$0xff]  }
 0x126   :  { %7581 = vmatprep.subr.bf16.mxu1 %v8314_v52  ;;  %5677 = vmatprep.mubr.bf16.mxu0 %v6541_v30  ;;  %v8363_v52 = vld [vmem:[%s10611_s1 + $0xa20] sm:$0xff]   ;;  %v8392_v30 = vld [vmem:[%s10611_s1 + $0xb90] sm:$0xff]  }
 0x127   :  { %5717 = vmatprep.mubr.bf16.mxu1 %v6543_v33  ;;  %v8395_v33 = vld [vmem:[%s10611_s1 + $0xb18] sm:$0xff]  }
 0x128   :  { %7560 = vmatpush3.bf16.msra.mxu0 %v8315_v53 }
 0x129   :  { %7582 = vmatpush3.bf16.msra.mxu1 %v8316_v54  ;;  %7561 = vmatprep.subr.bf16.mxu0 %v8317_v55  ;;  %v8364_v54 = vld [vmem:[%s10611_s1 + $0xaa0] sm:$0xff]  }
 0x12a   :  { %7583 = vmatprep.subr.bf16.mxu1 %v8318_v56 }
 0x12c   :  { %7562 = vmatpush3.bf16.msra.mxu0 %v8319_v57  ;;  %v8365_v57 = vld [vmem:[%s10611_s1 + $0xa68] sm:$0xff]  }
 0x12d   :  { %7584 = vmatpush3.bf16.msra.mxu1 %v8320_v58  ;;  %7563 = vmatprep.subr.bf16.mxu0 %v8321_v59 }
 0x12e   :  { %7585 = vmatprep.subr.bf16.mxu1 %v8322_v60  ;;  %v8366_v60 = vld [vmem:[%s10611_s1 + $0xae8] sm:$0xff]  }
 0x130   :  { %7564 = vmatpush3.bf16.msra.mxu0 %v8323_v61 }
 0x131   :  { %7586 = vmatpush3.bf16.msra.mxu1 %v8324_v62  ;;  %7565 = vmatprep.subr.bf16.mxu0 %v8325_v63  ;;  %v8367_v63 = vld [vmem:[%s10611_s1 + $0xa28] sm:$0xff]  }
 0x132   :  { %7587 = vmatprep.subr.bf16.mxu1 %v8326_v0 }
 0x134   :  { %7566 = vmatpush3.bf16.msra.mxu0 %v8327_v2 }
 0x135   :  { %7588 = vmatpush3.bf16.msra.mxu1 %v8328_v4  ;;  %7567 = vmatprep.subr.bf16.mxu0 %v8329_v8  ;;  %v8369_v4 = vld [vmem:[%s10611_s1 + $0xa70] sm:$0xff]  }
 0x136   :  { %v7265_v1 = vpop.f32.mrb[8].mxu0  ;;  %7589 = vmatprep.subr.bf16.mxu1 %v8330_v10  ;;  %v8372_v8 = vld [vmem:[%s10611_s1 + $0xab0] sm:$0xff]   ;;  %v8374_v10 = vld [vmem:[%s10611_s1 + $0xaf8] sm:$0xff]  }
 0x137   :  { %v7287_v3 = vpop.f32.mrb[8].mxu1  ;;  %v7266_v5 = vpop.f32.mrb[9].mxu0 }
 0x138   :  { %v7267_v6 = vadd.f32 %v7266_v5, %v7265_v1  ;;  %v7288_v7 = vpop.f32.mrb[9].mxu1  ;;  %v7268_v11 = vpop.f32.mrb[10].mxu0  ;;  %7568 = vmatpush3.bf16.msra.mxu0 %v8331_v14  ;;  %v8368_v1 = vld [vmem:[%s10611_s1 + $0xaa8] sm:$0xff]  }
 0x139   :  { %v7289_v9 = vadd.f32 %v7288_v7, %v7287_v3  ;;  %v7290_v13 = vpop.f32.mrb[10].mxu1  ;;  %v7269_v16 = vpop.f32.mrb[11].mxu0  ;;  %7590 = vmatpush3.bf16.msra.mxu1 %v8332_v15  ;;  %7569 = vmatprep.subr.bf16.mxu0 %v8333_v19  ;;  %v8371_v7 = vld [vmem:[%s10611_s1 + $0xa30] sm:$0xff]   ;;  %v8375_v11 = vld [vmem:[%s10611_s1 + $0xa38] sm:$0xff]   ;;  %v8381_v19 = vld [vmem:[%s10611_s1 + $0xb40] sm:$0xff]  }
 0x13a   :  { %v5120_v12 = vadd.f32 %v7267_v6, %v9596_v32  ;;  %v7291_v18 = vpop.f32.mrb[11].mxu1  ;;  %7591 = vmatprep.subr.bf16.mxu1 %v8334_v20  ;;  %v8345_v32 = vld [vmem:[%s10611_s1 + $0xa40] sm:$0xff]   ;;  %v8370_v6 = vld [vmem:[%s10611_s1 + $0xaf0] sm:$0xff]   ;;  %v43_v16 = vld [vmem:[%s10610_s0 + $0xa8] sm:$0xff] }
 0x13b   :  { %v42_v13 = vld [vmem:[%s10610_s0 + $0xa0] sm:$0xff]  ;;  %v6547_v18 = vcombine.high %v43_v16, %v43_v16 }
 0x13c   :  { %v9701_v17 = vadd.f32 %v7289_v9, %v5120_v12  ;;  %7570 = vmatpush3.bf16.msra.mxu0 %v8335_v21  ;;  %v8373_v9 = vld [vmem:[%s10611_s1 + $0xa78] sm:$0xff]   ;;  %v6544_v14 = vcombine.low %v42_v13, %v42_v13  ;;  %v6545_v15 = vcombine.high %v42_v13, %v42_v13  ;;  %v8382_v20 = vld [vmem:[%s10611_s1 + $0xbc0] sm:$0xff]   ;;  %v8425_v13 = vld [vmem:[%s10611_s1 + $0xc50] sm:$0xff]  }
 0x13d   :  { %7592 = vmatpush3.bf16.msra.mxu1 %v8336_v22  ;;  %7571 = vmatprep.subr.bf16.mxu0 %v8337_v23  ;;  %v8376_v12 = vld [vmem:[%s10611_s1 + $0xab8] sm:$0xff]   ;;  %v8383_v21 = vld [vmem:[%s10611_s1 + $0xb00] sm:$0xff]   ;;  %v8385_v23 = vld [vmem:[%s10611_s1 + $0xb48] sm:$0xff]  }
 0x13e   :  { %7593 = vmatprep.subr.bf16.mxu1 %v8338_v24  ;;  %v8384_v22 = vld [vmem:[%s10611_s1 + $0xb80] sm:$0xff]   ;;  %v8386_v24 = vld [vmem:[%s10611_s1 + $0xbc8] sm:$0xff]  }
 0x140   :  { %7572 = vmatpush3.bf16.msra.mxu0 %v8339_v25  ;;  %v8387_v25 = vld [vmem:[%s10611_s1 + $0xb08] sm:$0xff]  }
 0x141   :  { %7594 = vmatpush3.bf16.msra.mxu1 %v8340_v26  ;;  %7601 = vmatprep.subr.bf16.mxu0 %v8345_v32  ;;  %v8388_v26 = vld [vmem:[%s10611_s1 + $0xb88] sm:$0xff]   ;;  %v8394_v32 = vld [vmem:[%s10611_s1 + $0xbd8] sm:$0xff]  }
 0x142   :  { %7623 = vmatprep.subr.bf16.mxu1 %v8346_v34  ;;  %v8396_v34 = vld [vmem:[%s10611_s1 + $0xb98] sm:$0xff]  }
 0x143   :  { %5678 = vmatmul.mubr.bf16.vlgmr.msra.gmra.mrb[36].mxu0 %v6540_v29  ;;  %v8391_v29 = vld [vmem:[%s10611_s1 + $0xb10] sm:$0xff]  }
 0x144   :  { %5718 = vmatmul.mubr.bf16.vlgmr.msra.gmra.mrb[36].mxu1 %v6542_v31  ;;  %7602 = vmatpush3.bf16.msra.mxu0 %v8347_v35  ;;  %v8393_v31 = vld [vmem:[%s10611_s1 + $0xb58] sm:$0xff]   ;;  %v8397_v35 = vld [vmem:[%s10611_s1 + $0xb60] sm:$0xff]  }
 0x145   :  { %7624 = vmatpush3.bf16.msra.mxu1 %v8348_v36  ;;  %7603 = vmatprep.subr.bf16.mxu0 %v8349_v37  ;;  %v8398_v36 = vld [vmem:[%s10611_s1 + $0xbe0] sm:$0xff]  }
 0x146   :  { %7625 = vmatprep.subr.bf16.mxu1 %v8350_v38  ;;  %5757 = vmatprep.mubr.bf16.mxu0 %v6545_v15  ;;  %v8399_v38 = vld [vmem:[%s10611_s1 + $0xb20] sm:$0xff]   ;;  %v8427_v15 = vld [vmem:[%s10611_s1 + $0xc10] sm:$0xff]  }
 0x147   :  { %5797 = vmatprep.mubr.bf16.mxu1 %v6547_v18  ;;  %v8430_v18 = vld [vmem:[%s10611_s1 + $0xcd8] sm:$0xff]  }
 0x148   :  { %7604 = vmatpush3.bf16.msra.mxu0 %v8351_v39 }
 0x149   :  { %7626 = vmatpush3.bf16.msra.mxu1 %v8352_v40  ;;  %7605 = vmatprep.subr.bf16.mxu0 %v8353_v41  ;;  %v8400_v40 = vld [vmem:[%s10611_s1 + $0xba0] sm:$0xff]  }
 0x14a   :  { %7627 = vmatprep.subr.bf16.mxu1 %v8354_v42 }
 0x14c   :  { %7606 = vmatpush3.bf16.msra.mxu0 %v8355_v43  ;;  %v8401_v43 = vld [vmem:[%s10611_s1 + $0xb68] sm:$0xff]  }
 0x14d   :  { %7628 = vmatpush3.bf16.msra.mxu1 %v8356_v44  ;;  %7607 = vmatprep.subr.bf16.mxu0 %v8357_v45 }
 0x14e   :  { %7629 = vmatprep.subr.bf16.mxu1 %v8358_v46  ;;  %v8402_v46 = vld [vmem:[%s10611_s1 + $0xbe8] sm:$0xff]  }
 0x150   :  { %7608 = vmatpush3.bf16.msra.mxu0 %v8359_v47 }
 0x151   :  { %7630 = vmatpush3.bf16.msra.mxu1 %v8360_v48  ;;  %7609 = vmatprep.subr.bf16.mxu0 %v8361_v49  ;;  %v8403_v49 = vld [vmem:[%s10611_s1 + $0xb28] sm:$0xff]  }
 0x152   :  { %7631 = vmatprep.subr.bf16.mxu1 %v8362_v50 }
 0x154   :  { %7610 = vmatpush3.bf16.msra.mxu0 %v8363_v52 }
 0x155   :  { %7632 = vmatpush3.bf16.msra.mxu1 %v8364_v54  ;;  %7611 = vmatprep.subr.bf16.mxu0 %v8365_v57  ;;  %v8405_v54 = vld [vmem:[%s10611_s1 + $0xb70] sm:$0xff]  }
 0x156   :  { %v7309_v51 = vpop.f32.mrb[12].mxu0  ;;  %7633 = vmatprep.subr.bf16.mxu1 %v8366_v60  ;;  %v8407_v57 = vld [vmem:[%s10611_s1 + $0xb30] sm:$0xff]   ;;  %v8410_v60 = vld [vmem:[%s10611_s1 + $0xbf8] sm:$0xff]  }
 0x157   :  { %v7331_v53 = vpop.f32.mrb[12].mxu1  ;;  %v7310_v55 = vpop.f32.mrb[13].mxu0 }
 0x158   :  { %v7332_v56 = vpop.f32.mrb[13].mxu1  ;;  %v7311_v58 = vadd.f32 %v7310_v55, %v7309_v51  ;;  %v7312_v61 = vpop.f32.mrb[14].mxu0  ;;  %7612 = vmatpush3.bf16.msra.mxu0 %v8367_v63  ;;  %v8404_v51 = vld [vmem:[%s10611_s1 + $0xba8] sm:$0xff]   ;;  %v44_v63 = vld [vmem:[%s10610_s0 + $0xb0] sm:$0xff] }
 0x159   :  { %v7333_v59 = vadd.f32 %v7332_v56, %v7331_v53  ;;  %v7334_v62 = vpop.f32.mrb[14].mxu1  ;;  %v7313_v2 = vpop.f32.mrb[15].mxu0  ;;  %7634 = vmatpush3.bf16.msra.mxu1 %v8368_v1  ;;  %7613 = vmatprep.subr.bf16.mxu0 %v8369_v4  ;;  %v8406_v56 = vld [vmem:[%s10611_s1 + $0xbf0] sm:$0xff]   ;;  %v8411_v61 = vld [vmem:[%s10611_s1 + $0xb38] sm:$0xff]   ;;  %v6548_v1 = vcombine.low %v44_v63, %v44_v63 }
 0x15a   :  { %v5200_v0 = vadd.f32 %v7311_v58, %v9701_v17  ;;  %v7335_v3 = vpop.f32.mrb[15].mxu1  ;;  %7635 = vmatprep.subr.bf16.mxu1 %v8370_v6  ;;  %v6546_v17 = vcombine.low %v43_v16, %v43_v16  ;;  %v8408_v58 = vld [vmem:[%s10611_s1 + $0xbb0] sm:$0xff]   ;;  %v8412_v62 = vld [vmem:[%s10611_s1 + $0xbb8] sm:$0xff]   ;;  %v6549_v2 = vcombine.high %v44_v63, %v44_v63  ;;  %v8418_v6 = vld [vmem:[%s10611_s1 + $0xcc0] sm:$0xff]  }
 0x15b   :  { %v8428_v16 = vld [vmem:[%s10611_s1 + $0xc90] sm:$0xff]  }
 0x15c   :  { %v9809_v5 = vadd.f32 %v7333_v59, %v5200_v0  ;;  %7614 = vmatpush3.bf16.msra.mxu0 %v8371_v7  ;;  %v8409_v59 = vld [vmem:[%s10611_s1 + $0xb78] sm:$0xff]   ;;  %v8419_v7 = vld [vmem:[%s10611_s1 + $0xc00] sm:$0xff]   ;;  %v8461_v63 = vld [vmem:[%s10611_s1 + $0xd50] sm:$0xff]  }
 0x15d   :  { %7636 = vmatpush3.bf16.msra.mxu1 %v8372_v8  ;;  %7615 = vmatprep.subr.bf16.mxu0 %v8373_v9  ;;  %v45_v0 = vld [vmem:[%s10610_s0 + $0xb8] sm:$0xff]  ;;  %v8420_v8 = vld [vmem:[%s10611_s1 + $0xc80] sm:$0xff]   ;;  %v8421_v9 = vld [vmem:[%s10611_s1 + $0xc48] sm:$0xff]  }
 0x15e   :  { %7637 = vmatprep.subr.bf16.mxu1 %v8374_v10  ;;  %v6550_v3 = vcombine.low %v45_v0, %v45_v0  ;;  %v6551_v4 = vcombine.high %v45_v0, %v45_v0  ;;  %v8422_v10 = vld [vmem:[%s10611_s1 + $0xcc8] sm:$0xff]   ;;  %v8462_v0 = vld [vmem:[%s10611_s1 + $0xdd0] sm:$0xff]  }
 0x160   :  { %7616 = vmatpush3.bf16.msra.mxu0 %v8375_v11  ;;  %v8423_v11 = vld [vmem:[%s10611_s1 + $0xc08] sm:$0xff]  }
 0x161   :  { %7638 = vmatpush3.bf16.msra.mxu1 %v8376_v12  ;;  %7645 = vmatprep.subr.bf16.mxu0 %v8381_v19  ;;  %v8424_v12 = vld [vmem:[%s10611_s1 + $0xc88] sm:$0xff]   ;;  %v8431_v19 = vld [vmem:[%s10611_s1 + $0xc18] sm:$0xff]  }
 0x162   :  { %7667 = vmatprep.subr.bf16.mxu1 %v8382_v20  ;;  %v8432_v20 = vld [vmem:[%s10611_s1 + $0xc98] sm:$0xff]  }
 0x163   :  { %5758 = vmatmul.mubr.bf16.vlgmr.msra.gmra.mrb[40].mxu0 %v6544_v14  ;;  %v8426_v14 = vld [vmem:[%s10611_s1 + $0xcd0] sm:$0xff]  }
 0x164   :  { %5798 = vmatmul.mubr.bf16.vlgmr.msra.gmra.mrb[40].mxu1 %v6546_v17  ;;  %7646 = vmatpush3.bf16.msra.mxu0 %v8383_v21  ;;  %v8429_v17 = vld [vmem:[%s10611_s1 + $0xc58] sm:$0xff]   ;;  %v8433_v21 = vld [vmem:[%s10611_s1 + $0xc60] sm:$0xff]  }
 0x165   :  { %7668 = vmatpush3.bf16.msra.mxu1 %v8384_v22  ;;  %7647 = vmatprep.subr.bf16.mxu0 %v8385_v23  ;;  %v8434_v22 = vld [vmem:[%s10611_s1 + $0xce0] sm:$0xff]  }
 0x166   :  { %7669 = vmatprep.subr.bf16.mxu1 %v8386_v24  ;;  %5837 = vmatprep.mubr.bf16.mxu0 %v6549_v2  ;;  %v8435_v24 = vld [vmem:[%s10611_s1 + $0xc20] sm:$0xff]   ;;  %v8464_v2 = vld [vmem:[%s10611_s1 + $0xd90] sm:$0xff]  }
 0x167   :  { %5877 = vmatprep.mubr.bf16.mxu1 %v6551_v4  ;;  %v8466_v4 = vld [vmem:[%s10611_s1 + $0xdd8] sm:$0xff]  }
 0x168   :  { %7648 = vmatpush3.bf16.msra.mxu0 %v8387_v25 }
 0x169   :  { %7670 = vmatpush3.bf16.msra.mxu1 %v8388_v26  ;;  %7649 = vmatprep.subr.bf16.mxu0 %v8389_v27  ;;  %v8436_v26 = vld [vmem:[%s10611_s1 + $0xca0] sm:$0xff]  }
 0x16a   :  { %7671 = vmatprep.subr.bf16.mxu1 %v8390_v28 }
 0x16c   :  { %7650 = vmatpush3.bf16.msra.mxu0 %v8391_v29 }
 0x16d   :  { %7672 = vmatpush3.bf16.msra.mxu1 %v8392_v30  ;;  %7651 = vmatprep.subr.bf16.mxu0 %v8393_v31  ;;  %v8437_v30 = vld [vmem:[%s10611_s1 + $0xc68] sm:$0xff]  }
 0x16e   :  { %7673 = vmatprep.subr.bf16.mxu1 %v8394_v32  ;;  %v8438_v32 = vld [vmem:[%s10611_s1 + $0xce8] sm:$0xff]  }
 0x170   :  { %7652 = vmatpush3.bf16.msra.mxu0 %v8395_v33 }
 0x171   :  { %7674 = vmatpush3.bf16.msra.mxu1 %v8396_v34  ;;  %7653 = vmatprep.subr.bf16.mxu0 %v8397_v35 }
 0x172   :  { %7675 = vmatprep.subr.bf16.mxu1 %v8398_v36  ;;  %v8439_v36 = vld [vmem:[%s10611_s1 + $0xc28] sm:$0xff]  }
 0x174   :  { %7654 = vmatpush3.bf16.msra.mxu0 %v8399_v38 }
 0x175   :  { %7676 = vmatpush3.bf16.msra.mxu1 %v8400_v40  ;;  %7655 = vmatprep.subr.bf16.mxu0 %v8401_v43  ;;  %v8443_v43 = vld [vmem:[%s10611_s1 + $0xc30] sm:$0xff]  }
 0x176   :  { %v7353_v37 = vpop.f32.mrb[16].mxu0  ;;  %7677 = vmatprep.subr.bf16.mxu1 %v8402_v46  ;;  %v8446_v46 = vld [vmem:[%s10611_s1 + $0xcf8] sm:$0xff]  }
 0x177   :  { %v7375_v39 = vpop.f32.mrb[16].mxu1  ;;  %v7354_v41 = vpop.f32.mrb[17].mxu0 }
 0x178   :  { %v7376_v42 = vpop.f32.mrb[17].mxu1  ;;  %v7355_v44 = vadd.f32 %v7354_v41, %v7353_v37  ;;  %v7356_v47 = vpop.f32.mrb[18].mxu0  ;;  %7656 = vmatpush3.bf16.msra.mxu0 %v8403_v49  ;;  %v8440_v37 = vld [vmem:[%s10611_s1 + $0xca8] sm:$0xff]   ;;  %v8441_v41 = vld [vmem:[%s10611_s1 + $0xc70] sm:$0xff]   ;;  %v46_v49 = vld [vmem:[%s10610_s0 + $0xc0] sm:$0xff] }
 0x179   :  { %v7377_v45 = vadd.f32 %v7376_v42, %v7375_v39  ;;  %v7378_v48 = vpop.f32.mrb[18].mxu1  ;;  %v7357_v52 = vpop.f32.mrb[19].mxu0  ;;  %7678 = vmatpush3.bf16.msra.mxu1 %v8404_v51  ;;  %7657 = vmatprep.subr.bf16.mxu0 %v8405_v54  ;;  %v8442_v42 = vld [vmem:[%s10611_s1 + $0xcf0] sm:$0xff]   ;;  %v8447_v47 = vld [vmem:[%s10611_s1 + $0xc38] sm:$0xff]   ;;  %v6552_v51 = vcombine.low %v46_v49, %v46_v49  ;;  %v8453_v54 = vld [vmem:[%s10611_s1 + $0xd40] sm:$0xff]  }
 0x17a   :  { %v5280_v50 = vadd.f32 %v7355_v44, %v9809_v5  ;;  %v7379_v53 = vpop.f32.mrb[19].mxu1  ;;  %7679 = vmatprep.subr.bf16.mxu1 %v8406_v56  ;;  %v8417_v5 = vld [vmem:[%s10611_s1 + $0xc40] sm:$0xff]   ;;  %v8444_v44 = vld [vmem:[%s10611_s1 + $0xcb0] sm:$0xff]   ;;  %v8448_v48 = vld [vmem:[%s10611_s1 + $0xcb8] sm:$0xff]   ;;  %v6553_v52 = vcombine.high %v46_v49, %v46_v49 }
 0x17b   :  { %v8454_v56 = vld [vmem:[%s10611_s1 + $0xdc0] sm:$0xff]   ;;  %v8497_v49 = vld [vmem:[%s10611_s1 + $0xe50] sm:$0xff]  }
 0x17c   :  { %v9914_v55 = vadd.f32 %v7377_v45, %v5280_v50  ;;  %7658 = vmatpush3.bf16.msra.mxu0 %v8407_v57  ;;  %v8445_v45 = vld [vmem:[%s10611_s1 + $0xc78] sm:$0xff]   ;;  %v47_v50 = vld [vmem:[%s10610_s0 + $0xc8] sm:$0xff]  ;;  %v8455_v57 = vld [vmem:[%s10611_s1 + $0xd00] sm:$0xff]  }
 0x17d   :  { %7680 = vmatpush3.bf16.msra.mxu1 %v8408_v58  ;;  %7659 = vmatprep.subr.bf16.mxu0 %v8409_v59  ;;  %v6554_v53 = vcombine.low %v47_v50, %v47_v50  ;;  %v8456_v58 = vld [vmem:[%s10611_s1 + $0xd80] sm:$0xff]   ;;  %v8457_v59 = vld [vmem:[%s10611_s1 + $0xd48] sm:$0xff]  }
 0x17e   :  { %7681 = vmatprep.subr.bf16.mxu1 %v8410_v60  ;;  %v8458_v60 = vld [vmem:[%s10611_s1 + $0xdc8] sm:$0xff]  }
 0x180   :  { %7660 = vmatpush3.bf16.msra.mxu0 %v8411_v61  ;;  %v8459_v61 = vld [vmem:[%s10611_s1 + $0xd08] sm:$0xff]  }
 0x181   :  { %7682 = vmatpush3.bf16.msra.mxu1 %v8412_v62  ;;  %7689 = vmatprep.subr.bf16.mxu0 %v8417_v5  ;;  %v8460_v62 = vld [vmem:[%s10611_s1 + $0xd88] sm:$0xff]   ;;  %v8467_v5 = vld [vmem:[%s10611_s1 + $0xd18] sm:$0xff]  }
 0x182   :  { %7711 = vmatprep.subr.bf16.mxu1 %v8418_v6  ;;  %v8468_v6 = vld [vmem:[%s10611_s1 + $0xd98] sm:$0xff]  }
 0x183   :  { %5838 = vmatmul.mubr.bf16.vlgmr.msra.gmra.mrb[44].mxu0 %v6548_v1  ;;  %v8463_v1 = vld [vmem:[%s10611_s1 + $0xd10] sm:$0xff]  }
 0x184   :  { %5878 = vmatmul.mubr.bf16.vlgmr.msra.gmra.mrb[44].mxu1 %v6550_v3  ;;  %7690 = vmatpush3.bf16.msra.mxu0 %v8419_v7  ;;  %v8465_v3 = vld [vmem:[%s10611_s1 + $0xd58] sm:$0xff]   ;;  %v8469_v7 = vld [vmem:[%s10611_s1 + $0xd60] sm:$0xff]  }
 0x185   :  { %7712 = vmatpush3.bf16.msra.mxu1 %v8420_v8  ;;  %7691 = vmatprep.subr.bf16.mxu0 %v8421_v9  ;;  %v8470_v8 = vld [vmem:[%s10611_s1 + $0xde0] sm:$0xff]  }
 0x186   :  { %7713 = vmatprep.subr.bf16.mxu1 %v8422_v10  ;;  %5917 = vmatprep.mubr.bf16.mxu0 %v6553_v52  ;;  %v8471_v10 = vld [vmem:[%s10611_s1 + $0xd20] sm:$0xff]   ;;  %v8500_v52 = vld [vmem:[%s10611_s1 + $0xe90] sm:$0xff]  }
 0x188   :  { %7692 = vmatpush3.bf16.msra.mxu0 %v8423_v11 }
 0x189   :  { %7714 = vmatpush3.bf16.msra.mxu1 %v8424_v12  ;;  %7693 = vmatprep.subr.bf16.mxu0 %v8425_v13  ;;  %v8472_v12 = vld [vmem:[%s10611_s1 + $0xda0] sm:$0xff]  }
 0x18a   :  { %7715 = vmatprep.subr.bf16.mxu1 %v8426_v14 }
 0x18c   :  { %7694 = vmatpush3.bf16.msra.mxu0 %v8427_v15  ;;  %v8473_v15 = vld [vmem:[%s10611_s1 + $0xd68] sm:$0xff]  }
 0x18d   :  { %7716 = vmatpush3.bf16.msra.mxu1 %v8428_v16  ;;  %7695 = vmatprep.subr.bf16.mxu0 %v8429_v17 }
 0x18e   :  { %7717 = vmatprep.subr.bf16.mxu1 %v8430_v18  ;;  %v8474_v18 = vld [vmem:[%s10611_s1 + $0xde8] sm:$0xff]  }
 0x190   :  { %7696 = vmatpush3.bf16.msra.mxu0 %v8431_v19 }
 0x191   :  { %7718 = vmatpush3.bf16.msra.mxu1 %v8432_v20  ;;  %7697 = vmatprep.subr.bf16.mxu0 %v8433_v21  ;;  %v8475_v21 = vld [vmem:[%s10611_s1 + $0xd28] sm:$0xff]  }
 0x192   :  { %7719 = vmatprep.subr.bf16.mxu1 %v8434_v22 }
 0x194   :  { %7698 = vmatpush3.bf16.msra.mxu0 %v8435_v24 }
 0x195   :  { %7720 = vmatpush3.bf16.msra.mxu1 %v8436_v26  ;;  %7699 = vmatprep.subr.bf16.mxu0 %v8437_v30  ;;  %v8477_v26 = vld [vmem:[%s10611_s1 + $0xd70] sm:$0xff]  }
 0x196   :  { %v7397_v23 = vpop.f32.mrb[20].mxu0  ;;  %7721 = vmatprep.subr.bf16.mxu1 %v8438_v32  ;;  %v8480_v30 = vld [vmem:[%s10611_s1 + $0xdb0] sm:$0xff]   ;;  %v8482_v32 = vld [vmem:[%s10611_s1 + $0xdf8] sm:$0xff]  }
 0x197   :  { %v7419_v25 = vpop.f32.mrb[20].mxu1  ;;  %v7398_v27 = vpop.f32.mrb[21].mxu0 }
 0x198   :  { %v7399_v28 = vadd.f32 %v7398_v27, %v7397_v23  ;;  %v7420_v29 = vpop.f32.mrb[21].mxu1  ;;  %v7400_v33 = vpop.f32.mrb[22].mxu0  ;;  %7700 = vmatpush3.bf16.msra.mxu0 %v8439_v36  ;;  %v8476_v23 = vld [vmem:[%s10611_s1 + $0xda8] sm:$0xff]  }
 0x199   :  { %v7421_v31 = vadd.f32 %v7420_v29, %v7419_v25  ;;  %v7422_v35 = vpop.f32.mrb[22].mxu1  ;;  %v7401_v38 = vpop.f32.mrb[23].mxu0  ;;  %7722 = vmatpush3.bf16.msra.mxu1 %v8440_v37  ;;  %7701 = vmatprep.subr.bf16.mxu0 %v8441_v41  ;;  %v8479_v29 = vld [vmem:[%s10611_s1 + $0xd30] sm:$0xff]   ;;  %v8483_v33 = vld [vmem:[%s10611_s1 + $0xd38] sm:$0xff]   ;;  %v8489_v41 = vld [vmem:[%s10611_s1 + $0xe40] sm:$0xff]  }
 0x19a   :  { %v5360_v34 = vadd.f32 %v7399_v28, %v9914_v55  ;;  %v7423_v40 = vpop.f32.mrb[23].mxu1  ;;  %7723 = vmatprep.subr.bf16.mxu1 %v8442_v42  ;;  %v6555_v55 = vcombine.high %v47_v50, %v47_v50  ;;  %v8478_v28 = vld [vmem:[%s10611_s1 + $0xdf0] sm:$0xff]   ;;  %v49_v38 = vld [vmem:[%s10610_s0 + $0xd8] sm:$0xff]  ;;  %v8490_v42 = vld [vmem:[%s10611_s1 + $0xec0] sm:$0xff]  }
 0x19b   :  { %v48_v35 = vld [vmem:[%s10610_s0 + $0xd0] sm:$0xff]  ;;  %v6559_v40 = vcombine.high %v49_v38, %v49_v38 }
 0x19c   :  { %v10016_v39 = vadd.f32 %v7421_v31, %v5360_v34  ;;  %7702 = vmatpush3.bf16.msra.mxu0 %v8443_v43  ;;  %5957 = vmatprep.mubr.bf16.mxu1 %v6555_v55  ;;  %v8481_v31 = vld [vmem:[%s10611_s1 + $0xd78] sm:$0xff]   ;;  %v6556_v36 = vcombine.low %v48_v35, %v48_v35  ;;  %v6557_v37 = vcombine.high %v48_v35, %v48_v35  ;;  %v8491_v43 = vld [vmem:[%s10611_s1 + $0xe00] sm:$0xff]   ;;  %v8498_v50 = vld [vmem:[%s10611_s1 + $0xed0] sm:$0xff]  }
 0x19d   :  { %7724 = vmatpush3.bf16.msra.mxu1 %v8444_v44  ;;  %7703 = vmatprep.subr.bf16.mxu0 %v8445_v45  ;;  %v8484_v34 = vld [vmem:[%s10611_s1 + $0xdb8] sm:$0xff]   ;;  %v8492_v44 = vld [vmem:[%s10611_s1 + $0xe80] sm:$0xff]   ;;  %v8493_v45 = vld [vmem:[%s10611_s1 + $0xe48] sm:$0xff]  }
 0x19e   :  { %7725 = vmatprep.subr.bf16.mxu1 %v8446_v46  ;;  %v8494_v46 = vld [vmem:[%s10611_s1 + $0xec8] sm:$0xff]   ;;  %v8503_v55 = vld [vmem:[%s10611_s1 + $0xe18] sm:$0xff]   ;;  %v8533_v35 = vld [vmem:[%s10611_s1 + $0xf50] sm:$0xff]  }
 0x1a0   :  { %7704 = vmatpush3.bf16.msra.mxu0 %v8447_v47  ;;  %v8495_v47 = vld [vmem:[%s10611_s1 + $0xe08] sm:$0xff]  }
 0x1a1   :  { %7726 = vmatpush3.bf16.msra.mxu1 %v8448_v48  ;;  %7733 = vmatprep.subr.bf16.mxu0 %v8453_v54  ;;  %v8496_v48 = vld [vmem:[%s10611_s1 + $0xe88] sm:$0xff]   ;;  %v8502_v54 = vld [vmem:[%s10611_s1 + $0xed8] sm:$0xff]  }
 0x1a2   :  { %7755 = vmatprep.subr.bf16.mxu1 %v8454_v56  ;;  %v8504_v56 = vld [vmem:[%s10611_s1 + $0xe98] sm:$0xff]  }
 0x1a3   :  { %5918 = vmatmul.mubr.bf16.vlgmr.msra.gmra.mrb[48].mxu0 %v6552_v51  ;;  %v8499_v51 = vld [vmem:[%s10611_s1 + $0xe10] sm:$0xff]  }
 0x1a4   :  { %5958 = vmatmul.mubr.bf16.vlgmr.msra.gmra.mrb[48].mxu1 %v6554_v53  ;;  %7734 = vmatpush3.bf16.msra.mxu0 %v8455_v57  ;;  %v8501_v53 = vld [vmem:[%s10611_s1 + $0xe58] sm:$0xff]   ;;  %v8505_v57 = vld [vmem:[%s10611_s1 + $0xe60] sm:$0xff]  }
 0x1a5   :  { %7756 = vmatpush3.bf16.msra.mxu1 %v8456_v58  ;;  %7735 = vmatprep.subr.bf16.mxu0 %v8457_v59  ;;  %v8506_v58 = vld [vmem:[%s10611_s1 + $0xee0] sm:$0xff]  }
 0x1a6   :  { %7757 = vmatprep.subr.bf16.mxu1 %v8458_v60  ;;  %5997 = vmatprep.mubr.bf16.mxu0 %v6557_v37  ;;  %v8507_v60 = vld [vmem:[%s10611_s1 + $0xe20] sm:$0xff]   ;;  %v8535_v37 = vld [vmem:[%s10611_s1 + $0xf10] sm:$0xff]  }
 0x1a7   :  { %6037 = vmatprep.mubr.bf16.mxu1 %v6559_v40  ;;  %v8538_v40 = vld [vmem:[%s10611_s1 + $0xfd8] sm:$0xff]  }
 0x1a8   :  { %7736 = vmatpush3.bf16.msra.mxu0 %v8459_v61 }
 0x1a9   :  { %7758 = vmatpush3.bf16.msra.mxu1 %v8460_v62  ;;  %7737 = vmatprep.subr.bf16.mxu0 %v8461_v63  ;;  %v8508_v62 = vld [vmem:[%s10611_s1 + $0xea0] sm:$0xff]  }
 0x1aa   :  { %7759 = vmatprep.subr.bf16.mxu1 %v8462_v0 }
 0x1ac   :  { %7738 = vmatpush3.bf16.msra.mxu0 %v8463_v1  ;;  %v8509_v1 = vld [vmem:[%s10611_s1 + $0xe68] sm:$0xff]  }
 0x1ad   :  { %7760 = vmatpush3.bf16.msra.mxu1 %v8464_v2  ;;  %7739 = vmatprep.subr.bf16.mxu0 %v8465_v3 }
 0x1ae   :  { %7761 = vmatprep.subr.bf16.mxu1 %v8466_v4  ;;  %v8510_v4 = vld [vmem:[%s10611_s1 + $0xee8] sm:$0xff]  }
 0x1b0   :  { %7740 = vmatpush3.bf16.msra.mxu0 %v8467_v5 }
 0x1b1   :  { %7762 = vmatpush3.bf16.msra.mxu1 %v8468_v6  ;;  %7741 = vmatprep.subr.bf16.mxu0 %v8469_v7  ;;  %v8511_v7 = vld [vmem:[%s10611_s1 + $0xe28] sm:$0xff]  }
 0x1b2   :  { %7763 = vmatprep.subr.bf16.mxu1 %v8470_v8 }
 0x1b4   :  { %7742 = vmatpush3.bf16.msra.mxu0 %v8471_v10 }
 0x1b5   :  { %7764 = vmatpush3.bf16.msra.mxu1 %v8472_v12  ;;  %7743 = vmatprep.subr.bf16.mxu0 %v8473_v15  ;;  %v8513_v12 = vld [vmem:[%s10611_s1 + $0xe70] sm:$0xff]  }
 0x1b6   :  { %v7441_v9 = vpop.f32.mrb[24].mxu0  ;;  %7765 = vmatprep.subr.bf16.mxu1 %v8474_v18  ;;  %v8515_v15 = vld [vmem:[%s10611_s1 + $0xe30] sm:$0xff]   ;;  %v8518_v18 = vld [vmem:[%s10611_s1 + $0xef8] sm:$0xff]  }
 0x1b7   :  { %v7463_v11 = vpop.f32.mrb[24].mxu1  ;;  %v7442_v13 = vpop.f32.mrb[25].mxu0 }
 0x1b8   :  { %v7464_v14 = vpop.f32.mrb[25].mxu1  ;;  %v7443_v16 = vadd.f32 %v7442_v13, %v7441_v9  ;;  %v7444_v19 = vpop.f32.mrb[26].mxu0  ;;  %7744 = vmatpush3.bf16.msra.mxu0 %v8475_v21  ;;  %v8512_v9 = vld [vmem:[%s10611_s1 + $0xea8] sm:$0xff]   ;;  %v50_v21 = vld [vmem:[%s10610_s0 + $0xe0] sm:$0xff] }
 0x1b9   :  { %v7465_v17 = vadd.f32 %v7464_v14, %v7463_v11  ;;  %v7466_v20 = vpop.f32.mrb[26].mxu1  ;;  %v7445_v24 = vpop.f32.mrb[27].mxu0  ;;  %7766 = vmatpush3.bf16.msra.mxu1 %v8476_v23  ;;  %7745 = vmatprep.subr.bf16.mxu0 %v8477_v26  ;;  %v8514_v14 = vld [vmem:[%s10611_s1 + $0xef0] sm:$0xff]   ;;  %v8519_v19 = vld [vmem:[%s10611_s1 + $0xe38] sm:$0xff]   ;;  %v6560_v23 = vcombine.low %v50_v21, %v50_v21 }
 0x1ba   :  { %v5440_v22 = vadd.f32 %v7443_v16, %v10016_v39  ;;  %v7467_v25 = vpop.f32.mrb[27].mxu1  ;;  %7767 = vmatprep.subr.bf16.mxu1 %v8478_v28  ;;  %v6558_v39 = vcombine.low %v49_v38, %v49_v38  ;;  %v8516_v16 = vld [vmem:[%s10611_s1 + $0xeb0] sm:$0xff]   ;;  %v8520_v20 = vld [vmem:[%s10611_s1 + $0xeb8] sm:$0xff]   ;;  %v6561_v24 = vcombine.high %v50_v21, %v50_v21  ;;  %v8526_v28 = vld [vmem:[%s10611_s1 + $0xfc0] sm:$0xff]  }
 0x1bb   :  { %v8536_v38 = vld [vmem:[%s10611_s1 + $0xf90] sm:$0xff]  }
 0x1bc   :  { %v10124_v27 = vadd.f32 %v7465_v17, %v5440_v22  ;;  %7746 = vmatpush3.bf16.msra.mxu0 %v8479_v29  ;;  %v8517_v17 = vld [vmem:[%s10611_s1 + $0xe78] sm:$0xff]   ;;  %v51_v22 = vld [vmem:[%s10610_s0 + $0xe8] sm:$0xff]  ;;  %v8527_v29 = vld [vmem:[%s10611_s1 + $0xf00] sm:$0xff]  }
 0x1bd   :  { %7768 = vmatpush3.bf16.msra.mxu1 %v8480_v30  ;;  %7747 = vmatprep.subr.bf16.mxu0 %v8481_v31  ;;  %v6562_v25 = vcombine.low %v51_v22, %v51_v22  ;;  %v6563_v26 = vcombine.high %v51_v22, %v51_v22  ;;  %v8528_v30 = vld [vmem:[%s10611_s1 + $0xf80] sm:$0xff]   ;;  %v8529_v31 = vld [vmem:[%s10611_s1 + $0xf48] sm:$0xff]   ;;  %v8569_v21 = vld [vmem:[%s10611_s1 + $0x1050] sm:$0xff]  }
 0x1be   :  { %7769 = vmatprep.subr.bf16.mxu1 %v8482_v32  ;;  %v8530_v32 = vld [vmem:[%s10611_s1 + $0xfc8] sm:$0xff]   ;;  %v8570_v22 = vld [vmem:[%s10611_s1 + $0x10d0] sm:$0xff]  }
 0x1c0   :  { %7748 = vmatpush3.bf16.msra.mxu0 %v8483_v33  ;;  %v8531_v33 = vld [vmem:[%s10611_s1 + $0xf08] sm:$0xff]  }
 0x1c1   :  { %7770 = vmatpush3.bf16.msra.mxu1 %v8484_v34  ;;  %7777 = vmatprep.subr.bf16.mxu0 %v8489_v41  ;;  %v8532_v34 = vld [vmem:[%s10611_s1 + $0xf88] sm:$0xff]   ;;  %v8539_v41 = vld [vmem:[%s10611_s1 + $0xf18] sm:$0xff]  }
 0x1c2   :  { %7799 = vmatprep.subr.bf16.mxu1 %v8490_v42  ;;  %v8540_v42 = vld [vmem:[%s10611_s1 + $0xf98] sm:$0xff]  }
 0x1c3   :  { %5998 = vmatmul.mubr.bf16.vlgmr.msra.gmra.mrb[52].mxu0 %v6556_v36  ;;  %v8534_v36 = vld [vmem:[%s10611_s1 + $0xfd0] sm:$0xff]  }
 0x1c4   :  { %6038 = vmatmul.mubr.bf16.vlgmr.msra.gmra.mrb[52].mxu1 %v6558_v39  ;;  %7778 = vmatpush3.bf16.msra.mxu0 %v8491_v43  ;;  %v8537_v39 = vld [vmem:[%s10611_s1 + $0xf58] sm:$0xff]   ;;  %v8541_v43 = vld [vmem:[%s10611_s1 + $0xf60] sm:$0xff]  }
 0x1c5   :  { %7800 = vmatpush3.bf16.msra.mxu1 %v8492_v44  ;;  %7779 = vmatprep.subr.bf16.mxu0 %v8493_v45  ;;  %v8542_v44 = vld [vmem:[%s10611_s1 + $0xfe0] sm:$0xff]  }
 0x1c6   :  { %7801 = vmatprep.subr.bf16.mxu1 %v8494_v46  ;;  %6077 = vmatprep.mubr.bf16.mxu0 %v6561_v24  ;;  %v8543_v45 = vld [vmem:[%s10611_s1 + $0xf20] sm:$0xff]   ;;  %v8572_v24 = vld [vmem:[%s10611_s1 + $0x1090] sm:$0xff]  }
 0x1c7   :  { %6117 = vmatprep.mubr.bf16.mxu1 %v6563_v26  ;;  %v8574_v26 = vld [vmem:[%s10611_s1 + $0x10d8] sm:$0xff]  }
 0x1c8   :  { %7780 = vmatpush3.bf16.msra.mxu0 %v8495_v47  ;;  %v8544_v47 = vld [vmem:[%s10611_s1 + $0xfa0] sm:$0xff]  }
 0x1c9   :  { %7802 = vmatpush3.bf16.msra.mxu1 %v8496_v48  ;;  %7781 = vmatprep.subr.bf16.mxu0 %v8497_v49 }
 0x1ca   :  { %7803 = vmatprep.subr.bf16.mxu1 %v8498_v50 }
 0x1cc   :  { %7782 = vmatpush3.bf16.msra.mxu0 %v8499_v51 }
 0x1cd   :  { %7804 = vmatpush3.bf16.msra.mxu1 %v8500_v52  ;;  %7783 = vmatprep.subr.bf16.mxu0 %v8501_v53  ;;  %v8545_v53 = vld [vmem:[%s10611_s1 + $0xf68] sm:$0xff]  }
 0x1ce   :  { %7805 = vmatprep.subr.bf16.mxu1 %v8502_v54 }
 0x1d0   :  { %7784 = vmatpush3.bf16.msra.mxu0 %v8503_v55  ;;  %v8546_v55 = vld [vmem:[%s10611_s1 + $0xfe8] sm:$0xff]  }
 0x1d1   :  { %7806 = vmatpush3.bf16.msra.mxu1 %v8504_v56  ;;  %7785 = vmatprep.subr.bf16.mxu0 %v8505_v57 }
 0x1d2   :  { %7807 = vmatprep.subr.bf16.mxu1 %v8506_v58  ;;  %v8547_v58 = vld [vmem:[%s10611_s1 + $0xf28] sm:$0xff]  }
 0x1d4   :  { %7786 = vmatpush3.bf16.msra.mxu0 %v8507_v60  ;;  %v8548_v60 = vld [vmem:[%s10611_s1 + $0xfa8] sm:$0xff]  }
 0x1d5   :  { %7808 = vmatpush3.bf16.msra.mxu1 %v8508_v62  ;;  %7787 = vmatprep.subr.bf16.mxu0 %v8509_v1  ;;  %v8551_v1 = vld [vmem:[%s10611_s1 + $0xf30] sm:$0xff]  }
 0x1d6   :  { %v7485_v59 = vpop.f32.mrb[28].mxu0  ;;  %7809 = vmatprep.subr.bf16.mxu1 %v8510_v4  ;;  %v8554_v4 = vld [vmem:[%s10611_s1 + $0xff8] sm:$0xff]  }
 0x1d7   :  { %v7507_v61 = vpop.f32.mrb[28].mxu1  ;;  %v7486_v63 = vpop.f32.mrb[29].mxu0 }
 0x1d8   :  { %v7508_v0 = vpop.f32.mrb[29].mxu1  ;;  %v7487_v2 = vadd.f32 %v7486_v63, %v7485_v59  ;;  %v7488_v5 = vpop.f32.mrb[30].mxu0  ;;  %7788 = vmatpush3.bf16.msra.mxu0 %v8511_v7  ;;  %v8549_v63 = vld [vmem:[%s10611_s1 + $0xf70] sm:$0xff]  }
 0x1d9   :  { %v7509_v3 = vadd.f32 %v7508_v0, %v7507_v61  ;;  %v7510_v6 = vpop.f32.mrb[30].mxu1  ;;  %v7489_v10 = vpop.f32.mrb[31].mxu0  ;;  %7810 = vmatpush3.bf16.msra.mxu1 %v8512_v9  ;;  %7789 = vmatprep.subr.bf16.mxu0 %v8513_v12  ;;  %v8550_v0 = vld [vmem:[%s10611_s1 + $0xff0] sm:$0xff]   ;;  %v8555_v5 = vld [vmem:[%s10611_s1 + $0xf38] sm:$0xff]  }
 0x1da   :  { %v5520_v8 = vadd.f32 %v7487_v2, %v10124_v27  ;;  %v7511_v11 = vpop.f32.mrb[31].mxu1  ;;  %7811 = vmatprep.subr.bf16.mxu1 %v8514_v14  ;;  %v8525_v27 = vld [vmem:[%s10611_s1 + $0xf40] sm:$0xff]   ;;  %v8552_v2 = vld [vmem:[%s10611_s1 + $0xfb0] sm:$0xff]   ;;  %v8556_v6 = vld [vmem:[%s10611_s1 + $0xfb8] sm:$0xff]  }
 0x1db   :  { %v52_v7 = vld [vmem:[%s10610_s0 + $0xf0] sm:$0xff]  ;;  %v8562_v14 = vld [vmem:[%s10611_s1 + $0x10c0] sm:$0xff]  }
 0x1dc   :  { %v10229_v13 = vadd.f32 %v7509_v3, %v5520_v8  ;;  %7790 = vmatpush3.bf16.msra.mxu0 %v8515_v15  ;;  %v8553_v3 = vld [vmem:[%s10611_s1 + $0xf78] sm:$0xff]   ;;  %v6564_v9 = vcombine.low %v52_v7, %v52_v7  ;;  %v6565_v10 = vcombine.high %v52_v7, %v52_v7  ;;  %v8563_v15 = vld [vmem:[%s10611_s1 + $0x1000] sm:$0xff]   ;;  %v8605_v7 = vld [vmem:[%s10611_s1 + $0x1150] sm:$0xff]  }
 0x1dd   :  { %7812 = vmatpush3.bf16.msra.mxu1 %v8516_v16  ;;  %7791 = vmatprep.subr.bf16.mxu0 %v8517_v17  ;;  %v53_v8 = vld [vmem:[%s10610_s0 + $0xf8] sm:$0xff]  ;;  %v8564_v16 = vld [vmem:[%s10611_s1 + $0x1080] sm:$0xff]   ;;  %v8565_v17 = vld [vmem:[%s10611_s1 + $0x1048] sm:$0xff]  }
 0x1de   :  { %7813 = vmatprep.subr.bf16.mxu1 %v8518_v18  ;;  %v6566_v11 = vcombine.low %v53_v8, %v53_v8  ;;  %v6567_v12 = vcombine.high %v53_v8, %v53_v8  ;;  %v8566_v18 = vld [vmem:[%s10611_s1 + $0x10c8] sm:$0xff]   ;;  %v8606_v8 = vld [vmem:[%s10611_s1 + $0x11d0] sm:$0xff]  }
 0x1e0   :  { %7792 = vmatpush3.bf16.msra.mxu0 %v8519_v19  ;;  %v8567_v19 = vld [vmem:[%s10611_s1 + $0x1008] sm:$0xff]  }
 0x1e1   :  { %7814 = vmatpush3.bf16.msra.mxu1 %v8520_v20  ;;  %7821 = vmatprep.subr.bf16.mxu0 %v8525_v27  ;;  %v8568_v20 = vld [vmem:[%s10611_s1 + $0x1088] sm:$0xff]   ;;  %v8575_v27 = vld [vmem:[%s10611_s1 + $0x1018] sm:$0xff]  }
 0x1e2   :  { %7843 = vmatprep.subr.bf16.mxu1 %v8526_v28  ;;  %v8576_v28 = vld [vmem:[%s10611_s1 + $0x1098] sm:$0xff]  }
 0x1e3   :  { %6078 = vmatmul.mubr.bf16.vlgmr.msra.gmra.mrb[56].mxu0 %v6560_v23  ;;  %v8571_v23 = vld [vmem:[%s10611_s1 + $0x1010] sm:$0xff]  }
 0x1e4   :  { %6118 = vmatmul.mubr.bf16.vlgmr.msra.gmra.mrb[56].mxu1 %v6562_v25  ;;  %7822 = vmatpush3.bf16.msra.mxu0 %v8527_v29  ;;  %v8573_v25 = vld [vmem:[%s10611_s1 + $0x1058] sm:$0xff]   ;;  %v8577_v29 = vld [vmem:[%s10611_s1 + $0x1060] sm:$0xff]  }
 0x1e5   :  { %7844 = vmatpush3.bf16.msra.mxu1 %v8528_v30  ;;  %7823 = vmatprep.subr.bf16.mxu0 %v8529_v31  ;;  %v8578_v30 = vld [vmem:[%s10611_s1 + $0x10e0] sm:$0xff]  }
 0x1e6   :  { %7845 = vmatprep.subr.bf16.mxu1 %v8530_v32  ;;  %6157 = vmatprep.mubr.bf16.mxu0 %v6565_v10  ;;  %v8579_v31 = vld [vmem:[%s10611_s1 + $0x1020] sm:$0xff]   ;;  %v8608_v10 = vld [vmem:[%s10611_s1 + $0x1190] sm:$0xff]  }
 0x1e7   :  { %6197 = vmatprep.mubr.bf16.mxu1 %v6567_v12  ;;  %v8610_v12 = vld [vmem:[%s10611_s1 + $0x11d8] sm:$0xff]  }
 0x1e8   :  { %7824 = vmatpush3.bf16.msra.mxu0 %v8531_v33  ;;  %v8580_v33 = vld [vmem:[%s10611_s1 + $0x10a0] sm:$0xff]  }
 0x1e9   :  { %7846 = vmatpush3.bf16.msra.mxu1 %v8532_v34  ;;  %7825 = vmatprep.subr.bf16.mxu0 %v8533_v35 }
 0x1ea   :  { %7847 = vmatprep.subr.bf16.mxu1 %v8534_v36 }
 0x1ec   :  { %7826 = vmatpush3.bf16.msra.mxu0 %v8535_v37 }
 0x1ed   :  { %7848 = vmatpush3.bf16.msra.mxu1 %v8536_v38  ;;  %7827 = vmatprep.subr.bf16.mxu0 %v8537_v39  ;;  %v8581_v39 = vld [vmem:[%s10611_s1 + $0x1068] sm:$0xff]  }
 0x1ee   :  { %7849 = vmatprep.subr.bf16.mxu1 %v8538_v40 }
 0x1f0   :  { %7828 = vmatpush3.bf16.msra.mxu0 %v8539_v41  ;;  %v8582_v41 = vld [vmem:[%s10611_s1 + $0x10e8] sm:$0xff]  }
 0x1f1   :  { %7850 = vmatpush3.bf16.msra.mxu1 %v8540_v42  ;;  %7829 = vmatprep.subr.bf16.mxu0 %v8541_v43 }
 0x1f2   :  { %7851 = vmatprep.subr.bf16.mxu1 %v8542_v44  ;;  %v8583_v44 = vld [vmem:[%s10611_s1 + $0x1028] sm:$0xff]  }
 0x1f4   :  { %7830 = vmatpush3.bf16.msra.mxu0 %v8543_v45 }
 0x1f5   :  { %7852 = vmatpush3.bf16.msra.mxu1 %v8544_v47  ;;  %7831 = vmatprep.subr.bf16.mxu0 %v8545_v53  ;;  %v8589_v53 = vld [vmem:[%s10611_s1 + $0x1078] sm:$0xff]  }
 0x1f6   :  { %v7529_v46 = vpop.f32.mrb[32].mxu0  ;;  %7853 = vmatprep.subr.bf16.mxu1 %v8546_v55  ;;  %v8591_v55 = vld [vmem:[%s10611_s1 + $0x1038] sm:$0xff]  }
 0x1f7   :  { %v7551_v48 = vpop.f32.mrb[32].mxu1  ;;  %v7530_v49 = vpop.f32.mrb[33].mxu0 }
 0x1f8   :  { %v7552_v50 = vpop.f32.mrb[33].mxu1  ;;  %v7531_v51 = vadd.f32 %v7530_v49, %v7529_v46  ;;  %v7532_v54 = vpop.f32.mrb[34].mxu0  ;;  %7832 = vmatpush3.bf16.msra.mxu0 %v8547_v58  ;;  %v8584_v46 = vld [vmem:[%s10611_s1 + $0x10a8] sm:$0xff]   ;;  %v8585_v49 = vld [vmem:[%s10611_s1 + $0x1070] sm:$0xff]  }
 0x1f9   :  { %v7553_v52 = vadd.f32 %v7552_v50, %v7551_v48  ;;  %v7554_v56 = vpop.f32.mrb[34].mxu1  ;;  %v7533_v59 = vpop.f32.mrb[35].mxu0  ;;  %7854 = vmatpush3.bf16.msra.mxu1 %v8548_v60  ;;  %7833 = vmatprep.subr.bf16.mxu0 %v8549_v63  ;;  %v8586_v50 = vld [vmem:[%s10611_s1 + $0x10f0] sm:$0xff]   ;;  %v8590_v54 = vld [vmem:[%s10611_s1 + $0x10f8] sm:$0xff]   ;;  %v55_v58 = vld [vmem:[%s10610_s0 + $0x108] sm:$0xff] }
 0x1fa   :  { %v5600_v57 = vadd.f32 %v7531_v51, %v10229_v13  ;;  %v7555_v61 = vpop.f32.mrb[35].mxu1  ;;  %7855 = vmatprep.subr.bf16.mxu1 %v8550_v0  ;;  %v8561_v13 = vld [vmem:[%s10611_s1 + $0x1040] sm:$0xff]   ;;  %v8587_v51 = vld [vmem:[%s10611_s1 + $0x1030] sm:$0xff]   ;;  %v8592_v56 = vld [vmem:[%s10611_s1 + $0x10b8] sm:$0xff]  }
 0x1fb   :  { %v6570_v61 = vcombine.low %v55_v58, %v55_v58  ;;  %v8597_v63 = vld [vmem:[%s10611_s1 + $0x1140] sm:$0xff]  }
 0x1fc   :  { %v10331_v62 = vadd.f32 %v7553_v52, %v5600_v57  ;;  %7834 = vmatpush3.bf16.msra.mxu0 %v8551_v1  ;;  %v8588_v52 = vld [vmem:[%s10611_s1 + $0x10b0] sm:$0xff]   ;;  %v54_v57 = vld [vmem:[%s10610_s0 + $0x100] sm:$0xff] }
 0x1fd   :  { %7856 = vmatpush3.bf16.msra.mxu1 %v8552_v2  ;;  %7835 = vmatprep.subr.bf16.mxu0 %v8553_v3  ;;  %v6568_v59 = vcombine.low %v54_v57, %v54_v57  ;;  %v6569_v60 = vcombine.high %v54_v57, %v54_v57  ;;  %v8598_v0 = vld [vmem:[%s10611_s1 + $0x11c0] sm:$0xff]   ;;  %v8601_v3 = vld [vmem:[%s10611_s1 + $0x1148] sm:$0xff]  }
 0x1fe   :  { %7857 = vmatprep.subr.bf16.mxu1 %v8554_v4  ;;  %v8599_v1 = vld [vmem:[%s10611_s1 + $0x1100] sm:$0xff]   ;;  %v8602_v4 = vld [vmem:[%s10611_s1 + $0x11c8] sm:$0xff]  }
 0x1ff   :  { %v8600_v2 = vld [vmem:[%s10611_s1 + $0x1180] sm:$0xff]  }
 0x200   :  { %7836 = vmatpush3.bf16.msra.mxu0 %v8555_v5  ;;  %v8603_v5 = vld [vmem:[%s10611_s1 + $0x1108] sm:$0xff]  }
 0x201   :  { %7858 = vmatpush3.bf16.msra.mxu1 %v8556_v6  ;;  %7865 = vmatprep.subr.bf16.mxu0 %v8561_v13  ;;  %v8604_v6 = vld [vmem:[%s10611_s1 + $0x1188] sm:$0xff]   ;;  %v8611_v13 = vld [vmem:[%s10611_s1 + $0x1118] sm:$0xff]  }
 0x202   :  { %7887 = vmatprep.subr.bf16.mxu1 %v8562_v14  ;;  %v8612_v14 = vld [vmem:[%s10611_s1 + $0x1198] sm:$0xff]  }
 0x203   :  { %6158 = vmatmul.mubr.bf16.vlgmr.msra.gmra.mrb[60].mxu0 %v6564_v9  ;;  %v8607_v9 = vld [vmem:[%s10611_s1 + $0x1110] sm:$0xff]  }
 0x204   :  { %6198 = vmatmul.mubr.bf16.vlgmr.msra.gmra.mrb[60].mxu1 %v6566_v11  ;;  %7866 = vmatpush3.bf16.msra.mxu0 %v8563_v15  ;;  %v8609_v11 = vld [vmem:[%s10611_s1 + $0x1158] sm:$0xff]   ;;  %v8613_v15 = vld [vmem:[%s10611_s1 + $0x1160] sm:$0xff]  }
 0x205   :  { %7888 = vmatpush3.bf16.msra.mxu1 %v8564_v16  ;;  %7867 = vmatprep.subr.bf16.mxu0 %v8565_v17  ;;  %v8614_v16 = vld [vmem:[%s10611_s1 + $0x11e0] sm:$0xff]  }
 0x206   :  { %7889 = vmatprep.subr.bf16.mxu1 %v8566_v18  ;;  %6237 = vmatprep.mubr.bf16.mxu0 %v6569_v60  ;;  %v8615_v17 = vld [vmem:[%s10611_s1 + $0x1120] sm:$0xff]  }
 0x208   :  { %7868 = vmatpush3.bf16.msra.mxu0 %v8567_v19  ;;  %v8616_v19 = vld [vmem:[%s10611_s1 + $0x11a0] sm:$0xff]  }
 0x209   :  { %7890 = vmatpush3.bf16.msra.mxu1 %v8568_v20  ;;  %7869 = vmatprep.subr.bf16.mxu0 %v8569_v21 }
 0x20a   :  { %7891 = vmatprep.subr.bf16.mxu1 %v8570_v22 }
 0x20c   :  { %7870 = vmatpush3.bf16.msra.mxu0 %v8571_v23 }
 0x20d   :  { %7892 = vmatpush3.bf16.msra.mxu1 %v8572_v24  ;;  %7871 = vmatprep.subr.bf16.mxu0 %v8573_v25  ;;  %v8617_v25 = vld [vmem:[%s10611_s1 + $0x1168] sm:$0xff]  }
 0x20e   :  { %7893 = vmatprep.subr.bf16.mxu1 %v8574_v26 }
 0x210   :  { %7872 = vmatpush3.bf16.msra.mxu0 %v8575_v27  ;;  %v8618_v27 = vld [vmem:[%s10611_s1 + $0x11e8] sm:$0xff]  }
 0x211   :  { %7894 = vmatpush3.bf16.msra.mxu1 %v8576_v28  ;;  %7873 = vmatprep.subr.bf16.mxu0 %v8577_v29 }
 0x212   :  { %7895 = vmatprep.subr.bf16.mxu1 %v8578_v30  ;;  %v8619_v30 = vld [vmem:[%s10611_s1 + $0x1128] sm:$0xff]  }
 0x214   :  { %7874 = vmatpush3.bf16.msra.mxu0 %v8579_v31 }
 0x215   :  { %7896 = vmatpush3.bf16.msra.mxu1 %v8580_v33  ;;  %7875 = vmatprep.subr.bf16.mxu0 %v8581_v39  ;;  %v8625_v39 = vld [vmem:[%s10611_s1 + $0x1178] sm:$0xff]  }
 0x216   :  { %v7573_v32 = vpop.f32.mrb[36].mxu0  ;;  %7897 = vmatprep.subr.bf16.mxu1 %v8582_v41  ;;  %v8627_v41 = vld [vmem:[%s10611_s1 + $0x1138] sm:$0xff]  }
 0x217   :  { %v7595_v34 = vpop.f32.mrb[36].mxu1  ;;  %v7574_v35 = vpop.f32.mrb[37].mxu0 }
 0x218   :  { %v7596_v36 = vpop.f32.mrb[37].mxu1  ;;  %v7575_v37 = vadd.f32 %v7574_v35, %v7573_v32  ;;  %v7576_v40 = vpop.f32.mrb[38].mxu0  ;;  %7876 = vmatpush3.bf16.msra.mxu0 %v8583_v44  ;;  %v8620_v32 = vld [vmem:[%s10611_s1 + $0x11a8] sm:$0xff]   ;;  %v8621_v35 = vld [vmem:[%s10611_s1 + $0x1170] sm:$0xff]   ;;  %v57_v44 = vld [vmem:[%s10610_s0 + $0x118] sm:$0xff] }
 0x219   :  { %v7597_v38 = vadd.f32 %v7596_v36, %v7595_v34  ;;  %v7598_v42 = vpop.f32.mrb[38].mxu1  ;;  %v7577_v45 = vpop.f32.mrb[39].mxu0  ;;  %7898 = vmatpush3.bf16.msra.mxu1 %v8584_v46  ;;  %7877 = vmatprep.subr.bf16.mxu0 %v8585_v49  ;;  %v8622_v36 = vld [vmem:[%s10611_s1 + $0x11f0] sm:$0xff]   ;;  %v8626_v40 = vld [vmem:[%s10611_s1 + $0x11f8] sm:$0xff]  }
 0x21a   :  { %v5680_v43 = vadd.f32 %v7575_v37, %v10331_v62  ;;  %v7599_v47 = vpop.f32.mrb[39].mxu1  ;;  %7899 = vmatprep.subr.bf16.mxu1 %v8586_v50  ;;  %v6571_v62 = vcombine.high %v55_v58, %v55_v58  ;;  %v8623_v37 = vld [vmem:[%s10611_s1 + $0x1130] sm:$0xff]   ;;  %v8628_v42 = vld [vmem:[%s10611_s1 + $0x11b8] sm:$0xff]  }
 0x21b   :  { %v6574_v47 = vcombine.low %v57_v44, %v57_v44 }
 0x21c   :  { %v10436_v48 = vadd.f32 %v7597_v38, %v5680_v43  ;;  %7878 = vmatpush3.bf16.msra.mxu0 %v8587_v51  ;;  %6277 = vmatprep.mubr.bf16.mxu1 %v6571_v62  ;;  %v8624_v38 = vld [vmem:[%s10611_s1 + $0x11b0] sm:$0xff]  }
 0x21d   :  { %7900 = vmatpush3.bf16.msra.mxu1 %v8588_v52  ;;  %7879 = vmatprep.subr.bf16.mxu0 %v8589_v53  ;;  %v56_v43 = vld [vmem:[%s10610_s0 + $0x110] sm:$0xff] }
 0x21e   :  { %7901 = vmatprep.subr.bf16.mxu1 %v8590_v54  ;;  %v6572_v45 = vcombine.low %v56_v43, %v56_v43  ;;  %v6573_v46 = vcombine.high %v56_v43, %v56_v43 }
 0x220   :  { %7880 = vmatpush3.bf16.msra.mxu0 %v8591_v55 }
 0x221   :  { %7902 = vmatpush3.bf16.msra.mxu1 %v8592_v56  ;;  %7909 = vmatprep.subr.bf16.mxu0 %v8597_v63 }
 0x222   :  { %7931 = vmatprep.subr.bf16.mxu1 %v8598_v0 }
 0x223   :  { %6238 = vmatmul.mubr.bf16.vlgmr.msra.gmra.mrb[64].mxu0 %v6568_v59 }
 0x224   :  { %6278 = vmatmul.mubr.bf16.vlgmr.msra.gmra.mrb[64].mxu1 %v6570_v61  ;;  %7910 = vmatpush3.bf16.msra.mxu0 %v8599_v1 }
 0x225   :  { %7932 = vmatpush3.bf16.msra.mxu1 %v8600_v2  ;;  %7911 = vmatprep.subr.bf16.mxu0 %v8601_v3 }
 0x226   :  { %7933 = vmatprep.subr.bf16.mxu1 %v8602_v4  ;;  %6317 = vmatprep.mubr.bf16.mxu0 %v6573_v46 }
 0x228   :  { %7912 = vmatpush3.bf16.msra.mxu0 %v8603_v5 }
 0x229   :  { %7934 = vmatpush3.bf16.msra.mxu1 %v8604_v6  ;;  %7913 = vmatprep.subr.bf16.mxu0 %v8605_v7 }
 0x22a   :  { %7935 = vmatprep.subr.bf16.mxu1 %v8606_v8 }
 0x22c   :  { %7914 = vmatpush3.bf16.msra.mxu0 %v8607_v9 }
 0x22d   :  { %7936 = vmatpush3.bf16.msra.mxu1 %v8608_v10  ;;  %7915 = vmatprep.subr.bf16.mxu0 %v8609_v11 }
 0x22e   :  { %7937 = vmatprep.subr.bf16.mxu1 %v8610_v12 }
 0x230   :  { %7916 = vmatpush3.bf16.msra.mxu0 %v8611_v13 }
 0x231   :  { %7938 = vmatpush3.bf16.msra.mxu1 %v8612_v14  ;;  %7917 = vmatprep.subr.bf16.mxu0 %v8613_v15 }
 0x232   :  { %7939 = vmatprep.subr.bf16.mxu1 %v8614_v16 }
 0x234   :  { %7918 = vmatpush3.bf16.msra.mxu0 %v8615_v17 }
 0x235   :  { %7940 = vmatpush3.bf16.msra.mxu1 %v8616_v19  ;;  %7919 = vmatprep.subr.bf16.mxu0 %v8617_v25 }
 0x236   :  { %v7617_v18 = vpop.f32.mrb[40].mxu0  ;;  %7941 = vmatprep.subr.bf16.mxu1 %v8618_v27 }
 0x237   :  { %v7639_v20 = vpop.f32.mrb[40].mxu1  ;;  %v7618_v21 = vpop.f32.mrb[41].mxu0 }
 0x238   :  { %v7640_v22 = vpop.f32.mrb[41].mxu1  ;;  %v7619_v23 = vadd.f32 %v7618_v21, %v7617_v18  ;;  %v7620_v26 = vpop.f32.mrb[42].mxu0  ;;  %7920 = vmatpush3.bf16.msra.mxu0 %v8619_v30 }
 0x239   :  { %v7641_v24 = vadd.f32 %v7640_v22, %v7639_v20  ;;  %v7642_v28 = vpop.f32.mrb[42].mxu1  ;;  %v7621_v31 = vpop.f32.mrb[43].mxu0  ;;  %7942 = vmatpush3.bf16.msra.mxu1 %v8620_v32  ;;  %7921 = vmatprep.subr.bf16.mxu0 %v8621_v35 }
 0x23a   :  { %v5760_v29 = vadd.f32 %v7619_v23, %v10436_v48  ;;  %v7643_v33 = vpop.f32.mrb[43].mxu1  ;;  %7943 = vmatprep.subr.bf16.mxu1 %v8622_v36  ;;  %v6575_v48 = vcombine.high %v57_v44, %v57_v44 }
 0x23c   :  { %v5800_v34 = vadd.f32 %v7641_v24, %v5760_v29  ;;  %7922 = vmatpush3.bf16.msra.mxu0 %v8623_v37  ;;  %6357 = vmatprep.mubr.bf16.mxu1 %v6575_v48 }
 0x23d   :  { %7944 = vmatpush3.bf16.msra.mxu1 %v8624_v38  ;;  %7923 = vmatprep.subr.bf16.mxu0 %v8625_v39 }
 0x23e   :  { %7945 = vmatprep.subr.bf16.mxu1 %v8626_v40 }
 0x240   :  { %7924 = vmatpush3.bf16.msra.mxu0 %v8627_v41 }
 0x241   :  { %7946 = vmatpush3.bf16.msra.mxu1 %v8628_v42 }
 0x243   :  { %6318 = vmatmul.mubr.bf16.vlgmr.msra.gmra.mrb[68].mxu0 %v6572_v45 }
 0x244   :  { %6358 = vmatmul.mubr.bf16.vlgmr.msra.gmra.mrb[68].mxu1 %v6574_v47 }
 0x245   :  { %10 = vsyncpa [#allocation3], 0  ;;  %v8633_v9 = vld [vmem:[%s10613_s3] sm:$0xff]   ;;  %v8669_v10 = vmov 0.0   ;;  %v8634_v11 = vld [vmem:[%s10613_s3 + $0x8] sm:$0xff]   ;;  %vm8670_vm0 = vmmov 0  }
 0x246   :  { %7962 = vmatprep.subr.bf16.mxu0 %v8669_v10  ;;  %v8635_v12 = vld [vmem:[%s10613_s3 + $0x10] sm:$0xff]   ;;  %v8636_v13 = vld [vmem:[%s10613_s3 + $0x18] sm:$0xff]   ;;  %v8637_v14 = vld [vmem:[%s10613_s3 + $0x20] sm:$0xff]   ;;  %7978 = vmatprep.mubr.msk.bf16.mxu0 %vm8670_vm0, %v8669_v10  ;;  %s8671_s6 = smov [#allocation2]  }
 0x247   :  { %7963 = vmatpush3.bf16.msra.mxu0 %v8633_v9  ;;  %v8638_v25 = vld [vmem:[%s10613_s3 + $0x28] sm:$0xff]   ;;  %v8639_v28 = vld [vmem:[%s10613_s3 + $0x30] sm:$0xff]   ;;  %v8640_v29 = vld [vmem:[%s10613_s3 + $0x38] sm:$0xff]   ;;  %s6495_s7 = sshll.u32 %s8671_s6, 4  ;;  %s6496_s7 = int_to_ptr.vmem [resolvable:$true] %s6495_s7 }
 0x248   :  { %7964 = vmatprep.subr.bf16.mxu0 %v8669_v10  ;;  %p8650_p1 = scmp.lt.s32.totalorder %s6496_s7, %s6496_s7 }
 0x24b   :  { %7965 = vmatpush3.bf16.msra.mxu0 %v8634_v11 }
 0x24c   :  { %7966 = vmatprep.subr.bf16.mxu0 %v8669_v10 }
 0x24f   :  { %7967 = vmatpush3.bf16.msra.mxu0 %v8635_v12 }
 0x250   :  { %7968 = vmatprep.subr.bf16.mxu0 %v8669_v10 }
 0x253   :  { %7969 = vmatpush3.bf16.msra.mxu0 %v8636_v13 }
 0x254   :  { %7970 = vmatprep.subr.bf16.mxu0 %v8669_v10 }
 0x256   :  { %v7661_v49 = vpop.f32.mrb[44].mxu0 }
 0x257   :  { %v7683_v50 = vpop.f32.mrb[44].mxu1  ;;  %v7662_v51 = vpop.f32.mrb[45].mxu0  ;;  %7971 = vmatpush3.bf16.msra.mxu0 %v8637_v14 }
 0x258   :  { %v7663_v52 = vadd.f32 %v7662_v51, %v7661_v49  ;;  %v7684_v53 = vpop.f32.mrb[45].mxu1  ;;  %v7664_v54 = vpop.f32.mrb[46].mxu0  ;;  %7972 = vmatprep.subr.bf16.mxu0 %v8669_v10 }
 0x259   :  { %v7685_v55 = vadd.f32 %v7684_v53, %v7683_v50  ;;  %v7686_v56 = vpop.f32.mrb[46].mxu1  ;;  %v7665_v57 = vpop.f32.mrb[47].mxu0 }
 0x25a   :  { %v5840_v58 = vadd.f32 %v7663_v52, %v5800_v34  ;;  %v7687_v59 = vpop.f32.mrb[47].mxu1 }
 0x25b   :  { %7973 = vmatpush3.bf16.msra.mxu0 %v8638_v25 }
 0x25c   :  { %v5880_v60 = vadd.f32 %v7685_v55, %v5840_v58  ;;  %7974 = vmatprep.subr.bf16.mxu0 %v8669_v10 }
 0x25f   :  { %7975 = vmatpush3.bf16.msra.mxu0 %v8639_v28 }
 0x260   :  { %7976 = vmatprep.subr.bf16.mxu0 %v8669_v10 }
 0x263   :  { %7977 = vmatpush3.bf16.msra.mxu0 %v8640_v29 }
 0x276   :  { %v7705_v61 = vpop.f32.mrb[48].mxu0 }
 0x277   :  { %v7727_v62 = vpop.f32.mrb[48].mxu1  ;;  %v7706_v63 = vpop.f32.mrb[49].mxu0 }
 0x278   :  { %v7707_v0 = vadd.f32 %v7706_v63, %v7705_v61  ;;  %v7728_v1 = vpop.f32.mrb[49].mxu1  ;;  %v7708_v2 = vpop.f32.mrb[50].mxu0 }
 0x279   :  { %v7729_v3 = vadd.f32 %v7728_v1, %v7727_v62  ;;  %v7730_v4 = vpop.f32.mrb[50].mxu1  ;;  %v7709_v5 = vpop.f32.mrb[51].mxu0 }
 0x27a   :  { %v5920_v6 = vadd.f32 %v7707_v0, %v5880_v60  ;;  %v7731_v7 = vpop.f32.mrb[51].mxu1 }
 0x27c   :  { %v5960_v8 = vadd.f32 %v7729_v3, %v5920_v6 }
 0x296   :  { %v7749_v15 = vpop.f32.mrb[52].mxu0 }
 0x297   :  { %v7771_v16 = vpop.f32.mrb[52].mxu1  ;;  %v7750_v17 = vpop.f32.mrb[53].mxu0 }
 0x298   :  { %v7772_v18 = vpop.f32.mrb[53].mxu1  ;;  %v7751_v19 = vadd.f32 %v7750_v17, %v7749_v15  ;;  %v7752_v21 = vpop.f32.mrb[54].mxu0 }
 0x299   :  { %v7773_v20 = vadd.f32 %v7772_v18, %v7771_v16  ;;  %v7774_v22 = vpop.f32.mrb[54].mxu1  ;;  %v7753_v23 = vpop.f32.mrb[55].mxu0  ;;  %v7152_v16 = vld [vmem:[%s10614_s4] ss:$0 sm:$0xff]  ;;  %s8645_s4 = scalar_lea.vmem %s6496_s7, 128 }
 0x29a   :  { %v7775_v24 = vpop.f32.mrb[55].mxu1  ;;  %v6000_v26 = vadd.f32 %v7751_v19, %v5960_v8  ;;  %p8646_p0 = scmp.ne.s32.totalorder %s6496_s7, %s8645_s4  ;;  %p8651_p2 = scmp.lt.s32.totalorder %s8645_s4, %s8645_s4 }
 0x29c   :  { %v6040_v27 = vadd.f32 %v7773_v20, %v6000_v26  ;;  %p8652_p3 = por %p8651_p2, %p8650_p1 }
 0x29e   :  { %p8653_p4 = pnand %p8652_p3, %p8646_p0 }
 0x2b6   :  { %v7793_v30 = vpop.f32.mrb[56].mxu0 }
 0x2b7   :  { %v7815_v31 = vpop.f32.mrb[56].mxu1  ;;  %v7794_v32 = vpop.f32.mrb[57].mxu0 }
 0x2b8   :  { %v7795_v33 = vadd.f32 %v7794_v32, %v7793_v30  ;;  %v7816_v34 = vpop.f32.mrb[57].mxu1  ;;  %v7796_v35 = vpop.f32.mrb[58].mxu0 }
 0x2b9   :  { %v7817_v36 = vadd.f32 %v7816_v34, %v7815_v31  ;;  %v7818_v37 = vpop.f32.mrb[58].mxu1  ;;  %v7797_v38 = vpop.f32.mrb[59].mxu0 }
 0x2ba   :  { %v6080_v39 = vadd.f32 %v7795_v33, %v6040_v27  ;;  %v7819_v40 = vpop.f32.mrb[59].mxu1 }
 0x2bc   :  { %v6120_v41 = vadd.f32 %v7817_v36, %v6080_v39 }
 0x2d6   :  { %v7837_v42 = vpop.f32.mrb[60].mxu0 }
 0x2d7   :  { %v7859_v43 = vpop.f32.mrb[60].mxu1  ;;  %v7838_v44 = vpop.f32.mrb[61].mxu0 }
 0x2d8   :  { %v7839_v45 = vadd.f32 %v7838_v44, %v7837_v42  ;;  %v7860_v46 = vpop.f32.mrb[61].mxu1  ;;  %v7840_v47 = vpop.f32.mrb[62].mxu0 }
 0x2d9   :  { %v7861_v48 = vadd.f32 %v7860_v46, %v7859_v43  ;;  %v7862_v49 = vpop.f32.mrb[62].mxu1  ;;  %v7841_v50 = vpop.f32.mrb[63].mxu0 }
 0x2da   :  { %v6160_v51 = vadd.f32 %v7839_v45, %v6120_v41  ;;  %v7863_v52 = vpop.f32.mrb[63].mxu1 }
 0x2dc   :  { %v6200_v53 = vadd.f32 %v7861_v48, %v6160_v51 }
 0x2f6   :  { %v7881_v54 = vpop.f32.mrb[64].mxu0 }
 0x2f7   :  { %v7903_v55 = vpop.f32.mrb[64].mxu1  ;;  %v7882_v56 = vpop.f32.mrb[65].mxu0 }
 0x2f8   :  { %v7883_v57 = vadd.f32 %v7882_v56, %v7881_v54  ;;  %v7904_v58 = vpop.f32.mrb[65].mxu1  ;;  %v7884_v59 = vpop.f32.mrb[66].mxu0 }
 0x2f9   :  { %v7905_v60 = vadd.f32 %v7904_v58, %v7903_v55  ;;  %v7906_v61 = vpop.f32.mrb[66].mxu1  ;;  %v7885_v62 = vpop.f32.mrb[67].mxu0 }
 0x2fa   :  { %v6240_v63 = vadd.f32 %v7883_v57, %v6200_v53  ;;  %v7907_v0 = vpop.f32.mrb[67].mxu1 }
 0x2fc   :  { %v6280_v1 = vadd.f32 %v7905_v60, %v6240_v63 }
 0x316   :  { %v7925_v2 = vpop.f32.mrb[68].mxu0 }
 0x317   :  { %v7947_v3 = vpop.f32.mrb[68].mxu1  ;;  %v7926_v4 = vpop.f32.mrb[69].mxu0 }
 0x318   :  { %v7927_v5 = vadd.f32 %v7926_v4, %v7925_v2  ;;  %v7948_v6 = vpop.f32.mrb[69].mxu1  ;;  %v7928_v7 = vpop.f32.mrb[70].mxu0 }
 0x319   :  { %v7949_v8 = vadd.f32 %v7948_v6, %v7947_v3  ;;  %v7950_v9 = vpop.f32.mrb[70].mxu1  ;;  %v7929_v10 = vpop.f32.mrb[71].mxu0 }
 0x31a   :  { %v6320_v11 = vadd.f32 %v7927_v5, %v6280_v1  ;;  %v7951_v12 = vpop.f32.mrb[71].mxu1 }
 0x31c   :  { %v6360_v13 = vadd.f32 %v7949_v8, %v6320_v11 }
 0x31e   :  { %v6365_v14 = vmax.f32 %v6360_v13, 0.0 }
 0x320   :  { %v6366_v15 = vpack.c.bf16 %v6365_v14, %v6365_v14 }
 0x322   :  { %7979 = vmatmul.mubr.bf16.vlgmr.msra.gmra.mrb[72].mxu0 %v6366_v15 }
 0x3f5   :  { %v6472_v17 = vpop.f32.mrb[72].mxu0 }
 0x3f6   :  { %v6473_v18 = vadd.f32 %v7152_v16, %v6472_v17  ;;  %v7980_v19 = vpop.f32.mrb[73].mxu0 }
 0x3f7   :  { %v6475_v20 = vpop.f32.mrb[74].mxu0 }
 0x3f8   :  { %6478 = vmax.xlane.f32.xlu0 %v6473_v18  ;;  %v7981_v21 = vpop.f32.mrb[75].mxu0 }
 0x485   :  { %v6479_v22 = vpop.xlane.xlu0 %6478 }
 0x486   :  { %v6480_v23 = vsub.f32 %v6473_v18, %v6479_v22 }
 0x488   :  { %v6481_v24 = vmul.f32 1.442695, %v6480_v23 }
 0x48a   :  { %8641 = vpow2.f32 %v6481_v24 }
 0x494   :  { %v8642_v25 = vpop.eup %8641 }
 0x495   :  { %6483 = vadd.xlane.f32.xlu0 %v8642_v25 }
 0x522   :  { %v6484_v26 = vpop.xlane.xlu0 %6483 }
 0x523   :  { %8643 = vlog2.f32 %v6484_v26 }
 0x52d   :  { %v8644_v27 = vpop.eup %8643 }
 0x52e   :  { %v6486_v28 = vmul.f32 0.6931472, %v8644_v27 }
 0x530   :  { %v6487_v29 = vsub.f32 %v6480_v23, %v6486_v28 }
 0x532   :  { %6488 = vst [vmem:[#allocation2] sm:$0xff] %v6487_v29 }
 0x533   :  { %8656 = shalt.err (!%p8653_p4)
}
 0x534   :  { %s8657_s10 = scalar_lea.hbm %s10615_s5, 128 }
 0x535   :  { %p8658_p5 = scmp.ne.s32.totalorder %s10615_s5, %s8657_s10  ;;  %p8661_p6 = scmp.lt.u32.totalorder %s8657_s10, %s10615_s5 }
 0x537   :  { %p8663_p7 = pnand %p8661_p6, %p8658_p5 }
 0x539   :  { %8666 = shalt.err (!%p8663_p7)
}
 0x53a   :  { %6498 = dma.vmem_to_hbm [thread:$0]  %s6496_s7, 128, %s10615_s5, [#allocation3]  }
 0x53b   :  { %8667 = dma.done.wait [#allocation3], 128  }
 0x53c   :  { %8668 = vsyncadd [#allocation3], 4294967168 }
 0x53d   :  { %6502 = vsyncpa [#allocation3], 1 }

</bundles_post_ra>
